<compile_context>
chip_gen: v7x
topology: tpu7x:2x2x1
jax: 0.10.0
libtpu: 0.0.40
codegen_flags: <defaults>
</compile_context>

<pallas_src>
import numpy as np
import jax
import jax.numpy as jnp
from jax import lax
from jax.experimental import pallas as pl
from jax.experimental.pallas import tpu as pltpu

TEMPERATURE = 0.1
LANE = 128


# ----------------------------- kernels -----------------------------

def _edge_kernel(hts_ref, xb_ref, wc_ref, ef_ref):
    # ef = ((binv * H^T) @ X) @ Theta  -- reassociated, no Xt materialization.
    t = jnp.dot(hts_ref[...], xb_ref[...], preferred_element_type=jnp.float32)
    ef = jnp.dot(t.astype(jnp.bfloat16), wc_ref[...],
                 preferred_element_type=jnp.float32)
    ef_ref[...] = ef.astype(jnp.bfloat16)


def _node_kernel(hs_ref, x_ref, ef_ref, bc_ref,
                 w1_ref, b1_ref, w2_ref, b2_ref, alpha_ref,
                 hpos_ref, hpn_ref, p2n_ref):
    # hypergraph conv: m = (dinv * H) @ ef + bias   (dinv folded into H rows on host)
    m = jnp.dot(hs_ref[...], ef_ref[...], preferred_element_type=jnp.float32)
    m = m + bc_ref[...]

    # PReLU (single alpha, SMEM scalar); dropout is identity in eval mode
    alpha = alpha_ref[0, 0]
    h = jnp.where(m >= 0, m, alpha * m)

    # projector(h + x) -> h_pos
    hpx = h + x_ref[...]
    z1 = jnp.maximum(
        jnp.dot(hpx.astype(jnp.bfloat16), w1_ref[...],
                preferred_element_type=jnp.float32) + b1_ref[...], 0.0)
    h_pos = jnp.dot(z1.astype(jnp.bfloat16), w2_ref[...],
                    preferred_element_type=jnp.float32) + b2_ref[...]
    hpos_ref[...] = h_pos

    # h_neg = projector(h_pos[perm]) == projector(h_pos)[perm] (row-wise projector);
    # compute projector(h_pos) here, the permutation is handled in the loss kernel.
    z2 = jnp.maximum(
        jnp.dot(h_pos.astype(jnp.bfloat16), w1_ref[...],
                preferred_element_type=jnp.float32) + b1_ref[...], 0.0)
    p2 = jnp.dot(z2.astype(jnp.bfloat16), w2_ref[...],
                 preferred_element_type=jnp.float32) + b2_ref[...]

    # L2 normalization (rsqrt goes to the EUP slot)
    inv1 = lax.rsqrt(jnp.maximum(jnp.sum(h_pos * h_pos, -1, keepdims=True), 1e-24))
    inv2 = lax.rsqrt(jnp.maximum(jnp.sum(p2 * p2, -1, keepdims=True), 1e-24))
    hpn_ref[...] = (h_pos * inv1).astype(jnp.bfloat16)
    p2n_ref[...] = (p2 * inv2).astype(jnp.bfloat16)


def _loss_kernel(perm_ref, hpn_ref, p2n_ref, part_ref):
    # similarity of this row tile against ALL (unpermuted) normalized projections;
    # sum_j exp(hp_n[i] . p2n[perm[j]]) == sum_k exp(hp_n[i] . p2n[k]) (bijection).
    s = lax.dot_general(hpn_ref[...], p2n_ref[...],
                        (((1,), (1,)), ((), ())),
                        preferred_element_type=jnp.float32) * (1.0 / TEMPERATURE)
    tm, n = s.shape
    lane = lax.broadcasted_iota(jnp.int32, (tm, n), 1)
    onehot = lane == perm_ref[...]                                    # [tm, n]
    pos = jnp.sum(jnp.where(onehot, s, 0.0), axis=-1, keepdims=True)  # S[i, perm[i]]
    row = jnp.sum(jnp.exp(s), axis=-1, keepdims=True)
    # -log(exp(pos) / (exp(pos) + sum_j exp(S_ij)))  ==  log(exp(pos)+row) - pos
    # (matches the PyTorch reference, whose negative sum includes the positive index)
    li = jnp.log(jnp.exp(pos) + row) - pos
    partial = jnp.sum(li)
    # per-tile partial broadcast into this tile's own (8,128) block; reduced outside.
    part_ref[...] = jnp.zeros(part_ref.shape, jnp.float32) + partial


# ----------------------------- wrapper -----------------------------

def _pick_tile(n, cap):
    if n <= cap:
        return n
    for t in range(cap, 15, -1):
        if n % t == 0 and t % 16 == 0:
            return t
    return n


def _default_cap():
    # v7x has 2 TensorCores/chip: smaller tiles -> grid splits across cores and
    # double-buffering overlaps the incidence-tile DMA. Single-TC v5e/v6e prefer
    # larger tiles to amortize per-step pipeline overhead.
    try:
        kind = jax.devices()[0].device_kind.lower()
    except Exception:
        kind = ""
    return 128 if "v7" in kind else 256


def hypergcl_forward(x, h_inc, perm, params, *, row_cap=None, edge_cap=None):
    """Eval-mode forward of HyperGCL_Louvain_P_DA. Returns (h_pos, weighted_loss)."""
    x = jnp.asarray(x, jnp.float32)
    h_inc = jnp.asarray(h_inc, jnp.float32)
    N, Dh = x.shape
    E = h_inc.shape[1]
    Dp = max(LANE, ((Dh + LANE - 1) // LANE) * LANE)
    padf = Dp - Dh

    # lane-dense padding of the feature dim (zero columns are exact no-ops)
    xp = jnp.pad(x, ((0, 0), (0, padf)))                       # f32, for residual add
    xb = xp.astype(jnp.bfloat16)                                # bf16 MXU operand
    pad_w = lambda w: jnp.pad(jnp.asarray(w, jnp.float32),
                              ((0, padf), (0, padf))).astype(jnp.bfloat16)
    pad_b = lambda b: jnp.pad(jnp.asarray(b, jnp.float32).reshape(1, -1),
                              ((0, 0), (0, padf)))
    wc, w1, w2 = pad_w(params["wc"]), pad_w(params["w1"]), pad_w(params["w2"])
    bc, b1, b2 = pad_b(params["bc"]), pad_b(params["b1"]), pad_b(params["b2"])
    alpha = jnp.asarray(params["alpha"], jnp.float32).reshape(1, 1)
    clw = jnp.asarray(params["clw"], jnp.float32)

    # host-side layout + degree precompute; binv/dinv folded into the bf16 incidence
    # rows (no [*,1] side inputs, no post-dot VPU scaling in the kernels)
    bsum = jnp.sum(h_inc, axis=0)
    dsum = jnp.sum(h_inc, axis=1)
    binv = jnp.where(bsum > 0, 1.0 / bsum, 0.0)                 # [E]
    dinv = jnp.where(dsum > 0, 1.0 / dsum, 0.0)                 # [N]
    Hts = (h_inc.T * binv[:, None]).astype(jnp.bfloat16)        # [E, N]
    Hs = (h_inc * dinv[:, None]).astype(jnp.bfloat16)           # [N, E]
    perm = jnp.asarray(perm, jnp.int32).reshape(N, 1)

    cap = _default_cap()
    tm = _pick_tile(N, row_cap if row_cap else cap)
    te = _pick_tile(E, edge_cap if edge_cap else cap)
    n_tiles = N // tm
    smem = pl.BlockSpec(memory_space=pltpu.MemorySpace.SMEM)
    par = pltpu.CompilerParams(dimension_semantics=("parallel",))

    # --- K_edge: ef = ((binv*H^T) @ X) @ Theta  (hyperedge-tiled) ---
    ef = pl.pallas_call(
        _edge_kernel,
        out_shape=jax.ShapeDtypeStruct((E, Dp), jnp.bfloat16),
        grid=(E // te,),
        in_specs=[pl.BlockSpec((te, N), lambda e: (e, 0)),
                  pl.BlockSpec((N, Dp), lambda e: (0, 0)),
                  pl.BlockSpec((Dp, Dp), lambda e: (0, 0))],
        out_specs=pl.BlockSpec((te, Dp), lambda e: (e, 0)),
        compiler_params=par,
    )(Hts, xb, wc)

    # --- K_node: conv + PReLU + projector + normalization (row-tiled) ---
    h_pos, hp_n, p2_n = pl.pallas_call(
        _node_kernel,
        out_shape=(jax.ShapeDtypeStruct((N, Dp), jnp.float32),
                   jax.ShapeDtypeStruct((N, Dp), jnp.bfloat16),
                   jax.ShapeDtypeStruct((N, Dp), jnp.bfloat16)),
        grid=(N // tm,),
        in_specs=[pl.BlockSpec((tm, E), lambda i: (i, 0)),
                  pl.BlockSpec((tm, Dp), lambda i: (i, 0)),
                  pl.BlockSpec((E, Dp), lambda i: (0, 0)),
                  pl.BlockSpec((1, Dp), lambda i: (0, 0)),
                  pl.BlockSpec((Dp, Dp), lambda i: (0, 0)),
                  pl.BlockSpec((1, Dp), lambda i: (0, 0)),
                  pl.BlockSpec((Dp, Dp), lambda i: (0, 0)),
                  pl.BlockSpec((1, Dp), lambda i: (0, 0)),
                  smem],
        out_specs=(pl.BlockSpec((tm, Dp), lambda i: (i, 0)),
                   pl.BlockSpec((tm, Dp), lambda i: (i, 0)),
                   pl.BlockSpec((tm, Dp), lambda i: (i, 0))),
        compiler_params=par,
    )(Hs, xp, ef, bc, w1, b1, w2, b2, alpha)

    # --- K_loss: InfoNCE partials per row-tile (parallel, megacore-friendly) ---
    parts = pl.pallas_call(
        _loss_kernel,
        out_shape=jax.ShapeDtypeStruct((n_tiles * 8, LANE), jnp.float32),
        grid=(n_tiles,),
        in_specs=[pl.BlockSpec((tm, 1), lambda i: (i, 0)),
                  pl.BlockSpec((tm, Dp), lambda i: (i, 0)),
                  pl.BlockSpec((N, Dp), lambda i: (0, 0))],
        out_specs=pl.BlockSpec((8, LANE), lambda i: (i, 0)),
        compiler_params=par,
    )(perm, hp_n, p2_n)

    # mean(loss) * raw (detached) contrastive_loss_weight — eval path
    loss = jnp.sum(parts[::8, 0]) * (clw / jnp.float32(N))
    return h_pos[:, :Dh], jnp.reshape(loss, (1, 1))


# --------------- host-side glue (graph -> hypergraph, params) ---------------

def _connected_components(num_nodes, edges):
    parent = list(range(num_nodes))

    def find(a):
        while parent[a] != a:
            parent[a] = parent[parent[a]]
            a = parent[a]
        return a

    for u, v in edges:
        ru, rv = find(u), find(v)
        if ru != rv:
            parent[ru] = rv
    comps = {}
    for n in range(num_nodes):
        comps.setdefault(find(n), []).append(n)
    return list(comps.values())


def build_hypergraph_incidence(num_nodes, edges):
    # Mirrors build_hypergraph_from_graph: pairwise edges inside each community;
    # the second node of each pair is interpreted as the hyperedge id.
    # TODO(synk): Louvain best_partition replaced by deterministic connected components.
    communities = _connected_components(num_nodes, edges)
    H = np.zeros((num_nodes, num_nodes), dtype=np.float32)
    for nodes in communities:
        nodes = sorted(nodes)
        if len(nodes) > 1:
            for a in range(len(nodes)):
                for b in range(a + 1, len(nodes)):
                    H[nodes[a], nodes[b]] += 1.0
        else:
            H[nodes[0], nodes[0]] += 1.0
    return jnp.asarray(H)


if __name__ == "__main__":
    N, Dh, ring = 512, 32, 32
    key = jax.random.PRNGKey(0)
    k_x, k_wc, k_w1, k_w2, k_perm = jax.random.split(key, 5)

    # node features
    x = jax.random.normal(k_x, (N, Dh), dtype=jnp.float32)

    # deterministic small graph: 16 rings of 32 nodes -> 16 communities
    edges = []
    for r in range(N // ring):
        base = r * ring
        edges += [(base + i, base + (i + 1) % ring) for i in range(ring)]
    h_inc = build_hypergraph_incidence(N, edges)

    # negative-sampling permutation (index vector; no dense one-hot matrix needed)
    perm = jax.random.permutation(k_perm, N)

    # deterministic parameter init (kaiming-normal style, biases zero)
    std = float(np.sqrt(2.0 / Dh))
    params = {
        "wc": jax.random.normal(k_wc, (Dh, Dh), jnp.float32) * std,   # conv Theta
        "bc": jnp.zeros((Dh,), jnp.float32),                          # conv bias
        "alpha": jnp.float32(0.25),                                   # PReLU
        "w1": jax.random.normal(k_w1, (Dh, Dh), jnp.float32) * std,   # projector L1
        "b1": jnp.zeros((Dh,), jnp.float32),
        "w2": jax.random.normal(k_w2, (Dh, Dh), jnp.float32) * std,   # projector L2
        "b2": jnp.zeros((Dh,), jnp.float32),
        "clw": jnp.float32(1.0),                                      # loss weight
    }

    # jit the whole forward so host-side prep + partial reduce fuse into one dispatch
    fwd = jax.jit(hypergcl_forward)
    h_pos, weighted_loss = fwd(x, h_inc, perm, params)
    jax.block_until_ready((h_pos, weighted_loss))
    assert h_pos.shape == (N, Dh) and weighted_loss.shape == (1, 1)
    assert bool(jnp.all(jnp.isfinite(h_pos))) and bool(jnp.isfinite(weighted_loss[0, 0]))
    print("KERNEL_OK")
</pallas_src>

<mosaic_0001>
module attributes {stable_mosaic.version = 11 : i64} {
  func.func @_edge_kernel(%arg0: i32, %arg1: memref<256x512xbf16, #tpu.memory_space<vmem>>, %arg2: memref<512x128xbf16, #tpu.memory_space<vmem>>, %arg3: memref<128x128xbf16, #tpu.memory_space<vmem>>, %arg4: memref<256x128xbf16, #tpu.memory_space<vmem>>) attributes {dimension_semantics = [#tpu.dimension_semantics<parallel>], iteration_bounds = array<i64: 2>, scalar_prefetch = 0 : i64, scratch_operands = 0 : i64, tpu.core_type = #tpu.core_type<tc>, window_params = [{transform_indices = @transform_0, window_bounds = array<i64: 256, 512>}, {pipeline_mode = #tpu.pipeline_mode<synchronous>, transform_indices = @transform_1, window_bounds = array<i64: 512, 128>}, {pipeline_mode = #tpu.pipeline_mode<synchronous>, transform_indices = @transform_2, window_bounds = array<i64: 128, 128>}, {transform_indices = @transform_3, window_bounds = array<i64: 256, 128>}]} {
    %c0 = arith.constant 0 : index
    %c0_0 = arith.constant 0 : index
    %0 = vector.load %arg1[%c0, %c0_0] : memref<256x512xbf16, #tpu.memory_space<vmem>>, vector<256x512xbf16>
    %c0_1 = arith.constant 0 : index
    %c0_2 = arith.constant 0 : index
    %1 = vector.load %arg2[%c0_1, %c0_2] : memref<512x128xbf16, #tpu.memory_space<vmem>>, vector<512x128xbf16>
    %cst = arith.constant dense<0.000000e+00> : vector<256x128xf32>
    %2 = tpu.matmul %0, %1, %cst {dimension_numbers = #tpu.dot_dimension_numbers<[1], [0], [0], [1], [0, 0, 1, 1], [], []>} : vector<256x512xbf16>, vector<512x128xbf16>, vector<256x128xf32> -> vector<256x128xf32>
    %3 = arith.truncf %2 : vector<256x128xf32> to vector<256x128xbf16>
    %c0_3 = arith.constant 0 : index
    %c0_4 = arith.constant 0 : index
    %4 = vector.load %arg3[%c0_3, %c0_4] : memref<128x128xbf16, #tpu.memory_space<vmem>>, vector<128x128xbf16>
    %cst_5 = arith.constant dense<0.000000e+00> : vector<256x128xf32>
    %5 = tpu.matmul %3, %4, %cst_5 {dimension_numbers = #tpu.dot_dimension_numbers<[1], [0], [0], [1], [0, 0, 1, 1], [], []>} : vector<256x128xbf16>, vector<128x128xbf16>, vector<256x128xf32> -> vector<256x128xf32>
    %6 = arith.truncf %5 : vector<256x128xf32> to vector<256x128xbf16>
    %c0_6 = arith.constant 0 : index
    %c0_7 = arith.constant 0 : index
    %7 = vector.load %arg4[%c0_6, %c0_7] : memref<256x128xbf16, #tpu.memory_space<vmem>>, vector<256x128xbf16>
    tpu.vector_store %arg4[%c0_6, %c0_7], %6 {strides = array<i32>} : memref<256x128xbf16, #tpu.memory_space<vmem>>, vector<256x128xbf16>,
    return
  }
  func.func @transform_0(%arg0: i32) -> (i32, i32) {
    %c0_i32 = arith.constant 0 : i32
    %c0_i32_0 = arith.constant 0 : i32
    return %arg0, %c0_i32 : i32, i32
  }
  func.func @transform_1(%arg0: i32) -> (i32, i32) {
    %c0_i32 = arith.constant 0 : i32
    %c0_i32_0 = arith.constant 0 : i32
    %c0_i32_1 = arith.constant 0 : i32
    return %c0_i32, %c0_i32_0 : i32, i32
  }
  func.func @transform_2(%arg0: i32) -> (i32, i32) {
    %c0_i32 = arith.constant 0 : i32
    %c0_i32_0 = arith.constant 0 : i32
    %c0_i32_1 = arith.constant 0 : i32
    return %c0_i32, %c0_i32_0 : i32, i32
  }
  func.func @transform_3(%arg0: i32) -> (i32, i32) {
    %c0_i32 = arith.constant 0 : i32
    %c0_i32_0 = arith.constant 0 : i32
    return %arg0, %c0_i32 : i32, i32
  }
}

module attributes {stable_mosaic.version = 11 : i64} {
  func.func @_node_kernel(%arg0: i32, %arg1: memref<256x512xbf16, #tpu.memory_space<vmem>>, %arg2: memref<256x128xf32, #tpu.memory_space<vmem>>, %arg3: memref<512x128xbf16, #tpu.memory_space<vmem>>, %arg4: memref<1x128xf32, #tpu.memory_space<vmem>>, %arg5: memref<128x128xbf16, #tpu.memory_space<vmem>>, %arg6: memref<1x128xf32, #tpu.memory_space<vmem>>, %arg7: memref<128x128xbf16, #tpu.memory_space<vmem>>, %arg8: memref<1x128xf32, #tpu.memory_space<vmem>>, %arg9: memref<1x1xf32, #tpu.memory_space<smem>>, %arg10: memref<256x128xf32, #tpu.memory_space<vmem>>, %arg11: memref<256x128xbf16, #tpu.memory_space<vmem>>, %arg12: memref<256x128xbf16, #tpu.memory_space<vmem>>) attributes {dimension_semantics = [#tpu.dimension_semantics<parallel>], iteration_bounds = array<i64: 2>, scalar_prefetch = 0 : i64, scratch_operands = 0 : i64, tpu.core_type = #tpu.core_type<tc>, window_params = [{transform_indices = @transform_0, window_bounds = array<i64: 256, 512>}, {transform_indices = @transform_1, window_bounds = array<i64: 256, 128>}, {pipeline_mode = #tpu.pipeline_mode<synchronous>, transform_indices = @transform_2, window_bounds = array<i64: 512, 128>}, {pipeline_mode = #tpu.pipeline_mode<synchronous>, transform_indices = @transform_3, window_bounds = array<i64: 1, 128>}, {pipeline_mode = #tpu.pipeline_mode<synchronous>, transform_indices = @transform_4, window_bounds = array<i64: 128, 128>}, {pipeline_mode = #tpu.pipeline_mode<synchronous>, transform_indices = @transform_5, window_bounds = array<i64: 1, 128>}, {pipeline_mode = #tpu.pipeline_mode<synchronous>, transform_indices = @transform_6, window_bounds = array<i64: 128, 128>}, {pipeline_mode = #tpu.pipeline_mode<synchronous>, transform_indices = @transform_7, window_bounds = array<i64: 1, 128>}, {transform_indices = @transform_8, window_bounds = array<i64: 1, 1>}, {transform_indices = @transform_9, window_bounds = array<i64: 256, 128>}, {transform_indices = @transform_10, window_bounds = array<i64: 256, 128>}, {transform_indices = @transform_11, window_bounds = array<i64: 256, 128>}]} {
    %c0 = arith.constant 0 : index
    %c0_0 = arith.constant 0 : index
    %0 = vector.load %arg1[%c0, %c0_0] : memref<256x512xbf16, #tpu.memory_space<vmem>>, vector<256x512xbf16>
    %c0_1 = arith.constant 0 : index
    %c0_2 = arith.constant 0 : index
    %1 = vector.load %arg3[%c0_1, %c0_2] : memref<512x128xbf16, #tpu.memory_space<vmem>>, vector<512x128xbf16>
    %cst = arith.constant dense<0.000000e+00> : vector<256x128xf32>
    %2 = tpu.matmul %0, %1, %cst {dimension_numbers = #tpu.dot_dimension_numbers<[1], [0], [0], [1], [0, 0, 1, 1], [], []>} : vector<256x512xbf16>, vector<512x128xbf16>, vector<256x128xf32> -> vector<256x128xf32>
    %c0_3 = arith.constant 0 : index
    %c0_4 = arith.constant 0 : index
    %3 = vector.load %arg4[%c0_3, %c0_4] : memref<1x128xf32, #tpu.memory_space<vmem>>, vector<1x128xf32>
    %4 = vector.broadcast %3 : vector<1x128xf32> to vector<256x128xf32>
    %5 = arith.addf %2, %4 : vector<256x128xf32>
    %c0_5 = arith.constant 0 : index
    %c0_6 = arith.constant 0 : index
    %6 = memref.load %arg9[%c0_5, %c0_6] : memref<1x1xf32, #tpu.memory_space<smem>>
    %cst_7 = arith.constant 0.000000e+00 : f32
    %7 = vector.broadcast %cst_7 : f32 to vector<256x128xf32>
    %8 = arith.cmpf oge, %5, %7 : vector<256x128xf32>
    %9 = vector.broadcast %6 : f32 to vector<256x128xf32>
    %10 = arith.mulf %9, %5 : vector<256x128xf32>
    %11 = arith.select %8, %5, %10 : vector<256x128xi1>, vector<256x128xf32>
    %c0_8 = arith.constant 0 : index
    %c0_9 = arith.constant 0 : index
    %12 = vector.load %arg2[%c0_8, %c0_9] : memref<256x128xf32, #tpu.memory_space<vmem>>, vector<256x128xf32>
    %13 = arith.addf %11, %12 : vector<256x128xf32>
    %14 = arith.truncf %13 : vector<256x128xf32> to vector<256x128xbf16>
    %c0_10 = arith.constant 0 : index
    %c0_11 = arith.constant 0 : index
    %15 = vector.load %arg5[%c0_10, %c0_11] : memref<128x128xbf16, #tpu.memory_space<vmem>>, vector<128x128xbf16>
    %cst_12 = arith.constant dense<0.000000e+00> : vector<256x128xf32>
    %16 = tpu.matmul %14, %15, %cst_12 {dimension_numbers = #tpu.dot_dimension_numbers<[1], [0], [0], [1], [0, 0, 1, 1], [], []>} : vector<256x128xbf16>, vector<128x128xbf16>, vector<256x128xf32> -> vector<256x128xf32>
    %c0_13 = arith.constant 0 : index
    %c0_14 = arith.constant 0 : index
    %17 = vector.load %arg6[%c0_13, %c0_14] : memref<1x128xf32, #tpu.memory_space<vmem>>, vector<1x128xf32>
    %18 = vector.broadcast %17 : vector<1x128xf32> to vector<256x128xf32>
    %19 = arith.addf %16, %18 : vector<256x128xf32>
    %cst_15 = arith.constant 0.000000e+00 : f32
    %20 = vector.broadcast %cst_15 : f32 to vector<256x128xf32>
    %21 = arith.maximumf %19, %20 : vector<256x128xf32>
    %22 = arith.truncf %21 : vector<256x128xf32> to vector<256x128xbf16>
    %c0_16 = arith.constant 0 : index
    %c0_17 = arith.constant 0 : index
    %23 = vector.load %arg7[%c0_16, %c0_17] : memref<128x128xbf16, #tpu.memory_space<vmem>>, vector<128x128xbf16>
    %cst_18 = arith.constant dense<0.000000e+00> : vector<256x128xf32>
    %24 = tpu.matmul %22, %23, %cst_18 {dimension_numbers = #tpu.dot_dimension_numbers<[1], [0], [0], [1], [0, 0, 1, 1], [], []>} : vector<256x128xbf16>, vector<128x128xbf16>, vector<256x128xf32> -> vector<256x128xf32>
    %c0_19 = arith.constant 0 : index
    %c0_20 = arith.constant 0 : index
    %25 = vector.load %arg8[%c0_19, %c0_20] : memref<1x128xf32, #tpu.memory_space<vmem>>, vector<1x128xf32>
    %26 = vector.broadcast %25 : vector<1x128xf32> to vector<256x128xf32>
    %27 = arith.addf %24, %26 : vector<256x128xf32>
    %c0_21 = arith.constant 0 : index
    %c0_22 = arith.constant 0 : index
    %28 = vector.load %arg10[%c0_21, %c0_22] : memref<256x128xf32, #tpu.memory_space<vmem>>, vector<256x128xf32>
    tpu.vector_store %arg10[%c0_21, %c0_22], %27 {strides = array<i32>} : memref<256x128xf32, #tpu.memory_space<vmem>>, vector<256x128xf32>,
    %29 = arith.truncf %27 : vector<256x128xf32> to vector<256x128xbf16>
    %c0_23 = arith.constant 0 : index
    %c0_24 = arith.constant 0 : index
    %30 = vector.load %arg5[%c0_23, %c0_24] : memref<128x128xbf16, #tpu.memory_space<vmem>>, vector<128x128xbf16>
    %cst_25 = arith.constant dense<0.000000e+00> : vector<256x128xf32>
    %31 = tpu.matmul %29, %30, %cst_25 {dimension_numbers = #tpu.dot_dimension_numbers<[1], [0], [0], [1], [0, 0, 1, 1], [], []>} : vector<256x128xbf16>, vector<128x128xbf16>, vector<256x128xf32> -> vector<256x128xf32>
    %c0_26 = arith.constant 0 : index
    %c0_27 = arith.constant 0 : index
    %32 = vector.load %arg6[%c0_26, %c0_27] : memref<1x128xf32, #tpu.memory_space<vmem>>, vector<1x128xf32>
    %33 = vector.broadcast %32 : vector<1x128xf32> to vector<256x128xf32>
    %34 = arith.addf %31, %33 : vector<256x128xf32>
    %cst_28 = arith.constant 0.000000e+00 : f32
    %35 = vector.broadcast %cst_28 : f32 to vector<256x128xf32>
    %36 = arith.maximumf %34, %35 : vector<256x128xf32>
    %37 = arith.truncf %36 : vector<256x128xf32> to vector<256x128xbf16>
    %c0_29 = arith.constant 0 : index
    %c0_30 = arith.constant 0 : index
    %38 = vector.load %arg7[%c0_29, %c0_30] : memref<128x128xbf16, #tpu.memory_space<vmem>>, vector<128x128xbf16>
    %cst_31 = arith.constant dense<0.000000e+00> : vector<256x128xf32>
    %39 = tpu.matmul %37, %38, %cst_31 {dimension_numbers = #tpu.dot_dimension_numbers<[1], [0], [0], [1], [0, 0, 1, 1], [], []>} : vector<256x128xbf16>, vector<128x128xbf16>, vector<256x128xf32> -> vector<256x128xf32>
    %c0_32 = arith.constant 0 : index
    %c0_33 = arith.constant 0 : index
    %40 = vector.load %arg8[%c0_32, %c0_33] : memref<1x128xf32, #tpu.memory_space<vmem>>, vector<1x128xf32>
    %41 = vector.broadcast %40 : vector<1x128xf32> to vector<256x128xf32>
    %42 = arith.addf %39, %41 : vector<256x128xf32>
    %43 = arith.mulf %27, %27 : vector<256x128xf32>
    %cst_34 = arith.constant dense<0.000000e+00> : vector<256xf32>
    %44 = vector.multi_reduction <add>, %43, %cst_34 [1] : vector<256x128xf32> to vector<256xf32>
    %45 = vector.shape_cast %44 : vector<256xf32> to vector<256x1xf32>
    %cst_35 = arith.constant 1.000000e-24 : f32
    %46 = vector.broadcast %cst_35 : f32 to vector<256x1xf32>
    %47 = arith.maximumf %45, %46 : vector<256x1xf32>
    %48 = math.rsqrt %47 : vector<256x1xf32>
    %49 = arith.mulf %42, %42 : vector<256x128xf32>
    %cst_36 = arith.constant dense<0.000000e+00> : vector<256xf32>
    %50 = vector.multi_reduction <add>, %49, %cst_36 [1] : vector<256x128xf32> to vector<256xf32>
    %51 = vector.shape_cast %50 : vector<256xf32> to vector<256x1xf32>
    %cst_37 = arith.constant 1.000000e-24 : f32
    %52 = vector.broadcast %cst_37 : f32 to vector<256x1xf32>
    %53 = arith.maximumf %51, %52 : vector<256x1xf32>
    %54 = math.rsqrt %53 : vector<256x1xf32>
    %55 = vector.broadcast %48 : vector<256x1xf32> to vector<256x128xf32>
    %56 = arith.mulf %27, %55 : vector<256x128xf32>
    %57 = arith.truncf %56 : vector<256x128xf32> to vector<256x128xbf16>
    %c0_38 = arith.constant 0 : index
    %c0_39 = arith.constant 0 : index
    %58 = vector.load %arg11[%c0_38, %c0_39] : memref<256x128xbf16, #tpu.memory_space<vmem>>, vector<256x128xbf16>
    tpu.vector_store %arg11[%c0_38, %c0_39], %57 {strides = array<i32>} : memref<256x128xbf16, #tpu.memory_space<vmem>>, vector<256x128xbf16>,
    %59 = vector.broadcast %54 : vector<256x1xf32> to vector<256x128xf32>
    %60 = arith.mulf %42, %59 : vector<256x128xf32>
    %61 = arith.truncf %60 : vector<256x128xf32> to vector<256x128xbf16>
    %c0_40 = arith.constant 0 : index
    %c0_41 = arith.constant 0 : index
    %62 = vector.load %arg12[%c0_40, %c0_41] : memref<256x128xbf16, #tpu.memory_space<vmem>>, vector<256x128xbf16>
    tpu.vector_store %arg12[%c0_40, %c0_41], %61 {strides = array<i32>} : memref<256x128xbf16, #tpu.memory_space<vmem>>, vector<256x128xbf16>,
    return
  }
  func.func @transform_0(%arg0: i32) -> (i32, i32) {
    %c0_i32 = arith.constant 0 : i32
    %c0_i32_0 = arith.constant 0 : i32
    return %arg0, %c0_i32 : i32, i32
  }
  func.func @transform_1(%arg0: i32) -> (i32, i32) {
    %c0_i32 = arith.constant 0 : i32
    %c0_i32_0 = arith.constant 0 : i32
    return %arg0, %c0_i32 : i32, i32
  }
  func.func @transform_2(%arg0: i32) -> (i32, i32) {
    %c0_i32 = arith.constant 0 : i32
    %c0_i32_0 = arith.constant 0 : i32
    %c0_i32_1 = arith.constant 0 : i32
    return %c0_i32, %c0_i32_0 : i32, i32
  }
  func.func @transform_3(%arg0: i32) -> (i32, i32) {
    %c0_i32 = arith.constant 0 : i32
    %c0_i32_0 = arith.constant 0 : i32
    %c0_i32_1 = arith.constant 0 : i32
    return %c0_i32, %c0_i32_0 : i32, i32
  }
  func.func @transform_4(%arg0: i32) -> (i32, i32) {
    %c0_i32 = arith.constant 0 : i32
    %c0_i32_0 = arith.constant 0 : i32
    %c0_i32_1 = arith.constant 0 : i32
    return %c0_i32, %c0_i32_0 : i32, i32
  }
  func.func @transform_5(%arg0: i32) -> (i32, i32) {
    %c0_i32 = arith.constant 0 : i32
    %c0_i32_0 = arith.constant 0 : i32
    %c0_i32_1 = arith.constant 0 : i32
    return %c0_i32, %c0_i32_0 : i32, i32
  }
  func.func @transform_6(%arg0: i32) -> (i32, i32) {
    %c0_i32 = arith.constant 0 : i32
    %c0_i32_0 = arith.constant 0 : i32
    %c0_i32_1 = arith.constant 0 : i32
    return %c0_i32, %c0_i32_0 : i32, i32
  }
  func.func @transform_7(%arg0: i32) -> (i32, i32) {
    %c0_i32 = arith.constant 0 : i32
    %c0_i32_0 = arith.constant 0 : i32
    %c0_i32_1 = arith.constant 0 : i32
    return %c0_i32, %c0_i32_0 : i32, i32
  }
  func.func @transform_8(%arg0: i32) -> (i32, i32) {
    %c0_i32 = arith.constant 0 : i32
    %c0_i32_0 = arith.constant 0 : i32
    %c0_i32_1 = arith.constant 0 : i32
    return %c0_i32, %c0_i32_0 : i32, i32
  }
  func.func @transform_9(%arg0: i32) -> (i32, i32) {
    %c0_i32 = arith.constant 0 : i32
    %c0_i32_0 = arith.constant 0 : i32
    return %arg0, %c0_i32 : i32, i32
  }
  func.func @transform_10(%arg0: i32) -> (i32, i32) {
    %c0_i32 = arith.constant 0 : i32
    %c0_i32_0 = arith.constant 0 : i32
    return %arg0, %c0_i32 : i32, i32
  }
  func.func @transform_11(%arg0: i32) -> (i32, i32) {
    %c0_i32 = arith.constant 0 : i32
    %c0_i32_0 = arith.constant 0 : i32
    return %arg0, %c0_i32 : i32, i32
  }
}

module attributes {stable_mosaic.version = 11 : i64} {
  func.func @_loss_kernel(%arg0: i32, %arg1: memref<256x1xi32, #tpu.memory_space<vmem>>, %arg2: memref<256x128xbf16, #tpu.memory_space<vmem>>, %arg3: memref<512x128xbf16, #tpu.memory_space<vmem>>, %arg4: memref<8x128xf32, #tpu.memory_space<vmem>>) attributes {dimension_semantics = [#tpu.dimension_semantics<parallel>], iteration_bounds = array<i64: 2>, scalar_prefetch = 0 : i64, scratch_operands = 0 : i64, tpu.core_type = #tpu.core_type<tc>, window_params = [{transform_indices = @transform_0, window_bounds = array<i64: 256, 1>}, {transform_indices = @transform_1, window_bounds = array<i64: 256, 128>}, {pipeline_mode = #tpu.pipeline_mode<synchronous>, transform_indices = @transform_2, window_bounds = array<i64: 512, 128>}, {transform_indices = @transform_3, window_bounds = array<i64: 8, 128>}]} {
    %c0 = arith.constant 0 : index
    %c0_0 = arith.constant 0 : index
    %0 = vector.load %arg2[%c0, %c0_0] : memref<256x128xbf16, #tpu.memory_space<vmem>>, vector<256x128xbf16>
    %c0_1 = arith.constant 0 : index
    %c0_2 = arith.constant 0 : index
    %1 = vector.load %arg3[%c0_1, %c0_2] : memref<512x128xbf16, #tpu.memory_space<vmem>>, vector<512x128xbf16>
    %cst = arith.constant dense<0.000000e+00> : vector<256x512xf32>
    %2 = tpu.matmul %0, %1, %cst {dimension_numbers = #tpu.dot_dimension_numbers<[1], [1], [0], [0], [0, 0, 1, 0], [], []>} : vector<256x128xbf16>, vector<512x128xbf16>, vector<256x512xf32> -> vector<256x512xf32>
    %cst_3 = arith.constant 1.000000e+01 : f32
    %3 = vector.broadcast %cst_3 : f32 to vector<256x512xf32>
    %4 = arith.mulf %2, %3 : vector<256x512xf32>
    %5 = tpu.iota {dimensions = array<i32: 1>} : vector<256x512xi32>
    %c0_4 = arith.constant 0 : index
    %c0_5 = arith.constant 0 : index
    %6 = vector.load %arg1[%c0_4, %c0_5] : memref<256x1xi32, #tpu.memory_space<vmem>>, vector<256x1xi32>
    %7 = vector.broadcast %6 : vector<256x1xi32> to vector<256x512xi32>
    %8 = arith.cmpi eq, %5, %7 : vector<256x512xi32>
    %cst_6 = arith.constant 0.000000e+00 : f32
    %9 = vector.broadcast %cst_6 : f32 to vector<256x512xf32>
    %10 = arith.select %8, %4, %9 : vector<256x512xi1>, vector<256x512xf32>
    %cst_7 = arith.constant dense<0.000000e+00> : vector<256xf32>
    %11 = vector.multi_reduction <add>, %10, %cst_7 [1] : vector<256x512xf32> to vector<256xf32>
    %12 = vector.shape_cast %11 : vector<256xf32> to vector<256x1xf32>
    %13 = math.exp %4 : vector<256x512xf32>
    %cst_8 = arith.constant dense<0.000000e+00> : vector<256xf32>
    %14 = vector.multi_reduction <add>, %13, %cst_8 [1] : vector<256x512xf32> to vector<256xf32>
    %15 = vector.shape_cast %14 : vector<256xf32> to vector<256x1xf32>
    %16 = math.exp %12 : vector<256x1xf32>
    %17 = arith.addf %16, %15 : vector<256x1xf32>
    %18 = math.log %17 : vector<256x1xf32>
    %19 = arith.subf %18, %12 : vector<256x1xf32>
    %20 = vector.shape_cast %19 : vector<256x1xf32> to vector<1x256x1xf32>
    %cst_9 = arith.constant dense<0.000000e+00> : vector<1xf32>
    %21 = vector.multi_reduction <add>, %20, %cst_9 [1, 2] : vector<1x256x1xf32> to vector<1xf32>
    %22 = vector.shape_cast %21 : vector<1xf32> to vector<1x1x1xf32>
    %23 = vector.extract %22[0, 0, 0] : f32 from vector<1x1x1xf32>
    %cst_10 = arith.constant 0.000000e+00 : f32
    %24 = vector.broadcast %cst_10 : f32 to vector<8x128xf32>
    %25 = vector.broadcast %23 : f32 to vector<8x128xf32>
    %26 = arith.addf %24, %25 : vector<8x128xf32>
    %c0_11 = arith.constant 0 : index
    %c0_12 = arith.constant 0 : index
    %27 = vector.load %arg4[%c0_11, %c0_12] : memref<8x128xf32, #tpu.memory_space<vmem>>, vector<8x128xf32>
    tpu.vector_store %arg4[%c0_11, %c0_12], %26 {strides = array<i32>} : memref<8x128xf32, #tpu.memory_space<vmem>>, vector<8x128xf32>,
    return
  }
  func.func @transform_0(%arg0: i32) -> (i32, i32) {
    %c0_i32 = arith.constant 0 : i32
    %c0_i32_0 = arith.constant 0 : i32
    return %arg0, %c0_i32 : i32, i32
  }
  func.func @transform_1(%arg0: i32) -> (i32, i32) {
    %c0_i32 = arith.constant 0 : i32
    %c0_i32_0 = arith.constant 0 : i32
    return %arg0, %c0_i32 : i32, i32
  }
  func.func @transform_2(%arg0: i32) -> (i32, i32) {
    %c0_i32 = arith.constant 0 : i32
    %c0_i32_0 = arith.constant 0 : i32
    %c0_i32_1 = arith.constant 0 : i32
    return %c0_i32, %c0_i32_0 : i32, i32
  }
  func.func @transform_3(%arg0: i32) -> (i32, i32) {
    %c0_i32 = arith.constant 0 : i32
    %c0_i32_0 = arith.constant 0 : i32
    return %arg0, %c0_i32 : i32, i32
  }
}

</mosaic_0001>

<bundles_post_ra>
// kernel: hypergcl_forward.3
= control target key start
LH: loop header
LB: loop body
LE: loop exit
PB: predicated region body
PF: predicated region fallthrough
CT: control target
= control target key end

     0   :  { %s2357_s12 = smov 0   ;;  %s2606_s0 = inlined_call_operand.vmem [shape: bf16[512,512], index: 0, kind: input, shape index: {}]   ;;  %s2607_s1 = inlined_call_operand.vmem [shape: bf16[512,128], index: 1, kind: input, shape index: {}]   ;;  %s2608_s2 = inlined_call_operand.vmem [shape: bf16[128,128], index: 2, kind: input, shape index: {}]   ;;  %s2609_s3 = inlined_call_operand.vmem [shape: bf16[512,128], index: 3, kind: output, shape index: {}]  }
   0x1 LB: > { %s1597_s13 = sadd.s32 4294967295, %s2335_s12   ;;  %p1601_p0 = scmp.ge.s32.totalorder %s2335_s12, 1  ;;  %s2335_s12 = sphi %s2357_s12, %s13_s12  }
   0x2   : > { %p139_p1 = scmp.lt.s32.totalorder %s2335_s12, 3 }
   0x4   : > { %p140_p2 = pnand %p1601_p0, %p139_p1 }
   0x5   : > { %v2193_v0 = vld [vmem:[%s2607_s1 + $0x40] sm:$0xff] (!%p140_p2)   ;;  %s1602_s16 = sshll.u32 (!%p140_p2), %s1597_s13, 5  ;;  %v2195_v2 = vld [vmem:[%s2607_s1 + $0x48] sm:$0xff] (!%p140_p2)   ;;  %v2197_v4 = vld [vmem:[%s2607_s1 + $0x50] sm:$0xff] (!%p140_p2)  }
   0x6   : > { %143 = sbr.rel (%p140_p2) target bundleno = 629 (0x275), region = 32  ;;  %v2194_v1 = vld [vmem:[%s2607_s1] sm:$0xff] (!%p140_p2)   ;;  %2169 = vmatprep.subr.bf16.mxu1 (!%p140_p2), %v2193_v0  ;;  %1873 = vmatprep.subr.bf16.mxu0 (!%p140_p2), %v2193_v0  ;;  %v2196_v3 = vld [vmem:[%s2607_s1 + $0x8] sm:$0xff] (!%p140_p2)   ;;  %p165_p3 = scmp.lt.s32.totalorder (!%p140_p2), %s1602_s16, 63  ;;  %v2198_v5 = vld [vmem:[%s2607_s1 + $0x10] sm:$0xff] (!%p140_p2)  }
   0x7   : > { %2177 = vmatpush3.bf16.msra.mxu1 (!%p140_p2), %v2194_v1  ;;  %1874 = vmatpush3.bf16.msra.mxu0 (!%p140_p2), %v2194_v1  ;;  %v2199_v6 = vld [vmem:[%s2607_s1 + $0x58] sm:$0xff] (!%p140_p2)   ;;  %v2201_v8 = vld [vmem:[%s2607_s1 + $0x60] sm:$0xff] (!%p140_p2)   ;;  %v2203_v10 = vld [vmem:[%s2607_s1 + $0x68] sm:$0xff] (!%p140_p2)  }
   0x8   : > { %2170 = vmatprep.subr.bf16.mxu1 (!%p140_p2), %v2195_v2  ;;  %1875 = vmatprep.subr.bf16.mxu0 (!%p140_p2), %v2195_v2  ;;  %v2200_v7 = vld [vmem:[%s2607_s1 + $0x18] sm:$0xff] (!%p140_p2)   ;;  %v2202_v9 = vld [vmem:[%s2607_s1 + $0x20] sm:$0xff] (!%p140_p2)   ;;  %v2204_v12 = vld [vmem:[%s2607_s1 + $0x28] sm:$0xff] (!%p140_p2)  }
   0x9   : > { %v2205_v13 = vld [vmem:[%s2607_s1 + $0x70] sm:$0xff] (!%p140_p2)   ;;  %v2207_v15 = vld [vmem:[%s2607_s1 + $0x78] sm:$0xff] (!%p140_p2)   ;;  %v2212_v17 = vld [vmem:[%s2607_s1 + $0xc0] sm:$0xff] (!%p140_p2)  }
   0xa   : > { %v2206_v14 = vld [vmem:[%s2607_s1 + $0x30] sm:$0xff] (!%p140_p2)   ;;  %v2208_v16 = vld [vmem:[%s2607_s1 + $0x38] sm:$0xff] (!%p140_p2)   ;;  %v2213_v19 = vld [vmem:[%s2607_s1 + $0x80] sm:$0xff] (!%p140_p2)  }
   0xb   : > { %2178 = vmatpush3.bf16.msra.mxu1 (!%p140_p2), %v2196_v3  ;;  %1876 = vmatpush3.bf16.msra.mxu0 (!%p140_p2), %v2196_v3  ;;  %v2214_v21 = vld [vmem:[%s2607_s1 + $0xc8] sm:$0xff] (!%p140_p2)   ;;  %v2219_v24 = vld [vmem:[%s2607_s1 + $0xd0] sm:$0xff] (!%p140_p2)   ;;  %v2221_v28 = vld [vmem:[%s2607_s1 + $0xd8] sm:$0xff] (!%p140_p2)  }
   0xc   : > { %2171 = vmatprep.subr.bf16.mxu1 (!%p140_p2), %v2197_v4  ;;  %1877 = vmatprep.subr.bf16.mxu0 (!%p140_p2), %v2197_v4  ;;  %v2215_v22 = vld [vmem:[%s2607_s1 + $0x88] sm:$0xff] (!%p140_p2)   ;;  %v2220_v25 = vld [vmem:[%s2607_s1 + $0x90] sm:$0xff] (!%p140_p2)   ;;  %v2222_v31 = vld [vmem:[%s2607_s1 + $0x98] sm:$0xff] (!%p140_p2)  }
   0xd   : > { %s2611_s16 = smov (!%p165_p3, %s1602_s16), 63  ;;  %v2226_v33 = vld [vmem:[%s2607_s1 + $0xe0] sm:$0xff]   ;;  %v2228_v38 = vld [vmem:[%s2607_s1 + $0xe8] sm:$0xff]   ;;  %v2233_v41 = vld [vmem:[%s2607_s1 + $0xf0] sm:$0xff]  }
   0xe   : > { %s1745_s4 = sshll.u32 %s2611_s16, 4  ;;  %v2227_v36 = vld [vmem:[%s2607_s1 + $0xa0] sm:$0xff]   ;;  %v2229_v39 = vld [vmem:[%s2607_s1 + $0xa8] sm:$0xff]   ;;  %v2234_v44 = vld [vmem:[%s2607_s1 + $0xb0] sm:$0xff]  }
   0xf   : > { %2179 = vmatpush3.bf16.msra.mxu1 %v2198_v5  ;;  %1878 = vmatpush3.bf16.msra.mxu0 %v2198_v5  ;;  %s2398_s9 = scalar_lea.vmem %s2606_s0, %s1745_s4  ;;  %v2235_v46 = vld [vmem:[%s2607_s1 + $0xf8] sm:$0xff]  }
  0x10   : > { %2172 = vmatprep.subr.bf16.mxu1 %v2199_v6  ;;  %1879 = vmatprep.subr.bf16.mxu0 %v2199_v6  ;;  %v2211_v11 = vld [vmem:[%s2398_s9 + $0x184] ss:$16 sps:$4 sm:$0xff]   ;;  %v2209_v18 = vld [vmem:[%s2398_s9 + $0x180] ss:$16 sps:$4 sm:$0xff]   ;;  %v2242_v45 = vld [vmem:[%s2398_s9 + $0xc] ss:$16 sps:$4 sm:$0xff]  }
  0x11   : > { %946 = vmatprep.mubr.bf16.mxu1 %v2211_v11  ;;  %v2216_v20 = vld [vmem:[%s2398_s9 + $0x1a4] ss:$16 sps:$4 sm:$0xff]   ;;  %v2218_v23 = vld [vmem:[%s2398_s9 + $0x1a0] ss:$16 sps:$4 sm:$0xff]   ;;  %v2236_v47 = vld [vmem:[%s2607_s1 + $0xb8] sm:$0xff]  }
  0x12   : > { %v2237_v26 = vld [vmem:[%s2398_s9] ss:$16 sps:$4 sm:$0xff]   ;;  %v2239_v27 = vld [vmem:[%s2398_s9 + $0x4] ss:$16 sps:$4 sm:$0xff]   ;;  %v2240_v48 = vld [vmem:[%s2398_s9 + $0x8] ss:$16 sps:$4 sm:$0xff]  }
  0x13   : > { %2180 = vmatpush3.bf16.msra.mxu1 %v2200_v7  ;;  %1880 = vmatpush3.bf16.msra.mxu0 %v2200_v7  ;;  %v2223_v29 = vld [vmem:[%s2398_s9 + $0x1c4] ss:$16 sps:$4 sm:$0xff]   ;;  %v2225_v32 = vld [vmem:[%s2398_s9 + $0x1c0] ss:$16 sps:$4 sm:$0xff]   ;;  %v2245_v51 = vld [vmem:[%s2398_s9 + $0x2c] ss:$16 sps:$4 sm:$0xff]  }
  0x14   : > { %2173 = vmatprep.subr.bf16.mxu1 %v2201_v8  ;;  %1881 = vmatprep.subr.bf16.mxu0 %v2201_v8  ;;  %v2243_v30 = vld [vmem:[%s2398_s9 + $0x24] ss:$16 sps:$4 sm:$0xff]   ;;  %v2247_v34 = vld [vmem:[%s2398_s9 + $0x20] ss:$16 sps:$4 sm:$0xff]   ;;  %v2248_v53 = vld [vmem:[%s2398_s9 + $0x28] ss:$16 sps:$4 sm:$0xff]  }
  0x15   : > { %850 = vmatprep.mubr.bf16.mxu0 %v2239_v27  ;;  %v2249_v35 = vld [vmem:[%s2398_s9 + $0x44] ss:$16 sps:$4 sm:$0xff]   ;;  %v2232_v40 = vld [vmem:[%s2398_s9 + $0x1e0] ss:$16 sps:$4 sm:$0xff]   ;;  %v2251_v55 = vld [vmem:[%s2398_s9 + $0x4c] ss:$16 sps:$4 sm:$0xff]  }
  0x16   : > { %v2230_v37 = vld [vmem:[%s2398_s9 + $0x1e4] ss:$16 sps:$4 sm:$0xff]   ;;  %v2253_v42 = vld [vmem:[%s2398_s9 + $0x40] ss:$16 sps:$4 sm:$0xff]   ;;  %v2254_v57 = vld [vmem:[%s2398_s9 + $0x48] ss:$16 sps:$4 sm:$0xff]  }
  0x17   : > { %2181 = vmatpush3.bf16.msra.mxu1 %v2202_v9  ;;  %1882 = vmatpush3.bf16.msra.mxu0 %v2202_v9  ;;  %v2255_v43 = vld [vmem:[%s2398_s9 + $0x64] ss:$16 sps:$4 sm:$0xff]   ;;  %v2259_v49 = vld [vmem:[%s2398_s9 + $0x60] ss:$16 sps:$4 sm:$0xff]   ;;  %v2257_v59 = vld [vmem:[%s2398_s9 + $0x6c] ss:$16 sps:$4 sm:$0xff]  }
  0x18   : > { %2174 = vmatprep.subr.bf16.mxu1 %v2203_v10  ;;  %1883 = vmatprep.subr.bf16.mxu0 %v2203_v10  ;;  %v2261_v50 = vld [vmem:[%s2398_s9 + $0x84] ss:$16 sps:$4 sm:$0xff]   ;;  %v2265_v52 = vld [vmem:[%s2398_s9 + $0x80] ss:$16 sps:$4 sm:$0xff]   ;;  %v2260_v61 = vld [vmem:[%s2398_s9 + $0x68] ss:$16 sps:$4 sm:$0xff]  }
  0x19   : > { %v2267_v54 = vld [vmem:[%s2398_s9 + $0xa4] ss:$16 sps:$4 sm:$0xff]   ;;  %v2271_v56 = vld [vmem:[%s2398_s9 + $0xa0] ss:$16 sps:$4 sm:$0xff]   ;;  %v2263_v63 = vld [vmem:[%s2398_s9 + $0x8c] ss:$16 sps:$4 sm:$0xff]  }
  0x1a   : > { %v2273_v58 = vld [vmem:[%s2398_s9 + $0xc4] ss:$16 sps:$4 sm:$0xff]   ;;  %v2277_v60 = vld [vmem:[%s2398_s9 + $0xc0] ss:$16 sps:$4 sm:$0xff]   ;;  %v2266_v1 = vld [vmem:[%s2398_s9 + $0x88] ss:$16 sps:$4 sm:$0xff]  }
  0x1b   : > { %2182 = vmatpush3.bf16.msra.mxu1 %v2204_v12  ;;  %1884 = vmatpush3.bf16.msra.mxu0 %v2204_v12  ;;  %v2279_v62 = vld [vmem:[%s2398_s9 + $0xe4] ss:$16 sps:$4 sm:$0xff]   ;;  %v2283_v0 = vld [vmem:[%s2398_s9 + $0xe0] ss:$16 sps:$4 sm:$0xff]   ;;  %v2269_v3 = vld [vmem:[%s2398_s9 + $0xac] ss:$16 sps:$4 sm:$0xff]  }
  0x1c   : > { %2175 = vmatprep.subr.bf16.mxu1 %v2205_v13  ;;  %1885 = vmatprep.subr.bf16.mxu0 %v2205_v13  ;;  %v2285_v2 = vld [vmem:[%s2398_s9 + $0x104] ss:$16 sps:$4 sm:$0xff]   ;;  %v2289_v4 = vld [vmem:[%s2398_s9 + $0x100] ss:$16 sps:$4 sm:$0xff]   ;;  %v2272_v5 = vld [vmem:[%s2398_s9 + $0xa8] ss:$16 sps:$4 sm:$0xff]  }
  0x1d   : > { %v2291_v6 = vld [vmem:[%s2398_s9 + $0x124] ss:$16 sps:$4 sm:$0xff]   ;;  %v2275_v7 = vld [vmem:[%s2398_s9 + $0xcc] ss:$16 sps:$4 sm:$0xff]   ;;  %v2295_v8 = vld [vmem:[%s2398_s9 + $0x120] ss:$16 sps:$4 sm:$0xff]  }
  0x1e   : > { %v2278_v9 = vld [vmem:[%s2398_s9 + $0xc8] ss:$16 sps:$4 sm:$0xff]   ;;  %v2297_v10 = vld [vmem:[%s2398_s9 + $0x144] ss:$16 sps:$4 sm:$0xff]   ;;  %v2281_v11 = vld [vmem:[%s2398_s9 + $0xec] ss:$16 sps:$4 sm:$0xff]  }
  0x1f   : > { %2183 = vmatpush3.bf16.msra.mxu1 %v2206_v14  ;;  %1886 = vmatpush3.bf16.msra.mxu0 %v2206_v14  ;;  %v2301_v12 = vld [vmem:[%s2398_s9 + $0x140] ss:$16 sps:$4 sm:$0xff]   ;;  %v2284_v13 = vld [vmem:[%s2398_s9 + $0xe8] ss:$16 sps:$4 sm:$0xff]   ;;  %v2303_v14 = vld [vmem:[%s2398_s9 + $0x164] ss:$16 sps:$4 sm:$0xff]  }
  0x20   : > { %2176 = vmatprep.subr.bf16.mxu1 %v2207_v15  ;;  %1887 = vmatprep.subr.bf16.mxu0 %v2207_v15  ;;  %v2287_v15 = vld [vmem:[%s2398_s9 + $0x10c] ss:$16 sps:$4 sm:$0xff]   ;;  %v2325_v27 = vld [vmem:[%s2608_s2 + $0x20] sm:$0xff]  }
  0x23   : > { %2184 = vmatpush3.bf16.msra.mxu1 %v2208_v16  ;;  %1888 = vmatpush3.bf16.msra.mxu0 %v2208_v16  ;;  %v2307_v16 = vld [vmem:[%s2398_s9 + $0x160] ss:$16 sps:$4 sm:$0xff]  }
  0x24   : > { %1985 = vmatprep.subr.bf16.mxu1 %v2212_v17  ;;  %v2290_v17 = vld [vmem:[%s2398_s9 + $0x108] ss:$16 sps:$4 sm:$0xff]  }
  0x26   : > { %947 = vmatmul.mubr.bf16.vlgmr.msra.gmra.mrb[0].mxu1 %v2209_v18  ;;  %851 = vmatmul.mubr.bf16.vlgmr.msra.gmra.mrb[0].mxu0 %v2237_v26  ;;  %v2293_v18 = vld [vmem:[%s2398_s9 + $0x12c] ss:$16 sps:$4 sm:$0xff]  }
  0x27   : > { %1986 = vmatpush3.bf16.msra.mxu1 %v2213_v19  ;;  %954 = vmatprep.mubr.bf16.mxu1 %v2216_v20  ;;  %v2321_v19 = vld [vmem:[%s2608_s2] sm:$0xff]   ;;  %v2296_v20 = vld [vmem:[%s2398_s9 + $0x128] ss:$16 sps:$4 sm:$0xff]  }
  0x28   : > { %1987 = vmatprep.subr.bf16.mxu1 %v2214_v21  ;;  %858 = vmatprep.mubr.bf16.mxu0 %v2243_v30  ;;  %v2299_v21 = vld [vmem:[%s2398_s9 + $0x14c] ss:$16 sps:$4 sm:$0xff]  }
  0x29   : > { %2121 = vmatprep.subr.bf16.mxu0 %v2321_v19  ;;  %v2324_v26 = vld [vmem:[%s2608_s2 + $0x18] sm:$0xff]   ;;  %v2326_v30 = vld [vmem:[%s2608_s2 + $0x28] sm:$0xff]  }
  0x2a   : > { %2122 = vmatpush3.bf16.msra.mxu0 %v2321_v19 }
  0x2b   : > { %1988 = vmatpush3.bf16.msra.mxu1 %v2215_v22  ;;  %v2322_v22 = vld [vmem:[%s2608_s2 + $0x8] sm:$0xff]  }
  0x2c   : > { %1989 = vmatprep.subr.bf16.mxu1 %v2219_v24  ;;  %2123 = vmatprep.subr.bf16.mxu0 %v2322_v22  ;;  %v2302_v24 = vld [vmem:[%s2398_s9 + $0x148] ss:$16 sps:$4 sm:$0xff]  }
  0x2e   : > { %955 = vmatmul.mubr.bf16.gmra.mrb[4].mxu1 %v2218_v23  ;;  %859 = vmatmul.mubr.bf16.gmra.mrb[4].mxu0 %v2247_v34  ;;  %v2323_v23 = vld [vmem:[%s2608_s2 + $0x10] sm:$0xff]   ;;  %v2328_v34 = vld [vmem:[%s2608_s2 + $0x38] sm:$0xff]  }
  0x2f   : > { %1990 = vmatpush3.bf16.msra.mxu1 %v2220_v25  ;;  %962 = vmatprep.mubr.bf16.mxu1 %v2223_v29  ;;  %v2305_v25 = vld [vmem:[%s2398_s9 + $0x16c] ss:$16 sps:$4 sm:$0xff]  }
  0x30   : > { %1991 = vmatprep.subr.bf16.mxu1 %v2221_v28  ;;  %866 = vmatprep.mubr.bf16.mxu0 %v2249_v35  ;;  %v2308_v28 = vld [vmem:[%s2398_s9 + $0x168] ss:$16 sps:$4 sm:$0xff]   ;;  %v2309_v29 = vld [vmem:[%s2398_s9 + $0x18c] ss:$16 sps:$4 sm:$0xff]  }
  0x31   : > { %2124 = vmatpush3.bf16.msra.mxu0 %v2322_v22  ;;  %v2314_v35 = vld [vmem:[%s2398_s9 + $0x1a8] ss:$16 sps:$4 sm:$0xff]  }
  0x32   : > { %2125 = vmatprep.subr.bf16.mxu0 %v2323_v23 }
  0x33   : > { %1992 = vmatpush3.bf16.msra.mxu1 %v2222_v31  ;;  %v2327_v31 = vld [vmem:[%s2608_s2 + $0x30] sm:$0xff]  }
  0x34   : > { %1993 = vmatprep.subr.bf16.mxu1 %v2226_v33  ;;  %v2312_v33 = vld [vmem:[%s2398_s9 + $0x1ac] ss:$16 sps:$4 sm:$0xff]  }
  0x35   : > { %2126 = vmatpush3.bf16.msra.mxu0 %v2323_v23 }
  0x36   : > { %963 = vmatmul.mubr.bf16.gmra.mrb[8].mxu1 %v2225_v32  ;;  %867 = vmatmul.mubr.bf16.gmra.mrb[8].mxu0 %v2253_v42  ;;  %v2311_v32 = vld [vmem:[%s2398_s9 + $0x188] ss:$16 sps:$4 sm:$0xff]  }
  0x37   : > { %1994 = vmatpush3.bf16.msra.mxu1 %v2227_v36  ;;  %970 = vmatprep.mubr.bf16.mxu1 %v2230_v37  ;;  %v2315_v36 = vld [vmem:[%s2398_s9 + $0x1cc] ss:$16 sps:$4 sm:$0xff]   ;;  %v2317_v37 = vld [vmem:[%s2398_s9 + $0x1c8] ss:$16 sps:$4 sm:$0xff]  }
  0x38   : > { %1995 = vmatprep.subr.bf16.mxu1 %v2228_v38  ;;  %874 = vmatprep.mubr.bf16.mxu0 %v2255_v43  ;;  %v2318_v38 = vld [vmem:[%s2398_s9 + $0x1ec] ss:$16 sps:$4 sm:$0xff]  }
  0x39   : > { %2127 = vmatprep.subr.bf16.mxu0 %v2324_v26 }
  0x3a   : > { %2128 = vmatpush3.bf16.msra.mxu0 %v2324_v26 }
  0x3b   : > { %1996 = vmatpush3.bf16.msra.mxu1 %v2229_v39  ;;  %2129 = vmatprep.subr.bf16.mxu0 %v2325_v27  ;;  %v2320_v39 = vld [vmem:[%s2398_s9 + $0x1e8] ss:$16 sps:$4 sm:$0xff]   ;;  %s1606_s9 = sshll.u32 %s2611_s16, 2 }
  0x3c   : > { %1997 = vmatprep.subr.bf16.mxu1 %v2233_v41  ;;  %s2585_s28 = scalar_lea.vmem %s2609_s3, %s1606_s9 }
  0x3e   : > { %971 = vmatmul.mubr.bf16.gmra.mrb[12].mxu1 %v2232_v40  ;;  %875 = vmatmul.mubr.bf16.gmra.mrb[12].mxu0 %v2259_v49 }
  0x3f   : > { %1998 = vmatpush3.bf16.msra.mxu1 %v2234_v44  ;;  %1011 = vmatprep.mubr.bf16.mxu1 %v2242_v45 }
  0x40   : > { %1999 = vmatprep.subr.bf16.mxu1 %v2235_v46  ;;  %882 = vmatprep.mubr.bf16.mxu0 %v2261_v50 }
  0x41   : > { %2130 = vmatpush3.bf16.msra.mxu0 %v2325_v27 }
  0x42   : > { %2131 = vmatprep.subr.bf16.mxu0 %v2326_v30 }
  0x43   : > { %2000 = vmatpush3.bf16.msra.mxu1 %v2236_v47 }
  0x45   : > { %2132 = vmatpush3.bf16.msra.mxu0 %v2326_v30 }
  0x46   : > { %1012 = vmatmul.mubr.bf16.vlgmr.msra.gmra.mrb[16].mxu1 %v2240_v48  ;;  %883 = vmatmul.mubr.bf16.gmra.mrb[16].mxu0 %v2265_v52 }
  0x47   : > { %1019 = vmatprep.mubr.bf16.mxu1 %v2245_v51  ;;  %890 = vmatprep.mubr.bf16.mxu0 %v2267_v54 }
  0x48   : > { %2133 = vmatprep.subr.bf16.mxu0 %v2327_v31 }
  0x49   : > { %2134 = vmatpush3.bf16.msra.mxu0 %v2327_v31 }
  0x4a   : > { %2135 = vmatprep.subr.bf16.mxu0 %v2328_v34 }
  0x4d   : > { %2136 = vmatpush3.bf16.msra.mxu0 %v2328_v34 }
  0x4e   : > { %1020 = vmatmul.mubr.bf16.gmra.mrb[20].mxu1 %v2248_v53  ;;  %891 = vmatmul.mubr.bf16.gmra.mrb[20].mxu0 %v2271_v56 }
  0x4f   : > { %1027 = vmatprep.mubr.bf16.mxu1 %v2251_v55  ;;  %898 = vmatprep.mubr.bf16.mxu0 %v2273_v58 }
  0x56   : > { %1028 = vmatmul.mubr.bf16.gmra.mrb[24].mxu1 %v2254_v57  ;;  %899 = vmatmul.mubr.bf16.gmra.mrb[24].mxu0 %v2277_v60 }
  0x57   : > { %1035 = vmatprep.mubr.bf16.mxu1 %v2257_v59  ;;  %906 = vmatprep.mubr.bf16.mxu0 %v2279_v62 }
  0x5e   : > { %1036 = vmatmul.mubr.bf16.gmra.mrb[28].mxu1 %v2260_v61  ;;  %907 = vmatmul.mubr.bf16.gmra.mrb[28].mxu0 %v2283_v0 }
  0x5f   : > { %1043 = vmatprep.mubr.bf16.mxu1 %v2263_v63  ;;  %914 = vmatprep.mubr.bf16.mxu0 %v2285_v2 }
  0x66   : > { %1044 = vmatmul.mubr.bf16.gmra.mrb[32].mxu1 %v2266_v1  ;;  %915 = vmatmul.mubr.bf16.gmra.mrb[32].mxu0 %v2289_v4 }
  0x67   : > { %1051 = vmatprep.mubr.bf16.mxu1 %v2269_v3  ;;  %922 = vmatprep.mubr.bf16.mxu0 %v2291_v6 }
  0x6e   : > { %1052 = vmatmul.mubr.bf16.gmra.mrb[36].mxu1 %v2272_v5  ;;  %923 = vmatmul.mubr.bf16.gmra.mrb[36].mxu0 %v2295_v8 }
  0x6f   : > { %1059 = vmatprep.mubr.bf16.mxu1 %v2275_v7  ;;  %930 = vmatprep.mubr.bf16.mxu0 %v2297_v10 }
  0x76   : > { %1060 = vmatmul.mubr.bf16.gmra.mrb[40].mxu1 %v2278_v9  ;;  %931 = vmatmul.mubr.bf16.gmra.mrb[40].mxu0 %v2301_v12 }
  0x77   : > { %1067 = vmatprep.mubr.bf16.mxu1 %v2281_v11  ;;  %938 = vmatprep.mubr.bf16.mxu0 %v2303_v14 }
  0x7e   : > { %1068 = vmatmul.mubr.bf16.gmra.mrb[44].mxu1 %v2284_v13  ;;  %939 = vmatmul.mubr.bf16.gmra.mrb[44].mxu0 %v2307_v16 }
  0x7f   : > { %1075 = vmatprep.mubr.bf16.mxu1 %v2287_v15 }
  0x86   : > { %1076 = vmatmul.mubr.bf16.gmra.mrb[48].mxu1 %v2290_v17 }
  0x87   : > { %1083 = vmatprep.mubr.bf16.mxu1 %v2293_v18 }
  0x8e   : > { %1084 = vmatmul.mubr.bf16.gmra.mrb[52].mxu1 %v2296_v20 }
  0x8f   : > { %1091 = vmatprep.mubr.bf16.mxu1 %v2299_v21 }
  0x96   : > { %1092 = vmatmul.mubr.bf16.gmra.mrb[56].mxu1 %v2302_v24 }
  0x97   : > { %1099 = vmatprep.mubr.bf16.mxu1 %v2305_v25 }
  0x9e   : > { %1100 = vmatmul.mubr.bf16.gmra.mrb[60].mxu1 %v2308_v28 }
  0x9f   : > { %1107 = vmatprep.mubr.bf16.mxu1 %v2309_v29 }
  0xa6   : > { %1108 = vmatmul.mubr.bf16.gmra.mrb[64].mxu1 %v2311_v32 }
  0xa7   : > { %1115 = vmatprep.mubr.bf16.mxu1 %v2312_v33 }
  0xae   : > { %1116 = vmatmul.mubr.bf16.gmra.mrb[68].mxu1 %v2314_v35 }
  0xaf   : > { %1123 = vmatprep.mubr.bf16.mxu1 %v2315_v36 }
  0xb6   : > { %1124 = vmatmul.mubr.bf16.gmra.mrb[72].mxu1 %v2317_v37 }
  0xb7   : > { %1131 = vmatprep.mubr.bf16.mxu1 %v2318_v38 }
  0xbe   : > { %1132 = vmatmul.mubr.bf16.gmra.mrb[76].mxu1 %v2320_v39 }
  0xf9   : > { %v1961_v40 = vpop.f32.mrb[0].mxu1  ;;  %v1889_v46 = vpop.f32.mrb[0].mxu0 }
  0xfa   : > { %v1962_v41 = vpop.f32.mrb[1].mxu1  ;;  %v1890_v48 = vpop.f32.mrb[1].mxu0 }
  0xfb   : > { %v2557_v42 = vadd.f32 %v1962_v41, %v1961_v40  ;;  %v1964_v43 = vpop.f32.mrb[2].mxu1  ;;  %v1891_v50 = vadd.f32 %v1890_v48, %v1889_v46  ;;  %v1892_v51 = vpop.f32.mrb[2].mxu0 }
  0xfc   : > { %v1965_v44 = vpop.f32.mrb[3].mxu1  ;;  %v1893_v54 = vpop.f32.mrb[3].mxu0 }
  0xfd   : > { %v2559_v45 = vadd.f32 %v1965_v44, %v1964_v43  ;;  %v1894_v56 = vadd.f32 %v1893_v54, %v1892_v51 }
 0x101   : > { %v1967_v47 = vpop.f32.mrb[4].mxu1  ;;  %v1895_v58 = vpop.f32.mrb[4].mxu0 }
 0x102   : > { %v1968_v49 = vpop.f32.mrb[5].mxu1  ;;  %v1896_v60 = vpop.f32.mrb[5].mxu0 }
 0x103   : > { %v2561_v52 = vadd.f32 %v1968_v49, %v1967_v47  ;;  %v1970_v53 = vpop.f32.mrb[6].mxu1  ;;  %v1897_v62 = vadd.f32 %v1896_v60, %v1895_v58  ;;  %v1898_v63 = vpop.f32.mrb[6].mxu0 }
 0x104   : > { %v1971_v55 = vpop.f32.mrb[7].mxu1  ;;  %v1899_v2 = vpop.f32.mrb[7].mxu0 }
 0x105   : > { %v2563_v57 = vadd.f32 %v1971_v55, %v1970_v53  ;;  %v1900_v4 = vadd.f32 %v1899_v2, %v1898_v63 }
 0x109   : > { %v1973_v59 = vpop.f32.mrb[8].mxu1  ;;  %v1901_v6 = vpop.f32.mrb[8].mxu0 }
 0x10a   : > { %v1974_v61 = vpop.f32.mrb[9].mxu1  ;;  %v1902_v8 = vpop.f32.mrb[9].mxu0 }
 0x10b   : > { %v2565_v0 = vadd.f32 %v1974_v61, %v1973_v59  ;;  %v1976_v1 = vpop.f32.mrb[10].mxu1  ;;  %v1903_v10 = vadd.f32 %v1902_v8, %v1901_v6  ;;  %v1904_v11 = vpop.f32.mrb[10].mxu0 }
 0x10c   : > { %v1977_v3 = vpop.f32.mrb[11].mxu1  ;;  %v1905_v14 = vpop.f32.mrb[11].mxu0 }
 0x10d   : > { %v2567_v5 = vadd.f32 %v1977_v3, %v1976_v1  ;;  %v1906_v16 = vadd.f32 %v1905_v14, %v1904_v11 }
 0x111   : > { %v1979_v7 = vpop.f32.mrb[12].mxu1  ;;  %v1907_v18 = vpop.f32.mrb[12].mxu0 }
 0x112   : > { %v1980_v9 = vpop.f32.mrb[13].mxu1  ;;  %v1908_v20 = vpop.f32.mrb[13].mxu0 }
 0x113   : > { %v2569_v12 = vadd.f32 %v1980_v9, %v1979_v7  ;;  %v1982_v13 = vpop.f32.mrb[14].mxu1  ;;  %v1909_v22 = vadd.f32 %v1908_v20, %v1907_v18  ;;  %v1910_v23 = vpop.f32.mrb[14].mxu0 }
 0x114   : > { %v1983_v15 = vpop.f32.mrb[15].mxu1  ;;  %v1911_v26 = vpop.f32.mrb[15].mxu0 }
 0x115   : > { %v2571_v17 = vadd.f32 %v1983_v15, %v1982_v13  ;;  %v1912_v28 = vadd.f32 %v1911_v26, %v1910_v23 }
 0x119   : > { %v2001_v19 = vpop.f32.mrb[16].mxu1  ;;  %v1913_v32 = vpop.f32.mrb[16].mxu0 }
 0x11a   : > { %v2002_v21 = vpop.f32.mrb[17].mxu1  ;;  %v1914_v35 = vpop.f32.mrb[17].mxu0 }
 0x11b   : > { %v2003_v24 = vadd.f32 %v2002_v21, %v2001_v19  ;;  %v2004_v25 = vpop.f32.mrb[18].mxu1  ;;  %v1915_v37 = vadd.f32 %v1914_v35, %v1913_v32  ;;  %v1916_v38 = vpop.f32.mrb[18].mxu0 }
 0x11c   : > { %v2005_v27 = vpop.f32.mrb[19].mxu1  ;;  %v1917_v41 = vpop.f32.mrb[19].mxu0 }
 0x11d   : > { %v1014_v29 = vadd.f32 %v2003_v24, %v1891_v50  ;;  %v2006_v30 = vadd.f32 %v2005_v27, %v2004_v25  ;;  %v1918_v44 = vadd.f32 %v1917_v41, %v1916_v38 }
 0x11f   : > { %v1017_v31 = vadd.f32 %v2006_v30, %v1894_v56 }
 0x121   : > { %v2007_v33 = vpop.f32.mrb[20].mxu1  ;;  %v1140_v34 = vpack.c.bf16 %v1017_v31, %v1014_v29  ;;  %v1919_v49 = vpop.f32.mrb[20].mxu0 }
 0x122   : > { %v2008_v36 = vpop.f32.mrb[21].mxu1  ;;  %v1920_v53 = vpop.f32.mrb[21].mxu0 }
 0x123   : > { %v2009_v39 = vadd.f32 %v2008_v36, %v2007_v33  ;;  %v2010_v40 = vpop.f32.mrb[22].mxu1  ;;  %2137 = vmatprep.mubr.bf16.mxu0 %v1140_v34  ;;  %v1921_v55 = vadd.f32 %v1920_v53, %v1919_v49  ;;  %v1922_v56 = vpop.f32.mrb[22].mxu0 }
 0x124   : > { %v2011_v43 = vpop.f32.mrb[23].mxu1  ;;  %v1923_v60 = vpop.f32.mrb[23].mxu0 }
 0x125   : > { %v1022_v46 = vadd.f32 %v2009_v39, %v1897_v62  ;;  %v2012_v47 = vadd.f32 %v2011_v43, %v2010_v40  ;;  %v1924_v63 = vadd.f32 %v1923_v60, %v1922_v56 }
 0x127   : > { %v1025_v48 = vadd.f32 %v2012_v47, %v1900_v4 }
 0x129   : > { %v1141_v50 = vpack.c.bf16 %v1025_v48, %v1022_v46  ;;  %v2013_v51 = vpop.f32.mrb[24].mxu1  ;;  %v1925_v6 = vpop.f32.mrb[24].mxu0 }
 0x12a   : > { %v2014_v54 = vpop.f32.mrb[25].mxu1  ;;  %v1926_v4 = vpop.f32.mrb[25].mxu0 }
 0x12b   : > { %v2015_v58 = vadd.f32 %v2014_v54, %v2013_v51  ;;  %v2016_v59 = vpop.f32.mrb[26].mxu1  ;;  %2138 = vmatmul.mubr.bf16.vlgmr.msra.gmra.mrb[48].mxu0 %v1141_v50  ;;  %v1927_v9 = vadd.f32 %v1926_v4, %v1925_v6  ;;  %v1928_v11 = vpop.f32.mrb[26].mxu0 }
 0x12c   : > { %v2017_v61 = vpop.f32.mrb[27].mxu1  ;;  %v1929_v15 = vpop.f32.mrb[27].mxu0 }
 0x12d   : > { %v1030_v1 = vadd.f32 %v2015_v58, %v1903_v10  ;;  %v2018_v2 = vadd.f32 %v2017_v61, %v2016_v59  ;;  %v1930_v19 = vadd.f32 %v1929_v15, %v1928_v11 }
 0x12f   : > { %v1033_v3 = vadd.f32 %v2018_v2, %v1906_v16 }
 0x131   : > { %v2019_v62 = vpop.f32.mrb[28].mxu1  ;;  %v1142_v7 = vpack.c.bf16 %v1033_v3, %v1030_v1  ;;  %v1931_v24 = vpop.f32.mrb[28].mxu0 }
 0x132   : > { %v2020_v8 = vpop.f32.mrb[29].mxu1  ;;  %v1932_v16 = vpop.f32.mrb[29].mxu0 }
 0x133   : > { %v2021_v13 = vadd.f32 %v2020_v8, %v2019_v62  ;;  %v2022_v14 = vpop.f32.mrb[30].mxu1  ;;  %2141 = vmatprep.mubr.bf16.mxu0 %v1142_v7  ;;  %v1933_v27 = vadd.f32 %v1932_v16, %v1931_v24  ;;  %v1934_v29 = vpop.f32.mrb[30].mxu0 }
 0x134   : > { %v2023_v18 = vpop.f32.mrb[31].mxu1  ;;  %v1935_v32 = vpop.f32.mrb[31].mxu0 }
 0x135   : > { %v1038_v20 = vadd.f32 %v2021_v13, %v1909_v22  ;;  %v2024_v21 = vadd.f32 %v2023_v18, %v2022_v14  ;;  %v1936_v34 = vadd.f32 %v1935_v32, %v1934_v29 }
 0x137   : > { %v1041_v23 = vadd.f32 %v2024_v21, %v1912_v28 }
 0x139   : > { %v2025_v10 = vpop.f32.mrb[32].mxu1  ;;  %v1143_v25 = vpack.c.bf16 %v1041_v23, %v1038_v20  ;;  %v1937_v39 = vpop.f32.mrb[32].mxu0 }
 0x13a   : > { %v2026_v26 = vpop.f32.mrb[33].mxu1  ;;  %v1938_v28 = vpop.f32.mrb[33].mxu0 }
 0x13b   : > { %v2027_v30 = vadd.f32 %v2026_v26, %v2025_v10  ;;  %v2028_v31 = vpop.f32.mrb[34].mxu1  ;;  %2142 = vmatmul.mubr.bf16.gmra.mrb[52].mxu0 %v1143_v25  ;;  %v1939_v43 = vadd.f32 %v1938_v28, %v1937_v39  ;;  %v1940_v46 = vpop.f32.mrb[34].mxu0 }
 0x13c   : > { %v2029_v33 = vpop.f32.mrb[35].mxu1  ;;  %v1941_v49 = vpop.f32.mrb[35].mxu0 }
 0x13d   : > { %v1046_v35 = vadd.f32 %v2027_v30, %v1915_v37  ;;  %v2030_v36 = vadd.f32 %v2029_v33, %v2028_v31  ;;  %v1942_v51 = vadd.f32 %v1941_v49, %v1940_v46 }
 0x13f   : > { %v1049_v38 = vadd.f32 %v2030_v36, %v1918_v44 }
 0x141   : > { %v2031_v22 = vpop.f32.mrb[36].mxu1  ;;  %v1144_v40 = vpack.c.bf16 %v1049_v38, %v1046_v35  ;;  %v1943_v58 = vpop.f32.mrb[36].mxu0 }
 0x142   : > { %v2032_v41 = vpop.f32.mrb[37].mxu1  ;;  %v1944_v44 = vpop.f32.mrb[37].mxu0 }
 0x143   : > { %v2033_v47 = vadd.f32 %v2032_v41, %v2031_v22  ;;  %v2034_v48 = vpop.f32.mrb[38].mxu1  ;;  %2145 = vmatprep.mubr.bf16.mxu0 %v1144_v40  ;;  %v1945_v61 = vadd.f32 %v1944_v44, %v1943_v58  ;;  %v1946_v1 = vpop.f32.mrb[38].mxu0 }
 0x144   : > { %v2035_v50 = vpop.f32.mrb[39].mxu1  ;;  %v1947_v6 = vpop.f32.mrb[39].mxu0 }
 0x145   : > { %v1054_v53 = vadd.f32 %v2033_v47, %v1921_v55  ;;  %v2036_v54 = vadd.f32 %v2035_v50, %v2034_v48  ;;  %v1948_v7 = vadd.f32 %v1947_v6, %v1946_v1 }
 0x147   : > { %v1057_v56 = vadd.f32 %v2036_v54, %v1924_v63 }
 0x149   : > { %v2037_v37 = vpop.f32.mrb[40].mxu1  ;;  %v1145_v59 = vpack.c.bf16 %v1057_v56, %v1054_v53  ;;  %v1949_v13 = vpop.f32.mrb[40].mxu0 }
 0x14a   : > { %v2038_v60 = vpop.f32.mrb[41].mxu1  ;;  %v1950_v63 = vpop.f32.mrb[41].mxu0 }
 0x14b   : > { %v2039_v2 = vadd.f32 %v2038_v60, %v2037_v37  ;;  %v2040_v3 = vpop.f32.mrb[42].mxu1  ;;  %2146 = vmatmul.mubr.bf16.gmra.mrb[56].mxu0 %v1145_v59  ;;  %v1951_v18 = vadd.f32 %v1950_v63, %v1949_v13  ;;  %v1952_v20 = vpop.f32.mrb[42].mxu0 }
 0x14c   : > { %v2041_v62 = vpop.f32.mrb[43].mxu1  ;;  %v1953_v24 = vpop.f32.mrb[43].mxu0 }
 0x14d   : > { %v1062_v4 = vadd.f32 %v2039_v2, %v1927_v9  ;;  %v2042_v8 = vadd.f32 %v2041_v62, %v2040_v3  ;;  %v1954_v25 = vadd.f32 %v1953_v24, %v1952_v20 }
 0x14f   : > { %v1065_v11 = vadd.f32 %v2042_v8, %v1930_v19 }
 0x151   : > { %v2043_v55 = vpop.f32.mrb[44].mxu1  ;;  %v1146_v14 = vpack.c.bf16 %v1065_v11, %v1062_v4  ;;  %v1955_v30 = vpop.f32.mrb[44].mxu0 }
 0x152   : > { %v2044_v15 = vpop.f32.mrb[45].mxu1  ;;  %v1956_v19 = vpop.f32.mrb[45].mxu0 }
 0x153   : > { %v2045_v21 = vadd.f32 %v2044_v15, %v2043_v55  ;;  %v2046_v23 = vpop.f32.mrb[46].mxu1  ;;  %2149 = vmatprep.mubr.bf16.mxu0 %v1146_v14  ;;  %v1957_v33 = vadd.f32 %v1956_v19, %v1955_v30  ;;  %v1958_v35 = vpop.f32.mrb[46].mxu0 }
 0x154   : > { %v2047_v10 = vpop.f32.mrb[47].mxu1  ;;  %v1959_v39 = vpop.f32.mrb[47].mxu0 }
 0x155   : > { %v1070_v16 = vadd.f32 %v2045_v21, %v1933_v27  ;;  %v2048_v26 = vadd.f32 %v2047_v10, %v2046_v23  ;;  %v1960_v40 = vadd.f32 %v1959_v39, %v1958_v35 }
 0x157   : > { %v1073_v29 = vadd.f32 %v2048_v26, %v1936_v34 }
 0x159   : > { %v2049_v9 = vpop.f32.mrb[48].mxu1  ;;  %v1147_v31 = vpack.c.bf16 %v1073_v29, %v1070_v16 }
 0x15a   : > { %v2050_v32 = vpop.f32.mrb[49].mxu1 }
 0x15b   : > { %v2051_v36 = vadd.f32 %v2050_v32, %v2049_v9  ;;  %v2052_v38 = vpop.f32.mrb[50].mxu1  ;;  %2150 = vmatmul.mubr.bf16.gmra.mrb[60].mxu0 %v1147_v31 }
 0x15c   : > { %v2053_v22 = vpop.f32.mrb[51].mxu1 }
 0x15d   : > { %v1078_v28 = vadd.f32 %v2051_v36, %v1939_v43  ;;  %v2054_v41 = vadd.f32 %v2053_v22, %v2052_v38 }
 0x15f   : > { %v1081_v46 = vadd.f32 %v2054_v41, %v1942_v51 }
 0x161   : > { %v2055_v47 = vpop.f32.mrb[52].mxu1  ;;  %v1148_v27 = vpack.c.bf16 %v1081_v46, %v1078_v28 }
 0x162   : > { %v2056_v48 = vpop.f32.mrb[53].mxu1 }
 0x163   : > { %v2057_v34 = vadd.f32 %v2056_v48, %v2055_v47  ;;  %v2058_v49 = vpop.f32.mrb[54].mxu1  ;;  %2153 = vmatprep.mubr.bf16.mxu0 %v1148_v27 }
 0x164   : > { %v2059_v50 = vpop.f32.mrb[55].mxu1 }
 0x165   : > { %v1086_v53 = vadd.f32 %v2057_v34, %v1945_v61  ;;  %v2060_v54 = vadd.f32 %v2059_v50, %v2058_v49 }
 0x167   : > { %v1089_v56 = vadd.f32 %v2060_v54, %v1948_v7 }
 0x169   : > { %v2061_v58 = vpop.f32.mrb[56].mxu1  ;;  %v1149_v37 = vpack.c.bf16 %v1089_v56, %v1086_v53 }
 0x16a   : > { %v2062_v59 = vpop.f32.mrb[57].mxu1 }
 0x16b   : > { %v2063_v44 = vadd.f32 %v2062_v59, %v2061_v58  ;;  %v2064_v60 = vpop.f32.mrb[58].mxu1  ;;  %2154 = vmatmul.mubr.bf16.gmra.mrb[64].mxu0 %v1149_v37 }
 0x16c   : > { %v2065_v1 = vpop.f32.mrb[59].mxu1 }
 0x16d   : > { %v1094_v43 = vadd.f32 %v2063_v44, %v1951_v18  ;;  %v2066_v2 = vadd.f32 %v2065_v1, %v2064_v60 }
 0x16f   : > { %v1097_v51 = vadd.f32 %v2066_v2, %v1954_v25 }
 0x171   : > { %v2067_v3 = vpop.f32.mrb[60].mxu1  ;;  %v1150_v6 = vpack.c.bf16 %v1097_v51, %v1094_v43 }
 0x172   : > { %v2068_v62 = vpop.f32.mrb[61].mxu1 }
 0x173   : > { %v2069_v4 = vadd.f32 %v2068_v62, %v2067_v3  ;;  %v2070_v8 = vpop.f32.mrb[62].mxu1  ;;  %2157 = vmatprep.mubr.bf16.mxu0 %v1150_v6 }
 0x174   : > { %v2071_v11 = vpop.f32.mrb[63].mxu1 }
 0x175   : > { %v1102_v61 = vadd.f32 %v2069_v4, %v1957_v33  ;;  %v2072_v13 = vadd.f32 %v2071_v11, %v2070_v8 }
 0x177   : > { %v1105_v7 = vadd.f32 %v2072_v13, %v1960_v40 }
 0x179   : > { %v2073_v55 = vpop.f32.mrb[64].mxu1  ;;  %v1151_v14 = vpack.c.bf16 %v1105_v7, %v1102_v61 }
 0x17a   : > { %v2074_v63 = vpop.f32.mrb[65].mxu1 }
 0x17b   : > { %v2075_v15 = vadd.f32 %v2074_v63, %v2073_v55  ;;  %v2076_v20 = vpop.f32.mrb[66].mxu1  ;;  %2158 = vmatmul.mubr.bf16.gmra.mrb[68].mxu0 %v1151_v14 }
 0x17c   : > { %v2077_v21 = vpop.f32.mrb[67].mxu1 }
 0x17d   : > { %v1110_v18 = vadd.f32 %v2075_v15, %v2557_v42  ;;  %v2078_v23 = vadd.f32 %v2077_v21, %v2076_v20 }
 0x17f   : > { %v1113_v24 = vadd.f32 %v2078_v23, %v2559_v45 }
 0x181   : > { %v2079_v10 = vpop.f32.mrb[68].mxu1  ;;  %v1152_v25 = vpack.c.bf16 %v1113_v24, %v1110_v18 }
 0x182   : > { %v2080_v16 = vpop.f32.mrb[69].mxu1 }
 0x183   : > { %v2081_v26 = vadd.f32 %v2080_v16, %v2079_v10  ;;  %v2082_v29 = vpop.f32.mrb[70].mxu1  ;;  %2161 = vmatprep.mubr.bf16.mxu0 %v1152_v25 }
 0x184   : > { %v2083_v30 = vpop.f32.mrb[71].mxu1 }
 0x185   : > { %v1118_v9 = vadd.f32 %v2081_v26, %v2561_v52  ;;  %v2084_v31 = vadd.f32 %v2083_v30, %v2082_v29 }
 0x187   : > { %v1121_v19 = vadd.f32 %v2084_v31, %v2563_v57 }
 0x189   : > { %v2085_v32 = vpop.f32.mrb[72].mxu1  ;;  %v1153_v33 = vpack.c.bf16 %v1121_v19, %v1118_v9 }
 0x18a   : > { %v2086_v35 = vpop.f32.mrb[73].mxu1 }
 0x18b   : > { %v2087_v36 = vadd.f32 %v2086_v35, %v2085_v32  ;;  %v2088_v42 = vpop.f32.mrb[74].mxu1  ;;  %2162 = vmatmul.mubr.bf16.gmra.mrb[72].mxu0 %v1153_v33 }
 0x18c   : > { %v2089_v38 = vpop.f32.mrb[75].mxu1 }
 0x18d   : > { %v1126_v45 = vadd.f32 %v2087_v36, %v2565_v0  ;;  %v2090_v39 = vadd.f32 %v2089_v38, %v2088_v42 }
 0x18f   : > { %v1129_v22 = vadd.f32 %v2090_v39, %v2567_v5 }
 0x191   : > { %v2091_v40 = vpop.f32.mrb[76].mxu1  ;;  %v1154_v28 = vpack.c.bf16 %v1129_v22, %v1126_v45 }
 0x192   : > { %v2092_v41 = vpop.f32.mrb[77].mxu1 }
 0x193   : > { %v2093_v52 = vadd.f32 %v2092_v41, %v2091_v40  ;;  %v2094_v46 = vpop.f32.mrb[78].mxu1  ;;  %2165 = vmatprep.mubr.bf16.mxu0 %v1154_v28 }
 0x194   : > { %v2095_v57 = vpop.f32.mrb[79].mxu1 }
 0x195   : > { %v1134_v47 = vadd.f32 %v2093_v52, %v2569_v12  ;;  %v2096_v27 = vadd.f32 %v2095_v57, %v2094_v46 }
 0x197   : > { %v1137_v48 = vadd.f32 %v2096_v27, %v2571_v17 }
 0x199   : > { %v1155_v34 = vpack.c.bf16 %v1137_v48, %v1134_v47 }
 0x19b   : > { %2166 = vmatmul.mubr.bf16.gmra.mrb[76].mxu0 %v1155_v34 }
 0x1fe   : > { %v2139_v49 = vpop.f32.mrb[48].mxu0 }
 0x1ff   : > { %v1254_v0 = vpop.f32.mrb[49].mxu0 }
 0x200   : > { %v2140_v5 = vpop.f32.mrb[50].mxu0 }
 0x201   : > { %v1786_v50 = vpack.c.bf16 %v2140_v5, %v2139_v49  ;;  %v1257_v12 = vpop.f32.mrb[51].mxu0 }
 0x202   : > { %v1781_v53 = vpack.c.bf16 %v1257_v12, %v1254_v0 }
 0x203   : > { %1858 = vst [vmem:[%s2585_s28 + $0x8] sm:$0xff] %v1786_v50  }
 0x204   : > { %1782 = vst [vmem:[%s2585_s28] sm:$0xff] %v1781_v53  }
 0x20e   : > { %v2143_v17 = vpop.f32.mrb[52].mxu0 }
 0x20f   : > { %v1270_v54 = vpop.f32.mrb[53].mxu0 }
 0x210   : > { %v2144_v56 = vpop.f32.mrb[54].mxu0 }
 0x211   : > { %v1796_v58 = vpack.c.bf16 %v2144_v56, %v2143_v17  ;;  %v1273_v37 = vpop.f32.mrb[55].mxu0 }
 0x212   : > { %v1791_v59 = vpack.c.bf16 %v1273_v37, %v1270_v54 }
 0x213   : > { %1860 = vst [vmem:[%s2585_s28 + $0x18] sm:$0xff] %v1796_v58  }
 0x214   : > { %1859 = vst [vmem:[%s2585_s28 + $0x10] sm:$0xff] %v1791_v59  }
 0x21e   : > { %v2147_v44 = vpop.f32.mrb[56].mxu0 }
 0x21f   : > { %v1286_v60 = vpop.f32.mrb[57].mxu0 }
 0x220   : > { %v2148_v1 = vpop.f32.mrb[58].mxu0 }
 0x221   : > { %v1806_v43 = vpack.c.bf16 %v2148_v1, %v2147_v44  ;;  %v1289_v2 = vpop.f32.mrb[59].mxu0 }
 0x222   : > { %v1801_v51 = vpack.c.bf16 %v1289_v2, %v1286_v60 }
 0x223   : > { %1862 = vst [vmem:[%s2585_s28 + $0x28] sm:$0xff] %v1806_v43  }
 0x224   : > { %1861 = vst [vmem:[%s2585_s28 + $0x20] sm:$0xff] %v1801_v51  }
 0x22e   : > { %v2151_v3 = vpop.f32.mrb[60].mxu0 }
 0x22f   : > { %v1302_v6 = vpop.f32.mrb[61].mxu0 }
 0x230   : > { %v2152_v62 = vpop.f32.mrb[62].mxu0 }
 0x231   : > { %v1816_v4 = vpack.c.bf16 %v2152_v62, %v2151_v3  ;;  %v1305_v8 = vpop.f32.mrb[63].mxu0 }
 0x232   : > { %v1811_v11 = vpack.c.bf16 %v1305_v8, %v1302_v6 }
 0x233   : > { %1864 = vst [vmem:[%s2585_s28 + $0x38] sm:$0xff] %v1816_v4  }
 0x234   : > { %1863 = vst [vmem:[%s2585_s28 + $0x30] sm:$0xff] %v1811_v11  }
 0x23e   : > { %v2155_v61 = vpop.f32.mrb[64].mxu0 }
 0x23f   : > { %v1318_v13 = vpop.f32.mrb[65].mxu0 }
 0x240   : > { %v2156_v7 = vpop.f32.mrb[66].mxu0 }
 0x241   : > { %v1826_v55 = vpack.c.bf16 %v2156_v7, %v2155_v61  ;;  %v1321_v14 = vpop.f32.mrb[67].mxu0 }
 0x242   : > { %v1821_v63 = vpack.c.bf16 %v1321_v14, %v1318_v13 }
 0x243   : > { %1866 = vst [vmem:[%s2585_s28 + $0x48] sm:$0xff] %v1826_v55  }
 0x244   : > { %1865 = vst [vmem:[%s2585_s28 + $0x40] sm:$0xff] %v1821_v63  }
 0x24e   : > { %v2159_v15 = vpop.f32.mrb[68].mxu0 }
 0x24f   : > { %v1334_v20 = vpop.f32.mrb[69].mxu0 }
 0x250   : > { %v2160_v21 = vpop.f32.mrb[70].mxu0 }
 0x251   : > { %v1836_v18 = vpack.c.bf16 %v2160_v21, %v2159_v15  ;;  %v1337_v23 = vpop.f32.mrb[71].mxu0 }
 0x252   : > { %v1831_v24 = vpack.c.bf16 %v1337_v23, %v1334_v20 }
 0x253   : > { %1868 = vst [vmem:[%s2585_s28 + $0x58] sm:$0xff] %v1836_v18  }
 0x254   : > { %1867 = vst [vmem:[%s2585_s28 + $0x50] sm:$0xff] %v1831_v24  }
 0x25e   : > { %v2163_v10 = vpop.f32.mrb[72].mxu0 }
 0x25f   : > { %v1350_v25 = vpop.f32.mrb[73].mxu0 }
 0x260   : > { %v2164_v16 = vpop.f32.mrb[74].mxu0 }
 0x261   : > { %v1846_v26 = vpack.c.bf16 %v2164_v16, %v2163_v10  ;;  %v1353_v29 = vpop.f32.mrb[75].mxu0 }
 0x262   : > { %v1841_v30 = vpack.c.bf16 %v1353_v29, %v1350_v25 }
 0x263   : > { %1870 = vst [vmem:[%s2585_s28 + $0x68] sm:$0xff] %v1846_v26  }
 0x264   : > { %1869 = vst [vmem:[%s2585_s28 + $0x60] sm:$0xff] %v1841_v30  }
 0x26e   : > { %v2167_v9 = vpop.f32.mrb[76].mxu0 }
 0x26f   : > { %v1366_v31 = vpop.f32.mrb[77].mxu0 }
 0x270   : > { %v2168_v19 = vpop.f32.mrb[78].mxu0 }
 0x271   : > { %v1856_v32 = vpack.c.bf16 %v2168_v19, %v2167_v9  ;;  %v1369_v33 = vpop.f32.mrb[79].mxu0 }
 0x272   : > { %v1851_v35 = vpack.c.bf16 %v1369_v33, %v1366_v31 }
 0x273   : > { %1872 = vst [vmem:[%s2585_s28 + $0x78] sm:$0xff] %v1856_v32  }
 0x274   : > { %1871 = vst [vmem:[%s2585_s28 + $0x70] sm:$0xff] %v1851_v35  }
 0x275 PF: > { %s13_s12 = sadd.s32 1, %s2335_s12  }
 0x276   : > { %p10_p4 = scmp.ge.s32.totalorder %s13_s12, 4  }
 0x278   :  { %12 = sbr.rel (!%p10_p4) target bundleno = 1 (0x1), region = 62 }

// kernel: hypergcl_forward.5
= control target key start
LH: loop header
LB: loop body
LE: loop exit
PB: predicated region body
PF: predicated region fallthrough
CT: control target
= control target key end

     0   :  { %s3020_s12 = smov 0   ;;  %s4931_s0 = inlined_call_operand.vmem [shape: s32[512,1], index: 0, kind: input, shape index: {}]   ;;  %s4932_s1 = inlined_call_operand.vmem [shape: bf16[512,128], index: 1, kind: input, shape index: {}]   ;;  %s4933_s2 = inlined_call_operand.vmem [shape: bf16[512,128], index: 2, kind: input, shape index: {}]   ;;  %s4934_s3 = inlined_call_operand.vmem [shape: f32[16,128], index: 3, kind: output, shape index: {}]  }
   0x1 LB: > { %s3026_s13 = sadd.s32 4294967295, %s2997_s12   ;;  %p2394_p0 = scmp.ge.s32.totalorder %s2997_s12, 1  ;;  %s2997_s12 = sphi %s3020_s12, %s13_s12  }
   0x2   : > { %p149_p1 = scmp.lt.s32.totalorder %s2997_s12, 3 }
   0x4   : > { %p150_p2 = pnand %p2394_p0, %p149_p1 }
   0x6   : > { %153 = sbr.rel (%p150_p2) target bundleno = 885 (0x375), region = 32 }
   0xd   : > { %v2559_v0 = vld [vmem:[%s4933_s2 + $0x40] sm:$0xff]   ;;  %v2999_v4 = vmov 0   ;;  %v2563_v5 = vld [vmem:[%s4933_s2 + $0x48] sm:$0xff]   ;;  %v2567_v9 = vld [vmem:[%s4933_s2 + $0x50] sm:$0xff]   ;;  %s2395_s9 = sshll.u32 %s3026_s13, 5  ;;  %p189_p4 = scmp.lt.s32.totalorder %s3026_s13, 1 }
   0xe   : > { %v2560_v1 = vld [vmem:[%s4933_s2 + $0xc0] sm:$0xff]   ;;  %2450 = vmatprep.subr.bf16.mxu0 %v2559_v0  ;;  %2557 = vset.pattern.permute.xlu0 %v2999_v4  ;;  %v2564_v6 = vld [vmem:[%s4933_s2 + $0xc8] sm:$0xff]   ;;  %v2568_v10 = vld [vmem:[%s4933_s2 + $0xd0] sm:$0xff]   ;;  %p178_p3 = scmp.lt.s32.totalorder %s2395_s9, 63 }
   0xf   : > { %v2561_v2 = vld [vmem:[%s4933_s2] sm:$0xff]   ;;  %2498 = vmatprep.subr.bf16.mxu1 %v2560_v1  ;;  %2558 = vset.pattern.permute.xlu1 %v2999_v4  ;;  %v2565_v7 = vld [vmem:[%s4933_s2 + $0x8] sm:$0xff]   ;;  %v2569_v11 = vld [vmem:[%s4933_s2 + $0x10] sm:$0xff]   ;;  %s5024_s13 = smov (!%p189_p4, %s3026_s13), 1 }
  0x10   : > { %v2562_v3 = vld [vmem:[%s4933_s2 + $0x80] sm:$0xff]   ;;  %2451 = vmatpush3.bf16.xpose.msra.mxu0 %v2561_v2  ;;  %v2566_v8 = vld [vmem:[%s4933_s2 + $0x88] sm:$0xff]   ;;  %v2570_v12 = vld [vmem:[%s4933_s2 + $0x90] sm:$0xff]   ;;  %s5022_s9 = smov (!%p178_p3, %s2395_s9), 63 }
  0x11   : > { %2499 = vmatpush3.bf16.xpose.msra.mxu1 %v2562_v3  ;;  %2452 = vmatprep.subr.bf16.mxu0 %v2563_v5  ;;  %v2571_v13 = vld [vmem:[%s4933_s2 + $0x58] sm:$0xff]   ;;  %v2575_v17 = vld [vmem:[%s4933_s2 + $0x60] sm:$0xff]   ;;  %s2398_s26 = sshll.u32 %s5022_s9, 2  ;;  %s2396_s7 = sshll.u32 %s5022_s9, 3  ;;  %v2579_v22 = vld [vmem:[%s4933_s2 + $0x68] sm:$0xff]  }
  0x12   : > { %2500 = vmatprep.subr.bf16.mxu1 %v2564_v6  ;;  %v2572_v14 = vld [vmem:[%s4933_s2 + $0xd8] sm:$0xff]   ;;  %v2576_v18 = vld [vmem:[%s4933_s2 + $0xe0] sm:$0xff]   ;;  %s3088_s29 = scalar_lea.vmem %s4932_s1, %s2398_s26  ;;  %v2580_v23 = vld [vmem:[%s4933_s2 + $0xe8] sm:$0xff]   ;;  %s3110_s17 = scalar_lea.vmem %s4931_s0, %s2396_s7 }
  0x13   : > { %v2573_v15 = vld [vmem:[%s4933_s2 + $0x18] sm:$0xff]   ;;  %v2577_v19 = vld [vmem:[%s4933_s2 + $0x20] sm:$0xff]   ;;  %v1099_v25 = vld [vmem:[%s3110_s17 + $0x10] sm:$0xff] }
  0x14   : > { %v2574_v16 = vld [vmem:[%s4933_s2 + $0x98] sm:$0xff]   ;;  %v2578_v20 = vld [vmem:[%s4933_s2 + $0xa0] sm:$0xff]   ;;  %1136 = vperm.xlu1 %2558, %v1099_v25   ;;  %v1098_v26 = vld [vmem:[%s3110_s17 + $0x8] sm:$0xff] }
  0x15   : > { %v3097_v21 = vld [vmem:[%s3088_s29] sm:$0xff]   ;;  %v2581_v27 = vld [vmem:[%s4933_s2 + $0x28] sm:$0xff]   ;;  %v1100_v28 = vld [vmem:[%s3110_s17 + $0x18] sm:$0xff] }
  0x16   : > { %2466 = vmatprep.mubr.bf16.mxu0 %v3097_v21  ;;  %2514 = vmatprep.mubr.bf16.mxu1 %v3097_v21  ;;  %v1097_v24 = vld [vmem:[%s3110_s17] sm:$0xff]  ;;  %v2582_v29 = vld [vmem:[%s4933_s2 + $0xa8] sm:$0xff]   ;;  %v2583_v30 = vld [vmem:[%s4933_s2 + $0x70] sm:$0xff]  }
  0x17   : > { %1130 = vperm.xlu0 %2557, %v1097_v24   ;;  %v2584_v31 = vld [vmem:[%s4933_s2 + $0xf0] sm:$0xff]   ;;  %v1101_v32 = vld [vmem:[%s3110_s17 + $0x20] sm:$0xff]  ;;  %v1102_v33 = vld [vmem:[%s3110_s17 + $0x28] sm:$0xff] }
  0x18   : > { %2453 = vmatpush3.bf16.xpose.msra.mxu0 %v2565_v7  ;;  %1139 = vperm.xlu1 %2558, %v1100_v28   ;;  %v1103_v34 = vld [vmem:[%s3110_s17 + $0x30] sm:$0xff]  ;;  %v1104_v37 = vld [vmem:[%s3110_s17 + $0x38] sm:$0xff]  ;;  %v1105_v40 = vld [vmem:[%s3110_s17 + $0x40] sm:$0xff] }
  0x19   : > { %2501 = vmatpush3.bf16.xpose.msra.mxu1 %v2566_v8  ;;  %2454 = vmatprep.subr.bf16.mxu0 %v2567_v9  ;;  %v2585_v35 = vld [vmem:[%s4933_s2 + $0x30] sm:$0xff]   ;;  %v2587_v38 = vld [vmem:[%s4933_s2 + $0x78] sm:$0xff]   ;;  %v1106_v41 = vld [vmem:[%s3110_s17 + $0x48] sm:$0xff] }
  0x1a   : > { %2502 = vmatprep.subr.bf16.mxu1 %v2568_v10  ;;  %v2586_v36 = vld [vmem:[%s4933_s2 + $0xb0] sm:$0xff]   ;;  %v2588_v39 = vld [vmem:[%s4933_s2 + $0xf8] sm:$0xff]   ;;  %v1109_v46 = vld [vmem:[%s3110_s17 + $0x60] sm:$0xff] }
  0x1b   : > { %1133 = vperm.xlu0 %2557, %v1098_v26   ;;  %v2589_v42 = vld [vmem:[%s4933_s2 + $0x38] sm:$0xff]   ;;  %v1107_v43 = vld [vmem:[%s3110_s17 + $0x50] sm:$0xff]  ;;  %v1110_v47 = vld [vmem:[%s3110_s17 + $0x68] sm:$0xff] }
  0x1c   : > { %1145 = vperm.xlu1 %2558, %v1102_v33   ;;  %v1108_v44 = vld [vmem:[%s3110_s17 + $0x58] sm:$0xff]  ;;  %v1111_v48 = vld [vmem:[%s3110_s17 + $0x70] sm:$0xff]  ;;  %v2592_v49 = vld [vmem:[%s3088_s29 + $0x8] sm:$0xff]  }
  0x1d   : > { %v2590_v45 = vld [vmem:[%s4933_s2 + $0xb8] sm:$0xff]   ;;  %v1113_v51 = vld [vmem:[%s3110_s17 + $0x80] sm:$0xff]  ;;  %v1114_v52 = vld [vmem:[%s3110_s17 + $0x88] sm:$0xff] }
  0x1e   : > { %v1112_v50 = vld [vmem:[%s3110_s17 + $0x78] sm:$0xff]  ;;  %v1115_v53 = vld [vmem:[%s3110_s17 + $0x90] sm:$0xff]  ;;  %v1117_v56 = vld [vmem:[%s3110_s17 + $0xa0] sm:$0xff] }
  0x1f   : > { %1142 = vperm.xlu0 %2557, %v1101_v32   ;;  %v2593_v54 = vld [vmem:[%s3088_s29 + $0x10] sm:$0xff]   ;;  %v1116_v55 = vld [vmem:[%s3110_s17 + $0x98] sm:$0xff]  ;;  %v1118_v57 = vld [vmem:[%s3110_s17 + $0xa8] sm:$0xff] }
  0x20   : > { %2455 = vmatpush3.bf16.xpose.msra.mxu0 %v2569_v11  ;;  %1151 = vperm.xlu1 %2558, %v1104_v37   ;;  %v1119_v58 = vld [vmem:[%s3110_s17 + $0xb0] sm:$0xff]  ;;  %v2594_v59 = vld [vmem:[%s3088_s29 + $0x18] sm:$0xff]   ;;  %v1121_v61 = vld [vmem:[%s3110_s17 + $0xc0] sm:$0xff] }
  0x21   : > { %2503 = vmatpush3.bf16.xpose.msra.mxu1 %v2570_v12  ;;  %2456 = vmatprep.subr.bf16.mxu0 %v2571_v13  ;;  %v1120_v60 = vld [vmem:[%s3110_s17 + $0xb8] sm:$0xff]  ;;  %v1122_v62 = vld [vmem:[%s3110_s17 + $0xc8] sm:$0xff]  ;;  %v1123_v63 = vld [vmem:[%s3110_s17 + $0xd0] sm:$0xff] }
  0x22   : > { %2504 = vmatprep.subr.bf16.mxu1 %v2572_v14  ;;  %v2595_v0 = vld [vmem:[%s3088_s29 + $0x20] sm:$0xff]   ;;  %v1124_v1 = vld [vmem:[%s3110_s17 + $0xd8] sm:$0xff]  ;;  %v1126_v3 = vld [vmem:[%s3110_s17 + $0xe8] sm:$0xff] }
  0x23   : > { %1148 = vperm.xlu0 %2557, %v1103_v34   ;;  %v1125_v2 = vld [vmem:[%s3110_s17 + $0xe0] sm:$0xff]  ;;  %v1127_v4 = vld [vmem:[%s3110_s17 + $0xf0] sm:$0xff]  ;;  %v2596_v5 = vld [vmem:[%s3088_s29 + $0x28] sm:$0xff]  }
  0x24   : > { %1157 = vperm.xlu1 %2558, %v1106_v41   ;;  %v1128_v6 = vld [vmem:[%s3110_s17 + $0xf8] sm:$0xff]  ;;  %v2597_v7 = vld [vmem:[%s3088_s29 + $0x30] sm:$0xff]   ;;  %v2599_v9 = vld [vmem:[%s3088_s29 + $0x40] sm:$0xff]  }
  0x25   : > { %v2598_v8 = vld [vmem:[%s3088_s29 + $0x38] sm:$0xff]   ;;  %v2600_v10 = vld [vmem:[%s3088_s29 + $0x48] sm:$0xff]   ;;  %v2601_v11 = vld [vmem:[%s3088_s29 + $0x50] sm:$0xff]  }
  0x26   : > { %v2602_v12 = vld [vmem:[%s3088_s29 + $0x58] sm:$0xff]   ;;  %v2603_v13 = vld [vmem:[%s3088_s29 + $0x60] sm:$0xff]   ;;  %v2604_v14 = vld [vmem:[%s3088_s29 + $0x68] sm:$0xff]  }
  0x27   : > { %1154 = vperm.xlu0 %2557, %v1105_v40  }
  0x28   : > { %2457 = vmatpush3.bf16.xpose.msra.mxu0 %v2573_v15  ;;  %1163 = vperm.xlu1 %2558, %v1108_v44   ;;  %v2605_v15 = vld [vmem:[%s3088_s29 + $0x70] sm:$0xff]  }
  0x29   : > { %2505 = vmatpush3.bf16.xpose.msra.mxu1 %v2574_v16  ;;  %2458 = vmatprep.subr.bf16.mxu0 %v2575_v17  ;;  %v2606_v16 = vld [vmem:[%s3088_s29 + $0x78] sm:$0xff]   ;;  %v1092_v17 = vlaneseq  ;;  %s2399_s29 = sshll.u32 %s5024_s13, 3 }
  0x2a   : > { %2506 = vmatprep.subr.bf16.mxu1 %v2576_v18  ;;  %s192_s16 = scalar_lea.vmem %s4934_s3, %s2399_s29 }
  0x2b   : > { %1160 = vperm.xlu0 %2557, %v1107_v43   ;;  %v3191_v18 = vand.u32 127, %v1092_v17 }
  0x2c   : > { %1169 = vperm.xlu1 %2558, %v1110_v47  }
  0x2f   : > { %1166 = vperm.xlu0 %2557, %v1109_v46  }
  0x30   : > { %2459 = vmatpush3.bf16.xpose.msra.mxu0 %v2577_v19  ;;  %1175 = vperm.xlu1 %2558, %v1112_v50  }
  0x31   : > { %2507 = vmatpush3.bf16.xpose.msra.mxu1 %v2578_v20  ;;  %2460 = vmatprep.subr.bf16.mxu0 %v2579_v22  ;;  %v3199_v22 = vadd.s32 128, %v3191_v18 }
  0x32   : > { %2508 = vmatprep.subr.bf16.mxu1 %v2580_v23  ;;  %v3202_v23 = vadd.s32 384, %v3191_v18 }
  0x33   : > { %1172 = vperm.xlu0 %2557, %v1111_v48  }
  0x34   : > { %1181 = vperm.xlu1 %2558, %v1114_v52  }
  0x37   : > { %1178 = vperm.xlu0 %2557, %v1113_v51  }
  0x38   : > { %2461 = vmatpush3.bf16.xpose.msra.mxu0 %v2581_v27  ;;  %1187 = vperm.xlu1 %2558, %v1116_v55  }
  0x39   : > { %2509 = vmatpush3.bf16.xpose.msra.mxu1 %v2582_v29  ;;  %2462 = vmatprep.subr.bf16.mxu0 %v2583_v30 }
  0x3a   : > { %2510 = vmatprep.subr.bf16.mxu1 %v2584_v31 }
  0x3b   : > { %1184 = vperm.xlu0 %2557, %v1115_v53  }
  0x3c   : > { %1193 = vperm.xlu1 %2558, %v1118_v57  }
  0x3f   : > { %1190 = vperm.xlu0 %2557, %v1117_v56  }
  0x40   : > { %2463 = vmatpush3.bf16.xpose.msra.mxu0 %v2585_v35  ;;  %1199 = vperm.xlu1 %2558, %v1120_v60  }
  0x41   : > { %2511 = vmatpush3.bf16.xpose.msra.mxu1 %v2586_v36  ;;  %2464 = vmatprep.subr.bf16.mxu0 %v2587_v38 }
  0x42   : > { %2512 = vmatprep.subr.bf16.mxu1 %v2588_v39 }
  0x43   : > { %1196 = vperm.xlu0 %2557, %v1119_v58  }
  0x44   : > { %1205 = vperm.xlu1 %2558, %v1122_v62  }
  0x47   : > { %1202 = vperm.xlu0 %2557, %v1121_v61  }
  0x48   : > { %2465 = vmatpush3.bf16.xpose.msra.mxu0 %v2589_v42  ;;  %1211 = vperm.xlu1 %2558, %v1124_v1  }
  0x49   : > { %2513 = vmatpush3.bf16.xpose.msra.mxu1 %v2590_v45 }
  0x4b   : > { %1208 = vperm.xlu0 %2557, %v1123_v63  }
  0x4c   : > { %1217 = vperm.xlu1 %2558, %v1126_v3  }
  0x4f   : > { %2467 = vmatmul.mubr.bf16.vlgmr.msra.gmra.mrb[0].mxu0 %v3097_v21  ;;  %1214 = vperm.xlu0 %2557, %v1125_v2  }
  0x50   : > { %2515 = vmatmul.mubr.bf16.vlgmr.msra.gmra.mrb[0].mxu1 %v3097_v21  ;;  %2468 = vmatprep.mubr.bf16.mxu0 %v2592_v49  ;;  %v3196_v21 = vadd.s32 256, %v3191_v18 }
  0x51   : > { %2516 = vmatprep.mubr.bf16.mxu1 %v2592_v49  ;;  %1223 = vperm.xlu1 %2558, %v1128_v6  }
  0x53   : > { %1220 = vperm.xlu0 %2557, %v1127_v4  }
  0x57   : > { %2469 = vmatmul.mubr.bf16.gmra.mrb[4].mxu0 %v2592_v49 }
  0x58   : > { %2517 = vmatmul.mubr.bf16.gmra.mrb[4].mxu1 %v2592_v49  ;;  %2470 = vmatprep.mubr.bf16.mxu0 %v2593_v54 }
  0x59   : > { %2518 = vmatprep.mubr.bf16.mxu1 %v2593_v54 }
  0x5f   : > { %2471 = vmatmul.mubr.bf16.gmra.mrb[8].mxu0 %v2593_v54 }
  0x60   : > { %2519 = vmatmul.mubr.bf16.gmra.mrb[8].mxu1 %v2593_v54  ;;  %2472 = vmatprep.mubr.bf16.mxu0 %v2594_v59 }
  0x61   : > { %2520 = vmatprep.mubr.bf16.mxu1 %v2594_v59 }
  0x67   : > { %2473 = vmatmul.mubr.bf16.gmra.mrb[12].mxu0 %v2594_v59 }
  0x68   : > { %2521 = vmatmul.mubr.bf16.gmra.mrb[12].mxu1 %v2594_v59  ;;  %2474 = vmatprep.mubr.bf16.mxu0 %v2595_v0 }
  0x69   : > { %2522 = vmatprep.mubr.bf16.mxu1 %v2595_v0 }
  0x6f   : > { %2475 = vmatmul.mubr.bf16.gmra.mrb[16].mxu0 %v2595_v0 }
  0x70   : > { %2523 = vmatmul.mubr.bf16.gmra.mrb[16].mxu1 %v2595_v0  ;;  %2476 = vmatprep.mubr.bf16.mxu0 %v2596_v5 }
  0x71   : > { %2524 = vmatprep.mubr.bf16.mxu1 %v2596_v5 }
  0x77   : > { %2477 = vmatmul.mubr.bf16.gmra.mrb[20].mxu0 %v2596_v5 }
  0x78   : > { %2525 = vmatmul.mubr.bf16.gmra.mrb[20].mxu1 %v2596_v5  ;;  %2478 = vmatprep.mubr.bf16.mxu0 %v2597_v7 }
  0x79   : > { %2526 = vmatprep.mubr.bf16.mxu1 %v2597_v7 }
  0x7f   : > { %2479 = vmatmul.mubr.bf16.gmra.mrb[24].mxu0 %v2597_v7 }
  0x80   : > { %2527 = vmatmul.mubr.bf16.gmra.mrb[24].mxu1 %v2597_v7  ;;  %2480 = vmatprep.mubr.bf16.mxu0 %v2598_v8 }
  0x81   : > { %2528 = vmatprep.mubr.bf16.mxu1 %v2598_v8 }
  0x87   : > { %2481 = vmatmul.mubr.bf16.gmra.mrb[28].mxu0 %v2598_v8 }
  0x88   : > { %2529 = vmatmul.mubr.bf16.gmra.mrb[28].mxu1 %v2598_v8  ;;  %2482 = vmatprep.mubr.bf16.mxu0 %v2599_v9 }
  0x89   : > { %2530 = vmatprep.mubr.bf16.mxu1 %v2599_v9 }
  0x8f   : > { %2483 = vmatmul.mubr.bf16.gmra.mrb[32].mxu0 %v2599_v9 }
  0x90   : > { %2531 = vmatmul.mubr.bf16.gmra.mrb[32].mxu1 %v2599_v9  ;;  %2484 = vmatprep.mubr.bf16.mxu0 %v2600_v10 }
  0x91   : > { %2532 = vmatprep.mubr.bf16.mxu1 %v2600_v10 }
  0x93   : > { %v3193_v20 = vpop.permute.xlu1 %1136 }
  0x94   : > { %vm1233_vm6 = vcmp.eq.s32.totalorder %v3191_v18, %v3193_v20  ;;  %vm1235_vm7 = vcmp.eq.s32.totalorder %v3196_v21, %v3193_v20  ;;  %vm1234_vm9 = vcmp.eq.s32.totalorder %v3199_v22, %v3193_v20  ;;  %vm1236_vm12 = vcmp.eq.s32.totalorder %v3202_v23, %v3193_v20 }
  0x96   : > { %v1131_v19 = vpop.permute.xlu0 %1130 }
  0x97   : > { %2485 = vmatmul.mubr.bf16.gmra.mrb[36].mxu0 %v2600_v10  ;;  %v3206_v25 = vpop.permute.xlu1 %1139  ;;  %vm1225_vm0 = vcmp.eq.s32.totalorder %v3191_v18, %v1131_v19  ;;  %vm1227_vm1 = vcmp.eq.s32.totalorder %v3196_v21, %v1131_v19  ;;  %vm1226_vm2 = vcmp.eq.s32.totalorder %v3199_v22, %v1131_v19  ;;  %vm1228_vm3 = vcmp.eq.s32.totalorder %v3202_v23, %v1131_v19 }
  0x98   : > { %2533 = vmatmul.mubr.bf16.gmra.mrb[36].mxu1 %v2600_v10  ;;  %2486 = vmatprep.mubr.bf16.mxu0 %v2601_v11  ;;  %vm1237_vm10 = vcmp.eq.s32.totalorder %v3191_v18, %v3206_v25  ;;  %vm1239_vm13 = vcmp.eq.s32.totalorder %v3196_v21, %v3206_v25  ;;  %vm1238_vm14 = vcmp.eq.s32.totalorder %v3199_v22, %v3206_v25 }
  0x99   : > { %2534 = vmatprep.mubr.bf16.mxu1 %v2601_v11 }
  0x9a   : > { %v3204_v24 = vpop.permute.xlu0 %1133 }
  0x9b   : > { %vm1229_vm4 = vcmp.eq.s32.totalorder %v3191_v18, %v3204_v24  ;;  %vm1231_vm5 = vcmp.eq.s32.totalorder %v3196_v21, %v3204_v24  ;;  %vm1230_vm8 = vcmp.eq.s32.totalorder %v3199_v22, %v3204_v24  ;;  %vm1232_vm11 = vcmp.eq.s32.totalorder %v3202_v23, %v3204_v24  ;;  %v3253_v10 = vpop.permute.xlu1 %1145 }
  0x9e   : > { %v3245_v54 = vpop.permute.xlu0 %1142 }
  0x9f   : > { %2487 = vmatmul.mubr.bf16.gmra.mrb[40].mxu0 %v2601_v11  ;;  %vm1241_vm15 = vcmp.eq.s32.totalorder %v3191_v18, %v3245_v54 }
  0xa0   : > { %2535 = vmatmul.mubr.bf16.gmra.mrb[40].mxu1 %v2601_v11  ;;  %2488 = vmatprep.mubr.bf16.mxu0 %v2602_v12 }
  0xa1   : > { %2536 = vmatprep.mubr.bf16.mxu1 %v2602_v12 }
  0xa7   : > { %2489 = vmatmul.mubr.bf16.gmra.mrb[44].mxu0 %v2602_v12 }
  0xa8   : > { %2537 = vmatmul.mubr.bf16.gmra.mrb[44].mxu1 %v2602_v12  ;;  %2490 = vmatprep.mubr.bf16.mxu0 %v2603_v13 }
  0xa9   : > { %2538 = vmatprep.mubr.bf16.mxu1 %v2603_v13 }
  0xaf   : > { %2491 = vmatmul.mubr.bf16.gmra.mrb[48].mxu0 %v2603_v13 }
  0xb0   : > { %2539 = vmatmul.mubr.bf16.gmra.mrb[48].mxu1 %v2603_v13  ;;  %2492 = vmatprep.mubr.bf16.mxu0 %v2604_v14 }
  0xb1   : > { %2540 = vmatprep.mubr.bf16.mxu1 %v2604_v14 }
  0xb7   : > { %2493 = vmatmul.mubr.bf16.gmra.mrb[52].mxu0 %v2604_v14 }
  0xb8   : > { %2541 = vmatmul.mubr.bf16.gmra.mrb[52].mxu1 %v2604_v14  ;;  %2494 = vmatprep.mubr.bf16.mxu0 %v2605_v15 }
  0xb9   : > { %2542 = vmatprep.mubr.bf16.mxu1 %v2605_v15 }
  0xbf   : > { %2495 = vmatmul.mubr.bf16.gmra.mrb[56].mxu0 %v2605_v15 }
  0xc0   : > { %2543 = vmatmul.mubr.bf16.gmra.mrb[56].mxu1 %v2605_v15  ;;  %2496 = vmatprep.mubr.bf16.mxu0 %v2606_v16 }
  0xc1   : > { %2544 = vmatprep.mubr.bf16.mxu1 %v2606_v16 }
  0xc7   : > { %2497 = vmatmul.mubr.bf16.gmra.mrb[60].mxu0 %v2606_v16 }
  0xc8   : > { %2545 = vmatmul.mubr.bf16.gmra.mrb[60].mxu1 %v2606_v16 }
 0x122   : > { %v612_v26 = vpop.f32.mrb[0].mxu0 }
 0x123   : > { %v964_v27 = vmul.f32 10.0, %v612_v26  ;;  %v805_v28 = vpop.f32.mrb[0].mxu1  ;;  %v614_v29 = vpop.f32.mrb[1].mxu0 }
 0x124   : > { %v966_v30 = vmul.f32 10.0, %v805_v28  ;;  %v965_v31 = vmul.f32 10.0, %v614_v29  ;;  %v807_v32 = vpop.f32.mrb[1].mxu1  ;;  %v616_v33 = vpop.f32.mrb[2].mxu0 }
 0x125   : > { %v1353_v34 = vsel %vm1225_vm0, %v964_v27, 0.0  ;;  %v1641_v35 = vmul.f32 1.442695, %v964_v27  ;;  %v967_v36 = vmul.f32 10.0, %v807_v32  ;;  %v968_v37 = vmul.f32 10.0, %v616_v33  ;;  %v809_v38 = vpop.f32.mrb[2].mxu1 }
 0x126   : > { %v1355_v39 = vsel %vm1227_vm1, %v966_v30, 0.0  ;;  %v1645_v40 = vmul.f32 1.442695, %v966_v30  ;;  %v1354_v41 = vsel %vm1226_vm2, %v965_v31, 0.0  ;;  %v1643_v42 = vmul.f32 1.442695, %v965_v31 }
 0x127   : > { %2607 = vpow2.f32 %v1641_v35  ;;  %v1481_v43 = vadd.f32 %v1354_v41, %v1353_v34  ;;  %v1647_v44 = vmul.f32 1.442695, %v967_v36  ;;  %v1357_v45 = vsel %vm1229_vm4, %v968_v37, 0.0  ;;  %v618_v46 = vpop.f32.mrb[3].mxu0  ;;  %v811_v47 = vpop.f32.mrb[3].mxu1 }
 0x128   : > { %2609 = vpow2.f32 %v1645_v40  ;;  %v1649_v48 = vmul.f32 1.442695, %v968_v37  ;;  %v970_v49 = vmul.f32 10.0, %v809_v38  ;;  %v969_v50 = vmul.f32 10.0, %v618_v46 }
 0x129   : > { %2611 = vpow2.f32 %v1643_v42  ;;  %v971_v51 = vmul.f32 10.0, %v811_v47  ;;  %v1356_v52 = vsel %vm1228_vm3, %v967_v36, 0.0  ;;  %v1482_v53 = vadd.f32 %v1481_v43, %v1355_v39 }
 0x12a   : > { %2613 = vpow2.f32 %v1647_v44  ;;  %v1359_v55 = vsel %vm1231_vm5, %v970_v49, 0.0  ;;  %v1653_v56 = vmul.f32 1.442695, %v970_v49  ;;  %v1358_v57 = vsel %vm1230_vm8, %v969_v50, 0.0  ;;  %v622_v58 = vpop.f32.mrb[4].mxu0 }
 0x12b   : > { %2615 = vpow2.f32 %v1649_v48  ;;  %v1486_v59 = vadd.f32 %v1358_v57, %v1357_v45  ;;  %v1651_v60 = vmul.f32 1.442695, %v969_v50  ;;  %v1655_v61 = vmul.f32 1.442695, %v971_v51  ;;  %v815_v62 = vpop.f32.mrb[4].mxu1  ;;  %v624_v63 = vpop.f32.mrb[5].mxu0 }
 0x12c   : > { %2617 = vpow2.f32 %v1653_v56  ;;  %v972_v0 = vmul.f32 10.0, %v622_v58  ;;  %v974_v1 = vmul.f32 10.0, %v815_v62  ;;  %v973_v2 = vmul.f32 10.0, %v624_v63  ;;  %v817_v3 = vpop.f32.mrb[5].mxu1  ;;  %v626_v4 = vpop.f32.mrb[6].mxu0 }
 0x12d   : > { %2619 = vpow2.f32 %v1651_v60  ;;  %v975_v5 = vmul.f32 10.0, %v817_v3  ;;  %v976_v6 = vmul.f32 10.0, %v626_v4  ;;  %v819_v7 = vpop.f32.mrb[6].mxu1  ;;  %v628_v8 = vpop.f32.mrb[7].mxu0  ;;  %v1483_v9 = vadd.f32 %v1482_v53, %v1356_v52 }
 0x12e   : > { %2621 = vpow2.f32 %v1655_v61  ;;  %v1361_v11 = vsel %vm1233_vm6, %v972_v0, 0.0  ;;  %v1657_v12 = vmul.f32 1.442695, %v972_v0  ;;  %v3261_v13 = vsel %vm1235_vm7, %v974_v1, 0.0  ;;  %v821_v14 = vpop.f32.mrb[7].mxu1  ;;  %v3318_v61 = vpop.permute.xlu0 %1148 }
 0x12f   : > { %vm1243_vm0 = vcmp.eq.s32.totalorder %v3196_v21, %v3245_v54  ;;  %v1661_v15 = vmul.f32 1.442695, %v974_v1  ;;  %v1362_v16 = vsel %vm1234_vm9, %v973_v2, 0.0  ;;  %v1659_v17 = vmul.f32 1.442695, %v973_v2  ;;  %1484 = vadd.xlane.f32.xlu0 %v1483_v9 }
 0x130   : > { %v1365_v19 = vsel %vm1237_vm10, %v976_v6, 0.0  ;;  %vm1242_vm1 = vcmp.eq.s32.totalorder %v3199_v22, %v3245_v54  ;;  %vm1245_vm2 = vcmp.eq.s32.totalorder %v3191_v18, %v3253_v10  ;;  %2623 = vpow2.f32 %v1657_v12 }
 0x131   : > { %v3277_v26 = vadd.f32 %v1362_v16, %v1361_v11  ;;  %v1663_v27 = vmul.f32 1.442695, %v975_v5  ;;  %v1665_v28 = vmul.f32 1.442695, %v976_v6  ;;  %vm1240_vm3 = vcmp.eq.s32.totalorder %v3202_v23, %v3206_v25  ;;  %v3281_v29 = vpop.eup %2607  ;;  %v3340_v6 = vpop.permute.xlu1 %1151 }
 0x132   : > { %2625 = vpow2.f32 %v1661_v15  ;;  %v978_v30 = vmul.f32 10.0, %v819_v7  ;;  %v977_v31 = vmul.f32 10.0, %v628_v8  ;;  %v3283_v32 = vmul.f32 10.0, %v821_v14  ;;  %v3285_v33 = vpop.eup %2609  ;;  %v632_v36 = vpop.f32.mrb[8].mxu0 }
 0x133   : > { %2627 = vpow2.f32 %v1659_v17  ;;  %v1360_v34 = vsel %vm1232_vm11, %v971_v51, 0.0  ;;  %v1487_v35 = vadd.f32 %v1486_v59, %v1359_v55  ;;  %v3293_v37 = vsel %vm1236_vm12, %v975_v5, 0.0  ;;  %v3295_v38 = vpop.eup %2611  ;;  %v825_v41 = vpop.f32.mrb[8].mxu1 }
 0x134   : > { %2629 = vpow2.f32 %v1663_v27  ;;  %v1367_v39 = vsel %vm1239_vm13, %v978_v30, 0.0  ;;  %v1669_v40 = vmul.f32 1.442695, %v978_v30  ;;  %v1366_v24 = vsel %vm1238_vm14, %v977_v31, 0.0  ;;  %v634_v42 = vpop.f32.mrb[9].mxu0  ;;  %v3307_v20 = vpop.eup %2613 }
 0x135   : > { %vm1247_vm4 = vcmp.eq.s32.totalorder %v3196_v21, %v3253_v10  ;;  %vm1246_vm5 = vcmp.eq.s32.totalorder %v3199_v22, %v3253_v10  ;;  %2631 = vpow2.f32 %v1665_v28  ;;  %v1496_v43 = vadd.f32 %v1366_v24, %v1365_v19  ;;  %v827_v46 = vpop.f32.mrb[9].mxu1  ;;  %v636_v47 = vpop.f32.mrb[10].mxu0 }
 0x136   : > { %v1667_v44 = vmul.f32 1.442695, %v977_v31  ;;  %v1671_v45 = vmul.f32 1.442695, %v3283_v32  ;;  %v3310_v48 = vpop.eup %2615  ;;  %2633 = vpow2.f32 %v1669_v40  ;;  %v1488_v49 = vadd.f32 %v1487_v35, %v1360_v34  ;;  %v829_v52 = vpop.f32.mrb[10].mxu1 }
 0x137   : > { %v980_v50 = vmul.f32 10.0, %v632_v36  ;;  %v982_v51 = vmul.f32 10.0, %v825_v41  ;;  %v638_v53 = vpop.f32.mrb[11].mxu0  ;;  %v3312_v55 = vpop.eup %2617  ;;  %v981_v56 = vmul.f32 10.0, %v634_v42  ;;  %v3314_v57 = vmul.f32 10.0, %v827_v46 }
 0x138   : > { %2635 = vpow2.f32 %v1667_v44  ;;  %v984_v58 = vmul.f32 10.0, %v636_v47  ;;  %v831_v59 = vpop.f32.mrb[11].mxu1  ;;  %v3316_v60 = vpop.eup %2619  ;;  %1489 = vadd.xlane.f32.xlu1 %v1488_v49  ;;  %vm1249_vm6 = vcmp.eq.s32.totalorder %v3191_v18, %v3318_v61  ;;  %vm1251_vm7 = vcmp.eq.s32.totalorder %v3196_v21, %v3318_v61 }
 0x139   : > { %2637 = vpow2.f32 %v1671_v45  ;;  %v1369_v62 = vsel %vm1241_vm15, %v980_v50, 0.0  ;;  %v1673_v63 = vmul.f32 1.442695, %v980_v50  ;;  %v3326_v0 = vsel %vm1243_vm0, %v982_v51, 0.0  ;;  %v3328_v1 = vpop.eup %2621 }
 0x13a   : > { %v1677_v2 = vmul.f32 1.442695, %v982_v51  ;;  %v1370_v3 = vsel %vm1242_vm1, %v981_v56, 0.0  ;;  %v1675_v4 = vmul.f32 1.442695, %v981_v56  ;;  %v1373_v5 = vsel %vm1245_vm2, %v984_v58, 0.0  ;;  %v3347_v11 = vpop.eup %2623 }
 0x13b   : > { %2639 = vpow2.f32 %v1673_v63  ;;  %v3342_v7 = vadd.f32 %v1370_v3, %v1369_v62  ;;  %v1679_v8 = vmul.f32 1.442695, %v3314_v57  ;;  %v1681_v9 = vmul.f32 1.442695, %v984_v58  ;;  %v642_v16 = vpop.f32.mrb[12].mxu0  ;;  %v835_v30 = vpop.f32.mrb[12].mxu1 }
 0x13c   : > { %vm1250_vm8 = vcmp.eq.s32.totalorder %v3199_v22, %v3318_v61  ;;  %2641 = vpow2.f32 %v1677_v2  ;;  %v986_v12 = vmul.f32 10.0, %v829_v52  ;;  %v985_v14 = vmul.f32 10.0, %v638_v53  ;;  %v3353_v17 = vpop.eup %2625  ;;  %v644_v31 = vpop.f32.mrb[13].mxu0 }
 0x13d   : > { %v3349_v15 = vmul.f32 10.0, %v831_v59  ;;  %vm1253_vm9 = vcmp.eq.s32.totalorder %v3191_v18, %v3340_v6  ;;  %2643 = vpow2.f32 %v1675_v4  ;;  %v1492_v19 = vadd.f32 %v3277_v26, %v3261_v13  ;;  %v3361_v34 = vpop.eup %2627  ;;  %v837_v26 = vpop.f32.mrb[13].mxu1 }
 0x13e   : > { %v1368_v27 = vsel %vm1240_vm3, %v3283_v32, 0.0  ;;  %v1497_v28 = vadd.f32 %v1496_v43, %v1367_v39  ;;  %2645 = vpow2.f32 %v1679_v8  ;;  %v3366_v35 = vsel %vm1247_vm4, %v986_v12, 0.0  ;;  %v646_v40 = vpop.f32.mrb[14].mxu0  ;;  %v3373_v25 = vpop.eup %2629 }
 0x13f   : > { %v1685_v36 = vmul.f32 1.442695, %v986_v12  ;;  %v1374_v13 = vsel %vm1246_vm5, %v985_v14, 0.0  ;;  %vm1244_vm10 = vcmp.eq.s32.totalorder %v3202_v23, %v3245_v54  ;;  %2647 = vpow2.f32 %v1681_v9  ;;  %v839_v41 = vpop.f32.mrb[14].mxu1  ;;  %v648_v42 = vpop.f32.mrb[15].mxu0 }
 0x140   : > { %v3375_v32 = vadd.f32 %v1374_v13, %v1373_v5  ;;  %v1683_v39 = vmul.f32 1.442695, %v985_v14  ;;  %v1687_v24 = vmul.f32 1.442695, %v3349_v15  ;;  %vm1255_vm11 = vcmp.eq.s32.totalorder %v3196_v21, %v3340_v6  ;;  %v3382_v43 = vpop.eup %2631  ;;  %v841_v47 = vpop.f32.mrb[15].mxu1 }
 0x141   : > { %vm1254_vm12 = vcmp.eq.s32.totalorder %v3199_v22, %v3340_v6  ;;  %2649 = vpow2.f32 %v1685_v36  ;;  %v1493_v44 = vadd.f32 %v1492_v19, %v3293_v37  ;;  %v1498_v45 = vadd.f32 %v1497_v28, %v1368_v27  ;;  %v3387_v49 = vpop.eup %2633  ;;  %v3408_v3 = vpop.permute.xlu1 %1157 }
 0x142   : > { %v1897_v46 = vadd.f32 %v3295_v38, %v3281_v29  ;;  %2651 = vpow2.f32 %v1683_v39  ;;  %v988_v50 = vmul.f32 10.0, %v642_v16  ;;  %v990_v51 = vmul.f32 10.0, %v835_v30  ;;  %v3391_v53 = vpop.eup %2635  ;;  %v3398_v38 = vpop.permute.xlu0 %1154 }
 0x143   : > { %v989_v52 = vmul.f32 10.0, %v644_v31  ;;  %vm1248_vm13 = vcmp.eq.s32.totalorder %v3202_v23, %v3253_v10  ;;  %2653 = vpow2.f32 %v1687_v24  ;;  %1494 = vadd.xlane.f32.xlu0 %v1493_v44  ;;  %v3394_v56 = vmul.f32 10.0, %v837_v26  ;;  %v3396_v29 = vpop.eup %2637  ;;  %v652_v9 = vpop.f32.mrb[16].mxu0 }
 0x144   : > { %v1898_v37 = vadd.f32 %v3285_v33, %v1897_v46  ;;  %v992_v58 = vmul.f32 10.0, %v646_v40  ;;  %v1377_v59 = vsel %vm1249_vm6, %v988_v50, 0.0  ;;  %v1689_v62 = vmul.f32 1.442695, %v988_v50  ;;  %v845_v19 = vpop.f32.mrb[16].mxu1  ;;  %v654_v27 = vpop.f32.mrb[17].mxu0 }
 0x145   : > { %v3406_v63 = vsel %vm1251_vm7, %v990_v51, 0.0  ;;  %v1693_v2 = vmul.f32 1.442695, %v990_v51  ;;  %v1378_v4 = vsel %vm1250_vm8, %v989_v52, 0.0  ;;  %v1691_v5 = vmul.f32 1.442695, %v989_v52  ;;  %v3419_v12 = vpop.eup %2639 }
 0x146   : > { %v1899_v33 = vadd.f32 %v3307_v20, %v1898_v37  ;;  %v1695_v8 = vmul.f32 1.442695, %v3394_v56  ;;  %vm1257_vm14 = vcmp.eq.s32.totalorder %v3191_v18, %v3398_v38  ;;  %vm1259_vm15 = vcmp.eq.s32.totalorder %v3196_v21, %v3398_v38  ;;  %v3428_v28 = vpop.eup %2641  ;;  %v847_v13 = vpop.f32.mrb[17].mxu1 }
 0x147   : > { %2655 = vpow2.f32 %v1689_v62  ;;  %v3421_v14 = vadd.f32 %v1378_v4, %v1377_v59  ;;  %v1381_v20 = vsel %vm1253_vm9, %v992_v58, 0.0  ;;  %v1697_v16 = vmul.f32 1.442695, %v992_v58  ;;  %1499 = vadd.xlane.f32.xlu0 %v1498_v45  ;;  %v656_v26 = vpop.f32.mrb[18].mxu0  ;;  %v3432_v40 = vpop.eup %2643 }
 0x148   : > { %vm1258_vm0 = vcmp.eq.s32.totalorder %v3199_v22, %v3398_v38  ;;  %1900 = vadd.xlane.f32.xlu1 %v1899_v33  ;;  %2657 = vpow2.f32 %v1693_v2  ;;  %v994_v30 = vmul.f32 10.0, %v839_v41  ;;  %v993_v31 = vmul.f32 10.0, %v648_v42  ;;  %v849_v41 = vpop.f32.mrb[18].mxu1  ;;  %v658_v42 = vpop.f32.mrb[19].mxu0 }
 0x149   : > { %v3430_v36 = vmul.f32 10.0, %v841_v47  ;;  %2659 = vpow2.f32 %v1691_v5  ;;  %v1902_v39 = vadd.f32 %v3316_v60, %v3310_v48  ;;  %v1372_v24 = vsel %vm1244_vm10, %v3314_v57, 0.0  ;;  %v3444_v45 = vpop.eup %2645  ;;  %v851_v57 = vpop.f32.mrb[19].mxu1 }
 0x14a   : > { %v1502_v44 = vadd.f32 %v3342_v7, %v3326_v0  ;;  %vm1261_vm1 = vcmp.eq.s32.totalorder %v3191_v18, %v3408_v3  ;;  %2661 = vpow2.f32 %v1695_v8  ;;  %v3449_v48 = vsel %vm1255_vm11, %v994_v30, 0.0  ;;  %v3456_v0 = vpop.eup %2647  ;;  %v662_v5 = vpop.f32.mrb[20].mxu0 }
 0x14b   : > { %v1701_v60 = vmul.f32 1.442695, %v994_v30  ;;  %v1382_v54 = vsel %vm1254_vm12, %v993_v31, 0.0  ;;  %vm1263_vm2 = vcmp.eq.s32.totalorder %v3196_v21, %v3408_v3  ;;  %2663 = vpow2.f32 %v1697_v16  ;;  %v3463_v50 = vpop.eup %2649  ;;  %v664_v16 = vpop.f32.mrb[21].mxu0 }
 0x14c   : > { %v3458_v7 = vadd.f32 %v1382_v54, %v1381_v20  ;;  %v1699_v46 = vmul.f32 1.442695, %v993_v31  ;;  %v1703_v47 = vmul.f32 1.442695, %v3430_v36  ;;  %vm1262_vm3 = vcmp.eq.s32.totalorder %v3199_v22, %v3408_v3  ;;  %v3472_v58 = vpop.eup %2651 }
 0x14d   : > { %2665 = vpow2.f32 %v1701_v60  ;;  %v1903_v51 = vadd.f32 %v3312_v55, %v1902_v39  ;;  %v1503_v52 = vadd.f32 %v1502_v44, %v1372_v24  ;;  %v1376_v37 = vsel %vm1248_vm13, %v3349_v15, 0.0  ;;  %v3476_v33 = vpop.eup %2653  ;;  %v3478_v55 = vpop.permute.xlu0 %1160 }
 0x14e   : > { %vm1252_vm4 = vcmp.eq.s32.totalorder %v3202_v23, %v3318_v61  ;;  %2667 = vpow2.f32 %v1699_v46  ;;  %v1507_v59 = vadd.f32 %v3375_v32, %v3366_v35  ;;  %v996_v62 = vmul.f32 10.0, %v652_v9  ;;  %v855_v9 = vpop.f32.mrb[20].mxu1  ;;  %v3505_v60 = vpop.f32.mrb[22].mxu0 }
 0x14f   : > { %v998_v2 = vmul.f32 10.0, %v845_v19  ;;  %2669 = vpow2.f32 %v1703_v47  ;;  %v1904_v4 = vadd.f32 %v3328_v1, %v1903_v51  ;;  %1504 = vadd.xlane.f32.xlu1 %v1503_v52  ;;  %v997_v10 = vmul.f32 10.0, %v654_v27  ;;  %v857_v44 = vpop.f32.mrb[21].mxu1  ;;  %v3512_v52 = vpop.f32.mrb[23].mxu0 }
 0x150   : > { %v3481_v15 = vmul.f32 10.0, %v847_v13  ;;  %v1508_v8 = vadd.f32 %v1507_v59, %v1376_v37  ;;  %v1385_v20 = vsel %vm1257_vm14, %v996_v62, 0.0  ;;  %v1705_v35 = vmul.f32 1.442695, %v996_v62  ;;  %v859_v51 = vpop.f32.mrb[22].mxu1 }
 0x151   : > { %v3489_v32 = vsel %vm1259_vm15, %v998_v2, 0.0  ;;  %1905 = vadd.xlane.f32.xlu0 %v1904_v4  ;;  %v1709_v1 = vmul.f32 1.442695, %v998_v2  ;;  %v1386_v19 = vsel %vm1258_vm0, %v997_v10, 0.0  ;;  %v1707_v27 = vmul.f32 1.442695, %v997_v10  ;;  %v3498_v31 = vpop.eup %2655 }
 0x152   : > { %v1000_v30 = vmul.f32 10.0, %v656_v26  ;;  %vm1265_vm5 = vcmp.eq.s32.totalorder %v3191_v18, %v3478_v55  ;;  %vm1267_vm6 = vcmp.eq.s32.totalorder %v3196_v21, %v3478_v55  ;;  %2671 = vpow2.f32 %v1705_v35  ;;  %v3507_v26 = vpop.eup %2657  ;;  %v861_v4 = vpop.f32.mrb[23].mxu1 }
 0x153   : > { %v3500_v13 = vadd.f32 %v1386_v19, %v1385_v20  ;;  %v1711_v39 = vmul.f32 1.442695, %v3481_v15  ;;  %v1002_v24 = vmul.f32 10.0, %v849_v41  ;;  %vm1266_vm7 = vcmp.eq.s32.totalorder %v3199_v22, %v3478_v55  ;;  %v3514_v37 = vpop.eup %2659  ;;  %v3516_v41 = vpop.permute.xlu1 %1163 }
 0x154   : > { %2673 = vpow2.f32 %v1709_v1  ;;  %v1389_v54 = vsel %vm1261_vm1, %v1000_v30, 0.0  ;;  %v1713_v46 = vmul.f32 1.442695, %v1000_v30  ;;  %v1001_v47 = vmul.f32 10.0, %v658_v42  ;;  %v3525_v10 = vpop.eup %2661 }
 0x155   : > { %2675 = vpow2.f32 %v1707_v27  ;;  %v3521_v59 = vsel %vm1263_vm2, %v1002_v24, 0.0  ;;  %v1717_v62 = vmul.f32 1.442695, %v1002_v24  ;;  %v3523_v2 = vmul.f32 10.0, %v851_v57  ;;  %1509 = vadd.xlane.f32.xlu0 %v1508_v8  ;;  %v3536_v57 = vpop.eup %2663 }
 0x156   : > { %2677 = vpow2.f32 %v1711_v39  ;;  %v1390_v42 = vsel %vm1262_vm3, %v1001_v47, 0.0  ;;  %v1715_v20 = vmul.f32 1.442695, %v1001_v47  ;;  %v1907_v35 = vadd.f32 %v3361_v34, %v3347_v11  ;;  %v3556_v39 = vpop.f32.mrb[24].mxu0 }
 0x157   : > { %vm1269_vm8 = vcmp.eq.s32.totalorder %v3191_v18, %v3516_v41  ;;  %vm1271_vm9 = vcmp.eq.s32.totalorder %v3196_v21, %v3516_v41  ;;  %2679 = vpow2.f32 %v1713_v46  ;;  %v3538_v1 = vadd.f32 %v1390_v42, %v1389_v54  ;;  %v3547_v11 = vpop.eup %2665 }
 0x158   : > { %v1719_v8 = vmul.f32 1.442695, %v3523_v2  ;;  %v1380_v19 = vsel %vm1252_vm4, %v3394_v56, 0.0  ;;  %vm1270_vm10 = vcmp.eq.s32.totalorder %v3199_v22, %v3516_v41  ;;  %2681 = vpow2.f32 %v1717_v62  ;;  %v3558_v61 = vpop.eup %2667 }
 0x159   : > { %v1908_v34 = vadd.f32 %v3353_v17, %v1907_v35  ;;  %v1512_v27 = vadd.f32 %v3421_v14, %v3406_v63  ;;  %v1912_v30 = vadd.f32 %v3391_v53, %v3382_v43  ;;  %vm1256_vm11 = vcmp.eq.s32.totalorder %v3202_v23, %v3340_v6  ;;  %v3562_v17 = vpop.f32.mrb[24].mxu1  ;;  %v3564_v63 = vpop.f32.mrb[25].mxu0 }
 0x15a   : > { %2683 = vpow2.f32 %v1715_v20  ;;  %v1004_v56 = vmul.f32 10.0, %v662_v5  ;;  %v1006_v24 = vmul.f32 10.0, %v855_v9  ;;  %v1005_v54 = vmul.f32 10.0, %v664_v16  ;;  %v3566_v14 = vpop.eup %2669  ;;  %v3572_v5 = vpop.f32.mrb[25].mxu1 }
 0x15b   : > { %vm1260_vm12 = vcmp.eq.s32.totalorder %v3202_v23, %v3398_v38  ;;  %2685 = vpow2.f32 %v1719_v8  ;;  %v1909_v43 = vadd.f32 %v3373_v25, %v1908_v34  ;;  %v1513_v53 = vadd.f32 %v1512_v27, %v1380_v19  ;;  %v3574_v9 = vpop.f32.mrb[26].mxu0  ;;  %v3576_v16 = vpop.permute.xlu0 %1166 }
 0x15c   : > { %v1913_v46 = vadd.f32 %v3387_v49, %v1912_v30  ;;  %vm1264_vm13 = vcmp.eq.s32.totalorder %v3202_v23, %v3408_v3  ;;  %v1393_v47 = vsel %vm1265_vm5, %v1004_v56, 0.0  ;;  %v1721_v62 = vmul.f32 1.442695, %v1004_v56  ;;  %v3592_v19 = vpop.f32.mrb[26].mxu1  ;;  %v3594_v34 = vpop.f32.mrb[27].mxu0 }
 0x15d   : > { %v3584_v25 = vsel %vm1267_vm6, %v1006_v24, 0.0  ;;  %v1725_v49 = vmul.f32 1.442695, %v1006_v24  ;;  %1910 = vadd.xlane.f32.xlu0 %v1909_v43  ;;  %1514 = vadd.xlane.f32.xlu1 %v1513_v53  ;;  %v1394_v20 = vsel %vm1266_vm7, %v1005_v54, 0.0  ;;  %v1723_v35 = vmul.f32 1.442695, %v1005_v54  ;;  %v3596_v27 = vpop.eup %2671 }
 0x15e   : > { %v1914_v42 = vadd.f32 %v3396_v29, %v1913_v46  ;;  %v3590_v8 = vmul.f32 10.0, %v857_v44  ;;  %2687 = vpow2.f32 %v1721_v62  ;;  %v3598_v30 = vadd.f32 %v1394_v20, %v1393_v47  ;;  %v3603_v29 = vpop.f32.mrb[27].mxu1  ;;  %v3605_v54 = vpop.eup %2673 }
 0x15f   : > { %v1008_v56 = vmul.f32 10.0, %v3505_v60  ;;  %v1010_v24 = vmul.f32 10.0, %v859_v51  ;;  %vm1273_vm14 = vcmp.eq.s32.totalorder %v3191_v18, %v3576_v16  ;;  %4935 = vst [vmem:[#allocation2_spill] sm:$0xff] %v3605_v54  ;;  %2689 = vpow2.f32 %v1725_v49  ;;  %v3615_v60 = vpop.eup %2675  ;;  %v3617_v51 = vpop.permute.xlu1 %1169 }
 0x160   : > { %v1727_v44 = vmul.f32 1.442695, %v3590_v8  ;;  %v1009_v43 = vmul.f32 10.0, %v3512_v52  ;;  %v3609_v53 = vmul.f32 10.0, %v861_v4  ;;  %vm1275_vm15 = vcmp.eq.s32.totalorder %v3196_v21, %v3576_v16  ;;  %v3627_v4 = vpop.eup %2677 }
 0x161   : > { %vm1274_vm0 = vcmp.eq.s32.totalorder %v3199_v22, %v3576_v16  ;;  %2691 = vpow2.f32 %v1723_v35  ;;  %v1397_v46 = vsel %vm1269_vm8, %v1008_v56, 0.0  ;;  %v1729_v47 = vmul.f32 1.442695, %v1008_v56  ;;  %4936 = vst [vmem:[#allocation3_spill] sm:$0xff] %v3627_v4  ;;  %1915 = vadd.xlane.f32.xlu0 %v1914_v42  ;;  %v3634_v35 = vpop.f32.mrb[28].mxu0  ;;  %v3636_v56 = vpop.eup %2679 }
 0x162   : > { %v3625_v52 = vsel %vm1271_vm9, %v1010_v24, 0.0  ;;  %2693 = vpow2.f32 %v1727_v44  ;;  %v1733_v62 = vmul.f32 1.442695, %v1010_v24  ;;  %v1398_v49 = vsel %vm1270_vm10, %v1009_v43, 0.0  ;;  %4937 = vst [vmem:[#allocation4_spill] sm:$0xff] %v3636_v56  ;;  %v3645_v24 = vpop.f32.mrb[28].mxu1 }
 0x163   : > { %v1731_v20 = vmul.f32 1.442695, %v1009_v43  ;;  %vm1277_vm1 = vcmp.eq.s32.totalorder %v3191_v18, %v3617_v51  ;;  %2695 = vpow2.f32 %v1729_v47  ;;  %v3638_v54 = vadd.f32 %v1398_v49, %v1397_v46  ;;  %v3647_v44 = vpop.f32.mrb[29].mxu0  ;;  %v3649_v43 = vpop.eup %2681 }
 0x164   : > { %v1735_v4 = vmul.f32 1.442695, %v3609_v53  ;;  %v1384_v42 = vsel %vm1256_vm11, %v3430_v36, 0.0  ;;  %2697 = vpow2.f32 %v1733_v62  ;;  %v1517_v56 = vadd.f32 %v3458_v7, %v3449_v48  ;;  %v3663_v6 = vpop.f32.mrb[29].mxu1  ;;  %v3665_v36 = vpop.f32.mrb[30].mxu0 }
 0x165   : > { %v1388_v46 = vsel %vm1260_vm12, %v3481_v15, 0.0  ;;  %v1522_v47 = vadd.f32 %v3500_v13, %v3489_v32  ;;  %vm1279_vm2 = vcmp.eq.s32.totalorder %v3196_v21, %v3617_v51  ;;  %vm1268_vm3 = vcmp.eq.s32.totalorder %v3202_v23, %v3478_v55  ;;  %v3667_v62 = vpop.eup %2683  ;;  %v3679_v15 = vpop.f32.mrb[30].mxu1 }
 0x166   : > { %2699 = vpow2.f32 %v1731_v20  ;;  %v1917_v38 = vadd.f32 %v3432_v40, %v3419_v12  ;;  %v1392_v48 = vsel %vm1264_vm13, %v3523_v2, 0.0  ;;  %v1527_v7 = vadd.f32 %v3538_v1, %v3521_v59  ;;  %v3681_v32 = vpop.f32.mrb[31].mxu0  ;;  %v3683_v13 = vpop.eup %2685 }
 0x167   : > { %vm1278_vm4 = vcmp.eq.s32.totalorder %v3199_v22, %v3617_v51  ;;  %4938 = vst [vmem:[#allocation5_spill] sm:$0xff] %v3683_v13  ;;  %2701 = vpow2.f32 %v1735_v4  ;;  %v1518_v49 = vadd.f32 %v1517_v56, %v1384_v42  ;;  %v1523_v12 = vadd.f32 %v1522_v47, %v1388_v46  ;;  %v3686_v20 = vpop.f32.mrb[31].mxu1 }
 0x168   : > { %v1012_v40 = vmul.f32 10.0, %v3556_v39  ;;  %v1918_v3 = vadd.f32 %v3428_v28, %v1917_v38  ;;  %v1528_v2 = vadd.f32 %v1527_v7, %v1392_v48  ;;  %v1014_v59 = vmul.f32 10.0, %v3562_v17  ;;  %v3700_v42 = vpop.eup %2687  ;;  %v3702_v17 = vpop.permute.xlu0 %1172 }
 0x169   : > { %v1013_v1 = vmul.f32 10.0, %v3564_v63  ;;  %vm1272_vm5 = vcmp.eq.s32.totalorder %v3202_v23, %v3516_v41  ;;  %1519 = vadd.xlane.f32.xlu0 %v1518_v49  ;;  %1524 = vadd.xlane.f32.xlu1 %v1523_v12  ;;  %v3697_v39 = vmul.f32 10.0, %v3572_v5  ;;  %v1016_v28 = vmul.f32 10.0, %v3574_v9  ;;  %v3713_v5 = vpop.eup %2689  ;;  %v3715_v48 = vpop.permute.xlu1 %1175 }
 0x16a   : > { %v1401_v4 = vsel %vm1273_vm14, %v1012_v40, 0.0  ;;  %v1737_v56 = vmul.f32 1.442695, %v1012_v40  ;;  %v1919_v63 = vadd.f32 %v3444_v45, %v1918_v3  ;;  %v3708_v46 = vsel %vm1275_vm15, %v1014_v59, 0.0  ;;  %4939 = vst [vmem:[#allocation6_spill] sm:$0xff] %v3713_v5  ;;  %v3722_v49 = vpop.f32.mrb[32].mxu0 }
 0x16b   : > { %v1741_v47 = vmul.f32 1.442695, %v1014_v59  ;;  %v1402_v38 = vsel %vm1274_vm0, %v1013_v1, 0.0  ;;  %v1739_v7 = vmul.f32 1.442695, %v1013_v1  ;;  %vm1281_vm6 = vcmp.eq.s32.totalorder %v3191_v18, %v3702_v17  ;;  %v3724_v12 = vpop.eup %2691  ;;  %v3734_v1 = vpop.f32.mrb[32].mxu1 }
 0x16c   : > { %2703 = vpow2.f32 %v1737_v56  ;;  %v3717_v9 = vadd.f32 %v1402_v38, %v1401_v4  ;;  %v1743_v45 = vmul.f32 1.442695, %v3697_v39  ;;  %v1405_v40 = vsel %vm1277_vm1, %v1016_v28, 0.0  ;;  %v3736_v4 = vpop.f32.mrb[33].mxu0  ;;  %v3738_v56 = vpop.eup %2693 }
 0x16d   : > { %2705 = vpow2.f32 %v1741_v47  ;;  %v1745_v3 = vmul.f32 1.442695, %v1016_v28  ;;  %v1018_v59 = vmul.f32 10.0, %v3592_v19  ;;  %vm1283_vm7 = vcmp.eq.s32.totalorder %v3196_v21, %v3702_v17  ;;  %4940 = vst [vmem:[#allocation7_spill] sm:$0xff] %v3738_v56  ;;  %1920 = vadd.xlane.f32.xlu0 %v1919_v63  ;;  %1529 = vadd.xlane.f32.xlu1 %v1528_v2  ;;  %v3746_v38 = vpop.f32.mrb[33].mxu1  ;;  %v3748_v5 = vpop.f32.mrb[34].mxu0 }
 0x16e   : > { %vm1282_vm8 = vcmp.eq.s32.totalorder %v3199_v22, %v3702_v17  ;;  %2707 = vpow2.f32 %v1739_v7  ;;  %v1017_v47 = vmul.f32 10.0, %v3594_v34  ;;  %v3742_v28 = vmul.f32 10.0, %v3603_v29  ;;  %v3750_v13 = vpop.eup %2695 }
 0x16f   : > { %v1922_v19 = vadd.f32 %v3472_v58, %v3456_v0  ;;  %4941 = vst [vmem:[#allocation8_spill] sm:$0xff] %v3750_v13  ;;  %2709 = vpow2.f32 %v1743_v45  ;;  %v3755_v2 = vsel %vm1279_vm2, %v1018_v59, 0.0  ;;  %v1749_v63 = vmul.f32 1.442695, %v1018_v59  ;;  %v3763_v0 = vpop.f32.mrb[34].mxu1  ;;  %v3765_v58 = vpop.f32.mrb[35].mxu0 }
 0x170   : > { %v1396_v34 = vsel %vm1268_vm3, %v3590_v8, 0.0  ;;  %vm1285_vm9 = vcmp.eq.s32.totalorder %v3191_v18, %v3715_v48  ;;  %v3767_v29 = vpop.eup %2697  ;;  %2711 = vpow2.f32 %v1745_v3  ;;  %v1406_v7 = vsel %vm1278_vm4, %v1017_v47, 0.0  ;;  %v3773_v13 = vpop.f32.mrb[35].mxu1 }
 0x171   : > { %4942 = vst [vmem:[#allocation9_spill] sm:$0xff] %v3767_v29  ;;  %v1747_v45 = vmul.f32 1.442695, %v1017_v47  ;;  %v1751_v59 = vmul.f32 1.442695, %v3742_v28  ;;  %v3775_v55 = vpop.eup %2699  ;;  %2713 = vpow2.f32 %v1749_v63  ;;  %v3777_v8 = vadd.f32 %v1406_v7, %v1405_v40 }
 0x172   : > { %v1923_v56 = vadd.f32 %v3463_v50, %v1922_v19  ;;  %v1532_v29 = vadd.f32 %v3598_v30, %v3584_v25  ;;  %vm1287_vm10 = vcmp.eq.s32.totalorder %v3196_v21, %v3715_v48  ;;  %vm1276_vm11 = vcmp.eq.s32.totalorder %v3202_v23, %v3576_v16  ;;  %v3786_v3 = vpop.eup %2701 }
 0x173   : > { %2715 = vpow2.f32 %v1747_v45  ;;  %v1927_v47 = vadd.f32 %v3514_v37, %v3498_v31  ;;  %v1400_v50 = vsel %vm1272_vm5, %v3609_v53, 0.0  ;;  %v1537_v25 = vadd.f32 %v3638_v54, %v3625_v52  ;;  %v3805_v54 = vpop.f32.mrb[36].mxu0  ;;  %v3807_v53 = vpop.permute.xlu0 %1178 }
 0x174   : > { %vm1286_vm12 = vcmp.eq.s32.totalorder %v3199_v22, %v3715_v48  ;;  %2717 = vpow2.f32 %v1751_v59  ;;  %v1924_v30 = vadd.f32 %v3476_v33, %v1923_v56  ;;  %v1533_v40 = vadd.f32 %v1532_v29, %v1396_v34 }
 0x175   : > { %v1020_v19 = vmul.f32 10.0, %v3634_v35  ;;  %v1928_v63 = vadd.f32 %v3507_v26, %v1927_v47  ;;  %v1538_v31 = vadd.f32 %v1537_v25, %v1400_v50  ;;  %v1022_v37 = vmul.f32 10.0, %v3645_v24  ;;  %v3816_v24 = vpop.f32.mrb[36].mxu1 }
 0x176   : > { %v1021_v41 = vmul.f32 10.0, %v3647_v44  ;;  %vm1280_vm13 = vcmp.eq.s32.totalorder %v3202_v23, %v3617_v51  ;;  %1925 = vadd.xlane.f32.xlu0 %v1924_v30  ;;  %1534 = vadd.xlane.f32.xlu1 %v1533_v40  ;;  %v3813_v26 = vmul.f32 10.0, %v3663_v6  ;;  %v1024_v35 = vmul.f32 10.0, %v3665_v36  ;;  %v3818_v44 = vpop.eup %2703  ;;  %v3829_v6 = vpop.f32.mrb[37].mxu0 }
 0x177   : > { %v1409_v33 = vsel %vm1281_vm6, %v1020_v19, 0.0  ;;  %v1753_v52 = vmul.f32 1.442695, %v1020_v19  ;;  %v1929_v56 = vadd.f32 %v3525_v10, %v1928_v63  ;;  %v3824_v34 = vsel %vm1283_vm7, %v1022_v37, 0.0  ;;  %v3831_v45 = vpop.f32.mrb[37].mxu1  ;;  %v3833_v36 = vpop.eup %2705 }
 0x178   : > { %v1757_v29 = vmul.f32 1.442695, %v1022_v37  ;;  %v1410_v7 = vsel %vm1282_vm8, %v1021_v41, 0.0  ;;  %4943 = vst [vmem:[#allocation10_spill] sm:$0xff] %v3833_v36  ;;  %v1755_v10 = vmul.f32 1.442695, %v1021_v41  ;;  %vm1289_vm14 = vcmp.eq.s32.totalorder %v3191_v18, %v3807_v53  ;;  %v3844_v30 = vpop.eup %2707 }
 0x179   : > { %2719 = vpow2.f32 %v1753_v52  ;;  %v3835_v59 = vadd.f32 %v1410_v7, %v1409_v33  ;;  %v1759_v47 = vmul.f32 1.442695, %v3813_v26  ;;  %v3840_v50 = vpop.f32.mrb[38].mxu0  ;;  %v3842_v25 = vpop.f32.mrb[38].mxu1  ;;  %v1413_v40 = vsel %vm1285_vm9, %v1024_v35, 0.0 }
 0x17a   : > { %2721 = vpow2.f32 %v1757_v29  ;;  %v1761_v19 = vmul.f32 1.442695, %v1024_v35  ;;  %v1026_v63 = vmul.f32 10.0, %v3679_v15  ;;  %vm1291_vm15 = vcmp.eq.s32.totalorder %v3196_v21, %v3807_v53  ;;  %v3854_v37 = vpop.f32.mrb[39].mxu0  ;;  %v3856_v41 = vpop.f32.mrb[39].mxu1  ;;  %1930 = vadd.xlane.f32.xlu0 %v1929_v56  ;;  %1539 = vadd.xlane.f32.xlu1 %v1538_v31 }
 0x17b   : > { %vm1290_vm0 = vcmp.eq.s32.totalorder %v3199_v22, %v3807_v53  ;;  %v3858_v33 = vpop.eup %2709  ;;  %v3860_v52 = vpop.permute.xlu1 %1181  ;;  %2723 = vpow2.f32 %v1755_v10  ;;  %v1025_v35 = vmul.f32 10.0, %v3681_v32  ;;  %v3864_v15 = vmul.f32 10.0, %v3686_v20 }
 0x17c   : > { %4944 = vst [vmem:[#allocation11_spill] sm:$0xff] %v3858_v33  ;;  %v1932_v29 = vadd.f32 %v3558_v61, %v3536_v57  ;;  %v3868_v7 = vpop.eup %2711  ;;  %2725 = vpow2.f32 %v1759_v47  ;;  %v3873_v33 = vsel %vm1287_vm10, %v1026_v63, 0.0  ;;  %v1765_v36 = vmul.f32 1.442695, %v1026_v63  ;;  %v3898_v47 = vpop.f32.mrb[40].mxu0 }
 0x17d   : > { %v1404_v32 = vsel %vm1276_vm11, %v3697_v39, 0.0  ;;  %vm1293_vm1 = vcmp.eq.s32.totalorder %v3191_v18, %v3860_v52  ;;  %v3881_v20 = vpop.eup %2713  ;;  %2727 = vpow2.f32 %v1761_v19  ;;  %v1414_v57 = vsel %vm1286_vm12, %v1025_v35, 0.0 }
 0x17e   : > { %v1763_v61 = vmul.f32 1.442695, %v1025_v35  ;;  %v1767_v31 = vmul.f32 1.442695, %v3864_v15  ;;  %v3887_v56 = vpop.eup %2715  ;;  %2729 = vpow2.f32 %v1765_v36  ;;  %v3889_v10 = vadd.f32 %v1414_v57, %v1413_v40  ;;  %v3914_v40 = vpop.f32.mrb[41].mxu0 }
 0x17f   : > { %v1933_v16 = vadd.f32 %v3547_v11, %v1932_v29  ;;  %v1542_v39 = vadd.f32 %v3717_v9, %v3708_v46  ;;  %vm1295_vm2 = vcmp.eq.s32.totalorder %v3196_v21, %v3860_v52  ;;  %vm1284_vm3 = vcmp.eq.s32.totalorder %v3202_v23, %v3702_v17  ;;  %v3900_v19 = vpop.eup %2717  ;;  %v3912_v9 = vpop.f32.mrb[40].mxu1 }
 0x180   : > { %4945 = vst [vmem:[#allocation12_spill] sm:$0xff] %v3900_v19  ;;  %2731 = vpow2.f32 %v1763_v61  ;;  %v1937_v36 = vadd.f32 %v3615_v60, %v3596_v27  ;;  %v1408_v11 = vsel %vm1280_vm13, %v3742_v28, 0.0  ;;  %v1547_v46 = vadd.f32 %v3777_v8, %v3755_v2  ;;  %v3918_v60 = vpop.f32.mrb[41].mxu1  ;;  %v3920_v51 = vpop.f32.mrb[42].mxu0  ;;  %v4946_v28 = vld [vmem:[#allocation2_spill] sm:$0xff] }
 0x181   : > { %vm1294_vm4 = vcmp.eq.s32.totalorder %v3199_v22, %v3860_v52  ;;  %2733 = vpow2.f32 %v1767_v31  ;;  %v1934_v63 = vadd.f32 %v3566_v14, %v1933_v16  ;;  %v1543_v35 = vadd.f32 %v1542_v39, %v1404_v32  ;;  %v3927_v61 = vpop.f32.mrb[42].mxu1  ;;  %v3929_v14 = vpop.f32.mrb[43].mxu0 }
 0x182   : > { %v1028_v27 = vmul.f32 10.0, %v3722_v49  ;;  %v1938_v29 = vadd.f32 %v4946_v28, %v1937_v36  ;;  %v1548_v2 = vadd.f32 %v1547_v46, %v1408_v11  ;;  %v1030_v8 = vmul.f32 10.0, %v3734_v1  ;;  %v3942_v39 = vpop.permute.xlu0 %1184  ;;  %v4947_v36 = vld [vmem:[#allocation3_spill] sm:$0xff] }
 0x183   : > { %v1029_v57 = vmul.f32 10.0, %v3736_v4  ;;  %vm1288_vm5 = vcmp.eq.s32.totalorder %v3202_v23, %v3715_v48  ;;  %1935 = vadd.xlane.f32.xlu0 %v1934_v63  ;;  %1544 = vadd.xlane.f32.xlu1 %v1543_v35  ;;  %v3935_v31 = vmul.f32 10.0, %v3746_v38  ;;  %v1032_v1 = vmul.f32 10.0, %v3748_v5  ;;  %v3938_v4 = vpop.f32.mrb[43].mxu1  ;;  %v3940_v16 = vpop.eup %2719 }
 0x184   : > { %v1417_v49 = vsel %vm1289_vm14, %v1028_v27, 0.0  ;;  %v1769_v32 = vmul.f32 1.442695, %v1028_v27  ;;  %v1939_v11 = vadd.f32 %v4947_v36, %v1938_v29  ;;  %v3948_v46 = vsel %vm1291_vm15, %v1030_v8, 0.0  ;;  %v3953_v35 = vpop.eup %2721 }
 0x185   : > { %v1773_v63 = vmul.f32 1.442695, %v1030_v8  ;;  %v1418_v38 = vsel %vm1290_vm0, %v1029_v57, 0.0  ;;  %4948 = vst [vmem:[#allocation2_spill] sm:$0xff] %v3953_v35  ;;  %v1771_v27 = vmul.f32 1.442695, %v1029_v57  ;;  %vm1297_vm6 = vcmp.eq.s32.totalorder %v3191_v18, %v3942_v39  ;;  %v3960_v29 = vpop.eup %2723 }
 0x186   : > { %2735 = vpow2.f32 %v1769_v32  ;;  %v3955_v5 = vadd.f32 %v1418_v38, %v1417_v49  ;;  %v1775_v28 = vmul.f32 1.442695, %v3935_v31  ;;  %v1421_v8 = vsel %vm1293_vm1, %v1032_v1, 0.0  ;;  %v3970_v57 = vpop.eup %2725  ;;  %v3972_v49 = vpop.permute.xlu1 %1187 }
 0x187   : > { %2737 = vpow2.f32 %v1773_v63  ;;  %v1777_v36 = vmul.f32 1.442695, %v1032_v1  ;;  %v1034_v19 = vmul.f32 10.0, %v3763_v0  ;;  %vm1299_vm7 = vcmp.eq.s32.totalorder %v3196_v21, %v3942_v39  ;;  %4949 = vst [vmem:[#allocation3_spill] sm:$0xff] %v3970_v57  ;;  %1940 = vadd.xlane.f32.xlu0 %v1939_v11  ;;  %1549 = vadd.xlane.f32.xlu1 %v1548_v2  ;;  %v4950_v1 = vld [vmem:[#allocation4_spill] sm:$0xff]  ;;  %v3980_v38 = vpop.f32.mrb[44].mxu0  ;;  %v3982_v35 = vpop.eup %2727 }
 0x188   : > { %vm1298_vm8 = vcmp.eq.s32.totalorder %v3199_v22, %v3942_v39  ;;  %2739 = vpow2.f32 %v1771_v27  ;;  %v1033_v32 = vmul.f32 10.0, %v3765_v58  ;;  %v3976_v63 = vmul.f32 10.0, %v3773_v13  ;;  %4951 = vst [vmem:[#allocation4_spill] sm:$0xff] %v3982_v35  ;;  %v3997_v58 = vpop.f32.mrb[45].mxu0  ;;  %v3999_v11 = vpop.eup %2729 }
 0x189   : > { %v1942_v0 = vadd.f32 %v3667_v62, %v4950_v1  ;;  %2741 = vpow2.f32 %v1775_v28  ;;  %v3987_v57 = vsel %vm1295_vm2, %v1034_v19, 0.0  ;;  %v1781_v2 = vmul.f32 1.442695, %v1034_v19  ;;  %v3995_v62 = vpop.f32.mrb[44].mxu1  ;;  %4952 = vst [vmem:[#allocation13_spill] sm:$0xff] %v3999_v11 }
 0x18a   : > { %v1412_v13 = vsel %vm1284_vm3, %v3813_v26, 0.0  ;;  %vm1301_vm9 = vcmp.eq.s32.totalorder %v3191_v18, %v3972_v49  ;;  %2743 = vpow2.f32 %v1777_v36  ;;  %v1422_v27 = vsel %vm1294_vm4, %v1033_v32, 0.0  ;;  %v4005_v1 = vpop.f32.mrb[45].mxu1  ;;  %v4007_v17 = vpop.eup %2731 }
 0x18b   : > { %v1779_v19 = vmul.f32 1.442695, %v1033_v32  ;;  %v1783_v28 = vmul.f32 1.442695, %v3976_v63  ;;  %4953 = vst [vmem:[#allocation14_spill] sm:$0xff] %v4005_v1  ;;  %2745 = vpow2.f32 %v1781_v2  ;;  %v4009_v26 = vadd.f32 %v1422_v27, %v1421_v8  ;;  %v4018_v36 = vpop.f32.mrb[46].mxu0  ;;  %v4022_v1 = vpop.eup %2733 }
 0x18c   : > { %v1943_v35 = vadd.f32 %v3649_v43, %v1942_v0  ;;  %v1552_v11 = vadd.f32 %v3835_v59, %v3824_v34  ;;  %vm1303_vm10 = vcmp.eq.s32.totalorder %v3196_v21, %v3972_v49  ;;  %vm1292_vm11 = vcmp.eq.s32.totalorder %v3202_v23, %v3807_v53  ;;  %v4020_v32 = vpop.f32.mrb[46].mxu1  ;;  %4954 = vst [vmem:[#allocation15_spill] sm:$0xff] %v4022_v1  ;;  %v4034_v59 = vpop.f32.mrb[47].mxu0  ;;  %v4955_v2 = vld [vmem:[#allocation5_spill] sm:$0xff] }
 0x18d   : > { %2747 = vpow2.f32 %v1779_v19  ;;  %v1947_v8 = vadd.f32 %v3724_v12, %v3700_v42  ;;  %v1416_v43 = vsel %vm1288_vm5, %v3864_v15, 0.0  ;;  %v1557_v34 = vadd.f32 %v3889_v10, %v3873_v33  ;;  %v4036_v0 = vpop.f32.mrb[47].mxu1  ;;  %v4956_v12 = vld [vmem:[#allocation6_spill] sm:$0xff]  ;;  %v4045_v10 = vpop.permute.xlu0 %1190 }
 0x18e   : > { %vm1302_vm12 = vcmp.eq.s32.totalorder %v3199_v22, %v3972_v49  ;;  %2749 = vpow2.f32 %v1783_v28  ;;  %v1944_v27 = vadd.f32 %v4955_v2, %v1943_v35  ;;  %v1553_v19 = vadd.f32 %v1552_v11, %v1412_v13  ;;  %v4957_v28 = vld [vmem:[#allocation7_spill] sm:$0xff] }
 0x18f   : > { %v1036_v42 = vmul.f32 10.0, %v3805_v54  ;;  %v1948_v1 = vadd.f32 %v4956_v12, %v1947_v8  ;;  %v1558_v48 = vadd.f32 %v1557_v34, %v1416_v43  ;;  %v1038_v15 = vmul.f32 10.0, %v3816_v24 }
 0x190   : > { %v1037_v33 = vmul.f32 10.0, %v3829_v6  ;;  %vm1296_vm13 = vcmp.eq.s32.totalorder %v3202_v23, %v3860_v52  ;;  %1945 = vadd.xlane.f32.xlu0 %v1944_v27  ;;  %1554 = vadd.xlane.f32.xlu1 %v1553_v19  ;;  %v4051_v54 = vmul.f32 10.0, %v3831_v45  ;;  %v1040_v11 = vmul.f32 10.0, %v3840_v50  ;;  %v4054_v24 = vpop.eup %2735  ;;  %v4056_v6 = vpop.permute.xlu1 %1193 }
 0x191   : > { %v1425_v35 = vsel %vm1297_vm6, %v1036_v42, 0.0  ;;  %v1785_v13 = vmul.f32 1.442695, %v1036_v42  ;;  %v1949_v8 = vadd.f32 %v4957_v28, %v1948_v1  ;;  %v4062_v43 = vsel %vm1299_vm7, %v1038_v15, 0.0  ;;  %v4067_v45 = vpop.f32.mrb[48].mxu0  ;;  %v4069_v27 = vpop.eup %2737 }
 0x192   : > { %v1789_v34 = vmul.f32 1.442695, %v1038_v15  ;;  %v1426_v2 = vsel %vm1298_vm8, %v1037_v33, 0.0  ;;  %4958 = vst [vmem:[#allocation5_spill] sm:$0xff] %v4067_v45  ;;  %4959 = vst [vmem:[#allocation6_spill] sm:$0xff] %v4069_v27  ;;  %vm1305_vm14 = vcmp.eq.s32.totalorder %v3191_v18, %v4045_v10  ;;  %v4076_v42 = vpop.f32.mrb[48].mxu1  ;;  %v4080_v15 = vpop.eup %2739  ;;  %vm1307_vm15 = vcmp.eq.s32.totalorder %v3196_v21, %v4045_v10 }
 0x193   : > { %2751 = vpow2.f32 %v1785_v13  ;;  %v4071_v50 = vadd.f32 %v1426_v2, %v1425_v35  ;;  %v1787_v19 = vmul.f32 1.442695, %v1037_v33  ;;  %v1791_v1 = vmul.f32 1.442695, %v4051_v54  ;;  %4960 = vst [vmem:[#allocation7_spill] sm:$0xff] %v4076_v42  ;;  %v4078_v12 = vpop.f32.mrb[49].mxu0 }
 0x194   : > { %4961 = vst [vmem:[#allocation16_spill] sm:$0xff] %v4078_v12  ;;  %2753 = vpow2.f32 %v1789_v34  ;;  %v1429_v28 = vsel %vm1301_vm9, %v1040_v11, 0.0  ;;  %v1793_v13 = vmul.f32 1.442695, %v1040_v11  ;;  %v1042_v35 = vmul.f32 10.0, %v3842_v25  ;;  %v4090_v33 = vpop.f32.mrb[49].mxu1  ;;  %v4094_v12 = vpop.eup %2741  ;;  %1950 = vadd.xlane.f32.xlu0 %v1949_v8  ;;  %1559 = vadd.xlane.f32.xlu1 %v1558_v48 }
 0x195   : > { %vm1306_vm0 = vcmp.eq.s32.totalorder %v3199_v22, %v4045_v10  ;;  %4962 = vst [vmem:[#allocation17_spill] sm:$0xff] %v4090_v33  ;;  %v4092_v2 = vpop.f32.mrb[50].mxu0  ;;  %2755 = vpow2.f32 %v1787_v19  ;;  %v1041_v34 = vmul.f32 10.0, %v3854_v37  ;;  %v4098_v11 = vmul.f32 10.0, %v3856_v41  ;;  %v4963_v25 = vld [vmem:[#allocation8_spill] sm:$0xff]  ;;  %v4102_v27 = vpop.f32.mrb[50].mxu1 }
 0x196   : > { %v1952_v42 = vadd.f32 %v3775_v55, %v4963_v25  ;;  %v4104_v45 = vpop.f32.mrb[51].mxu0  ;;  %v4106_v33 = vpop.eup %2743  ;;  %2757 = vpow2.f32 %v1791_v1  ;;  %v4111_v48 = vsel %vm1303_vm10, %v1042_v35, 0.0  ;;  %v1797_v8 = vmul.f32 1.442695, %v1042_v35 }
 0x197   : > { %4964 = vst [vmem:[#allocation8_spill] sm:$0xff] %v4106_v33  ;;  %v1420_v37 = vsel %vm1292_vm11, %v3935_v31, 0.0  ;;  %vm1309_vm1 = vcmp.eq.s32.totalorder %v3191_v18, %v4056_v6  ;;  %v4119_v55 = vpop.f32.mrb[51].mxu1  ;;  %v4121_v41 = vpop.eup %2745  ;;  %2759 = vpow2.f32 %v1793_v13  ;;  %v1430_v19 = vsel %vm1302_vm12, %v1041_v34, 0.0  ;;  %v4966_v31 = vld [vmem:[#allocation9_spill] sm:$0xff] }
 0x198   : > { %4965 = vst [vmem:[#allocation18_spill] sm:$0xff] %v4119_v55  ;;  %v1795_v1 = vmul.f32 1.442695, %v1041_v34  ;;  %v1799_v35 = vmul.f32 1.442695, %v4098_v11  ;;  %v4127_v25 = vpop.eup %2747  ;;  %2761 = vpow2.f32 %v1797_v8  ;;  %v4129_v53 = vadd.f32 %v1430_v19, %v1429_v28  ;;  %v4152_v19 = vpop.f32.mrb[52].mxu0 }
 0x199   : > { %v1953_v33 = vadd.f32 %v4966_v31, %v1952_v42  ;;  %v1562_v55 = vadd.f32 %v3955_v5, %v3948_v46  ;;  %vm1311_vm2 = vcmp.eq.s32.totalorder %v3196_v21, %v4056_v6  ;;  %vm1300_vm3 = vcmp.eq.s32.totalorder %v3202_v23, %v3942_v39  ;;  %v4138_v13 = vpop.eup %2749 }
 0x19a   : > { %2763 = vpow2.f32 %v1795_v1  ;;  %v1957_v34 = vadd.f32 %v3844_v30, %v3818_v44  ;;  %v1424_v42 = vsel %vm1296_vm13, %v3976_v63, 0.0  ;;  %v1567_v46 = vadd.f32 %v4009_v26, %v3987_v57  ;;  %v4967_v44 = vld [vmem:[#allocation10_spill] sm:$0xff]  ;;  %v4159_v57 = vpop.f32.mrb[52].mxu1  ;;  %v4161_v26 = vpop.f32.mrb[53].mxu0 }
 0x19b   : > { %vm1310_vm4 = vcmp.eq.s32.totalorder %v3199_v22, %v4056_v6  ;;  %2765 = vpow2.f32 %v1799_v35  ;;  %v1954_v5 = vadd.f32 %v3786_v3, %v1953_v33  ;;  %v1563_v28 = vadd.f32 %v1562_v55, %v1420_v37  ;;  %v4163_v3 = vpop.permute.xlu0 %1196  ;;  %v4172_v37 = vpop.f32.mrb[53].mxu1  ;;  %v4968_v35 = vld [vmem:[#allocation11_spill] sm:$0xff] }
 0x19c   : > { %v1044_v8 = vmul.f32 10.0, %v3898_v47  ;;  %v1958_v30 = vadd.f32 %v4967_v44, %v1957_v34  ;;  %v1568_v1 = vadd.f32 %v1567_v46, %v1424_v42  ;;  %v1046_v52 = vmul.f32 10.0, %v3912_v9 }
 0x19d   : > { %v1045_v63 = vmul.f32 10.0, %v3914_v40  ;;  %vm1304_vm5 = vcmp.eq.s32.totalorder %v3202_v23, %v3972_v49  ;;  %1955 = vadd.xlane.f32.xlu0 %v1954_v5  ;;  %1564 = vadd.xlane.f32.xlu1 %v1563_v28  ;;  %v4169_v9 = vmul.f32 10.0, %v3918_v60  ;;  %v1048_v40 = vmul.f32 10.0, %v3920_v51  ;;  %v4174_v55 = vpop.eup %2751  ;;  %v4185_v60 = vpop.f32.mrb[54].mxu0 }
 0x19e   : > { %v1433_v47 = vsel %vm1305_vm14, %v1044_v8, 0.0  ;;  %v1801_v33 = vmul.f32 1.442695, %v1044_v8  ;;  %v1959_v31 = vadd.f32 %v4968_v35, %v1958_v30  ;;  %v4180_v34 = vsel %vm1307_vm15, %v1046_v52, 0.0  ;;  %v4187_v5 = vpop.f32.mrb[54].mxu1  ;;  %v4189_v51 = vpop.eup %2753 }
 0x19f   : > { %v1805_v42 = vmul.f32 1.442695, %v1046_v52  ;;  %v1434_v46 = vsel %vm1306_vm0, %v1045_v63, 0.0  ;;  %4969 = vst [vmem:[#allocation9_spill] sm:$0xff] %v4187_v5  ;;  %v1803_v8 = vmul.f32 1.442695, %v1045_v63  ;;  %vm1313_vm6 = vcmp.eq.s32.totalorder %v3191_v18, %v4163_v3  ;;  %v4200_v35 = vpop.eup %2755 }
 0x1a0   : > { %2767 = vpow2.f32 %v1801_v33  ;;  %v4191_v28 = vadd.f32 %v1434_v46, %v1433_v47  ;;  %v1807_v44 = vmul.f32 1.442695, %v4169_v9  ;;  %v4196_v30 = vpop.f32.mrb[55].mxu0  ;;  %v4198_v52 = vpop.f32.mrb[55].mxu1  ;;  %v1437_v5 = vsel %vm1309_vm1, %v1048_v40, 0.0 }
 0x1a1   : > { %4970 = vst [vmem:[#allocation10_spill] sm:$0xff] %v4196_v30  ;;  %4971 = vst [vmem:[#allocation11_spill] sm:$0xff] %v4198_v52  ;;  %2769 = vpow2.f32 %v1805_v42  ;;  %v1809_v33 = vmul.f32 1.442695, %v1048_v40  ;;  %v1050_v47 = vmul.f32 10.0, %v3927_v61  ;;  %vm1315_vm7 = vcmp.eq.s32.totalorder %v3196_v21, %v4163_v3  ;;  %v4210_v63 = vpop.eup %2757  ;;  %v4212_v46 = vpop.permute.xlu1 %1199  ;;  %1960 = vadd.xlane.f32.xlu0 %v1959_v31  ;;  %1569 = vadd.xlane.f32.xlu1 %v1568_v1 }
 0x1a2   : > { %vm1314_vm8 = vcmp.eq.s32.totalorder %v3199_v22, %v4163_v3  ;;  %4972 = vst [vmem:[#allocation19_spill] sm:$0xff] %v4210_v63  ;;  %2771 = vpow2.f32 %v1803_v8  ;;  %v1049_v42 = vmul.f32 10.0, %v3929_v14  ;;  %v4216_v52 = vmul.f32 10.0, %v3938_v4  ;;  %v4220_v40 = vpop.eup %2759  ;;  %v4239_v31 = vpop.f32.mrb[56].mxu0 }
 0x1a3   : > { %v1962_v61 = vadd.f32 %v3887_v56, %v3868_v7  ;;  %2773 = vpow2.f32 %v1807_v44  ;;  %v4225_v30 = vsel %vm1311_vm2, %v1050_v47, 0.0  ;;  %v1813_v63 = vmul.f32 1.442695, %v1050_v47  ;;  %v4233_v4 = vpop.eup %2761  ;;  %v4254_v47 = vpop.f32.mrb[57].mxu0 }
 0x1a4   : > { %v1428_v14 = vsel %vm1300_vm3, %v4051_v54, 0.0  ;;  %vm1317_vm9 = vcmp.eq.s32.totalorder %v3191_v18, %v4212_v46  ;;  %2775 = vpow2.f32 %v1809_v33  ;;  %v1438_v7 = vsel %vm1310_vm4, %v1049_v42, 0.0  ;;  %v4241_v8 = vpop.eup %2763  ;;  %v4252_v33 = vpop.f32.mrb[56].mxu1  ;;  %4974 = vst [vmem:[#allocation21_spill] sm:$0xff] %v4254_v47 }
 0x1a5   : > { %v1811_v56 = vmul.f32 1.442695, %v1049_v42  ;;  %v1815_v1 = vmul.f32 1.442695, %v4216_v52  ;;  %2777 = vpow2.f32 %v1813_v63  ;;  %v4243_v39 = vadd.f32 %v1438_v7, %v1437_v5  ;;  %4973 = vst [vmem:[#allocation20_spill] sm:$0xff] %v4252_v33  ;;  %v4256_v42 = vpop.eup %2765  ;;  %v4270_v63 = vpop.f32.mrb[58].mxu0 }
 0x1a6   : > { %v1963_v54 = vadd.f32 %v3881_v20, %v1962_v61  ;;  %v1572_v44 = vadd.f32 %v4071_v50, %v4062_v43  ;;  %vm1319_vm10 = vcmp.eq.s32.totalorder %v3196_v21, %v4212_v46  ;;  %vm1308_vm11 = vcmp.eq.s32.totalorder %v3202_v23, %v4045_v10  ;;  %v4268_v50 = vpop.f32.mrb[57].mxu1  ;;  %4975 = vst [vmem:[#allocation22_spill] sm:$0xff] %v4270_v63  ;;  %v4976_v61 = vld [vmem:[#allocation12_spill] sm:$0xff]  ;;  %v4276_v49 = vpop.f32.mrb[59].mxu0 }
 0x1a7   : > { %2779 = vpow2.f32 %v1811_v56  ;;  %v1967_v5 = vadd.f32 %v3960_v29, %v3940_v16  ;;  %v1432_v20 = vsel %vm1304_vm5, %v4098_v11, 0.0  ;;  %v1577_v43 = vadd.f32 %v4129_v53, %v4111_v48  ;;  %v4274_v29 = vpop.f32.mrb[58].mxu1  ;;  %4978 = vst [vmem:[#allocation23_spill] sm:$0xff] %v4276_v49  ;;  %v4979_v11 = vld [vmem:[#allocation2_spill] sm:$0xff] }
 0x1a8   : > { %vm1318_vm12 = vcmp.eq.s32.totalorder %v3199_v22, %v4212_v46  ;;  %2781 = vpow2.f32 %v1815_v1  ;;  %v1964_v7 = vadd.f32 %v4976_v61, %v1963_v54  ;;  %v1573_v56 = vadd.f32 %v1572_v44, %v1428_v14  ;;  %4977 = vst [vmem:[#allocation12_spill] sm:$0xff] %v4274_v29  ;;  %v4283_v1 = vpop.f32.mrb[59].mxu1  ;;  %v4981_v54 = vld [vmem:[#allocation14_spill] sm:$0xff] }
 0x1a9   : > { %v1052_v16 = vmul.f32 10.0, %v3980_v38  ;;  %v1968_v47 = vadd.f32 %v4979_v11, %v1967_v5  ;;  %v1578_v48 = vadd.f32 %v1577_v43, %v1432_v20  ;;  %v1054_v53 = vmul.f32 10.0, %v3995_v62  ;;  %4980 = vst [vmem:[#allocation2_spill] sm:$0xff] %v4283_v1  ;;  %v4982_v20 = vld [vmem:[#allocation3_spill] sm:$0xff]  ;;  %v4334_v49 = vpop.f32.mrb[60].mxu1 }
 0x1aa   : > { %v1053_v33 = vmul.f32 10.0, %v3997_v58  ;;  %vm1312_vm13 = vcmp.eq.s32.totalorder %v3202_v23, %v4056_v6  ;;  %1965 = vadd.xlane.f32.xlu0 %v1964_v7  ;;  %1574 = vadd.xlane.f32.xlu1 %v1573_v56  ;;  %v4289_v44 = vmul.f32 10.0, %v4981_v54  ;;  %v1056_v5 = vmul.f32 10.0, %v4018_v36  ;;  %v4292_v62 = vpop.eup %2767  ;;  %v4294_v58 = vpop.permute.xlu0 %1202  ;;  %4985 = vst [vmem:[#allocation3_spill] sm:$0xff] %v4334_v49 }
 0x1ab   : > { %v1441_v38 = vsel %vm1313_vm6, %v1052_v16, 0.0  ;;  %v1817_v14 = vmul.f32 1.442695, %v1052_v16  ;;  %v1969_v43 = vadd.f32 %v4982_v20, %v1968_v47  ;;  %v4300_v61 = vsel %vm1315_vm7, %v1054_v53, 0.0  ;;  %v4305_v16 = vpop.eup %2769  ;;  %v4314_v20 = vpop.permute.xlu1 %1205 }
 0x1ac   : > { %v1821_v7 = vmul.f32 1.442695, %v1054_v53  ;;  %v1442_v56 = vsel %vm1314_vm8, %v1053_v33, 0.0  ;;  %v1819_v11 = vmul.f32 1.442695, %v1053_v33  ;;  %vm1321_vm14 = vcmp.eq.s32.totalorder %v3191_v18, %v4294_v58  ;;  %v4312_v47 = vpop.eup %2771  ;;  %v4324_v33 = vpop.f32.mrb[60].mxu0 }
 0x1ad   : > { %2783 = vpow2.f32 %v1817_v14  ;;  %v4307_v36 = vadd.f32 %v1442_v56, %v1441_v38  ;;  %v1823_v54 = vmul.f32 1.442695, %v4289_v44  ;;  %v1445_v53 = vsel %vm1317_vm9, %v1056_v5, 0.0  ;;  %4983 = vst [vmem:[#allocation14_spill] sm:$0xff] %v4324_v33  ;;  %v4326_v38 = vpop.eup %2773  ;;  %v4336_v29 = vpop.f32.mrb[61].mxu0 }
 0x1ae   : > { %2785 = vpow2.f32 %v1821_v7  ;;  %v1825_v1 = vmul.f32 1.442695, %v1056_v5  ;;  %v1058_v14 = vmul.f32 10.0, %v4020_v32  ;;  %vm1323_vm15 = vcmp.eq.s32.totalorder %v3196_v21, %v4294_v58  ;;  %1970 = vadd.xlane.f32.xlu0 %v1969_v43  ;;  %1579 = vadd.xlane.f32.xlu1 %v1578_v48  ;;  %v4984_v5 = vld [vmem:[#allocation4_spill] sm:$0xff]  ;;  %v4338_v63 = vpop.eup %2775 }
 0x1af   : > { %vm1322_vm0 = vcmp.eq.s32.totalorder %v3199_v22, %v4294_v58  ;;  %2787 = vpow2.f32 %v1819_v11  ;;  %v1057_v7 = vmul.f32 10.0, %v4034_v59  ;;  %v4330_v56 = vmul.f32 10.0, %v4036_v0  ;;  %4986 = vst [vmem:[#allocation4_spill] sm:$0xff] %v4336_v29  ;;  %v4353_v0 = vpop.f32.mrb[62].mxu0  ;;  %v4355_v11 = vpop.eup %2777 }
 0x1b0   : > { %v1972_v32 = vadd.f32 %v4007_v17, %v4984_v5  ;;  %2789 = vpow2.f32 %v1823_v54  ;;  %v4343_v48 = vsel %vm1319_vm10, %v1058_v14, 0.0  ;;  %v1829_v43 = vmul.f32 1.442695, %v1058_v14  ;;  %v4351_v17 = vpop.f32.mrb[61].mxu1  ;;  %4988 = vst [vmem:[#allocation25_spill] sm:$0xff] %v4353_v0 }
 0x1b1   : > { %v1436_v59 = vsel %vm1308_vm11, %v4169_v9, 0.0  ;;  %vm1325_vm1 = vcmp.eq.s32.totalorder %v3191_v18, %v4314_v20  ;;  %4987 = vst [vmem:[#allocation24_spill] sm:$0xff] %v4351_v17  ;;  %2791 = vpow2.f32 %v1825_v1  ;;  %v1446_v54 = vsel %vm1318_vm12, %v1057_v7, 0.0  ;;  %v4361_v29 = vpop.f32.mrb[62].mxu1  ;;  %v4363_v10 = vpop.eup %2779  ;;  %v4990_v17 = vld [vmem:[#allocation13_spill] sm:$0xff] }
 0x1b2   : > { %v1827_v14 = vmul.f32 1.442695, %v1057_v7  ;;  %v1831_v5 = vmul.f32 1.442695, %v4330_v56  ;;  %4989 = vst [vmem:[#allocation26_spill] sm:$0xff] %v4361_v29  ;;  %2793 = vpow2.f32 %v1829_v43  ;;  %v4365_v9 = vadd.f32 %v1446_v54, %v1445_v53  ;;  %v4374_v1 = vpop.f32.mrb[63].mxu0  ;;  %v4378_v29 = vpop.eup %2781 }
 0x1b3   : > { %v1973_v49 = vadd.f32 %v4990_v17, %v1972_v32  ;;  %v1582_v0 = vadd.f32 %v4191_v28, %v4180_v34  ;;  %vm1327_vm2 = vcmp.eq.s32.totalorder %v3196_v21, %v4314_v20  ;;  %vm1316_vm3 = vcmp.eq.s32.totalorder %v3202_v23, %v4163_v3  ;;  %4991 = vst [vmem:[#allocation13_spill] sm:$0xff] %v4374_v1  ;;  %v4376_v7 = vpop.f32.mrb[63].mxu1  ;;  %v4994_v32 = vld [vmem:[#allocation15_spill] sm:$0xff]  ;;  %v4995_v54 = vld [vmem:[#allocation5_spill] sm:$0xff] }
 0x1b4   : > { %4992 = vst [vmem:[#allocation27_spill] sm:$0xff] %v4376_v7  ;;  %4993 = vst [vmem:[#allocation28_spill] sm:$0xff] %v4378_v29  ;;  %2795 = vpow2.f32 %v1827_v14  ;;  %v1977_v53 = vadd.f32 %v4080_v15, %v4054_v24  ;;  %v1440_v34 = vsel %vm1312_vm13, %v4216_v52, 0.0  ;;  %v1587_v28 = vadd.f32 %v4243_v39, %v4225_v30  ;;  %v4996_v7 = vld [vmem:[#allocation6_spill] sm:$0xff]  ;;  %v4997_v15 = vld [vmem:[#allocation7_spill] sm:$0xff] }
 0x1b5   : > { %vm1326_vm4 = vcmp.eq.s32.totalorder %v3199_v22, %v4314_v20  ;;  %2797 = vpow2.f32 %v1831_v5  ;;  %v1974_v43 = vadd.f32 %v4994_v32, %v1973_v49  ;;  %v1583_v17 = vadd.f32 %v1582_v0, %v1436_v59  ;;  %v4998_v29 = vld [vmem:[#allocation16_spill] sm:$0xff]  ;;  %v4999_v39 = vld [vmem:[#allocation17_spill] sm:$0xff]  ;;  %v4406_v5 = vpop.permute.xlu0 %1208 }
 0x1b6   : > { %v1060_v14 = vmul.f32 10.0, %v4995_v54  ;;  %v1978_v1 = vadd.f32 %v4996_v7, %v1977_v53  ;;  %v1588_v24 = vadd.f32 %v1587_v28, %v1440_v34  ;;  %v1062_v33 = vmul.f32 10.0, %v4997_v15 }
 0x1b7   : > { %v1061_v6 = vmul.f32 10.0, %v4998_v29  ;;  %vm1320_vm5 = vcmp.eq.s32.totalorder %v3202_v23, %v4212_v46  ;;  %1975 = vadd.xlane.f32.xlu0 %v1974_v43  ;;  %1584 = vadd.xlane.f32.xlu1 %v1583_v17  ;;  %v4401_v49 = vmul.f32 10.0, %v4999_v39  ;;  %v1064_v59 = vmul.f32 10.0, %v4092_v2  ;;  %v4404_v0 = vpop.eup %2783 }
 0x1b8   : > { %v1449_v30 = vsel %vm1321_vm14, %v1060_v14, 0.0  ;;  %v1833_v52 = vmul.f32 1.442695, %v1060_v14  ;;  %v1979_v29 = vadd.f32 %v4094_v12, %v1978_v1  ;;  %v4412_v7 = vsel %vm1323_vm15, %v1062_v33, 0.0  ;;  %v4417_v28 = vpop.eup %2785  ;;  %v4436_v14 = vpop.permute.xlu1 %1211 }
 0x1b9   : > { %v1837_v53 = vmul.f32 1.442695, %v1062_v33  ;;  %v1450_v34 = vsel %vm1322_vm0, %v1061_v6, 0.0  ;;  %v1835_v32 = vmul.f32 1.442695, %v1061_v6  ;;  %vm1329_vm6 = vcmp.eq.s32.totalorder %v3191_v18, %v4406_v5  ;;  %v4424_v12 = vpop.eup %2787  ;;  %v5000_v6 = vld [vmem:[#allocation18_spill] sm:$0xff] }
 0x1ba   : > { %2799 = vpow2.f32 %v1833_v52  ;;  %v4419_v2 = vadd.f32 %v1450_v34, %v1449_v30  ;;  %v1839_v43 = vmul.f32 1.442695, %v4401_v49  ;;  %v1453_v33 = vsel %vm1325_vm1, %v1064_v59, 0.0  ;;  %v4434_v54 = vpop.eup %2789  ;;  %v5001_v52 = vld [vmem:[#allocation8_spill] sm:$0xff] }
 0x1bb   : > { %2801 = vpow2.f32 %v1837_v53  ;;  %v1841_v1 = vmul.f32 1.442695, %v1064_v59  ;;  %v1066_v17 = vmul.f32 10.0, %v4102_v27  ;;  %vm1331_vm7 = vcmp.eq.s32.totalorder %v3196_v21, %v4406_v5  ;;  %1980 = vadd.xlane.f32.xlu0 %v1979_v29  ;;  %1589 = vadd.xlane.f32.xlu1 %v1588_v24  ;;  %v4444_v39 = vpop.eup %2791 }
 0x1bc   : > { %vm1330_vm8 = vcmp.eq.s32.totalorder %v3199_v22, %v4406_v5  ;;  %2803 = vpow2.f32 %v1835_v32  ;;  %v1065_v15 = vmul.f32 10.0, %v4104_v45  ;;  %v4440_v30 = vmul.f32 10.0, %v5000_v6  ;;  %v4457_v24 = vpop.eup %2793 }
 0x1bd   : > { %v1982_v27 = vadd.f32 %v4127_v25, %v5001_v52  ;;  %2805 = vpow2.f32 %v1839_v43  ;;  %v4449_v59 = vsel %vm1327_vm2, %v1066_v17, 0.0  ;;  %v1845_v53 = vmul.f32 1.442695, %v1066_v17 }
 0x1be   : > { %v1444_v45 = vsel %vm1316_vm3, %v4289_v44, 0.0  ;;  %vm1333_vm9 = vcmp.eq.s32.totalorder %v3191_v18, %v4436_v14  ;;  %2807 = vpow2.f32 %v1841_v1  ;;  %v1454_v25 = vsel %vm1326_vm4, %v1065_v15, 0.0  ;;  %v4463_v32 = vpop.eup %2795 }
 0x1bf   : > { %v1843_v29 = vmul.f32 1.442695, %v1065_v15  ;;  %v1847_v34 = vmul.f32 1.442695, %v4440_v30  ;;  %2809 = vpow2.f32 %v1845_v53  ;;  %v4465_v43 = vadd.f32 %v1454_v25, %v1453_v33  ;;  %v4474_v1 = vpop.eup %2797 }
 0x1c0   : > { %v1983_v3 = vadd.f32 %v4121_v41, %v1982_v27  ;;  %v1592_v44 = vadd.f32 %v4307_v36, %v4300_v61  ;;  %vm1335_vm10 = vcmp.eq.s32.totalorder %v3196_v21, %v4436_v14  ;;  %vm1324_vm11 = vcmp.eq.s32.totalorder %v3202_v23, %v4294_v58 }
 0x1c1   : > { %2811 = vpow2.f32 %v1843_v29  ;;  %v1987_v17 = vadd.f32 %v4200_v35, %v4174_v55  ;;  %v1448_v41 = vsel %vm1320_vm5, %v4330_v56, 0.0  ;;  %v1597_v61 = vadd.f32 %v4365_v9, %v4343_v48 }
 0x1c2   : > { %vm1334_vm12 = vcmp.eq.s32.totalorder %v3199_v22, %v4436_v14  ;;  %2813 = vpow2.f32 %v1847_v34  ;;  %v1984_v36 = vadd.f32 %v4138_v13, %v1983_v3  ;;  %v1593_v33 = vadd.f32 %v1592_v44, %v1444_v45  ;;  %v5003_v44 = vld [vmem:[#allocation9_spill] sm:$0xff] }
 0x1c3   : > { %v1068_v15 = vmul.f32 10.0, %v4152_v19  ;;  %v1988_v6 = vadd.f32 %v4189_v51, %v1987_v17  ;;  %v1598_v55 = vadd.f32 %v1597_v61, %v1448_v41  ;;  %v1070_v35 = vmul.f32 10.0, %v4159_v57  ;;  %v4502_v57 = vpop.permute.xlu0 %1214  ;;  %v4532_v61 = vpop.permute.xlu1 %1217 }
 0x1c4   : > { %v1069_v46 = vmul.f32 10.0, %v4161_v26  ;;  %vm1328_vm13 = vcmp.eq.s32.totalorder %v3202_v23, %v4314_v20  ;;  %1985 = vadd.xlane.f32.xlu0 %v1984_v36  ;;  %1594 = vadd.xlane.f32.xlu1 %v1593_v33  ;;  %v4497_v48 = vmul.f32 10.0, %v4172_v37  ;;  %v1072_v19 = vmul.f32 10.0, %v4185_v60  ;;  %v4500_v51 = vpop.eup %2799  ;;  %v5002_v26 = vld [vmem:[#allocation19_spill] sm:$0xff]  ;;  %v5004_v36 = vld [vmem:[#allocation10_spill] sm:$0xff] }
 0x1c5   : > { %v1457_v56 = vsel %vm1329_vm6, %v1068_v15, 0.0  ;;  %v1849_v13 = vmul.f32 1.442695, %v1068_v15  ;;  %v1989_v9 = vadd.f32 %v5002_v26, %v1988_v6  ;;  %v4508_v52 = vsel %vm1331_vm7, %v1070_v35, 0.0  ;;  %v4513_v37 = vpop.eup %2801  ;;  %v5005_v15 = vld [vmem:[#allocation11_spill] sm:$0xff] }
 0x1c6   : > { %v1853_v27 = vmul.f32 1.442695, %v1070_v35  ;;  %v1458_v53 = vsel %vm1330_vm8, %v1069_v46, 0.0  ;;  %v1851_v45 = vmul.f32 1.442695, %v1069_v46  ;;  %vm1337_vm14 = vcmp.eq.s32.totalorder %v3191_v18, %v4502_v57  ;;  %v4520_v29 = vpop.eup %2803 }
 0x1c7   : > { %2815 = vpow2.f32 %v1849_v13  ;;  %v4515_v60 = vadd.f32 %v1458_v53, %v1457_v56  ;;  %v1855_v25 = vmul.f32 1.442695, %v4497_v48  ;;  %v1461_v34 = vsel %vm1333_vm9, %v1072_v19, 0.0  ;;  %v4530_v41 = vpop.eup %2805 }
 0x1c8   : > { %2817 = vpow2.f32 %v1853_v27  ;;  %v1857_v3 = vmul.f32 1.442695, %v1072_v19  ;;  %v1074_v17 = vmul.f32 10.0, %v5003_v44  ;;  %vm1339_vm15 = vcmp.eq.s32.totalorder %v3196_v21, %v4502_v57  ;;  %1990 = vadd.xlane.f32.xlu0 %v1989_v9  ;;  %1599 = vadd.xlane.f32.xlu1 %v1598_v55  ;;  %v4540_v46 = vpop.eup %2807  ;;  %v5006_v44 = vld [vmem:[#allocation20_spill] sm:$0xff] }
 0x1c9   : > { %vm1338_vm0 = vcmp.eq.s32.totalorder %v3199_v22, %v4502_v57  ;;  %2819 = vpow2.f32 %v1851_v45  ;;  %v1073_v33 = vmul.f32 10.0, %v5004_v36  ;;  %v4536_v6 = vmul.f32 10.0, %v5005_v15  ;;  %v4553_v19 = vpop.eup %2809 }
 0x1ca   : > { %v1992_v35 = vadd.f32 %v4241_v8, %v4220_v40  ;;  %2821 = vpow2.f32 %v1855_v25  ;;  %v4545_v56 = vsel %vm1335_vm10, %v1074_v17, 0.0  ;;  %v1861_v13 = vmul.f32 1.442695, %v1074_v17 }
 0x1cb   : > { %v1452_v55 = vsel %vm1324_vm11, %v4401_v49, 0.0  ;;  %vm1341_vm1 = vcmp.eq.s32.totalorder %v3191_v18, %v4532_v61  ;;  %2823 = vpow2.f32 %v1857_v3  ;;  %v1462_v40 = vsel %vm1334_vm12, %v1073_v33, 0.0  ;;  %v4559_v9 = vpop.eup %2811  ;;  %v4584_v3 = vpop.permute.xlu0 %1220 }
 0x1cc   : > { %v1859_v8 = vmul.f32 1.442695, %v1073_v33  ;;  %v1863_v26 = vmul.f32 1.442695, %v4536_v6  ;;  %2825 = vpow2.f32 %v1861_v13  ;;  %v4561_v27 = vadd.f32 %v1462_v40, %v1461_v34  ;;  %v4570_v53 = vpop.eup %2813 }
 0x1cd   : > { %v1993_v58 = vadd.f32 %v4233_v4, %v1992_v35  ;;  %v1602_v49 = vadd.f32 %v4419_v2, %v4412_v7  ;;  %vm1343_vm2 = vcmp.eq.s32.totalorder %v3196_v21, %v4532_v61  ;;  %vm1332_vm3 = vcmp.eq.s32.totalorder %v3202_v23, %v4406_v5 }
 0x1ce   : > { %2827 = vpow2.f32 %v1859_v8  ;;  %v1997_v45 = vadd.f32 %v4312_v47, %v4292_v62  ;;  %v1456_v4 = vsel %vm1328_vm13, %v4440_v30, 0.0  ;;  %v1607_v7 = vadd.f32 %v4465_v43, %v4449_v59  ;;  %v5007_v30 = vld [vmem:[#allocation21_spill] sm:$0xff]  ;;  %v5008_v43 = vld [vmem:[#allocation22_spill] sm:$0xff] }
 0x1cf   : > { %vm1342_vm4 = vcmp.eq.s32.totalorder %v3199_v22, %v4532_v61  ;;  %2829 = vpow2.f32 %v1863_v26  ;;  %v1994_v2 = vadd.f32 %v4256_v42, %v1993_v58  ;;  %v1603_v25 = vadd.f32 %v1602_v49, %v1452_v55 }
 0x1d0   : > { %v1076_v34 = vmul.f32 10.0, %v4239_v31  ;;  %v1998_v62 = vadd.f32 %v4305_v16, %v1997_v45  ;;  %v1608_v47 = vadd.f32 %v1607_v7, %v1456_v4  ;;  %v1078_v20 = vmul.f32 10.0, %v5006_v44  ;;  %v5009_v45 = vld [vmem:[#allocation12_spill] sm:$0xff] }
 0x1d1   : > { %v1077_v17 = vmul.f32 10.0, %v5007_v30  ;;  %vm1336_vm5 = vcmp.eq.s32.totalorder %v3202_v23, %v4436_v14  ;;  %1995 = vadd.xlane.f32.xlu0 %v1994_v2  ;;  %1604 = vadd.xlane.f32.xlu1 %v1603_v25  ;;  %v4595_v31 = vmul.f32 10.0, %v4268_v50  ;;  %v1080_v16 = vmul.f32 10.0, %v5008_v43  ;;  %v4598_v36 = vpop.eup %2815  ;;  %v4611_v50 = vpop.permute.xlu1 %1223  ;;  %v5010_v2 = vld [vmem:[#allocation23_spill] sm:$0xff] }
 0x1d2   : > { %v1465_v42 = vsel %vm1337_vm14, %v1076_v34, 0.0  ;;  %v1865_v59 = vmul.f32 1.442695, %v1076_v34  ;;  %v1999_v33 = vadd.f32 %v4326_v38, %v1998_v62  ;;  %v4604_v15 = vsel %vm1339_vm15, %v1078_v20, 0.0  ;;  %v4609_v55 = vpop.eup %2817  ;;  %v5011_v34 = vld [vmem:[#allocation2_spill] sm:$0xff]  ;;  %v5014_v14 = vld [vmem:[#allocation3_spill] sm:$0xff] }
 0x1d3   : > { %v1869_v35 = vmul.f32 1.442695, %v1078_v20  ;;  %v1466_v13 = vsel %vm1338_vm0, %v1077_v17, 0.0  ;;  %v1867_v8 = vmul.f32 1.442695, %v1077_v17  ;;  %vm1345_vm6 = vcmp.eq.s32.totalorder %v3191_v18, %v4584_v3  ;;  %v4618_v26 = vpop.eup %2819 }
 0x1d4   : > { %2831 = vpow2.f32 %v1865_v59  ;;  %v4613_v40 = vadd.f32 %v1466_v13, %v1465_v42  ;;  %v1871_v38 = vmul.f32 1.442695, %v4595_v31  ;;  %v1469_v58 = vsel %vm1341_vm1, %v1080_v16, 0.0  ;;  %v4628_v7 = vpop.eup %2821 }
 0x1d5   : > { %2833 = vpow2.f32 %v1869_v35  ;;  %v1873_v49 = vmul.f32 1.442695, %v1080_v16  ;;  %v1082_v4 = vmul.f32 10.0, %v5009_v45  ;;  %vm1347_vm7 = vcmp.eq.s32.totalorder %v3196_v21, %v4584_v3  ;;  %2000 = vadd.xlane.f32.xlu0 %v1999_v33  ;;  %1609 = vadd.xlane.f32.xlu1 %v1608_v47  ;;  %v4636_v20 = vpop.eup %2823 }
 0x1d6   : > { %vm1346_vm8 = vcmp.eq.s32.totalorder %v3199_v22, %v4584_v3  ;;  %2835 = vpow2.f32 %v1867_v8  ;;  %v1081_v25 = vmul.f32 10.0, %v5010_v2  ;;  %v4632_v62 = vmul.f32 10.0, %v5011_v34  ;;  %v4649_v42 = vpop.eup %2825 }
 0x1d7   : > { %v2002_v44 = vadd.f32 %v4363_v10, %v4338_v63  ;;  %2837 = vpow2.f32 %v1871_v38  ;;  %v4641_v30 = vsel %vm1343_vm2, %v1082_v4, 0.0  ;;  %v1877_v17 = vmul.f32 1.442695, %v1082_v4  ;;  %v5013_v38 = vld [vmem:[#allocation14_spill] sm:$0xff]  ;;  %v5016_v4 = vld [vmem:[#allocation24_spill] sm:$0xff] }
 0x1d8   : > { %v1460_v47 = vsel %vm1332_vm3, %v4497_v48, 0.0  ;;  %vm1349_vm9 = vcmp.eq.s32.totalorder %v3191_v18, %v4611_v50  ;;  %2839 = vpow2.f32 %v1873_v49  ;;  %v1470_v63 = vsel %vm1342_vm4, %v1081_v25, 0.0  ;;  %v4655_v43 = vpop.eup %2827  ;;  %v5015_v49 = vld [vmem:[#allocation4_spill] sm:$0xff] }
 0x1d9   : > { %v1875_v10 = vmul.f32 1.442695, %v1081_v25  ;;  %v1879_v59 = vmul.f32 1.442695, %v4632_v62  ;;  %2841 = vpow2.f32 %v1877_v17  ;;  %v4657_v16 = vadd.f32 %v1470_v63, %v1469_v58  ;;  %v4666_v33 = vpop.eup %2829  ;;  %v5017_v25 = vld [vmem:[#allocation25_spill] sm:$0xff] }
 0x1da   : > { %v2003_v5 = vadd.f32 %v4355_v11, %v2002_v44  ;;  %v1612_v48 = vadd.f32 %v4515_v60, %v4508_v52  ;;  %vm1351_vm10 = vcmp.eq.s32.totalorder %v3196_v21, %v4611_v50  ;;  %vm1340_vm11 = vcmp.eq.s32.totalorder %v3202_v23, %v4502_v57  ;;  %v5012_v60 = vld [vmem:[#allocation28_spill] sm:$0xff] }
 0x1db   : > { %2843 = vpow2.f32 %v1875_v10  ;;  %v2007_v35 = vadd.f32 %v4424_v12, %v4404_v0  ;;  %v1464_v11 = vsel %vm1336_vm5, %v4536_v6, 0.0  ;;  %v1617_v52 = vadd.f32 %v4561_v27, %v4545_v56 }
 0x1dc   : > { %vm1350_vm12 = vcmp.eq.s32.totalorder %v3199_v22, %v4611_v50  ;;  %vm1352_vm13 = vcmp.eq.s32.totalorder %v3202_v23, %v4611_v50  ;;  %2845 = vpow2.f32 %v1879_v59  ;;  %v2004_v13 = vadd.f32 %v5012_v60, %v2003_v5 }
 0x1dd   : > { %v1613_v8 = vadd.f32 %v1612_v48, %v1460_v47  ;;  %v1084_v0 = vmul.f32 10.0, %v5013_v38  ;;  %v2008_v12 = vadd.f32 %v4417_v28, %v2007_v35  ;;  %v1618_v58 = vadd.f32 %v1617_v52, %v1464_v11  ;;  %v5018_v52 = vld [vmem:[#allocation26_spill] sm:$0xff] }
 0x1de   : > { %v1086_v6 = vmul.f32 10.0, %v5014_v14  ;;  %v1085_v45 = vmul.f32 10.0, %v5015_v49  ;;  %vm1344_vm14 = vcmp.eq.s32.totalorder %v3202_v23, %v4532_v61  ;;  %2005 = vadd.xlane.f32.xlu0 %v2004_v13  ;;  %v1087_v2 = vmul.f32 10.0, %v5016_v4  ;;  %v4692_v28 = vpop.eup %2831 }
 0x1df   : > { %1614 = vadd.xlane.f32.xlu1 %v1613_v8  ;;  %v1473_v56 = vsel %vm1345_vm6, %v1084_v0, 0.0  ;;  %v1881_v27 = vmul.f32 1.442695, %v1084_v0  ;;  %v1088_v34 = vmul.f32 10.0, %v5017_v25  ;;  %v2009_v44 = vadd.f32 %v4434_v54, %v2008_v12  ;;  %v4703_v10 = vpop.eup %2833  ;;  %v5019_v8 = vld [vmem:[#allocation13_spill] sm:$0xff]  ;;  %v5020_v0 = vld [vmem:[#allocation27_spill] sm:$0xff] }
 0x1e0   : > { %v1475_v17 = vsel %vm1347_vm7, %v1086_v6, 0.0  ;;  %v1885_v47 = vmul.f32 1.442695, %v1086_v6  ;;  %v1474_v63 = vsel %vm1346_vm8, %v1085_v45, 0.0  ;;  %vm1348_vm15 = vcmp.eq.s32.totalorder %v3202_v23, %v4584_v3  ;;  %v2836_v35 = vpop.eup %2835 }
 0x1e1   : > { %2847 = vpow2.f32 %v1881_v27  ;;  %v1631_v59 = vadd.f32 %v1474_v63, %v1473_v56  ;;  %v1883_v5 = vmul.f32 1.442695, %v1085_v45  ;;  %v1887_v48 = vmul.f32 1.442695, %v1087_v2  ;;  %v4709_v13 = vpop.eup %2837 }
 0x1e2   : > { %2849 = vpow2.f32 %v1885_v47  ;;  %v1477_v54 = vsel %vm1349_vm9, %v1088_v34, 0.0  ;;  %v1889_v11 = vmul.f32 1.442695, %v1088_v34  ;;  %v1090_v60 = vmul.f32 10.0, %v5018_v52  ;;  %2010 = vadd.xlane.f32.xlu0 %v2009_v44  ;;  %v2840_v6 = vpop.eup %2839 }
 0x1e3   : > { %1619 = vadd.xlane.f32.xlu1 %v1618_v58  ;;  %2851 = vpow2.f32 %v1883_v5  ;;  %v1089_v38 = vmul.f32 10.0, %v5019_v8  ;;  %v1091_v12 = vmul.f32 10.0, %v5020_v0  ;;  %v2012_v14 = vadd.f32 %v4463_v32, %v4444_v39  ;;  %v2842_v45 = vpop.eup %2841  ;;  %v4728_v32 = vpop.xlane.xlu0 %1484 }
 0x1e4   : > { %2853 = vpow2.f32 %v1887_v48  ;;  %v1479_v18 = vsel %vm1351_vm10, %v1090_v60, 0.0  ;;  %v1893_v49 = vmul.f32 1.442695, %v1090_v60  ;;  %v1468_v58 = vsel %vm1340_vm11, %v4595_v31, 0.0 }
 0x1e5   : > { %2855 = vpow2.f32 %v1889_v11  ;;  %v1478_v56 = vsel %vm1350_vm12, %v1089_v38, 0.0  ;;  %v1891_v27 = vmul.f32 1.442695, %v1089_v38  ;;  %v1480_v39 = vsel %vm1352_vm13, %v1091_v12, 0.0  ;;  %v2844_v21 = vpop.eup %2843 }
 0x1e6   : > { %2857 = vpow2.f32 %v1893_v49  ;;  %v1636_v4 = vadd.f32 %v1478_v56, %v1477_v54  ;;  %v1895_v25 = vmul.f32 1.442695, %v1091_v12  ;;  %v2013_v57 = vadd.f32 %v4457_v24, %v2012_v14  ;;  %v2846_v31 = vpop.eup %2845 }
 0x1e7   : > { %2859 = vpow2.f32 %v1891_v27  ;;  %v1622_v34 = vadd.f32 %v4613_v40, %v4604_v15  ;;  %v2017_v22 = vadd.f32 %v4520_v29, %v4500_v51  ;;  %v1472_v50 = vsel %vm1344_vm14, %v4632_v62, 0.0  ;;  %v4748_v40 = vpop.xlane.xlu0 %1494 }
 0x1e8   : > { %2861 = vpow2.f32 %v1895_v25  ;;  %v2014_v44 = vadd.f32 %v4474_v1, %v2013_v57  ;;  %v1627_v47 = vadd.f32 %v4657_v16, %v4641_v30  ;;  %v2022_v24 = vadd.f32 %v4559_v9, %v4540_v46  ;;  %v4753_v16 = vpop.xlane.xlu1 %1489 }
 0x1e9   : > { %v1623_v63 = vadd.f32 %v1622_v34, %v1468_v58  ;;  %v2018_v15 = vadd.f32 %v4513_v37, %v2017_v22  ;;  %v1476_v51 = vsel %vm1348_vm15, %v1087_v2, 0.0  ;;  %v1632_v29 = vadd.f32 %v1631_v59, %v1475_v17 }
 0x1ea   : > { %2015 = vadd.xlane.f32.xlu0 %v2014_v44  ;;  %v1628_v61 = vadd.f32 %v1627_v47, %v1472_v50  ;;  %v2023_v1 = vadd.f32 %v4553_v19, %v2022_v24  ;;  %v2032_v62 = vadd.f32 %v4655_v43, %v4636_v20  ;;  %v1637_v30 = vadd.f32 %v1636_v4, %v1479_v18 }
 0x1eb   : > { %v2848_v46 = vpop.eup %2847  ;;  %1624 = vadd.xlane.f32.xlu1 %v1623_v63  ;;  %v2019_v37 = vadd.f32 %v4530_v41, %v2018_v15  ;;  %v1633_v9 = vadd.f32 %v1632_v29, %v1476_v51  ;;  %v2042_v23 = vadd.f32 %v2844_v21, %v2840_v6  ;;  %v2027_v3 = vadd.f32 %v4618_v26, %v4598_v36 }
 0x1ec   : > { %v2850_v2 = vpop.eup %2849  ;;  %v2024_v17 = vadd.f32 %v4570_v53, %v2023_v1  ;;  %v2033_v19 = vadd.f32 %v4649_v42, %v2032_v62  ;;  %v1638_v59 = vadd.f32 %v1637_v30, %v1480_v39  ;;  %v2037_v20 = vadd.f32 %v2836_v35, %v4692_v28  ;;  %v4767_v35 = vpop.xlane.xlu0 %1499 }
 0x1ed   : > { %v2852_v43 = vpop.eup %2851  ;;  %v2043_v5 = vadd.f32 %v2842_v45, %v2042_v23  ;;  %v2028_v48 = vadd.f32 %v4609_v55, %v2027_v3  ;;  %v2057_v54 = vmul.f32 1.442695, %v4728_v32  ;;  %v2059_v41 = vmul.f32 1.442695, %v4753_v16  ;;  %v1901_v6 = vpop.xlane.xlu1 %1900 }
 0x1ee   : > { %v2854_v11 = vpop.eup %2853  ;;  %2020 = vadd.xlane.f32.xlu0 %v2019_v37  ;;  %v2034_v36 = vadd.f32 %v4666_v33, %v2033_v19  ;;  %v2038_v26 = vadd.f32 %v4703_v10, %v2037_v20  ;;  %v2047_v53 = vadd.f32 %v2852_v43, %v2848_v46  ;;  %v2061_v0 = vmul.f32 1.442695, %v4748_v40 }
 0x1ef   : > { %v2856_v52 = vpop.eup %2855  ;;  %1629 = vadd.xlane.f32.xlu1 %v1628_v61  ;;  %v2044_v42 = vadd.f32 %v2846_v31, %v2043_v5  ;;  %v2029_v28 = vadd.f32 %v4628_v7, %v2028_v48  ;;  %2863 = vpow2.f32 %v2057_v54  ;;  %v2063_v7 = vmul.f32 1.442695, %v4767_v35 }
 0x1f0   : > { %v2858_v55 = vpop.eup %2857  ;;  %v2039_v60 = vadd.f32 %v4709_v13, %v2038_v26  ;;  %v2048_v8 = vadd.f32 %v2850_v2, %v2047_v53  ;;  %2865 = vpow2.f32 %v2059_v41  ;;  %v1906_v18 = vpop.xlane.xlu0 %1905  ;;  %vm2249_vm0 = vcmask 7168  }
 0x1f1   : > { %v2860_v38 = vpop.eup %2859  ;;  %2867 = vpow2.f32 %v2061_v0  ;;  %v4774_v27 = vpop.xlane.xlu1 %1504 }
 0x1f2   : > { %v2862_v33 = vpop.eup %2861  ;;  %2025 = vadd.xlane.f32.xlu0 %v2024_v17  ;;  %v2052_v10 = vadd.f32 %v2860_v38, %v2856_v52  ;;  %v2049_v12 = vadd.f32 %v2854_v11, %v2048_v8  ;;  %2869 = vpow2.f32 %v2063_v7  ;;  %v2065_v21 = vmul.f32 1.442695, %v4774_v27 }
 0x1f3   : > { %1634 = vadd.xlane.f32.xlu1 %v1633_v9 }
 0x1f4   : > { %v2053_v14 = vadd.f32 %v2858_v55, %v2052_v10  ;;  %v4772_v58 = vpop.xlane.xlu0 %1509 }
 0x1f5   : > { %v4777_v50 = vpop.xlane.xlu1 %1514  ;;  %v2067_v47 = vmul.f32 1.442695, %v4772_v58 }
 0x1f6   : > { %2035 = vadd.xlane.f32.xlu0 %v2034_v36  ;;  %v2054_v49 = vadd.f32 %v2862_v33, %v2053_v14  ;;  %v2069_v62 = vmul.f32 1.442695, %v4777_v50 }
 0x1f7   : > { %1639 = vadd.xlane.f32.xlu1 %v1638_v59 }
 0x1f8   : > { %v1911_v25 = vpop.xlane.xlu0 %1910 }
 0x1f9   : > { %v2864_v13 = vpop.eup %2863  ;;  %v4781_v29 = vpop.xlane.xlu1 %1524 }
 0x1fa   : > { %v2866_v45 = vpop.eup %2865  ;;  %2045 = vadd.xlane.f32.xlu0 %v2044_v42  ;;  %v2121_v56 = vadd.f32 %v2864_v13, %v1901_v6  ;;  %v2073_v26 = vmul.f32 1.442695, %v4781_v29 }
 0x1fb   : > { %2030 = vadd.xlane.f32.xlu1 %v2029_v28  ;;  %v2122_v39 = vadd.f32 %v2866_v45, %v1906_v18  ;;  %v2868_v4 = vpop.eup %2867 }
 0x1fc   : > { %2871 = vlog2.f32 %v2121_v56  ;;  %v2123_v57 = vadd.f32 %v2868_v4, %v1911_v25  ;;  %v2870_v31 = vpop.eup %2869  ;;  %v1916_v34 = vpop.xlane.xlu0 %1915 }
 0x1fd   : > { %2873 = vlog2.f32 %v2122_v39  ;;  %v2124_v22 = vadd.f32 %v2870_v31, %v1916_v34 }
 0x1fe   : > { %2055 = vadd.xlane.f32.xlu0 %v2054_v49  ;;  %2875 = vpow2.f32 %v2065_v21 }
 0x1ff   : > { %2040 = vadd.xlane.f32.xlu1 %v2039_v60  ;;  %2877 = vlog2.f32 %v2123_v57 }
 0x200   : > { %2879 = vlog2.f32 %v2124_v22  ;;  %v4783_v61 = vpop.xlane.xlu0 %1519 }
 0x201   : > { %2881 = vpow2.f32 %v2067_v47  ;;  %v2071_v20 = vmul.f32 1.442695, %v4783_v61 }
 0x202   : > { %2883 = vpow2.f32 %v2069_v62 }
 0x203   : > { %2050 = vadd.xlane.f32.xlu1 %v2049_v12 }
 0x204   : > { %v1921_v3 = vpop.xlane.xlu0 %1920 }
 0x206   : > { %v2872_v44 = vpop.eup %2871 }
 0x207   : > { %v2874_v24 = vpop.eup %2873  ;;  %v2154_v63 = vmul.f32 0.6931472, %v2872_v44 }
 0x208   : > { %v2156_v15 = vmul.f32 0.6931472, %v2874_v24  ;;  %v2876_v30 = vpop.eup %2875  ;;  %v1926_v11 = vpop.xlane.xlu0 %1925 }
 0x209   : > { %v2217_v51 = vsub.f32 %v2154_v63, %v4728_v32  ;;  %v2878_v9 = vpop.eup %2877  ;;  %v4789_v32 = vpop.xlane.xlu1 %1529  ;;  %v2125_v17 = vadd.f32 %v2876_v30, %v1921_v3 }
 0x20a   : > { %v2218_v1 = vsub.f32 %v2156_v15, %v4753_v16  ;;  %v2158_v2 = vmul.f32 0.6931472, %v2878_v9  ;;  %v2880_v19 = vpop.eup %2879 }
 0x20b   : > { %v2250_v46 = vsel %vm2249_vm0, %v2217_v51, 0.0  ;;  %v2160_v16 = vmul.f32 0.6931472, %v2880_v19  ;;  %2885 = vlog2.f32 %v2125_v17  ;;  %v2882_v54 = vpop.eup %2881 }
 0x20c   : > { %v2251_v37 = vsel %vm2249_vm0, %v2218_v1, 0.0  ;;  %v2219_v59 = vsub.f32 %v2158_v2, %v4748_v40  ;;  %2887 = vpow2.f32 %v2071_v20  ;;  %v2126_v53 = vadd.f32 %v2882_v54, %v1926_v11  ;;  %v2884_v52 = vpop.eup %2883  ;;  %v1931_v42 = vpop.xlane.xlu0 %1930 }
 0x20d   : > { %v2252_v23 = vadd.f32 %v2251_v37, %v2250_v46  ;;  %v2220_v48 = vsub.f32 %v2160_v16, %v4767_v35  ;;  %v4795_v41 = vpop.xlane.xlu1 %1534  ;;  %v2127_v55 = vadd.f32 %v2884_v52, %v1931_v42  ;;  %v2075_v35 = vmul.f32 1.442695, %v4789_v32 }
 0x20e   : > { %v2253_v43 = vsel %vm2249_vm0, %v2219_v59, 0.0  ;;  %2889 = vlog2.f32 %v2126_v53  ;;  %v2077_v14 = vmul.f32 1.442695, %v4795_v41 }
 0x20f   : > { %v2254_v5 = vadd.f32 %v2253_v43, %v2252_v23  ;;  %v2255_v36 = vsel %vm2249_vm0, %v2220_v48, 0.0  ;;  %2891 = vpow2.f32 %v2073_v26 }
 0x210   : > { %2893 = vlog2.f32 %v2127_v55  ;;  %v1936_v10 = vpop.xlane.xlu0 %1935 }
 0x211   : > { %v2256_v40 = vadd.f32 %v2255_v36, %v2254_v5  ;;  %v4799_v28 = vpop.xlane.xlu1 %1539  ;;  %2895 = vpow2.f32 %v2075_v35 }
 0x212   : > { %v2079_v25 = vmul.f32 1.442695, %v4799_v28 }
 0x214   : > { %v1941_v45 = vpop.xlane.xlu0 %1940 }
 0x215   : > { %v2886_v60 = vpop.eup %2885  ;;  %v4803_v33 = vpop.xlane.xlu1 %1544 }
 0x216   : > { %v2162_v8 = vmul.f32 0.6931472, %v2886_v60  ;;  %v2888_v0 = vpop.eup %2887  ;;  %v2081_v63 = vmul.f32 1.442695, %v4803_v33 }
 0x217   : > { %v2128_v6 = vadd.f32 %v2888_v0, %v1936_v10 }
 0x218   : > { %v2221_v38 = vsub.f32 %v2162_v8, %v4774_v27  ;;  %v2890_v18 = vpop.eup %2889 }
 0x219   : > { %v2892_v49 = vpop.eup %2891  ;;  %v2164_v13 = vmul.f32 0.6931472, %v2890_v18  ;;  %2897 = vlog2.f32 %v2128_v6  ;;  %v4807_v56 = vpop.xlane.xlu1 %1549 }
 0x21a   : > { %v2257_v12 = vsel %vm2249_vm0, %v2221_v38, 0.0  ;;  %2899 = vpow2.f32 %v2077_v14  ;;  %v2129_v27 = vadd.f32 %v2892_v49, %v1941_v45  ;;  %v2894_v21 = vpop.eup %2893  ;;  %v2083_v3 = vmul.f32 1.442695, %v4807_v56 }
 0x21b   : > { %v2258_v7 = vadd.f32 %v2257_v12, %v2256_v40  ;;  %v2222_v39 = vsub.f32 %v2164_v13, %v4772_v58  ;;  %v2166_v57 = vmul.f32 0.6931472, %v2894_v21  ;;  %v2896_v22 = vpop.eup %2895 }
 0x21c   : > { %2901 = vlog2.f32 %v2129_v27 }
 0x21d   : > { %v2259_v4 = vsel %vm2249_vm0, %v2222_v39, 0.0  ;;  %v2223_v34 = vsub.f32 %v2166_v57, %v4777_v50  ;;  %v4813_v44 = vpop.xlane.xlu1 %1554  ;;  %v1946_v47 = vpop.xlane.xlu0 %1945  ;;  %2903 = vpow2.f32 %v2079_v25 }
 0x21e   : > { %v2260_v31 = vadd.f32 %v2259_v4, %v2258_v7  ;;  %v2130_v58 = vadd.f32 %v2896_v22, %v1946_v47 }
 0x21f   : > { %v2261_v24 = vsel %vm2249_vm0, %v2223_v34, 0.0 }
 0x220   : > { %v2262_v15 = vadd.f32 %v2261_v24, %v2260_v31  ;;  %2905 = vlog2.f32 %v2130_v58  ;;  %v2085_v58 = vmul.f32 1.442695, %v4813_v44 }
 0x221   : > { %v1951_v30 = vpop.xlane.xlu0 %1950  ;;  %2907 = vpow2.f32 %v2081_v63  ;;  %v4817_v46 = vpop.xlane.xlu1 %1559 }
 0x223   : > { %v2898_v51 = vpop.eup %2897 }
 0x224   : > { %v2900_v1 = vpop.eup %2899  ;;  %v2168_v62 = vmul.f32 0.6931472, %v2898_v51 }
 0x225   : > { %v2131_v50 = vadd.f32 %v2900_v1, %v1951_v30 }
 0x226   : > { %v2224_v37 = vsub.f32 %v2168_v62, %v4783_v61  ;;  %v2902_v9 = vpop.eup %2901 }
 0x227   : > { %v2170_v2 = vmul.f32 0.6931472, %v2902_v9  ;;  %2909 = vlog2.f32 %v2131_v50  ;;  %v2904_v59 = vpop.eup %2903 }
 0x228   : > { %v2263_v23 = vsel %vm2249_vm0, %v2224_v37, 0.0  ;;  %2911 = vpow2.f32 %v2083_v3 }
 0x229   : > { %v2264_v17 = vadd.f32 %v2263_v23, %v2262_v15  ;;  %v2225_v19 = vsub.f32 %v2170_v2, %v4781_v29  ;;  %v2087_v15 = vmul.f32 1.442695, %v4817_v46 }
 0x22a   : > { %v4823_v16 = vpop.xlane.xlu1 %1564  ;;  %v1956_v20 = vpop.xlane.xlu0 %1955 }
 0x22b   : > { %v2265_v43 = vsel %vm2249_vm0, %v2225_v19, 0.0  ;;  %v2132_v5 = vadd.f32 %v2904_v59, %v1956_v20  ;;  %v2906_v61 = vpop.eup %2905  ;;  %v2089_v62 = vmul.f32 1.442695, %v4823_v16 }
 0x22c   : > { %v2266_v48 = vadd.f32 %v2265_v43, %v2264_v17  ;;  %v2908_v54 = vpop.eup %2907  ;;  %v2172_v11 = vmul.f32 0.6931472, %v2906_v61 }
 0x22d   : > { %2913 = vlog2.f32 %v2132_v5 }
 0x22e   : > { %v1961_v36 = vpop.xlane.xlu0 %1960  ;;  %v4826_v26 = vpop.xlane.xlu1 %1569  ;;  %v2226_v40 = vsub.f32 %v2172_v11, %v4789_v32 }
 0x22f   : > { %v2133_v53 = vadd.f32 %v2908_v54, %v1961_v36  ;;  %v2091_v30 = vmul.f32 1.442695, %v4826_v26 }
 0x230   : > { %v2267_v52 = vsel %vm2249_vm0, %v2226_v40, 0.0 }
 0x231   : > { %v2910_v29 = vpop.eup %2909  ;;  %2915 = vlog2.f32 %v2133_v53  ;;  %v2268_v55 = vadd.f32 %v2267_v52, %v2266_v48 }
 0x232   : > { %v2174_v42 = vmul.f32 0.6931472, %v2910_v29  ;;  %v2912_v35 = vpop.eup %2911 }
 0x234   : > { %v2227_v60 = vsub.f32 %v2174_v42, %v4795_v41 }
 0x236   : > { %v2269_v0 = vsel %vm2249_vm0, %v2227_v60, 0.0 }
 0x237   : > { %v4831_v8 = vpop.xlane.xlu1 %1574  ;;  %v1966_v38 = vpop.xlane.xlu0 %1965  ;;  %v2270_v12 = vadd.f32 %v2269_v0, %v2268_v55 }
 0x238   : > { %v2134_v10 = vadd.f32 %v2912_v35, %v1966_v38  ;;  %v2914_v14 = vpop.eup %2913 }
 0x239   : > { %v2176_v6 = vmul.f32 0.6931472, %v2914_v14 }
 0x23a   : > { %2917 = vlog2.f32 %v2134_v10 }
 0x23b   : > { %v4834_v32 = vpop.xlane.xlu1 %1579  ;;  %v1971_v7 = vpop.xlane.xlu0 %1970  ;;  %v2228_v18 = vsub.f32 %v2176_v6, %v4799_v28  ;;  %2919 = vpow2.f32 %v2085_v58 }
 0x23c   : > { %v2916_v49 = vpop.eup %2915  ;;  %2921 = vpow2.f32 %v2087_v15  ;;  %v2095_v50 = vmul.f32 1.442695, %v4834_v32 }
 0x23d   : > { %v2271_v13 = vsel %vm2249_vm0, %v2228_v18, 0.0  ;;  %v2178_v41 = vmul.f32 0.6931472, %v2916_v49  ;;  %2923 = vpow2.f32 %v2089_v62 }
 0x23e   : > { %v2272_v45 = vadd.f32 %v2271_v13, %v2270_v12  ;;  %2925 = vpow2.f32 %v2091_v30 }
 0x23f   : > { %v2229_v27 = vsub.f32 %v2178_v41, %v4803_v33 }
 0x241   : > { %v2273_v4 = vsel %vm2249_vm0, %v2229_v27, 0.0 }
 0x242   : > { %v2274_v25 = vadd.f32 %v2273_v4, %v2272_v45 }
 0x244   : > { %v4839_v39 = vpop.xlane.xlu1 %1584  ;;  %v1976_v21 = vpop.xlane.xlu0 %1975 }
 0x245   : > { %v2918_v57 = vpop.eup %2917  ;;  %v2097_v23 = vmul.f32 1.442695, %v4839_v39 }
 0x246   : > { %v2180_v31 = vmul.f32 0.6931472, %v2918_v57  ;;  %v2920_v2 = vpop.eup %2919 }
 0x247   : > { %v2135_v59 = vadd.f32 %v2920_v2, %v1971_v7  ;;  %v2922_v20 = vpop.eup %2921 }
 0x248   : > { %v4842_v34 = vpop.xlane.xlu1 %1589  ;;  %v1981_v22 = vpop.xlane.xlu0 %1980  ;;  %v2230_v28 = vsub.f32 %v2180_v31, %v4807_v56  ;;  %v2093_v56 = vmul.f32 1.442695, %v4831_v8  ;;  %v2136_v5 = vadd.f32 %v2922_v20, %v1976_v21 }
 0x249   : > { %v2099_v3 = vmul.f32 1.442695, %v4842_v34  ;;  %v2924_v48 = vpop.eup %2923 }
 0x24a   : > { %v2275_v47 = vsel %vm2249_vm0, %v2230_v28, 0.0  ;;  %2927 = vpow2.f32 %v2093_v56  ;;  %v2926_v54 = vpop.eup %2925  ;;  %v2137_v11 = vadd.f32 %v2924_v48, %v1981_v22 }
 0x24b   : > { %v4846_v24 = vadd.f32 %v2275_v47, %v2274_v25  ;;  %2929 = vpow2.f32 %v2095_v50 }
 0x24c   : > { %2931 = vpow2.f32 %v2097_v23 }
 0x24d   : > { %2933 = vpow2.f32 %v2099_v3 }
 0x24e   : > { %2935 = vlog2.f32 %v2135_v59 }
 0x251   : > { %v4848_v63 = vpop.xlane.xlu1 %1594  ;;  %v1986_v33 = vpop.xlane.xlu0 %1985 }
 0x252   : > { %v2101_v43 = vmul.f32 1.442695, %v4848_v63  ;;  %v2138_v36 = vadd.f32 %v2926_v54, %v1986_v33 }
 0x254   : > { %2937 = vpow2.f32 %v2101_v43  ;;  %v2928_v52 = vpop.eup %2927 }
 0x255   : > { %v4852_v51 = vpop.xlane.xlu1 %1599  ;;  %v1991_v1 = vpop.xlane.xlu0 %1990  ;;  %2939 = vlog2.f32 %v2136_v5 }
 0x256   : > { %v2103_v61 = vmul.f32 1.442695, %v4852_v51  ;;  %v2930_v42 = vpop.eup %2929  ;;  %v2139_v55 = vadd.f32 %v2928_v52, %v1991_v1 }
 0x257   : > { %v2932_v0 = vpop.eup %2931 }
 0x258   : > { %2941 = vpow2.f32 %v2103_v61  ;;  %v2934_v12 = vpop.eup %2933 }
 0x259   : > { %2943 = vlog2.f32 %v2137_v11  ;;  %v2936_v7 = vpop.eup %2935 }
 0x25a   : > { %2945 = vlog2.f32 %v2138_v36  ;;  %v2182_v21 = vmul.f32 0.6931472, %v2936_v7 }
 0x25c   : > { %v2231_v58 = vsub.f32 %v2182_v21, %v4813_v44 }
 0x25e   : > { %v4858_v37 = vpop.xlane.xlu1 %1604  ;;  %v1996_v9 = vpop.xlane.xlu0 %1995  ;;  %v2277_v44 = vsel %vm2249_vm0, %v2231_v58, 0.0 }
 0x25f   : > { %v2105_v29 = vmul.f32 1.442695, %v4858_v37  ;;  %v2140_v60 = vadd.f32 %v2930_v42, %v1996_v9  ;;  %v2938_v49 = vpop.eup %2937 }
 0x260   : > { %v2940_v13 = vpop.eup %2939 }
 0x261   : > { %2947 = vpow2.f32 %v2105_v29  ;;  %v2184_v28 = vmul.f32 0.6931472, %v2940_v13  ;;  %v2278_v29 = vadd.f32 %v2277_v44, %v4846_v24 }
 0x262   : > { %v4862_v17 = vpop.xlane.xlu1 %1609  ;;  %v2001_v19 = vpop.xlane.xlu0 %2000  ;;  %2949 = vlog2.f32 %v2139_v55 }
 0x263   : > { %v2107_v35 = vmul.f32 1.442695, %v4862_v17  ;;  %v2141_v14 = vadd.f32 %v2932_v0, %v2001_v19  ;;  %2951 = vlog2.f32 %v2140_v60  ;;  %v2942_v27 = vpop.eup %2941  ;;  %v2232_v23 = vsub.f32 %v2184_v28, %v4817_v46 }
 0x264   : > { %v2944_v57 = vpop.eup %2943 }
 0x265   : > { %2953 = vpow2.f32 %v2107_v35  ;;  %v2946_v22 = vpop.eup %2945  ;;  %v2186_v15 = vmul.f32 0.6931472, %v2944_v57  ;;  %v2279_v46 = vsel %vm2249_vm0, %v2232_v23, 0.0 }
 0x266   : > { %2955 = vlog2.f32 %v2141_v14  ;;  %v2188_v3 = vmul.f32 0.6931472, %v2946_v22  ;;  %v2280_v0 = vadd.f32 %v2279_v46, %v2278_v29 }
 0x267   : > { %v2233_v59 = vsub.f32 %v2186_v15, %v4823_v16 }
 0x268   : > { %v2234_v11 = vsub.f32 %v2188_v3, %v4826_v26 }
 0x269   : > { %v2281_v16 = vsel %vm2249_vm0, %v2233_v59, 0.0 }
 0x26a   : > { %v2283_v14 = vsel %vm2249_vm0, %v2234_v11, 0.0 }
 0x26b   : > { %v2006_v40 = vpop.xlane.xlu0 %2005  ;;  %v2948_v47 = vpop.eup %2947 }
 0x26c   : > { %v4866_v53 = vpop.xlane.xlu1 %1614  ;;  %v2142_v6 = vadd.f32 %v2934_v12, %v2006_v40  ;;  %v2950_v30 = vpop.eup %2949 }
 0x26d   : > { %v2109_v4 = vmul.f32 1.442695, %v4866_v53  ;;  %v2952_v9 = vpop.eup %2951  ;;  %v2190_v20 = vmul.f32 0.6931472, %v2950_v30 }
 0x26e   : > { %2957 = vlog2.f32 %v2142_v6  ;;  %v2192_v36 = vmul.f32 0.6931472, %v2952_v9 }
 0x26f   : > { %v2011_v38 = vpop.xlane.xlu0 %2010  ;;  %v2954_v2 = vpop.eup %2953  ;;  %v2235_v42 = vsub.f32 %v2190_v20, %v4831_v8 }
 0x270   : > { %v4870_v10 = vpop.xlane.xlu1 %1619  ;;  %v2143_v41 = vadd.f32 %v2938_v49, %v2011_v38  ;;  %v2956_v48 = vpop.eup %2955  ;;  %v2236_v6 = vsub.f32 %v2192_v36, %v4834_v32 }
 0x271   : > { %v2111_v18 = vmul.f32 1.442695, %v4870_v10  ;;  %v2194_v55 = vmul.f32 0.6931472, %v2956_v48  ;;  %v2285_v13 = vsel %vm2249_vm0, %v2235_v42, 0.0 }
 0x273   : > { %2959 = vpow2.f32 %v2111_v18  ;;  %v2282_v18 = vadd.f32 %v2281_v16, %v2280_v0 }
 0x274   : > { %2961 = vlog2.f32 %v2143_v41  ;;  %v2237_v41 = vsub.f32 %v2194_v55, %v4839_v39 }
 0x275   : > { %2963 = vpow2.f32 %v2109_v4  ;;  %v2284_v4 = vadd.f32 %v2283_v14, %v2282_v18 }
 0x276   : > { %v2289_v15 = vsel %vm2249_vm0, %v2237_v41, 0.0 }
 0x277   : > { %v2016_v45 = vpop.xlane.xlu0 %2015 }
 0x278   : > { %v4874_v25 = vpop.xlane.xlu1 %1624  ;;  %v2144_v31 = vadd.f32 %v2942_v27, %v2016_v45  ;;  %v2958_v54 = vpop.eup %2957 }
 0x279   : > { %v2113_v56 = vmul.f32 1.442695, %v4874_v25  ;;  %v2196_v24 = vmul.f32 0.6931472, %v2958_v54 }
 0x27a   : > { %2965 = vlog2.f32 %v2144_v31  ;;  %v2287_v31 = vsel %vm2249_vm0, %v2236_v6, 0.0 }
 0x27b   : > { %v2021_v33 = vpop.xlane.xlu0 %2020  ;;  %v2238_v32 = vsub.f32 %v2196_v24, %v4842_v34 }
 0x27c   : > { %v4877_v1 = vpop.xlane.xlu1 %1629  ;;  %v2145_v62 = vadd.f32 %v2948_v47, %v2021_v33  ;;  %v2286_v33 = vadd.f32 %v2285_v13, %v2284_v4 }
 0x27d   : > { %v2115_v50 = vmul.f32 1.442695, %v4877_v1  ;;  %v2960_v40 = vpop.eup %2959  ;;  %v2291_v9 = vsel %vm2249_vm0, %v2238_v32, 0.0 }
 0x27e   : > { %2967 = vlog2.f32 %v2145_v62  ;;  %v2962_v38 = vpop.eup %2961 }
 0x27f   : > { %2969 = vpow2.f32 %v2115_v50  ;;  %v2026_v19 = vpop.xlane.xlu0 %2025  ;;  %v2964_v26 = vpop.eup %2963  ;;  %v2198_v45 = vmul.f32 0.6931472, %v2962_v38 }
 0x280   : > { %v4884_v43 = vpop.xlane.xlu1 %1634  ;;  %v2146_v5 = vadd.f32 %v2954_v2, %v2026_v19  ;;  %2971 = vpow2.f32 %v2113_v56  ;;  %v2288_v56 = vadd.f32 %v2287_v31, %v2286_v33 }
 0x281   : > { %v2117_v61 = vmul.f32 1.442695, %v4884_v43  ;;  %v2239_v62 = vsub.f32 %v2198_v45, %v4848_v63 }
 0x282   : > { %2973 = vlog2.f32 %v2146_v5  ;;  %v2290_v2 = vadd.f32 %v2289_v15, %v2288_v56 }
 0x283   : > { %v2036_v52 = vpop.xlane.xlu0 %2035  ;;  %2975 = vpow2.f32 %v2117_v61  ;;  %v2293_v44 = vsel %vm2249_vm0, %v2239_v62, 0.0 }
 0x284   : > { %v4892_v60 = vpop.xlane.xlu1 %1639  ;;  %v2148_v35 = vadd.f32 %v2960_v40, %v2036_v52  ;;  %v2966_v7 = vpop.eup %2965  ;;  %v2292_v5 = vadd.f32 %v2291_v9, %v2290_v2 }
 0x285   : > { %v2119_v12 = vmul.f32 1.442695, %v4892_v60  ;;  %v2200_v22 = vmul.f32 0.6931472, %v2966_v7 }
 0x286   : > { %2977 = vlog2.f32 %v2148_v35 }
 0x287   : > { %2979 = vpow2.f32 %v2119_v12  ;;  %v2046_v8 = vpop.xlane.xlu0 %2045  ;;  %v2240_v23 = vsub.f32 %v2200_v22, %v4852_v51  ;;  %v2294_v51 = vadd.f32 %v2293_v44, %v2292_v5 }
 0x288   : > { %v2968_v49 = vpop.eup %2967  ;;  %v2031_v27 = vpop.xlane.xlu1 %2030 }
 0x289   : > { %v2970_v21 = vpop.eup %2969  ;;  %v2147_v57 = vadd.f32 %v2964_v26, %v2031_v27  ;;  %v2202_v39 = vmul.f32 0.6931472, %v2968_v49  ;;  %v2295_v54 = vsel %vm2249_vm0, %v2240_v23, 0.0 }
 0x28a   : > { %v2150_v28 = vadd.f32 %v2970_v21, %v2046_v8  ;;  %v2972_v47 = vpop.eup %2971  ;;  %v2296_v52 = vadd.f32 %v2295_v54, %v2294_v51 }
 0x28b   : > { %2981 = vlog2.f32 %v2147_v57  ;;  %v2241_v59 = vsub.f32 %v2202_v39, %v4858_v37  ;;  %v2056_v48 = vpop.xlane.xlu0 %2055 }
 0x28c   : > { %v2974_v58 = vpop.eup %2973  ;;  %2983 = vlog2.f32 %v2150_v28  ;;  %v2041_v30 = vpop.xlane.xlu1 %2040 }
 0x28d   : > { %v2149_v50 = vadd.f32 %v2972_v47, %v2041_v30  ;;  %v2204_v34 = vmul.f32 0.6931472, %v2974_v58  ;;  %v2976_v3 = vpop.eup %2975  ;;  %v2297_v36 = vsel %vm2249_vm0, %v2241_v59, 0.0 }
 0x28e   : > { %v2298_v55 = vadd.f32 %v2297_v36, %v2296_v52 }
 0x28f   : > { %2985 = vlog2.f32 %v2149_v50  ;;  %v2242_v46 = vsub.f32 %v2204_v34, %v4862_v17 }
 0x290   : > { %v2978_v19 = vpop.eup %2977  ;;  %v2051_v20 = vpop.xlane.xlu1 %2050 }
 0x291   : > { %v2980_v63 = vpop.eup %2979  ;;  %v2151_v61 = vadd.f32 %v2976_v3, %v2051_v20  ;;  %v2208_v40 = vmul.f32 0.6931472, %v2978_v19  ;;  %v2299_v37 = vsel %vm2249_vm0, %v2242_v46, 0.0 }
 0x292   : > { %v2152_v11 = vadd.f32 %v2980_v63, %v2056_v48  ;;  %v2300_v12 = vadd.f32 %v2299_v37, %v2298_v55 }
 0x293   : > { %2987 = vlog2.f32 %v2151_v61  ;;  %v2244_v35 = vsub.f32 %v2208_v40, %v4870_v10 }
 0x294   : > { %2989 = vlog2.f32 %v2152_v11 }
 0x295   : > { %v2982_v29 = vpop.eup %2981  ;;  %v2303_v24 = vsel %vm2249_vm0, %v2244_v35, 0.0 }
 0x296   : > { %v2984_v16 = vpop.eup %2983  ;;  %v2206_v42 = vmul.f32 0.6931472, %v2982_v29 }
 0x297   : > { %v2212_v0 = vmul.f32 0.6931472, %v2984_v16 }
 0x298   : > { %v2243_v38 = vsub.f32 %v2206_v42, %v4866_v53 }
 0x299   : > { %v2986_v17 = vpop.eup %2985  ;;  %v2246_v7 = vsub.f32 %v2212_v0, %v4877_v1 }
 0x29a   : > { %v2301_v26 = vsel %vm2249_vm0, %v2243_v38, 0.0  ;;  %v2210_v14 = vmul.f32 0.6931472, %v2986_v17 }
 0x29b   : > { %v2302_v6 = vadd.f32 %v2301_v26, %v2300_v12  ;;  %v2307_v21 = vsel %vm2249_vm0, %v2246_v7, 0.0 }
 0x29c   : > { %v2245_v18 = vsub.f32 %v2210_v14, %v4874_v25 }
 0x29d   : > { %v2988_v8 = vpop.eup %2987  ;;  %v2304_v49 = vadd.f32 %v2303_v24, %v2302_v6 }
 0x29e   : > { %v2990_v13 = vpop.eup %2989  ;;  %v2305_v10 = vsel %vm2249_vm0, %v2245_v18, 0.0  ;;  %v2214_v41 = vmul.f32 0.6931472, %v2988_v8 }
 0x29f   : > { %v2216_v53 = vmul.f32 0.6931472, %v2990_v13  ;;  %v2306_v45 = vadd.f32 %v2305_v10, %v2304_v49 }
 0x2a0   : > { %v2247_v27 = vsub.f32 %v2214_v41, %v4884_v43 }
 0x2a1   : > { %v2248_v4 = vsub.f32 %v2216_v53, %v4892_v60  ;;  %v2308_v57 = vadd.f32 %v2307_v21, %v2306_v45 }
 0x2a2   : > { %v2309_v1 = vsel %vm2249_vm0, %v2247_v27, 0.0 }
 0x2a3   : > { %v2310_v25 = vadd.f32 %v2309_v1, %v2308_v57  ;;  %v2311_v31 = vsel %vm2249_vm0, %v2248_v4, 0.0 }
 0x2a5   : > { %v2312_v32 = vadd.f32 %v2311_v31, %v2310_v25 }
 0x2a7   : > { %2313 = vadd.xlane.f32.xlu1 %v2312_v32 }
 0x334   : > { %v2314_v22 = vpop.xlane.xlu1 %2313 }
 0x335   : > { %v2315_v28 = vrot.slane %v2314_v22, 4 }
 0x337   : > { %v2316_v47 = vadd.f32 %v2315_v28, %v2314_v22 }
 0x339   : > { %v2317_v33 = vrot.slane %v2316_v47, 2 }
 0x33b   : > { %v2318_v58 = vadd.f32 %v2317_v33, %v2316_v47 }
 0x33d   : > { %v2319_v43 = vrot.slane %v2318_v58, 1 }
 0x33f   : > { %v2320_v15 = vadd.f32 %v2319_v43, %v2318_v58 }
 0x341   : > { %2546 = vpush %v2320_v15 }
 0x372   : > { %s2547_s17 = spop %2546 }
 0x373   : > { %v2322_v60 = vstv %s2547_s17 }
 0x374   : > { %2324 = vst [vmem:[%s192_s16] sm:$0xff] %v2322_v60 }
 0x375 PF: > { %s13_s12 = sadd.s32 1, %s2997_s12  }
 0x376   : > { %p10_p5 = scmp.ge.s32.totalorder %s13_s12, 4  }
 0x378   :  { %12 = sbr.rel (!%p10_p5) target bundleno = 1 (0x1), region = 65 }

// kernel: hypergcl_forward.4
= control target key start
LH: loop header
LB: loop body
LE: loop exit
PB: predicated region body
PF: predicated region fallthrough
CT: control target
= control target key end

     0   :  { %s4853_s19 = smov 0   ;;  %s5859_s0 = inlined_call_operand.vmem [shape: bf16[512,512], index: 0, kind: input, shape index: {}]   ;;  %s5860_s1 = inlined_call_operand.vmem [shape: f32[512,128], index: 1, kind: input, shape index: {}]   ;;  %s5861_s2 = inlined_call_operand.vmem [shape: bf16[512,128], index: 2, kind: input, shape index: {}]   ;;  %s5862_s3 = inlined_call_operand.vmem [shape: f32[1,128], index: 3, kind: input, shape index: {}]   ;;  %s5863_s4 = inlined_call_operand.vmem [shape: bf16[128,128], index: 4, kind: input, shape index: {}]   ;;  %s5864_s5 = inlined_call_operand.vmem [shape: f32[1,128], index: 5, kind: input, shape index: {}]   ;;  %s5865_s6 = inlined_call_operand.vmem [shape: bf16[128,128], index: 6, kind: input, shape index: {}]   ;;  %s5866_s7 = inlined_call_operand.vmem [shape: f32[1,128], index: 7, kind: input, shape index: {}]   ;;  %s5867_s8 = inlined_call_operand.<no memory space> [shape: f32[1,1], index: 8, kind: input, shape index: {}]   ;;  %s5868_s9 = inlined_call_operand.vmem [shape: f32[512,128], index: 9, kind: output, shape index: {0}]   ;;  %s5869_s10 = inlined_call_operand.vmem [shape: bf16[512,128], index: 10, kind: output, shape index: {1}]   ;;  %s5870_s11 = inlined_call_operand.vmem [shape: bf16[512,128], index: 11, kind: output, shape index: {2}]  }
   0x1   :  { %17 = sst [smem:[#allocation2]] %s5867_s8 }
   0x2 LB: > { %s3503_s20 = sadd.s32 4294967295, %s4788_s19   ;;  %p3507_p0 = scmp.ge.s32.totalorder %s4788_s19, 1  ;;  %s4788_s19 = sphi %s4853_s19, %s23_s19  }
   0x3   : > { %p356_p1 = scmp.lt.s32.totalorder %s4788_s19, 3 }
   0x5   : > { %p357_p2 = pnand %p3507_p0, %p356_p1 }
   0x6   : > { %v4493_v0 = vld [vmem:[%s5861_s2 + $0x40] sm:$0xff] (!%p357_p2)   ;;  %v4497_v4 = vld [vmem:[%s5861_s2 + $0x48] sm:$0xff] (!%p357_p2)   ;;  %v4501_v8 = vld [vmem:[%s5861_s2 + $0x50] sm:$0xff] (!%p357_p2)   ;;  %s3508_s15 = sshll.u32 (!%p357_p2), %s3503_s20, 5  ;;  %s1413_s14 = sld [smem:[#allocation2]] (!%p357_p2) }
   0x7   : > { %360 = sbr.rel (%p357_p2) target bundleno = 1435 (0x59b), region = 56  ;;  %v4494_v1 = vld [vmem:[%s5861_s2 + $0xc0] sm:$0xff] (!%p357_p2)   ;;  %3973 = vmatprep.subr.bf16.mxu0 (!%p357_p2), %v4493_v0  ;;  %v4498_v5 = vld [vmem:[%s5861_s2 + $0xc8] sm:$0xff] (!%p357_p2)   ;;  %v4502_v9 = vld [vmem:[%s5861_s2 + $0xd0] sm:$0xff] (!%p357_p2)   ;;  %p413_p3 = scmp.lt.s32.totalorder (!%p357_p2), %s3508_s15, 63 }
   0x8   : > { %v4495_v2 = vld [vmem:[%s5861_s2] sm:$0xff] (!%p357_p2)   ;;  %4085 = vmatprep.subr.bf16.mxu1 (!%p357_p2), %v4494_v1  ;;  %v4499_v6 = vld [vmem:[%s5861_s2 + $0x8] sm:$0xff] (!%p357_p2)   ;;  %v4503_v10 = vld [vmem:[%s5861_s2 + $0x10] sm:$0xff] (!%p357_p2)  }
   0x9   : > { %v4496_v3 = vld [vmem:[%s5861_s2 + $0x80] sm:$0xff] (!%p357_p2)   ;;  %3974 = vmatpush3.bf16.msra.mxu0 (!%p357_p2), %v4495_v2  ;;  %v4500_v7 = vld [vmem:[%s5861_s2 + $0x88] sm:$0xff] (!%p357_p2)   ;;  %v4504_v11 = vld [vmem:[%s5861_s2 + $0x90] sm:$0xff] (!%p357_p2)  }
   0xa   : > { %4086 = vmatpush3.bf16.msra.mxu1 (!%p357_p2), %v4496_v3  ;;  %3975 = vmatprep.subr.bf16.mxu0 (!%p357_p2), %v4497_v4  ;;  %v4505_v12 = vld [vmem:[%s5861_s2 + $0x58] sm:$0xff] (!%p357_p2)   ;;  %v4509_v16 = vld [vmem:[%s5861_s2 + $0x60] sm:$0xff] (!%p357_p2)   ;;  %v4513_v20 = vld [vmem:[%s5861_s2 + $0x68] sm:$0xff] (!%p357_p2)  }
   0xb   : > { %4087 = vmatprep.subr.bf16.mxu1 (!%p357_p2), %v4498_v5  ;;  %v4506_v13 = vld [vmem:[%s5861_s2 + $0xd8] sm:$0xff] (!%p357_p2)   ;;  %v4510_v17 = vld [vmem:[%s5861_s2 + $0xe0] sm:$0xff] (!%p357_p2)   ;;  %v4514_v21 = vld [vmem:[%s5861_s2 + $0xe8] sm:$0xff] (!%p357_p2)  }
   0xc   : > { %v4507_v14 = vld [vmem:[%s5861_s2 + $0x18] sm:$0xff] (!%p357_p2)   ;;  %v4511_v18 = vld [vmem:[%s5861_s2 + $0x20] sm:$0xff] (!%p357_p2)   ;;  %v4515_v22 = vld [vmem:[%s5861_s2 + $0x28] sm:$0xff] (!%p357_p2)  }
   0xd   : > { %3976 = vmatpush3.bf16.msra.mxu0 (!%p357_p2), %v4499_v6  ;;  %v4508_v15 = vld [vmem:[%s5861_s2 + $0x98] sm:$0xff] (!%p357_p2)   ;;  %v4512_v19 = vld [vmem:[%s5861_s2 + $0xa0] sm:$0xff] (!%p357_p2)   ;;  %v4516_v23 = vld [vmem:[%s5861_s2 + $0xa8] sm:$0xff] (!%p357_p2)  }
   0xe   : > { %4088 = vmatpush3.bf16.msra.mxu1 %v4500_v7  ;;  %3977 = vmatprep.subr.bf16.mxu0 %v4501_v8  ;;  %s5872_s15 = smov (!%p413_p3, %s3508_s15), 63  ;;  %v4517_v24 = vld [vmem:[%s5861_s2 + $0x70] sm:$0xff]   ;;  %v4521_v28 = vld [vmem:[%s5861_s2 + $0x78] sm:$0xff]   ;;  %v4621_v58 = vld [vmem:[%s5863_s4] sm:$0xff]  }
   0xf   : > { %4089 = vmatprep.subr.bf16.mxu1 %v4502_v9  ;;  %v4518_v25 = vld [vmem:[%s5861_s2 + $0xf0] sm:$0xff]   ;;  %s3718_s22 = sshll.u32 %s5872_s15, 4  ;;  %v4522_v29 = vld [vmem:[%s5861_s2 + $0xf8] sm:$0xff]   ;;  %v4622_v59 = vld [vmem:[%s5863_s4 + $0x8] sm:$0xff]   ;;  %s3516_s25 = sshll.u32 %s5872_s15, 2 }
  0x10   : > { %v4519_v26 = vld [vmem:[%s5861_s2 + $0x30] sm:$0xff]   ;;  %s4959_s29 = scalar_lea.vmem %s5859_s0, %s3718_s22  ;;  %v4523_v30 = vld [vmem:[%s5861_s2 + $0x38] sm:$0xff]   ;;  %s5808_s16 = scalar_lea.vmem %s5870_s11, %s3516_s25 }
  0x11   : > { %3978 = vmatpush3.bf16.msra.mxu0 %v4503_v10  ;;  %v4520_v27 = vld [vmem:[%s5861_s2 + $0xb0] sm:$0xff]   ;;  %v4524_v31 = vld [vmem:[%s5861_s2 + $0xb8] sm:$0xff]  }
  0x12   : > { %4090 = vmatpush3.bf16.msra.mxu1 %v4504_v11  ;;  %3979 = vmatprep.subr.bf16.mxu0 %v4505_v12  ;;  %v4525_v32 = vld [vmem:[%s4959_s29] ss:$16 sps:$4 sm:$0xff]   ;;  %v4527_v33 = vld [vmem:[%s4959_s29 + $0x4] ss:$16 sps:$4 sm:$0xff]   ;;  %v4528_v34 = vld [vmem:[%s4959_s29 + $0x8] ss:$16 sps:$4 sm:$0xff]  }
  0x13   : > { %4091 = vmatprep.subr.bf16.mxu1 %v4506_v13  ;;  %v4530_v35 = vld [vmem:[%s4959_s29 + $0xc] ss:$16 sps:$4 sm:$0xff]   ;;  %1123 = vmatprep.mubr.bf16.mxu0 %v4527_v33  ;;  %v4531_v36 = vld [vmem:[%s4959_s29 + $0x24] ss:$16 sps:$4 sm:$0xff]   ;;  %v4535_v38 = vld [vmem:[%s4959_s29 + $0x20] ss:$16 sps:$4 sm:$0xff]  }
  0x14   : > { %1284 = vmatprep.mubr.bf16.mxu1 %v4530_v35  ;;  %v4533_v37 = vld [vmem:[%s4959_s29 + $0x2c] ss:$16 sps:$4 sm:$0xff]   ;;  %v4536_v39 = vld [vmem:[%s4959_s29 + $0x28] ss:$16 sps:$4 sm:$0xff]   ;;  %v4537_v40 = vld [vmem:[%s4959_s29 + $0x44] ss:$16 sps:$4 sm:$0xff]  }
  0x15   : > { %3980 = vmatpush3.bf16.msra.mxu0 %v4507_v14  ;;  %v4539_v41 = vld [vmem:[%s4959_s29 + $0x4c] ss:$16 sps:$4 sm:$0xff]   ;;  %v4541_v42 = vld [vmem:[%s4959_s29 + $0x40] ss:$16 sps:$4 sm:$0xff]   ;;  %v4542_v43 = vld [vmem:[%s4959_s29 + $0x48] ss:$16 sps:$4 sm:$0xff]  }
  0x16   : > { %4092 = vmatpush3.bf16.msra.mxu1 %v4508_v15  ;;  %3981 = vmatprep.subr.bf16.mxu0 %v4509_v16  ;;  %v4543_v44 = vld [vmem:[%s4959_s29 + $0x64] ss:$16 sps:$4 sm:$0xff]   ;;  %v4545_v45 = vld [vmem:[%s4959_s29 + $0x6c] ss:$16 sps:$4 sm:$0xff]   ;;  %v4547_v46 = vld [vmem:[%s4959_s29 + $0x60] ss:$16 sps:$4 sm:$0xff]  }
  0x17   : > { %4093 = vmatprep.subr.bf16.mxu1 %v4510_v17  ;;  %v4548_v47 = vld [vmem:[%s4959_s29 + $0x68] ss:$16 sps:$4 sm:$0xff]   ;;  %v4549_v48 = vld [vmem:[%s4959_s29 + $0x84] ss:$16 sps:$4 sm:$0xff]   ;;  %v4551_v49 = vld [vmem:[%s4959_s29 + $0x8c] ss:$16 sps:$4 sm:$0xff]  }
  0x18   : > { %v4553_v50 = vld [vmem:[%s4959_s29 + $0x80] ss:$16 sps:$4 sm:$0xff]   ;;  %v4554_v51 = vld [vmem:[%s4959_s29 + $0x88] ss:$16 sps:$4 sm:$0xff]   ;;  %v4555_v52 = vld [vmem:[%s4959_s29 + $0xa4] ss:$16 sps:$4 sm:$0xff]  }
  0x19   : > { %3982 = vmatpush3.bf16.msra.mxu0 %v4511_v18  ;;  %v4557_v53 = vld [vmem:[%s4959_s29 + $0xac] ss:$16 sps:$4 sm:$0xff]   ;;  %v4559_v54 = vld [vmem:[%s4959_s29 + $0xa0] ss:$16 sps:$4 sm:$0xff]   ;;  %v4560_v55 = vld [vmem:[%s4959_s29 + $0xa8] ss:$16 sps:$4 sm:$0xff]  }
  0x1a   : > { %4094 = vmatpush3.bf16.msra.mxu1 %v4512_v19  ;;  %3983 = vmatprep.subr.bf16.mxu0 %v4513_v20  ;;  %v4561_v56 = vld [vmem:[%s4959_s29 + $0xc4] ss:$16 sps:$4 sm:$0xff]   ;;  %v4563_v57 = vld [vmem:[%s4959_s29 + $0xcc] ss:$16 sps:$4 sm:$0xff]   ;;  %v4565_v60 = vld [vmem:[%s4959_s29 + $0xc0] ss:$16 sps:$4 sm:$0xff]  }
  0x1b   : > { %4095 = vmatprep.subr.bf16.mxu1 %v4514_v21  ;;  %v4623_v61 = vld [vmem:[%s5863_s4 + $0x10] sm:$0xff]   ;;  %v4566_v62 = vld [vmem:[%s4959_s29 + $0xc8] ss:$16 sps:$4 sm:$0xff]   ;;  %v4569_v0 = vld [vmem:[%s4959_s29 + $0xec] ss:$16 sps:$4 sm:$0xff]  }
  0x1c   : > { %v4567_v63 = vld [vmem:[%s4959_s29 + $0xe4] ss:$16 sps:$4 sm:$0xff]   ;;  %v4571_v1 = vld [vmem:[%s4959_s29 + $0xe0] ss:$16 sps:$4 sm:$0xff]   ;;  %v4572_v2 = vld [vmem:[%s4959_s29 + $0xe8] ss:$16 sps:$4 sm:$0xff]  }
  0x1d   : > { %3984 = vmatpush3.bf16.msra.mxu0 %v4515_v22  ;;  %v4573_v3 = vld [vmem:[%s4959_s29 + $0x104] ss:$16 sps:$4 sm:$0xff]   ;;  %v4575_v4 = vld [vmem:[%s4959_s29 + $0x10c] ss:$16 sps:$4 sm:$0xff]   ;;  %v4577_v5 = vld [vmem:[%s4959_s29 + $0x100] ss:$16 sps:$4 sm:$0xff]  }
  0x1e   : > { %4096 = vmatpush3.bf16.msra.mxu1 %v4516_v23  ;;  %3985 = vmatprep.subr.bf16.mxu0 %v4517_v24  ;;  %v4578_v6 = vld [vmem:[%s4959_s29 + $0x108] ss:$16 sps:$4 sm:$0xff]   ;;  %v4579_v7 = vld [vmem:[%s4959_s29 + $0x124] ss:$16 sps:$4 sm:$0xff]   ;;  %v4581_v8 = vld [vmem:[%s4959_s29 + $0x12c] ss:$16 sps:$4 sm:$0xff]  }
  0x1f   : > { %4097 = vmatprep.subr.bf16.mxu1 %v4518_v25  ;;  %v4583_v9 = vld [vmem:[%s4959_s29 + $0x120] ss:$16 sps:$4 sm:$0xff]   ;;  %v4584_v10 = vld [vmem:[%s4959_s29 + $0x128] ss:$16 sps:$4 sm:$0xff]   ;;  %v4585_v11 = vld [vmem:[%s4959_s29 + $0x144] ss:$16 sps:$4 sm:$0xff]  }
  0x20   : > { %v4587_v12 = vld [vmem:[%s4959_s29 + $0x14c] ss:$16 sps:$4 sm:$0xff]   ;;  %v4589_v13 = vld [vmem:[%s4959_s29 + $0x140] ss:$16 sps:$4 sm:$0xff]   ;;  %v4590_v14 = vld [vmem:[%s4959_s29 + $0x148] ss:$16 sps:$4 sm:$0xff]  }
  0x21   : > { %3986 = vmatpush3.bf16.msra.mxu0 %v4519_v26  ;;  %v4591_v15 = vld [vmem:[%s4959_s29 + $0x164] ss:$16 sps:$4 sm:$0xff]   ;;  %v4593_v16 = vld [vmem:[%s4959_s29 + $0x16c] ss:$16 sps:$4 sm:$0xff]   ;;  %v4595_v17 = vld [vmem:[%s4959_s29 + $0x160] ss:$16 sps:$4 sm:$0xff]  }
  0x22   : > { %4098 = vmatpush3.bf16.msra.mxu1 %v4520_v27  ;;  %3987 = vmatprep.subr.bf16.mxu0 %v4521_v28  ;;  %v4624_v18 = vld [vmem:[%s5863_s4 + $0x18] sm:$0xff]   ;;  %v4597_v20 = vld [vmem:[%s4959_s29 + $0x184] ss:$16 sps:$4 sm:$0xff]   ;;  %v4601_v23 = vld [vmem:[%s4959_s29 + $0x180] ss:$16 sps:$4 sm:$0xff]  }
  0x23   : > { %4099 = vmatprep.subr.bf16.mxu1 %v4522_v29  ;;  %v4596_v19 = vld [vmem:[%s4959_s29 + $0x168] ss:$16 sps:$4 sm:$0xff]   ;;  %v4599_v21 = vld [vmem:[%s4959_s29 + $0x18c] ss:$16 sps:$4 sm:$0xff]   ;;  %v4625_v22 = vld [vmem:[%s5863_s4 + $0x20] sm:$0xff]  }
  0x24   : > { %v4602_v24 = vld [vmem:[%s4959_s29 + $0x188] ss:$16 sps:$4 sm:$0xff]   ;;  %v4603_v25 = vld [vmem:[%s4959_s29 + $0x1a4] ss:$16 sps:$4 sm:$0xff]   ;;  %v4605_v26 = vld [vmem:[%s4959_s29 + $0x1ac] ss:$16 sps:$4 sm:$0xff]  }
  0x25   : > { %3988 = vmatpush3.bf16.msra.mxu0 %v4523_v30  ;;  %v4626_v27 = vld [vmem:[%s5863_s4 + $0x28] sm:$0xff]   ;;  %v4627_v28 = vld [vmem:[%s5863_s4 + $0x30] sm:$0xff]   ;;  %v4628_v33 = vld [vmem:[%s5863_s4 + $0x38] sm:$0xff]  }
  0x26   : > { %4100 = vmatpush3.bf16.msra.mxu1 %v4524_v31  ;;  %4293 = vmatprep.subr.bf16.mxu0 %v4621_v58  ;;  %v4607_v29 = vld [vmem:[%s4959_s29 + $0x1a0] ss:$16 sps:$4 sm:$0xff]   ;;  %v4608_v30 = vld [vmem:[%s4959_s29 + $0x1a8] ss:$16 sps:$4 sm:$0xff]   ;;  %v4609_v31 = vld [vmem:[%s4959_s29 + $0x1c4] ss:$16 sps:$4 sm:$0xff]  }
  0x27   : > { %v4614_v35 = vld [vmem:[%s4959_s29 + $0x1c8] ss:$16 sps:$4 sm:$0xff]  }
  0x28   : > { %1124 = vmatmul.mubr.bf16.vlgmr.msra.gmra.mrb[0].mxu0 %v4525_v32  ;;  %v4611_v32 = vld [vmem:[%s4959_s29 + $0x1cc] ss:$16 sps:$4 sm:$0xff]  }
  0x29   : > { %1285 = vmatmul.mubr.bf16.vlgmr.msra.gmra.mrb[0].mxu1 %v4528_v34  ;;  %1131 = vmatprep.mubr.bf16.mxu0 %v4531_v36  ;;  %v4613_v34 = vld [vmem:[%s4959_s29 + $0x1c0] ss:$16 sps:$4 sm:$0xff]   ;;  %v4615_v36 = vld [vmem:[%s4959_s29 + $0x1e4] ss:$16 sps:$4 sm:$0xff]  }
  0x2a   : > { %1292 = vmatprep.mubr.bf16.mxu1 %v4533_v37  ;;  %4294 = vmatpush3.bf16.msra.mxu0 %v4621_v58  ;;  %v4617_v37 = vld [vmem:[%s4959_s29 + $0x1ec] ss:$16 sps:$4 sm:$0xff]  }
  0x2b   : > { %4295 = vmatprep.subr.bf16.mxu0 %v4622_v59 }
  0x2e   : > { %4296 = vmatpush3.bf16.msra.mxu0 %v4622_v59 }
  0x2f   : > { %4297 = vmatprep.subr.bf16.mxu0 %v4623_v61 }
  0x30   : > { %1132 = vmatmul.mubr.bf16.gmra.mrb[4].mxu0 %v4535_v38  ;;  %v4619_v38 = vld [vmem:[%s4959_s29 + $0x1e0] ss:$16 sps:$4 sm:$0xff]  }
  0x31   : > { %1293 = vmatmul.mubr.bf16.gmra.mrb[4].mxu1 %v4536_v39  ;;  %1139 = vmatprep.mubr.bf16.mxu0 %v4537_v40  ;;  %v4620_v39 = vld [vmem:[%s4959_s29 + $0x1e8] ss:$16 sps:$4 sm:$0xff]   ;;  %s3512_s29 = sshll.u32 %s5872_s15, 3 }
  0x32   : > { %1300 = vmatprep.mubr.bf16.mxu1 %v4539_v41  ;;  %4298 = vmatpush3.bf16.msra.mxu0 %v4623_v61  ;;  %s5070_s22 = scalar_lea.vmem %s5860_s1, %s3512_s29  ;;  %s5261_s26 = scalar_lea.vmem %s5868_s9, %s3512_s29 }
  0x33   : > { %4299 = vmatprep.subr.bf16.mxu0 %v4624_v18 }
  0x36   : > { %4300 = vmatpush3.bf16.msra.mxu0 %v4624_v18 }
  0x37   : > { %4301 = vmatprep.subr.bf16.mxu0 %v4625_v22 }
  0x38   : > { %1140 = vmatmul.mubr.bf16.gmra.mrb[8].mxu0 %v4541_v42  ;;  %v5058_v42 = vld [vmem:[%s5862_s3] ss:$0 sm:$0xff] }
  0x39   : > { %1301 = vmatmul.mubr.bf16.gmra.mrb[8].mxu1 %v4542_v43  ;;  %1147 = vmatprep.mubr.bf16.mxu0 %v4543_v44 }
  0x3a   : > { %1308 = vmatprep.mubr.bf16.mxu1 %v4545_v45  ;;  %4302 = vmatpush3.bf16.msra.mxu0 %v4625_v22 }
  0x3b   : > { %4303 = vmatprep.subr.bf16.mxu0 %v4626_v27 }
  0x3e   : > { %4304 = vmatpush3.bf16.msra.mxu0 %v4626_v27 }
  0x3f   : > { %4305 = vmatprep.subr.bf16.mxu0 %v4627_v28 }
  0x40   : > { %1148 = vmatmul.mubr.bf16.gmra.mrb[12].mxu0 %v4547_v46 }
  0x41   : > { %1309 = vmatmul.mubr.bf16.gmra.mrb[12].mxu1 %v4548_v47  ;;  %1155 = vmatprep.mubr.bf16.mxu0 %v4549_v48 }
  0x42   : > { %1316 = vmatprep.mubr.bf16.mxu1 %v4551_v49  ;;  %4306 = vmatpush3.bf16.msra.mxu0 %v4627_v28  ;;  %v1513_v28 = vld [vmem:[%s5070_s22 + $0x10] sm:$0xff] }
  0x43   : > { %4307 = vmatprep.subr.bf16.mxu0 %v4628_v33 }
  0x46   : > { %4308 = vmatpush3.bf16.msra.mxu0 %v4628_v33 }
  0x48   : > { %1156 = vmatmul.mubr.bf16.gmra.mrb[16].mxu0 %v4553_v50 }
  0x49   : > { %1317 = vmatmul.mubr.bf16.gmra.mrb[16].mxu1 %v4554_v51  ;;  %1163 = vmatprep.mubr.bf16.mxu0 %v4555_v52 }
  0x4a   : > { %1324 = vmatprep.mubr.bf16.mxu1 %v4557_v53  ;;  %v5062_v53 = vstv %s1413_s14 }
  0x50   : > { %1164 = vmatmul.mubr.bf16.gmra.mrb[20].mxu0 %v4559_v54 }
  0x51   : > { %1325 = vmatmul.mubr.bf16.gmra.mrb[20].mxu1 %v4560_v55  ;;  %1171 = vmatprep.mubr.bf16.mxu0 %v4561_v56 }
  0x52   : > { %1332 = vmatprep.mubr.bf16.mxu1 %v4563_v57 }
  0x58   : > { %1172 = vmatmul.mubr.bf16.gmra.mrb[24].mxu0 %v4565_v60 }
  0x59   : > { %1333 = vmatmul.mubr.bf16.gmra.mrb[24].mxu1 %v4566_v62  ;;  %1179 = vmatprep.mubr.bf16.mxu0 %v4567_v63  ;;  %v4629_v62 = vld [vmem:[%s5865_s6] sm:$0xff]   ;;  %v4630_v63 = vld [vmem:[%s5865_s6 + $0x8] sm:$0xff]  }
  0x5a   : > { %1340 = vmatprep.mubr.bf16.mxu1 %v4569_v0  ;;  %4341 = vmatprep.subr.bf16.mxu1 %v4629_v62 }
  0x5b   : > { %4342 = vmatpush3.bf16.msra.mxu1 %v4629_v62  ;;  %v1516_v62 = vld [vmem:[%s5070_s22 + $0x28] sm:$0xff] }
  0x5c   : > { %4343 = vmatprep.subr.bf16.mxu1 %v4630_v63 }
  0x5f   : > { %4344 = vmatpush3.bf16.msra.mxu1 %v4630_v63 }
  0x60   : > { %1180 = vmatmul.mubr.bf16.gmra.mrb[28].mxu0 %v4571_v1 }
  0x61   : > { %1341 = vmatmul.mubr.bf16.gmra.mrb[28].mxu1 %v4572_v2  ;;  %1187 = vmatprep.mubr.bf16.mxu0 %v4573_v3 }
  0x62   : > { %1348 = vmatprep.mubr.bf16.mxu1 %v4575_v4 }
  0x68   : > { %1188 = vmatmul.mubr.bf16.gmra.mrb[32].mxu0 %v4577_v5  ;;  %v1511_v5 = vld [vmem:[%s5070_s22] sm:$0xff] }
  0x69   : > { %1349 = vmatmul.mubr.bf16.gmra.mrb[32].mxu1 %v4578_v6  ;;  %1195 = vmatprep.mubr.bf16.mxu0 %v4579_v7  ;;  %v1512_v6 = vld [vmem:[%s5070_s22 + $0x8] sm:$0xff] }
  0x6a   : > { %1356 = vmatprep.mubr.bf16.mxu1 %v4581_v8 }
  0x70   : > { %1196 = vmatmul.mubr.bf16.gmra.mrb[36].mxu0 %v4583_v9 }
  0x71   : > { %1357 = vmatmul.mubr.bf16.gmra.mrb[36].mxu1 %v4584_v10  ;;  %1203 = vmatprep.mubr.bf16.mxu0 %v4585_v11 }
  0x72   : > { %1364 = vmatprep.mubr.bf16.mxu1 %v4587_v12 }
  0x78   : > { %1204 = vmatmul.mubr.bf16.gmra.mrb[40].mxu0 %v4589_v13 }
  0x79   : > { %1365 = vmatmul.mubr.bf16.gmra.mrb[40].mxu1 %v4590_v14  ;;  %1211 = vmatprep.mubr.bf16.mxu0 %v4591_v15 }
  0x7a   : > { %1372 = vmatprep.mubr.bf16.mxu1 %v4593_v16 }
  0x80   : > { %1212 = vmatmul.mubr.bf16.gmra.mrb[44].mxu0 %v4595_v17  ;;  %v4631_v17 = vld [vmem:[%s5865_s6 + $0x10] sm:$0xff]  }
  0x81   : > { %1373 = vmatmul.mubr.bf16.gmra.mrb[44].mxu1 %v4596_v19  ;;  %1219 = vmatprep.mubr.bf16.mxu0 %v4597_v20 }
  0x82   : > { %1380 = vmatprep.mubr.bf16.mxu1 %v4599_v21  ;;  %4345 = vmatprep.subr.bf16.mxu1 %v4631_v17 }
  0x83   : > { %4346 = vmatpush3.bf16.msra.mxu1 %v4631_v17 }
  0x88   : > { %1220 = vmatmul.mubr.bf16.gmra.mrb[48].mxu0 %v4601_v23 }
  0x89   : > { %1381 = vmatmul.mubr.bf16.gmra.mrb[48].mxu1 %v4602_v24  ;;  %1227 = vmatprep.mubr.bf16.mxu0 %v4603_v25 }
  0x8a   : > { %1388 = vmatprep.mubr.bf16.mxu1 %v4605_v26  ;;  %v4632_v26 = vld [vmem:[%s5865_s6 + $0x18] sm:$0xff]  }
  0x8b   : > { %4347 = vmatprep.subr.bf16.mxu1 %v4632_v26 }
  0x8c   : > { %4348 = vmatpush3.bf16.msra.mxu1 %v4632_v26 }
  0x90   : > { %1228 = vmatmul.mubr.bf16.gmra.mrb[52].mxu0 %v4607_v29 }
  0x91   : > { %1389 = vmatmul.mubr.bf16.gmra.mrb[52].mxu1 %v4608_v30  ;;  %1235 = vmatprep.mubr.bf16.mxu0 %v4609_v31  ;;  %v1514_v30 = vld [vmem:[%s5070_s22 + $0x18] sm:$0xff] }
  0x92   : > { %1396 = vmatprep.mubr.bf16.mxu1 %v4611_v32 }
  0x98   : > { %1236 = vmatmul.mubr.bf16.gmra.mrb[56].mxu0 %v4613_v34 }
  0x99   : > { %1397 = vmatmul.mubr.bf16.gmra.mrb[56].mxu1 %v4614_v35  ;;  %1243 = vmatprep.mubr.bf16.mxu0 %v4615_v36 }
  0x9a   : > { %1404 = vmatprep.mubr.bf16.mxu1 %v4617_v37 }
  0xa0   : > { %1244 = vmatmul.mubr.bf16.gmra.mrb[60].mxu0 %v4619_v38 }
  0xa1   : > { %1405 = vmatmul.mubr.bf16.gmra.mrb[60].mxu1 %v4620_v39 }
  0xfb   : > { %v3989_v40 = vpop.f32.mrb[0].mxu0 }
  0xfc   : > { %v4101_v41 = vpop.f32.mrb[0].mxu1  ;;  %v3990_v43 = vpop.f32.mrb[1].mxu0 }
  0xfd   : > { %v3991_v44 = vadd.f32 %v3990_v43, %v3989_v40  ;;  %v4102_v45 = vpop.f32.mrb[1].mxu1  ;;  %v3992_v46 = vpop.f32.mrb[2].mxu0 }
  0xfe   : > { %v4103_v47 = vadd.f32 %v4102_v45, %v4101_v41  ;;  %v4104_v48 = vpop.f32.mrb[2].mxu1  ;;  %v3993_v49 = vpop.f32.mrb[3].mxu0  ;;  %v4633_v45 = vld [vmem:[%s5865_s6 + $0x20] sm:$0xff]  }
  0xff   : > { %v1126_v50 = vadd.f32 %v3991_v44, %v5058_v42  ;;  %v3994_v51 = vadd.f32 %v3993_v49, %v3992_v46  ;;  %v4105_v52 = vpop.f32.mrb[3].mxu1  ;;  %4349 = vmatprep.subr.bf16.mxu1 %v4633_v45 }
 0x100   : > { %v4106_v54 = vadd.f32 %v4105_v52, %v4104_v48  ;;  %4350 = vmatpush3.bf16.msra.mxu1 %v4633_v45 }
 0x101   : > { %v1287_v55 = vadd.f32 %v4103_v47, %v1126_v50  ;;  %v1129_v56 = vadd.f32 %v3994_v51, %v5058_v42 }
 0x103   : > { %vm1414_vm0 = vcmp.ge.f32.partialorder %v1287_v55, 0.0  ;;  %v1447_v57 = vmul.f32 %v5062_v53, %v1287_v55  ;;  %v1290_v58 = vadd.f32 %v4106_v54, %v1129_v56  ;;  %v3995_v59 = vpop.f32.mrb[4].mxu0 }
 0x104   : > { %v4107_v60 = vpop.f32.mrb[4].mxu1  ;;  %v3996_v61 = vpop.f32.mrb[5].mxu0 }
 0x105   : > { %vm1415_vm1 = vcmp.ge.f32.partialorder %v1290_v58, 0.0  ;;  %v1448_v0 = vmul.f32 %v5062_v53, %v1290_v58  ;;  %v3997_v1 = vadd.f32 %v3996_v61, %v3995_v59  ;;  %v4108_v2 = vpop.f32.mrb[5].mxu1  ;;  %v3998_v3 = vpop.f32.mrb[6].mxu0  ;;  %v1479_v4 = vsel %vm1414_vm0, %v1287_v55, %v1447_v57  ;;  %v4634_v55 = vld [vmem:[%s5865_s6 + $0x28] sm:$0xff]   ;;  %v1515_v61 = vld [vmem:[%s5070_s22 + $0x20] sm:$0xff] }
 0x106   : > { %v4109_v7 = vadd.f32 %v4108_v2, %v4107_v60  ;;  %v4110_v8 = vpop.f32.mrb[6].mxu1  ;;  %v3999_v9 = vpop.f32.mrb[7].mxu0  ;;  %v1543_v15 = vadd.f32 %v1511_v5, %v1479_v4  ;;  %4351 = vmatprep.subr.bf16.mxu1 %v4634_v55 }
 0x107   : > { %v1134_v10 = vadd.f32 %v3997_v1, %v5058_v42  ;;  %v4000_v11 = vadd.f32 %v3999_v9, %v3998_v3  ;;  %v4111_v12 = vpop.f32.mrb[7].mxu1  ;;  %v1480_v13 = vsel %vm1415_vm1, %v1290_v58, %v1448_v0  ;;  %4352 = vmatpush3.bf16.msra.mxu1 %v4634_v55 }
 0x108   : > { %v4112_v14 = vadd.f32 %v4111_v12, %v4110_v8  ;;  %v1544_v16 = vadd.f32 %v1512_v6, %v1480_v13 }
 0x109   : > { %v1295_v18 = vadd.f32 %v4109_v7, %v1134_v10  ;;  %v1137_v19 = vadd.f32 %v4000_v11, %v5058_v42 }
 0x10a   : > { %v1575_v20 = vpack.c.bf16 %v1544_v16, %v1543_v15 }
 0x10b   : > { %vm1416_vm2 = vcmp.ge.f32.partialorder %v1295_v18, 0.0  ;;  %v1449_v21 = vmul.f32 %v5062_v53, %v1295_v18  ;;  %v1298_v22 = vadd.f32 %v4112_v14, %v1137_v19  ;;  %v4001_v23 = vpop.f32.mrb[8].mxu0 }
 0x10c   : > { %v4113_v24 = vpop.f32.mrb[8].mxu1  ;;  %v4002_v25 = vpop.f32.mrb[9].mxu0  ;;  %4309 = vmatprep.mubr.bf16.mxu0 %v1575_v20 }
 0x10d   : > { %v1481_v27 = vsel %vm1416_vm2, %v1295_v18, %v1449_v21  ;;  %vm1417_vm3 = vcmp.ge.f32.partialorder %v1298_v22, 0.0  ;;  %v1450_v29 = vmul.f32 %v5062_v53, %v1298_v22  ;;  %v4003_v31 = vadd.f32 %v4002_v25, %v4001_v23  ;;  %v4114_v32 = vpop.f32.mrb[9].mxu1  ;;  %v4004_v33 = vpop.f32.mrb[10].mxu0  ;;  %v1518_v23 = vld [vmem:[%s5070_s22 + $0x38] sm:$0xff] }
 0x10e   : > { %v4115_v34 = vadd.f32 %v4114_v32, %v4113_v24  ;;  %v4116_v35 = vpop.f32.mrb[10].mxu1  ;;  %v4005_v36 = vpop.f32.mrb[11].mxu0  ;;  %v1545_v41 = vadd.f32 %v1513_v28, %v1481_v27 }
 0x10f   : > { %v1482_v37 = vsel %vm1417_vm3, %v1298_v22, %v1450_v29  ;;  %v1142_v38 = vadd.f32 %v4003_v31, %v5058_v42  ;;  %v4006_v39 = vadd.f32 %v4005_v36, %v4004_v33  ;;  %v4117_v40 = vpop.f32.mrb[11].mxu1  ;;  %v1517_v22 = vld [vmem:[%s5070_s22 + $0x30] sm:$0xff] }
 0x110   : > { %v1546_v43 = vadd.f32 %v1514_v30, %v1482_v37  ;;  %v4118_v44 = vadd.f32 %v4117_v40, %v4116_v35 }
 0x111   : > { %v1303_v46 = vadd.f32 %v4115_v34, %v1142_v38  ;;  %v1145_v47 = vadd.f32 %v4006_v39, %v5058_v42 }
 0x112   : > { %v1576_v48 = vpack.c.bf16 %v1546_v43, %v1545_v41 }
 0x113   : > { %vm1418_vm4 = vcmp.ge.f32.partialorder %v1303_v46, 0.0  ;;  %v1451_v49 = vmul.f32 %v5062_v53, %v1303_v46  ;;  %v1306_v50 = vadd.f32 %v4118_v44, %v1145_v47  ;;  %v4007_v51 = vpop.f32.mrb[12].mxu0 }
 0x114   : > { %v4119_v52 = vpop.f32.mrb[12].mxu1  ;;  %v4008_v54 = vpop.f32.mrb[13].mxu0  ;;  %4310 = vmatmul.mubr.bf16.vlgmr.msra.gmra.mrb[64].mxu0 %v1576_v48  ;;  %v1519_v48 = vld [vmem:[%s5070_s22 + $0x40] sm:$0xff] }
 0x115   : > { %vm1419_vm5 = vcmp.ge.f32.partialorder %v1306_v50, 0.0  ;;  %v1452_v56 = vmul.f32 %v5062_v53, %v1306_v50  ;;  %v4009_v57 = vadd.f32 %v4008_v54, %v4007_v51  ;;  %v4120_v58 = vpop.f32.mrb[13].mxu1  ;;  %v4010_v59 = vpop.f32.mrb[14].mxu0  ;;  %v1483_v60 = vsel %vm1418_vm4, %v1303_v46, %v1451_v49  ;;  %v1520_v49 = vld [vmem:[%s5070_s22 + $0x48] sm:$0xff] }
 0x116   : > { %v4121_v63 = vadd.f32 %v4120_v58, %v4119_v52  ;;  %v4122_v0 = vpop.f32.mrb[14].mxu1  ;;  %v4011_v1 = vpop.f32.mrb[15].mxu0  ;;  %v1547_v7 = vadd.f32 %v1515_v61, %v1483_v60 }
 0x117   : > { %v1150_v2 = vadd.f32 %v4009_v57, %v5058_v42  ;;  %v4012_v3 = vadd.f32 %v4011_v1, %v4010_v59  ;;  %v4123_v4 = vpop.f32.mrb[15].mxu1  ;;  %v1484_v5 = vsel %vm1419_vm5, %v1306_v50, %v1452_v56 }
 0x118   : > { %v4124_v6 = vadd.f32 %v4123_v4, %v4122_v0  ;;  %v1548_v8 = vadd.f32 %v1516_v62, %v1484_v5 }
 0x119   : > { %v1311_v9 = vadd.f32 %v4121_v63, %v1150_v2  ;;  %v1153_v10 = vadd.f32 %v4012_v3, %v5058_v42 }
 0x11a   : > { %v1577_v11 = vpack.c.bf16 %v1548_v8, %v1547_v7 }
 0x11b   : > { %vm1420_vm6 = vcmp.ge.f32.partialorder %v1311_v9, 0.0  ;;  %v1453_v12 = vmul.f32 %v5062_v53, %v1311_v9  ;;  %v1314_v13 = vadd.f32 %v4124_v6, %v1153_v10  ;;  %v4013_v14 = vpop.f32.mrb[16].mxu0  ;;  %v1521_v10 = vld [vmem:[%s5070_s22 + $0x50] sm:$0xff] }
 0x11c   : > { %v4125_v15 = vpop.f32.mrb[16].mxu1  ;;  %v4014_v16 = vpop.f32.mrb[17].mxu0  ;;  %4313 = vmatprep.mubr.bf16.mxu0 %v1577_v11  ;;  %v1522_v11 = vld [vmem:[%s5070_s22 + $0x58] sm:$0xff] }
 0x11d   : > { %vm1421_vm7 = vcmp.ge.f32.partialorder %v1314_v13, 0.0  ;;  %v1454_v17 = vmul.f32 %v5062_v53, %v1314_v13  ;;  %v4015_v18 = vadd.f32 %v4014_v16, %v4013_v14  ;;  %v4126_v19 = vpop.f32.mrb[17].mxu1  ;;  %v4016_v20 = vpop.f32.mrb[18].mxu0  ;;  %v1485_v21 = vsel %vm1420_vm6, %v1311_v9, %v1453_v12 }
 0x11e   : > { %v4127_v24 = vadd.f32 %v4126_v19, %v4125_v15  ;;  %v4128_v25 = vpop.f32.mrb[18].mxu1  ;;  %v4017_v26 = vpop.f32.mrb[19].mxu0  ;;  %v1549_v32 = vadd.f32 %v1517_v22, %v1485_v21 }
 0x11f   : > { %v1158_v27 = vadd.f32 %v4015_v18, %v5058_v42  ;;  %v4018_v28 = vadd.f32 %v4017_v26, %v4016_v20  ;;  %v4129_v29 = vpop.f32.mrb[19].mxu1  ;;  %v1486_v30 = vsel %vm1421_vm7, %v1314_v13, %v1454_v17 }
 0x120   : > { %v4130_v31 = vadd.f32 %v4129_v29, %v4128_v25  ;;  %v1550_v33 = vadd.f32 %v1518_v23, %v1486_v30 }
 0x121   : > { %v1319_v34 = vadd.f32 %v4127_v24, %v1158_v27  ;;  %v1161_v35 = vadd.f32 %v4018_v28, %v5058_v42 }
 0x122   : > { %v1578_v36 = vpack.c.bf16 %v1550_v33, %v1549_v32 }
 0x123   : > { %vm1422_vm8 = vcmp.ge.f32.partialorder %v1319_v34, 0.0  ;;  %v1455_v37 = vmul.f32 %v5062_v53, %v1319_v34  ;;  %v1322_v38 = vadd.f32 %v4130_v31, %v1161_v35  ;;  %v4019_v39 = vpop.f32.mrb[20].mxu0  ;;  %v1523_v35 = vld [vmem:[%s5070_s22 + $0x60] sm:$0xff] }
 0x124   : > { %v4131_v40 = vpop.f32.mrb[20].mxu1  ;;  %v4020_v41 = vpop.f32.mrb[21].mxu0  ;;  %4314 = vmatmul.mubr.bf16.gmra.mrb[68].mxu0 %v1578_v36  ;;  %v1524_v36 = vld [vmem:[%s5070_s22 + $0x68] sm:$0xff] }
 0x125   : > { %vm1423_vm9 = vcmp.ge.f32.partialorder %v1322_v38, 0.0  ;;  %v1456_v43 = vmul.f32 %v5062_v53, %v1322_v38  ;;  %v4021_v44 = vadd.f32 %v4020_v41, %v4019_v39  ;;  %v4132_v45 = vpop.f32.mrb[21].mxu1  ;;  %v4022_v46 = vpop.f32.mrb[22].mxu0  ;;  %v1487_v47 = vsel %vm1422_vm8, %v1319_v34, %v1455_v37 }
 0x126   : > { %v4133_v50 = vadd.f32 %v4132_v45, %v4131_v40  ;;  %v4134_v51 = vpop.f32.mrb[22].mxu1  ;;  %v4023_v52 = vpop.f32.mrb[23].mxu0  ;;  %v1551_v59 = vadd.f32 %v1519_v48, %v1487_v47 }
 0x127   : > { %v1166_v54 = vadd.f32 %v4021_v44, %v5058_v42  ;;  %v4024_v55 = vadd.f32 %v4023_v52, %v4022_v46  ;;  %v4135_v56 = vpop.f32.mrb[23].mxu1  ;;  %v1488_v57 = vsel %vm1423_vm9, %v1322_v38, %v1456_v43 }
 0x128   : > { %v4136_v58 = vadd.f32 %v4135_v56, %v4134_v51  ;;  %v1552_v60 = vadd.f32 %v1520_v49, %v1488_v57 }
 0x129   : > { %v1327_v61 = vadd.f32 %v4133_v50, %v1166_v54  ;;  %v1169_v62 = vadd.f32 %v4024_v55, %v5058_v42 }
 0x12a   : > { %v1579_v63 = vpack.c.bf16 %v1552_v60, %v1551_v59 }
 0x12b   : > { %vm1424_vm10 = vcmp.ge.f32.partialorder %v1327_v61, 0.0  ;;  %v1457_v0 = vmul.f32 %v5062_v53, %v1327_v61  ;;  %v1330_v1 = vadd.f32 %v4136_v58, %v1169_v62  ;;  %v4025_v2 = vpop.f32.mrb[24].mxu0  ;;  %v1525_v62 = vld [vmem:[%s5070_s22 + $0x70] sm:$0xff] }
 0x12c   : > { %v4137_v3 = vpop.f32.mrb[24].mxu1  ;;  %v4026_v4 = vpop.f32.mrb[25].mxu0  ;;  %4317 = vmatprep.mubr.bf16.mxu0 %v1579_v63  ;;  %v1526_v63 = vld [vmem:[%s5070_s22 + $0x78] sm:$0xff] }
 0x12d   : > { %vm1425_vm11 = vcmp.ge.f32.partialorder %v1330_v1, 0.0  ;;  %v1458_v5 = vmul.f32 %v5062_v53, %v1330_v1  ;;  %v4027_v6 = vadd.f32 %v4026_v4, %v4025_v2  ;;  %v4138_v7 = vpop.f32.mrb[25].mxu1  ;;  %v4028_v8 = vpop.f32.mrb[26].mxu0  ;;  %v1489_v9 = vsel %vm1424_vm10, %v1327_v61, %v1457_v0 }
 0x12e   : > { %v4139_v12 = vadd.f32 %v4138_v7, %v4137_v3  ;;  %v4140_v13 = vpop.f32.mrb[26].mxu1  ;;  %v4029_v14 = vpop.f32.mrb[27].mxu0  ;;  %v1553_v20 = vadd.f32 %v1521_v10, %v1489_v9 }
 0x12f   : > { %v1174_v15 = vadd.f32 %v4027_v6, %v5058_v42  ;;  %v4030_v16 = vadd.f32 %v4029_v14, %v4028_v8  ;;  %v4141_v17 = vpop.f32.mrb[27].mxu1  ;;  %v1490_v18 = vsel %vm1425_vm11, %v1330_v1, %v1458_v5 }
 0x130   : > { %v4142_v19 = vadd.f32 %v4141_v17, %v4140_v13  ;;  %v1554_v21 = vadd.f32 %v1522_v11, %v1490_v18 }
 0x131   : > { %v1335_v22 = vadd.f32 %v4139_v12, %v1174_v15  ;;  %v1177_v23 = vadd.f32 %v4030_v16, %v5058_v42 }
 0x132   : > { %v1580_v24 = vpack.c.bf16 %v1554_v21, %v1553_v20 }
 0x133   : > { %vm1426_vm12 = vcmp.ge.f32.partialorder %v1335_v22, 0.0  ;;  %v1459_v25 = vmul.f32 %v5062_v53, %v1335_v22  ;;  %v1338_v26 = vadd.f32 %v4142_v19, %v1177_v23  ;;  %v4031_v27 = vpop.f32.mrb[28].mxu0  ;;  %v1527_v23 = vld [vmem:[%s5070_s22 + $0x80] sm:$0xff] }
 0x134   : > { %v4143_v28 = vpop.f32.mrb[28].mxu1  ;;  %v4032_v29 = vpop.f32.mrb[29].mxu0  ;;  %4318 = vmatmul.mubr.bf16.gmra.mrb[72].mxu0 %v1580_v24  ;;  %v1528_v24 = vld [vmem:[%s5070_s22 + $0x88] sm:$0xff] }
 0x135   : > { %vm1427_vm13 = vcmp.ge.f32.partialorder %v1338_v26, 0.0  ;;  %v1460_v30 = vmul.f32 %v5062_v53, %v1338_v26  ;;  %v4033_v31 = vadd.f32 %v4032_v29, %v4031_v27  ;;  %v4144_v32 = vpop.f32.mrb[29].mxu1  ;;  %v4034_v33 = vpop.f32.mrb[30].mxu0  ;;  %v1491_v34 = vsel %vm1426_vm12, %v1335_v22, %v1459_v25 }
 0x136   : > { %v4145_v37 = vadd.f32 %v4144_v32, %v4143_v28  ;;  %v4146_v38 = vpop.f32.mrb[30].mxu1  ;;  %v4035_v39 = vpop.f32.mrb[31].mxu0  ;;  %v1555_v46 = vadd.f32 %v1523_v35, %v1491_v34 }
 0x137   : > { %v1182_v40 = vadd.f32 %v4033_v31, %v5058_v42  ;;  %v4036_v41 = vadd.f32 %v4035_v39, %v4034_v33  ;;  %v4147_v43 = vpop.f32.mrb[31].mxu1  ;;  %v1492_v44 = vsel %vm1427_vm13, %v1338_v26, %v1460_v30 }
 0x138   : > { %v4148_v45 = vadd.f32 %v4147_v43, %v4146_v38  ;;  %v1556_v47 = vadd.f32 %v1524_v36, %v1492_v44 }
 0x139   : > { %v1343_v48 = vadd.f32 %v4145_v37, %v1182_v40  ;;  %v1185_v49 = vadd.f32 %v4036_v41, %v5058_v42 }
 0x13a   : > { %v1581_v50 = vpack.c.bf16 %v1556_v47, %v1555_v46 }
 0x13b   : > { %vm1428_vm14 = vcmp.ge.f32.partialorder %v1343_v48, 0.0  ;;  %v1461_v51 = vmul.f32 %v5062_v53, %v1343_v48  ;;  %v1346_v52 = vadd.f32 %v4148_v45, %v1185_v49  ;;  %v4037_v54 = vpop.f32.mrb[32].mxu0  ;;  %v1529_v49 = vld [vmem:[%s5070_s22 + $0x90] sm:$0xff] }
 0x13c   : > { %v4149_v55 = vpop.f32.mrb[32].mxu1  ;;  %v4038_v56 = vpop.f32.mrb[33].mxu0  ;;  %4321 = vmatprep.mubr.bf16.mxu0 %v1581_v50  ;;  %v1530_v50 = vld [vmem:[%s5070_s22 + $0x98] sm:$0xff] }
 0x13d   : > { %vm1429_vm15 = vcmp.ge.f32.partialorder %v1346_v52, 0.0  ;;  %v1462_v57 = vmul.f32 %v5062_v53, %v1346_v52  ;;  %v4039_v58 = vadd.f32 %v4038_v56, %v4037_v54  ;;  %v4150_v59 = vpop.f32.mrb[33].mxu1  ;;  %v4040_v60 = vpop.f32.mrb[34].mxu0  ;;  %v1493_v61 = vsel %vm1428_vm14, %v1343_v48, %v1461_v51 }
 0x13e   : > { %v4151_v0 = vadd.f32 %v4150_v59, %v4149_v55  ;;  %v4152_v1 = vpop.f32.mrb[34].mxu1  ;;  %v4041_v2 = vpop.f32.mrb[35].mxu0  ;;  %v1557_v8 = vadd.f32 %v1525_v62, %v1493_v61 }
 0x13f   : > { %v1190_v3 = vadd.f32 %v4039_v58, %v5058_v42  ;;  %v4042_v4 = vadd.f32 %v4041_v2, %v4040_v60  ;;  %v4153_v5 = vpop.f32.mrb[35].mxu1  ;;  %v1494_v6 = vsel %vm1429_vm15, %v1346_v52, %v1462_v57 }
 0x140   : > { %v4154_v7 = vadd.f32 %v4153_v5, %v4152_v1  ;;  %v1558_v9 = vadd.f32 %v1526_v63, %v1494_v6 }
 0x141   : > { %v1351_v10 = vadd.f32 %v4151_v0, %v1190_v3  ;;  %v1193_v11 = vadd.f32 %v4042_v4, %v5058_v42 }
 0x142   : > { %v1582_v12 = vpack.c.bf16 %v1558_v9, %v1557_v8 }
 0x143   : > { %vm1430_vm0 = vcmp.ge.f32.partialorder %v1351_v10, 0.0  ;;  %v1463_v13 = vmul.f32 %v5062_v53, %v1351_v10  ;;  %v1354_v14 = vadd.f32 %v4154_v7, %v1193_v11  ;;  %v4043_v15 = vpop.f32.mrb[36].mxu0  ;;  %v1531_v11 = vld [vmem:[%s5070_s22 + $0xa0] sm:$0xff] }
 0x144   : > { %v4155_v16 = vpop.f32.mrb[36].mxu1  ;;  %v4044_v17 = vpop.f32.mrb[37].mxu0  ;;  %4322 = vmatmul.mubr.bf16.gmra.mrb[76].mxu0 %v1582_v12  ;;  %v1532_v12 = vld [vmem:[%s5070_s22 + $0xa8] sm:$0xff] }
 0x145   : > { %vm1431_vm1 = vcmp.ge.f32.partialorder %v1354_v14, 0.0  ;;  %v1464_v18 = vmul.f32 %v5062_v53, %v1354_v14  ;;  %v4045_v19 = vadd.f32 %v4044_v17, %v4043_v15  ;;  %v4156_v20 = vpop.f32.mrb[37].mxu1  ;;  %v4046_v21 = vpop.f32.mrb[38].mxu0  ;;  %v1495_v22 = vsel %vm1430_vm0, %v1351_v10, %v1463_v13 }
 0x146   : > { %v4157_v25 = vadd.f32 %v4156_v20, %v4155_v16  ;;  %v4158_v26 = vpop.f32.mrb[38].mxu1  ;;  %v4047_v27 = vpop.f32.mrb[39].mxu0  ;;  %v1559_v33 = vadd.f32 %v1527_v23, %v1495_v22 }
 0x147   : > { %v1198_v28 = vadd.f32 %v4045_v19, %v5058_v42  ;;  %v4048_v29 = vadd.f32 %v4047_v27, %v4046_v21  ;;  %v4159_v30 = vpop.f32.mrb[39].mxu1  ;;  %v1496_v31 = vsel %vm1431_vm1, %v1354_v14, %v1464_v18 }
 0x148   : > { %v4160_v32 = vadd.f32 %v4159_v30, %v4158_v26  ;;  %v1560_v34 = vadd.f32 %v1528_v24, %v1496_v31 }
 0x149   : > { %v1359_v35 = vadd.f32 %v4157_v25, %v1198_v28  ;;  %v1201_v36 = vadd.f32 %v4048_v29, %v5058_v42 }
 0x14a   : > { %v1583_v37 = vpack.c.bf16 %v1560_v34, %v1559_v33 }
 0x14b   : > { %vm1432_vm2 = vcmp.ge.f32.partialorder %v1359_v35, 0.0  ;;  %v1465_v38 = vmul.f32 %v5062_v53, %v1359_v35  ;;  %v1362_v39 = vadd.f32 %v4160_v32, %v1201_v36  ;;  %v4049_v40 = vpop.f32.mrb[40].mxu0  ;;  %v1533_v36 = vld [vmem:[%s5070_s22 + $0xb0] sm:$0xff] }
 0x14c   : > { %v4161_v41 = vpop.f32.mrb[40].mxu1  ;;  %v4050_v43 = vpop.f32.mrb[41].mxu0  ;;  %4325 = vmatprep.mubr.bf16.mxu0 %v1583_v37  ;;  %v1534_v37 = vld [vmem:[%s5070_s22 + $0xb8] sm:$0xff] }
 0x14d   : > { %vm1433_vm3 = vcmp.ge.f32.partialorder %v1362_v39, 0.0  ;;  %v1466_v44 = vmul.f32 %v5062_v53, %v1362_v39  ;;  %v4051_v45 = vadd.f32 %v4050_v43, %v4049_v40  ;;  %v4162_v46 = vpop.f32.mrb[41].mxu1  ;;  %v4052_v47 = vpop.f32.mrb[42].mxu0  ;;  %v1497_v48 = vsel %vm1432_vm2, %v1359_v35, %v1465_v38 }
 0x14e   : > { %v4163_v51 = vadd.f32 %v4162_v46, %v4161_v41  ;;  %v4164_v52 = vpop.f32.mrb[42].mxu1  ;;  %v4053_v54 = vpop.f32.mrb[43].mxu0  ;;  %v1561_v60 = vadd.f32 %v1529_v49, %v1497_v48 }
 0x14f   : > { %v1206_v55 = vadd.f32 %v4051_v45, %v5058_v42  ;;  %v4054_v56 = vadd.f32 %v4053_v54, %v4052_v47  ;;  %v4165_v57 = vpop.f32.mrb[43].mxu1  ;;  %v1498_v58 = vsel %vm1433_vm3, %v1362_v39, %v1466_v44 }
 0x150   : > { %v4166_v59 = vadd.f32 %v4165_v57, %v4164_v52  ;;  %v1562_v61 = vadd.f32 %v1530_v50, %v1498_v58 }
 0x151   : > { %v1367_v62 = vadd.f32 %v4163_v51, %v1206_v55  ;;  %v1209_v63 = vadd.f32 %v4054_v56, %v5058_v42 }
 0x152   : > { %v1584_v0 = vpack.c.bf16 %v1562_v61, %v1561_v60 }
 0x153   : > { %vm1434_vm4 = vcmp.ge.f32.partialorder %v1367_v62, 0.0  ;;  %v1467_v1 = vmul.f32 %v5062_v53, %v1367_v62  ;;  %v1370_v2 = vadd.f32 %v4166_v59, %v1209_v63  ;;  %v4055_v3 = vpop.f32.mrb[44].mxu0  ;;  %v1535_v63 = vld [vmem:[%s5070_s22 + $0xc0] sm:$0xff] }
 0x154   : > { %v4167_v4 = vpop.f32.mrb[44].mxu1  ;;  %v4056_v5 = vpop.f32.mrb[45].mxu0  ;;  %4326 = vmatmul.mubr.bf16.gmra.mrb[80].mxu0 %v1584_v0  ;;  %v1536_v0 = vld [vmem:[%s5070_s22 + $0xc8] sm:$0xff] }
 0x155   : > { %vm1435_vm5 = vcmp.ge.f32.partialorder %v1370_v2, 0.0  ;;  %v1468_v6 = vmul.f32 %v5062_v53, %v1370_v2  ;;  %v4057_v7 = vadd.f32 %v4056_v5, %v4055_v3  ;;  %v4168_v8 = vpop.f32.mrb[45].mxu1  ;;  %v4058_v9 = vpop.f32.mrb[46].mxu0  ;;  %v1499_v10 = vsel %vm1434_vm4, %v1367_v62, %v1467_v1 }
 0x156   : > { %v4169_v13 = vadd.f32 %v4168_v8, %v4167_v4  ;;  %v4170_v14 = vpop.f32.mrb[46].mxu1  ;;  %v4059_v15 = vpop.f32.mrb[47].mxu0  ;;  %v1563_v21 = vadd.f32 %v1531_v11, %v1499_v10 }
 0x157   : > { %v1214_v16 = vadd.f32 %v4057_v7, %v5058_v42  ;;  %v4060_v17 = vadd.f32 %v4059_v15, %v4058_v9  ;;  %v4171_v18 = vpop.f32.mrb[47].mxu1  ;;  %v1500_v19 = vsel %vm1435_vm5, %v1370_v2, %v1468_v6 }
 0x158   : > { %v4172_v20 = vadd.f32 %v4171_v18, %v4170_v14  ;;  %v1564_v22 = vadd.f32 %v1532_v12, %v1500_v19 }
 0x159   : > { %v1375_v23 = vadd.f32 %v4169_v13, %v1214_v16  ;;  %v1217_v24 = vadd.f32 %v4060_v17, %v5058_v42  ;;  %v4635_v13 = vld [vmem:[%s5865_s6 + $0x30] sm:$0xff]  }
 0x15a   : > { %v1585_v25 = vpack.c.bf16 %v1564_v22, %v1563_v21  ;;  %4353 = vmatprep.subr.bf16.mxu1 %v4635_v13 }
 0x15b   : > { %vm1436_vm6 = vcmp.ge.f32.partialorder %v1375_v23, 0.0  ;;  %v1469_v26 = vmul.f32 %v5062_v53, %v1375_v23  ;;  %v1378_v27 = vadd.f32 %v4172_v20, %v1217_v24  ;;  %v4061_v28 = vpop.f32.mrb[48].mxu0  ;;  %4354 = vmatpush3.bf16.msra.mxu1 %v4635_v13 }
 0x15c   : > { %v4173_v29 = vpop.f32.mrb[48].mxu1  ;;  %v4062_v30 = vpop.f32.mrb[49].mxu0  ;;  %4329 = vmatprep.mubr.bf16.mxu0 %v1585_v25  ;;  %v1537_v25 = vld [vmem:[%s5070_s22 + $0xd0] sm:$0xff] }
 0x15d   : > { %vm1437_vm7 = vcmp.ge.f32.partialorder %v1378_v27, 0.0  ;;  %v1470_v31 = vmul.f32 %v5062_v53, %v1378_v27  ;;  %v4063_v32 = vadd.f32 %v4062_v30, %v4061_v28  ;;  %v4174_v33 = vpop.f32.mrb[49].mxu1  ;;  %v4064_v34 = vpop.f32.mrb[50].mxu0  ;;  %v1501_v35 = vsel %vm1436_vm6, %v1375_v23, %v1469_v26  ;;  %v1538_v26 = vld [vmem:[%s5070_s22 + $0xd8] sm:$0xff] }
 0x15e   : > { %v4175_v38 = vadd.f32 %v4174_v33, %v4173_v29  ;;  %v4176_v39 = vpop.f32.mrb[50].mxu1  ;;  %v4065_v40 = vpop.f32.mrb[51].mxu0  ;;  %v1565_v47 = vadd.f32 %v1533_v36, %v1501_v35 }
 0x15f   : > { %v1222_v41 = vadd.f32 %v4063_v32, %v5058_v42  ;;  %v4066_v43 = vadd.f32 %v4065_v40, %v4064_v34  ;;  %v4177_v44 = vpop.f32.mrb[51].mxu1  ;;  %v1502_v45 = vsel %vm1437_vm7, %v1378_v27, %v1470_v31  ;;  %v4636_v27 = vld [vmem:[%s5865_s6 + $0x38] sm:$0xff]  }
 0x160   : > { %v4178_v46 = vadd.f32 %v4177_v44, %v4176_v39  ;;  %v1566_v48 = vadd.f32 %v1534_v37, %v1502_v45  ;;  %4355 = vmatprep.subr.bf16.mxu1 %v4636_v27 }
 0x161   : > { %v1383_v49 = vadd.f32 %v4175_v38, %v1222_v41  ;;  %v1225_v50 = vadd.f32 %v4066_v43, %v5058_v42  ;;  %4356 = vmatpush3.bf16.msra.mxu1 %v4636_v27 }
 0x162   : > { %v1586_v51 = vpack.c.bf16 %v1566_v48, %v1565_v47 }
 0x163   : > { %vm1438_vm8 = vcmp.ge.f32.partialorder %v1383_v49, 0.0  ;;  %v1471_v52 = vmul.f32 %v5062_v53, %v1383_v49  ;;  %v1386_v54 = vadd.f32 %v4178_v46, %v1225_v50  ;;  %v4067_v55 = vpop.f32.mrb[52].mxu0 }
 0x164   : > { %v4179_v56 = vpop.f32.mrb[52].mxu1  ;;  %v4068_v57 = vpop.f32.mrb[53].mxu0  ;;  %4330 = vmatmul.mubr.bf16.gmra.mrb[84].mxu0 %v1586_v51 }
 0x165   : > { %vm1439_vm9 = vcmp.ge.f32.partialorder %v1386_v54, 0.0  ;;  %v1472_v58 = vmul.f32 %v5062_v53, %v1386_v54  ;;  %v4069_v59 = vadd.f32 %v4068_v57, %v4067_v55  ;;  %v4180_v60 = vpop.f32.mrb[53].mxu1  ;;  %v4070_v61 = vpop.f32.mrb[54].mxu0  ;;  %v1503_v62 = vsel %vm1438_vm8, %v1383_v49, %v1471_v52  ;;  %v1539_v52 = vld [vmem:[%s5070_s22 + $0xe0] sm:$0xff] }
 0x166   : > { %v4181_v1 = vadd.f32 %v4180_v60, %v4179_v56  ;;  %v4182_v2 = vpop.f32.mrb[54].mxu1  ;;  %v4071_v3 = vpop.f32.mrb[55].mxu0  ;;  %v1567_v9 = vadd.f32 %v1535_v63, %v1503_v62 }
 0x167   : > { %v1230_v4 = vadd.f32 %v4069_v59, %v5058_v42  ;;  %v4072_v5 = vadd.f32 %v4071_v3, %v4070_v61  ;;  %v4183_v6 = vpop.f32.mrb[55].mxu1  ;;  %v1504_v7 = vsel %vm1439_vm9, %v1386_v54, %v1472_v58  ;;  %v1540_v54 = vld [vmem:[%s5070_s22 + $0xe8] sm:$0xff] }
 0x168   : > { %v4184_v8 = vadd.f32 %v4183_v6, %v4182_v2  ;;  %v1568_v10 = vadd.f32 %v1536_v0, %v1504_v7 }
 0x169   : > { %v1391_v11 = vadd.f32 %v4181_v1, %v1230_v4  ;;  %v1233_v12 = vadd.f32 %v4072_v5, %v5058_v42 }
 0x16a   : > { %v1587_v14 = vpack.c.bf16 %v1568_v10, %v1567_v9  ;;  %v1542_v9 = vld [vmem:[%s5070_s22 + $0xf8] sm:$0xff] }
 0x16b   : > { %vm1440_vm10 = vcmp.ge.f32.partialorder %v1391_v11, 0.0  ;;  %v1473_v15 = vmul.f32 %v5062_v53, %v1391_v11  ;;  %v1394_v16 = vadd.f32 %v4184_v8, %v1233_v12  ;;  %v4073_v17 = vpop.f32.mrb[56].mxu0  ;;  %v1541_v8 = vld [vmem:[%s5070_s22 + $0xf0] sm:$0xff]  ;;  %s5552_s22 = scalar_lea.vmem %s5869_s10, %s3516_s25 }
 0x16c   : > { %v4185_v18 = vpop.f32.mrb[56].mxu1  ;;  %v4074_v19 = vpop.f32.mrb[57].mxu0  ;;  %4333 = vmatprep.mubr.bf16.mxu0 %v1587_v14  ;;  %v4638_v14 = vld [vmem:[%s5863_s4 + $0x8] sm:$0xff]  }
 0x16d   : > { %vm1441_vm11 = vcmp.ge.f32.partialorder %v1394_v16, 0.0  ;;  %v1474_v20 = vmul.f32 %v5062_v53, %v1394_v16  ;;  %v4075_v21 = vadd.f32 %v4074_v19, %v4073_v17  ;;  %v4186_v22 = vpop.f32.mrb[57].mxu1  ;;  %v4076_v23 = vpop.f32.mrb[58].mxu0  ;;  %v1505_v24 = vsel %vm1440_vm10, %v1391_v11, %v1473_v15  ;;  %v4639_v15 = vld [vmem:[%s5863_s4 + $0x10] sm:$0xff]  }
 0x16e   : > { %v4187_v28 = vadd.f32 %v4186_v22, %v4185_v18  ;;  %v4188_v29 = vpop.f32.mrb[58].mxu1  ;;  %v4077_v30 = vpop.f32.mrb[59].mxu0  ;;  %v1569_v36 = vadd.f32 %v1537_v25, %v1505_v24 }
 0x16f   : > { %v1238_v31 = vadd.f32 %v4075_v21, %v5058_v42  ;;  %v4078_v32 = vadd.f32 %v4077_v30, %v4076_v23  ;;  %v4189_v33 = vpop.f32.mrb[59].mxu1  ;;  %v1506_v34 = vsel %vm1441_vm11, %v1394_v16, %v1474_v20  ;;  %v4640_v23 = vld [vmem:[%s5863_s4 + $0x18] sm:$0xff]   ;;  %v4641_v30 = vld [vmem:[%s5863_s4 + $0x20] sm:$0xff]  }
 0x170   : > { %v4190_v35 = vadd.f32 %v4189_v33, %v4188_v29  ;;  %v1570_v37 = vadd.f32 %v1538_v26, %v1506_v34 }
 0x171   : > { %v1399_v38 = vadd.f32 %v4187_v28, %v1238_v31  ;;  %v1241_v39 = vadd.f32 %v4078_v32, %v5058_v42  ;;  %v4642_v32 = vld [vmem:[%s5863_s4 + $0x28] sm:$0xff]  }
 0x172   : > { %v1588_v40 = vpack.c.bf16 %v1570_v37, %v1569_v36 }
 0x173   : > { %vm1442_vm12 = vcmp.ge.f32.partialorder %v1399_v38, 0.0  ;;  %v1475_v41 = vmul.f32 %v5062_v53, %v1399_v38  ;;  %v1402_v43 = vadd.f32 %v4190_v35, %v1241_v39  ;;  %v4079_v44 = vpop.f32.mrb[60].mxu0 }
 0x174   : > { %v4191_v45 = vpop.f32.mrb[60].mxu1  ;;  %v4080_v46 = vpop.f32.mrb[61].mxu0  ;;  %4334 = vmatmul.mubr.bf16.gmra.mrb[88].mxu0 %v1588_v40 }
 0x175   : > { %vm1443_vm13 = vcmp.ge.f32.partialorder %v1402_v43, 0.0  ;;  %v1476_v47 = vmul.f32 %v5062_v53, %v1402_v43  ;;  %v4081_v48 = vadd.f32 %v4080_v46, %v4079_v44  ;;  %v4192_v49 = vpop.f32.mrb[61].mxu1  ;;  %v4082_v50 = vpop.f32.mrb[62].mxu0  ;;  %v1507_v51 = vsel %vm1442_vm12, %v1399_v38, %v1475_v41 }
 0x176   : > { %v4193_v55 = vadd.f32 %v4192_v49, %v4191_v45  ;;  %v4194_v56 = vpop.f32.mrb[62].mxu1  ;;  %v4083_v57 = vpop.f32.mrb[63].mxu0  ;;  %v1571_v63 = vadd.f32 %v1539_v52, %v1507_v51 }
 0x177   : > { %v1246_v58 = vadd.f32 %v4081_v48, %v5058_v42  ;;  %v4084_v59 = vadd.f32 %v4083_v57, %v4082_v50  ;;  %v4195_v60 = vpop.f32.mrb[63].mxu1  ;;  %v1508_v61 = vsel %vm1443_vm13, %v1402_v43, %v1476_v47 }
 0x178   : > { %v4196_v62 = vadd.f32 %v4195_v60, %v4194_v56  ;;  %v1572_v0 = vadd.f32 %v1540_v54, %v1508_v61 }
 0x179   : > { %v1407_v1 = vadd.f32 %v4193_v55, %v1246_v58  ;;  %v1249_v2 = vadd.f32 %v4084_v59, %v5058_v42  ;;  %v4637_v42 = vld [vmem:[%s5863_s4] sm:$0xff]  }
 0x17a   : > { %v1589_v3 = vpack.c.bf16 %v1572_v0, %v1571_v63  ;;  %4389 = vmatprep.subr.bf16.mxu0 %v4637_v42 }
 0x17b   : > { %vm1444_vm14 = vcmp.ge.f32.partialorder %v1407_v1, 0.0  ;;  %v1477_v4 = vmul.f32 %v5062_v53, %v1407_v1  ;;  %v1410_v5 = vadd.f32 %v4196_v62, %v1249_v2  ;;  %4390 = vmatpush3.bf16.msra.mxu0 %v4637_v42 }
 0x17c   : > { %4337 = vmatprep.mubr.bf16.mxu0 %v1589_v3  ;;  %4391 = vmatprep.subr.bf16.mxu0 %v4638_v14 }
 0x17d   : > { %vm1445_vm15 = vcmp.ge.f32.partialorder %v1410_v5, 0.0  ;;  %v1478_v6 = vmul.f32 %v5062_v53, %v1410_v5  ;;  %v1509_v7 = vsel %vm1444_vm14, %v1407_v1, %v1477_v4  ;;  %v5199_v53 = vld [vmem:[%s5864_s5] ss:$0 sm:$0xff] }
 0x17e   : > { %v1573_v11 = vadd.f32 %v1541_v8, %v1509_v7 }
 0x17f   : > { %v1510_v10 = vsel %vm1445_vm15, %v1410_v5, %v1478_v6  ;;  %4392 = vmatpush3.bf16.msra.mxu0 %v4638_v14 }
 0x180   : > { %v1574_v12 = vadd.f32 %v1542_v9, %v1510_v10  ;;  %4393 = vmatprep.subr.bf16.mxu0 %v4639_v15 }
 0x182   : > { %v1590_v13 = vpack.c.bf16 %v1574_v12, %v1573_v11 }
 0x183   : > { %4394 = vmatpush3.bf16.msra.mxu0 %v4639_v15 }
 0x184   : > { %4338 = vmatmul.mubr.bf16.gmra.mrb[92].mxu0 %v1590_v13  ;;  %4395 = vmatprep.subr.bf16.mxu0 %v4640_v23 }
 0x187   : > { %4396 = vmatpush3.bf16.msra.mxu0 %v4640_v23 }
 0x188   : > { %4397 = vmatprep.subr.bf16.mxu0 %v4641_v30 }
 0x18b   : > { %4398 = vmatpush3.bf16.msra.mxu0 %v4641_v30 }
 0x18c   : > { %4399 = vmatprep.subr.bf16.mxu0 %v4642_v32 }
 0x18f   : > { %4400 = vmatpush3.bf16.msra.mxu0 %v4642_v32 }
 0x1e7   : > { %v4311_v16 = vpop.f32.mrb[64].mxu0 }
 0x1e8   : > { %v1705_v17 = vadd.f32 %v4311_v16, %v5199_v53  ;;  %v1696_v18 = vpop.f32.mrb[65].mxu0 }
 0x1e9   : > { %v1697_v19 = vadd.f32 %v5199_v53, %v1696_v18  ;;  %v4312_v20 = vpop.f32.mrb[66].mxu0 }
 0x1ea   : > { %v1708_v21 = vadd.f32 %v4312_v20, %v5199_v53  ;;  %v1699_v22 = vpop.f32.mrb[67].mxu0  ;;  %v1825_v25 = vmax.f32 %v1705_v17, 0.0 }
 0x1eb   : > { %v1700_v24 = vadd.f32 %v5199_v53, %v1699_v22  ;;  %v1823_v27 = vmax.f32 %v1697_v19, 0.0 }
 0x1ec   : > { %v1826_v26 = vmax.f32 %v1708_v21, 0.0 }
 0x1ed   : > { %v1824_v28 = vmax.f32 %v1700_v24, 0.0 }
 0x1ee   : > { %v1856_v29 = vpack.c.bf16 %v1826_v26, %v1825_v25 }
 0x1ef   : > { %v1855_v31 = vpack.c.bf16 %v1824_v28, %v1823_v27 }
 0x1f1   : > { %4357 = vmatprep.mubr.bf16.mxu1 %v1855_v31 }
 0x1f2   : > { %4358 = vmatmul.mubr.bf16.vlgmr.msra.gmra.mrb[64].mxu1 %v1856_v29 }
 0x1f7   : > { %v4315_v33 = vpop.f32.mrb[68].mxu0 }
 0x1f8   : > { %v1721_v34 = vadd.f32 %v4315_v33, %v5199_v53  ;;  %v1712_v35 = vpop.f32.mrb[69].mxu0 }
 0x1f9   : > { %v1713_v36 = vadd.f32 %v5199_v53, %v1712_v35  ;;  %v4316_v37 = vpop.f32.mrb[70].mxu0 }
 0x1fa   : > { %v1724_v38 = vadd.f32 %v4316_v37, %v5199_v53  ;;  %v1715_v39 = vpop.f32.mrb[71].mxu0  ;;  %v1829_v41 = vmax.f32 %v1721_v34, 0.0 }
 0x1fb   : > { %v1716_v40 = vadd.f32 %v5199_v53, %v1715_v39  ;;  %v1827_v44 = vmax.f32 %v1713_v36, 0.0 }
 0x1fc   : > { %v1830_v43 = vmax.f32 %v1724_v38, 0.0 }
 0x1fd   : > { %v1828_v45 = vmax.f32 %v1716_v40, 0.0  ;;  %v4643_v40 = vld [vmem:[%s5863_s4 + $0x30] sm:$0xff]  }
 0x1fe   : > { %v1858_v46 = vpack.c.bf16 %v1830_v43, %v1829_v41  ;;  %4401 = vmatprep.subr.bf16.mxu0 %v4643_v40 }
 0x1ff   : > { %v1857_v47 = vpack.c.bf16 %v1828_v45, %v1827_v44  ;;  %4402 = vmatpush3.bf16.msra.mxu0 %v4643_v40 }
 0x201   : > { %4361 = vmatprep.mubr.bf16.mxu1 %v1857_v47  ;;  %v4644_v47 = vld [vmem:[%s5863_s4 + $0x38] sm:$0xff]  }
 0x202   : > { %4362 = vmatmul.mubr.bf16.gmra.mrb[68].mxu1 %v1858_v46  ;;  %4403 = vmatprep.subr.bf16.mxu0 %v4644_v47 }
 0x203   : > { %4404 = vmatpush3.bf16.msra.mxu0 %v4644_v47 }
 0x207   : > { %v4319_v48 = vpop.f32.mrb[72].mxu0 }
 0x208   : > { %v1737_v49 = vadd.f32 %v4319_v48, %v5199_v53  ;;  %v1728_v50 = vpop.f32.mrb[73].mxu0 }
 0x209   : > { %v1729_v51 = vadd.f32 %v5199_v53, %v1728_v50  ;;  %v4320_v52 = vpop.f32.mrb[74].mxu0 }
 0x20a   : > { %v1740_v54 = vadd.f32 %v4320_v52, %v5199_v53  ;;  %v1731_v55 = vpop.f32.mrb[75].mxu0  ;;  %v1833_v57 = vmax.f32 %v1737_v49, 0.0 }
 0x20b   : > { %v1732_v56 = vadd.f32 %v5199_v53, %v1731_v55  ;;  %v1831_v59 = vmax.f32 %v1729_v51, 0.0 }
 0x20c   : > { %v1834_v58 = vmax.f32 %v1740_v54, 0.0 }
 0x20d   : > { %v1832_v60 = vmax.f32 %v1732_v56, 0.0 }
 0x20e   : > { %v1860_v61 = vpack.c.bf16 %v1834_v58, %v1833_v57 }
 0x20f   : > { %v1859_v62 = vpack.c.bf16 %v1832_v60, %v1831_v59 }
 0x211   : > { %4365 = vmatprep.mubr.bf16.mxu1 %v1859_v62 }
 0x212   : > { %4366 = vmatmul.mubr.bf16.gmra.mrb[72].mxu1 %v1860_v61 }
 0x217   : > { %v4323_v63 = vpop.f32.mrb[76].mxu0 }
 0x218   : > { %v1753_v0 = vadd.f32 %v4323_v63, %v5199_v53  ;;  %v1744_v1 = vpop.f32.mrb[77].mxu0 }
 0x219   : > { %v1745_v2 = vadd.f32 %v5199_v53, %v1744_v1  ;;  %v4324_v3 = vpop.f32.mrb[78].mxu0 }
 0x21a   : > { %v1756_v4 = vadd.f32 %v4324_v3, %v5199_v53  ;;  %v1747_v5 = vpop.f32.mrb[79].mxu0  ;;  %v1837_v7 = vmax.f32 %v1753_v0, 0.0 }
 0x21b   : > { %v1748_v6 = vadd.f32 %v5199_v53, %v1747_v5  ;;  %v1835_v9 = vmax.f32 %v1745_v2, 0.0 }
 0x21c   : > { %v1838_v8 = vmax.f32 %v1756_v4, 0.0 }
 0x21d   : > { %v1836_v10 = vmax.f32 %v1748_v6, 0.0 }
 0x21e   : > { %v1862_v11 = vpack.c.bf16 %v1838_v8, %v1837_v7  ;;  %v5254_v8 = vld [vmem:[%s5866_s7] ss:$0 sm:$0xff] }
 0x21f   : > { %v1861_v12 = vpack.c.bf16 %v1836_v10, %v1835_v9 }
 0x221   : > { %4369 = vmatprep.mubr.bf16.mxu1 %v1861_v12 }
 0x222   : > { %4370 = vmatmul.mubr.bf16.gmra.mrb[76].mxu1 %v1862_v11 }
 0x227   : > { %v4327_v13 = vpop.f32.mrb[80].mxu0 }
 0x228   : > { %v1769_v42 = vadd.f32 %v4327_v13, %v5199_v53  ;;  %v1760_v14 = vpop.f32.mrb[81].mxu0 }
 0x229   : > { %v1761_v15 = vadd.f32 %v5199_v53, %v1760_v14  ;;  %v4328_v16 = vpop.f32.mrb[82].mxu0 }
 0x22a   : > { %v1772_v17 = vadd.f32 %v4328_v16, %v5199_v53  ;;  %v1763_v18 = vpop.f32.mrb[83].mxu0  ;;  %v1841_v20 = vmax.f32 %v1769_v42, 0.0 }
 0x22b   : > { %v1764_v19 = vadd.f32 %v5199_v53, %v1763_v18  ;;  %v1839_v22 = vmax.f32 %v1761_v15, 0.0 }
 0x22c   : > { %v1842_v21 = vmax.f32 %v1772_v17, 0.0 }
 0x22d   : > { %v1840_v23 = vmax.f32 %v1764_v19, 0.0 }
 0x22e   : > { %v1864_v24 = vpack.c.bf16 %v1842_v21, %v1841_v20 }
 0x22f   : > { %v1863_v25 = vpack.c.bf16 %v1840_v23, %v1839_v22 }
 0x231   : > { %4373 = vmatprep.mubr.bf16.mxu1 %v1863_v25 }
 0x232   : > { %4374 = vmatmul.mubr.bf16.gmra.mrb[80].mxu1 %v1864_v24 }
 0x237   : > { %v4331_v26 = vpop.f32.mrb[84].mxu0 }
 0x238   : > { %v1785_v27 = vadd.f32 %v4331_v26, %v5199_v53  ;;  %v1776_v28 = vpop.f32.mrb[85].mxu0 }
 0x239   : > { %v1777_v29 = vadd.f32 %v5199_v53, %v1776_v28  ;;  %v4332_v30 = vpop.f32.mrb[86].mxu0 }
 0x23a   : > { %v1788_v31 = vadd.f32 %v4332_v30, %v5199_v53  ;;  %v1779_v32 = vpop.f32.mrb[87].mxu0  ;;  %v1845_v34 = vmax.f32 %v1785_v27, 0.0 }
 0x23b   : > { %v1780_v33 = vadd.f32 %v5199_v53, %v1779_v32  ;;  %v1843_v36 = vmax.f32 %v1777_v29, 0.0 }
 0x23c   : > { %v1846_v35 = vmax.f32 %v1788_v31, 0.0 }
 0x23d   : > { %v1844_v37 = vmax.f32 %v1780_v33, 0.0 }
 0x23e   : > { %v1866_v38 = vpack.c.bf16 %v1846_v35, %v1845_v34 }
 0x23f   : > { %v1865_v39 = vpack.c.bf16 %v1844_v37, %v1843_v36 }
 0x241   : > { %4377 = vmatprep.mubr.bf16.mxu1 %v1865_v39 }
 0x242   : > { %4378 = vmatmul.mubr.bf16.gmra.mrb[84].mxu1 %v1866_v38 }
 0x247   : > { %v4335_v41 = vpop.f32.mrb[88].mxu0 }
 0x248   : > { %v1801_v43 = vadd.f32 %v4335_v41, %v5199_v53  ;;  %v1792_v44 = vpop.f32.mrb[89].mxu0 }
 0x249   : > { %v1793_v45 = vadd.f32 %v5199_v53, %v1792_v44  ;;  %v4336_v46 = vpop.f32.mrb[90].mxu0 }
 0x24a   : > { %v1804_v48 = vadd.f32 %v4336_v46, %v5199_v53  ;;  %v1795_v49 = vpop.f32.mrb[91].mxu0  ;;  %v1849_v51 = vmax.f32 %v1801_v43, 0.0 }
 0x24b   : > { %v1796_v50 = vadd.f32 %v5199_v53, %v1795_v49  ;;  %v1847_v54 = vmax.f32 %v1793_v45, 0.0 }
 0x24c   : > { %v1850_v52 = vmax.f32 %v1804_v48, 0.0 }
 0x24d   : > { %v1848_v55 = vmax.f32 %v1796_v50, 0.0 }
 0x24e   : > { %v1868_v56 = vpack.c.bf16 %v1850_v52, %v1849_v51 }
 0x24f   : > { %v1867_v57 = vpack.c.bf16 %v1848_v55, %v1847_v54 }
 0x251   : > { %4381 = vmatprep.mubr.bf16.mxu1 %v1867_v57 }
 0x252   : > { %4382 = vmatmul.mubr.bf16.gmra.mrb[88].mxu1 %v1868_v56 }
 0x257   : > { %v4339_v58 = vpop.f32.mrb[92].mxu0 }
 0x258   : > { %v1817_v59 = vadd.f32 %v4339_v58, %v5199_v53  ;;  %v1808_v60 = vpop.f32.mrb[93].mxu0 }
 0x259   : > { %v1809_v61 = vadd.f32 %v5199_v53, %v1808_v60  ;;  %v4340_v62 = vpop.f32.mrb[94].mxu0 }
 0x25a   : > { %v1820_v63 = vadd.f32 %v4340_v62, %v5199_v53  ;;  %v1811_v0 = vpop.f32.mrb[95].mxu0  ;;  %v1853_v2 = vmax.f32 %v1817_v59, 0.0 }
 0x25b   : > { %v1812_v1 = vadd.f32 %v5199_v53, %v1811_v0  ;;  %v1851_v4 = vmax.f32 %v1809_v61, 0.0 }
 0x25c   : > { %v1854_v3 = vmax.f32 %v1820_v63, 0.0 }
 0x25d   : > { %v1852_v5 = vmax.f32 %v1812_v1, 0.0 }
 0x25e   : > { %v1870_v6 = vpack.c.bf16 %v1854_v3, %v1853_v2 }
 0x25f   : > { %v1869_v7 = vpack.c.bf16 %v1852_v5, %v1851_v4 }
 0x261   : > { %4385 = vmatprep.mubr.bf16.mxu1 %v1869_v7 }
 0x262   : > { %4386 = vmatmul.mubr.bf16.gmra.mrb[92].mxu1 %v1870_v6 }
 0x2c5   : > { %v4359_v9 = vpop.f32.mrb[64].mxu1 }
 0x2c6   : > { %v5264_v10 = vadd.f32 %v4359_v9, %v5254_v8  ;;  %v1976_v11 = vpop.f32.mrb[65].mxu1 }
 0x2c7   : > { %v5267_v12 = vadd.f32 %v5254_v8, %v1976_v11  ;;  %v4360_v13 = vpop.f32.mrb[66].mxu1 }
 0x2c8   : > { %2105 = vst [vmem:[%s5261_s26 + $0x10] sm:$0xff] %v5264_v10  ;;  %v5272_v42 = vadd.f32 %v4360_v13, %v5254_v8  ;;  %v1979_v14 = vpop.f32.mrb[67].mxu1  ;;  %v2665_v15 = vmul.f32 %v5264_v10, %v5264_v10 }
 0x2c9   : > { %2103 = vst [vmem:[%s5261_s26] sm:$0xff] %v5267_v12  ;;  %v5279_v16 = vadd.f32 %v5254_v8, %v1979_v14  ;;  %v2663_v17 = vmul.f32 %v5267_v12, %v5267_v12 }
 0x2ca   : > { %2106 = vst [vmem:[%s5261_s26 + $0x18] sm:$0xff] %v5272_v42  ;;  %2699 = vadd.xlane.f32.xlu1 %v2665_v15  ;;  %v2136_v19 = vpack.c.bf16 %v5272_v42, %v5264_v10  ;;  %v2666_v20 = vmul.f32 %v5272_v42, %v5272_v42 }
 0x2cb   : > { %2104 = vst [vmem:[%s5261_s26 + $0x8] sm:$0xff] %v5279_v16  ;;  %2695 = vadd.xlane.f32.xlu0 %v2663_v17  ;;  %v2135_v18 = vpack.c.bf16 %v5279_v16, %v5267_v12  ;;  %v2664_v21 = vmul.f32 %v5279_v16, %v5279_v16  ;;  %v4645_v17 = vld [vmem:[%s5865_s6] sm:$0xff]  }
 0x2cc   : > { %4437 = vmatprep.subr.bf16.mxu1 %v4645_v17 }
 0x2cd   : > { %4405 = vmatprep.mubr.bf16.mxu0 %v2135_v18  ;;  %4438 = vmatpush3.bf16.msra.mxu1 %v4645_v17 }
 0x2ce   : > { %2701 = vadd.xlane.f32.xlu1 %v2666_v20  ;;  %4406 = vmatmul.mubr.bf16.vlgmr.msra.gmra.mrb[96].mxu0 %v2136_v19 }
 0x2cf   : > { %2697 = vadd.xlane.f32.xlu0 %v2664_v21  ;;  %v4646_v21 = vld [vmem:[%s5865_s6 + $0x8] sm:$0xff]  }
 0x2d0   : > { %4439 = vmatprep.subr.bf16.mxu1 %v4646_v21 }
 0x2d1   : > { %4440 = vmatpush3.bf16.msra.mxu1 %v4646_v21 }
 0x2d5   : > { %v4363_v22 = vpop.f32.mrb[68].mxu1 }
 0x2d6   : > { %v5296_v23 = vadd.f32 %v4363_v22, %v5254_v8  ;;  %v1992_v24 = vpop.f32.mrb[69].mxu1  ;;  %v4647_v22 = vld [vmem:[%s5865_s6 + $0x10] sm:$0xff]  }
 0x2d7   : > { %v5299_v25 = vadd.f32 %v5254_v8, %v1992_v24  ;;  %v4364_v26 = vpop.f32.mrb[70].mxu1  ;;  %4441 = vmatprep.subr.bf16.mxu1 %v4647_v22 }
 0x2d8   : > { %2109 = vst [vmem:[%s5261_s26 + $0x30] sm:$0xff] %v5296_v23  ;;  %v5304_v27 = vadd.f32 %v4364_v26, %v5254_v8  ;;  %v1995_v28 = vpop.f32.mrb[71].mxu1  ;;  %v2669_v29 = vmul.f32 %v5296_v23, %v5296_v23  ;;  %4442 = vmatpush3.bf16.msra.mxu1 %v4647_v22 }
 0x2d9   : > { %2107 = vst [vmem:[%s5261_s26 + $0x20] sm:$0xff] %v5299_v25  ;;  %v5311_v30 = vadd.f32 %v5254_v8, %v1995_v28  ;;  %v2667_v33 = vmul.f32 %v5299_v25, %v5299_v25 }
 0x2da   : > { %2110 = vst [vmem:[%s5261_s26 + $0x38] sm:$0xff] %v5304_v27  ;;  %2707 = vadd.xlane.f32.xlu0 %v2669_v29  ;;  %v2670_v31 = vmul.f32 %v5304_v27, %v5304_v27  ;;  %v2138_v34 = vpack.c.bf16 %v5304_v27, %v5296_v23 }
 0x2db   : > { %2108 = vst [vmem:[%s5261_s26 + $0x28] sm:$0xff] %v5311_v30  ;;  %v2137_v32 = vpack.c.bf16 %v5311_v30, %v5299_v25  ;;  %v2668_v35 = vmul.f32 %v5311_v30, %v5311_v30 }
 0x2dc   : > { %2709 = vadd.xlane.f32.xlu1 %v2670_v31 }
 0x2dd   : > { %4409 = vmatprep.mubr.bf16.mxu0 %v2137_v32  ;;  %v4648_v32 = vld [vmem:[%s5865_s6 + $0x18] sm:$0xff]  }
 0x2de   : > { %2703 = vadd.xlane.f32.xlu0 %v2667_v33  ;;  %4410 = vmatmul.mubr.bf16.gmra.mrb[100].mxu0 %v2138_v34 }
 0x2df   : > { %4443 = vmatprep.subr.bf16.mxu1 %v4648_v32 }
 0x2e0   : > { %2705 = vadd.xlane.f32.xlu1 %v2668_v35  ;;  %4444 = vmatpush3.bf16.msra.mxu1 %v4648_v32 }
 0x2e5   : > { %v4367_v36 = vpop.f32.mrb[72].mxu1 }
 0x2e6   : > { %v5328_v37 = vadd.f32 %v4367_v36, %v5254_v8  ;;  %v2008_v38 = vpop.f32.mrb[73].mxu1 }
 0x2e7   : > { %v5331_v39 = vadd.f32 %v5254_v8, %v2008_v38  ;;  %v4368_v40 = vpop.f32.mrb[74].mxu1 }
 0x2e8   : > { %2113 = vst [vmem:[%s5261_s26 + $0x50] sm:$0xff] %v5328_v37  ;;  %v5336_v41 = vadd.f32 %v4368_v40, %v5254_v8  ;;  %v2011_v43 = vpop.f32.mrb[75].mxu1  ;;  %v2673_v44 = vmul.f32 %v5328_v37, %v5328_v37 }
 0x2e9   : > { %2111 = vst [vmem:[%s5261_s26 + $0x40] sm:$0xff] %v5331_v39  ;;  %v5343_v45 = vadd.f32 %v5254_v8, %v2011_v43  ;;  %v2671_v48 = vmul.f32 %v5331_v39, %v5331_v39  ;;  %v4649_v43 = vld [vmem:[%s5865_s6 + $0x20] sm:$0xff]  }
 0x2ea   : > { %2114 = vst [vmem:[%s5261_s26 + $0x58] sm:$0xff] %v5336_v41  ;;  %2715 = vadd.xlane.f32.xlu0 %v2673_v44  ;;  %v2674_v46 = vmul.f32 %v5336_v41, %v5336_v41  ;;  %v2140_v49 = vpack.c.bf16 %v5336_v41, %v5328_v37  ;;  %4445 = vmatprep.subr.bf16.mxu1 %v4649_v43 }
 0x2eb   : > { %2112 = vst [vmem:[%s5261_s26 + $0x48] sm:$0xff] %v5343_v45  ;;  %v2139_v47 = vpack.c.bf16 %v5343_v45, %v5331_v39  ;;  %v2672_v50 = vmul.f32 %v5343_v45, %v5343_v45  ;;  %4446 = vmatpush3.bf16.msra.mxu1 %v4649_v43 }
 0x2ec   : > { %2717 = vadd.xlane.f32.xlu1 %v2674_v46 }
 0x2ed   : > { %4413 = vmatprep.mubr.bf16.mxu0 %v2139_v47 }
 0x2ee   : > { %2711 = vadd.xlane.f32.xlu0 %v2671_v48  ;;  %4414 = vmatmul.mubr.bf16.gmra.mrb[104].mxu0 %v2140_v49  ;;  %v4650_v48 = vld [vmem:[%s5865_s6 + $0x28] sm:$0xff]   ;;  %v4651_v49 = vld [vmem:[%s5865_s6 + $0x30] sm:$0xff]  }
 0x2ef   : > { %4447 = vmatprep.subr.bf16.mxu1 %v4650_v48 }
 0x2f0   : > { %2713 = vadd.xlane.f32.xlu1 %v2672_v50  ;;  %4448 = vmatpush3.bf16.msra.mxu1 %v4650_v48 }
 0x2f1   : > { %4449 = vmatprep.subr.bf16.mxu1 %v4651_v49 }
 0x2f4   : > { %4450 = vmatpush3.bf16.msra.mxu1 %v4651_v49 }
 0x2f5   : > { %v4371_v51 = vpop.f32.mrb[76].mxu1 }
 0x2f6   : > { %v5360_v52 = vadd.f32 %v4371_v51, %v5254_v8  ;;  %v2024_v54 = vpop.f32.mrb[77].mxu1 }
 0x2f7   : > { %v5363_v55 = vadd.f32 %v5254_v8, %v2024_v54  ;;  %v4372_v56 = vpop.f32.mrb[78].mxu1 }
 0x2f8   : > { %2117 = vst [vmem:[%s5261_s26 + $0x70] sm:$0xff] %v5360_v52  ;;  %v5368_v57 = vadd.f32 %v4372_v56, %v5254_v8  ;;  %v2027_v58 = vpop.f32.mrb[79].mxu1  ;;  %v2677_v59 = vmul.f32 %v5360_v52, %v5360_v52 }
 0x2f9   : > { %2115 = vst [vmem:[%s5261_s26 + $0x60] sm:$0xff] %v5363_v55  ;;  %v5375_v60 = vadd.f32 %v5254_v8, %v2027_v58  ;;  %v2675_v63 = vmul.f32 %v5363_v55, %v5363_v55 }
 0x2fa   : > { %2118 = vst [vmem:[%s5261_s26 + $0x78] sm:$0xff] %v5368_v57  ;;  %2723 = vadd.xlane.f32.xlu0 %v2677_v59  ;;  %v2678_v61 = vmul.f32 %v5368_v57, %v5368_v57  ;;  %v2142_v0 = vpack.c.bf16 %v5368_v57, %v5360_v52  ;;  %v4652_v59 = vld [vmem:[%s5865_s6 + $0x38] sm:$0xff]  }
 0x2fb   : > { %2116 = vst [vmem:[%s5261_s26 + $0x68] sm:$0xff] %v5375_v60  ;;  %v2141_v62 = vpack.c.bf16 %v5375_v60, %v5363_v55  ;;  %v2676_v1 = vmul.f32 %v5375_v60, %v5375_v60  ;;  %4451 = vmatprep.subr.bf16.mxu1 %v4652_v59 }
 0x2fc   : > { %2725 = vadd.xlane.f32.xlu1 %v2678_v61  ;;  %4452 = vmatpush3.bf16.msra.mxu1 %v4652_v59 }
 0x2fd   : > { %4417 = vmatprep.mubr.bf16.mxu0 %v2141_v62 }
 0x2fe   : > { %2719 = vadd.xlane.f32.xlu0 %v2675_v63  ;;  %4418 = vmatmul.mubr.bf16.gmra.mrb[108].mxu0 %v2142_v0 }
 0x300   : > { %2721 = vadd.xlane.f32.xlu1 %v2676_v1 }
 0x305   : > { %v4375_v2 = vpop.f32.mrb[80].mxu1 }
 0x306   : > { %v5392_v3 = vadd.f32 %v4375_v2, %v5254_v8  ;;  %v2040_v4 = vpop.f32.mrb[81].mxu1 }
 0x307   : > { %v5395_v5 = vadd.f32 %v5254_v8, %v2040_v4  ;;  %v4376_v6 = vpop.f32.mrb[82].mxu1 }
 0x308   : > { %2121 = vst [vmem:[%s5261_s26 + $0x90] sm:$0xff] %v5392_v3  ;;  %v5400_v7 = vadd.f32 %v4376_v6, %v5254_v8  ;;  %v2043_v9 = vpop.f32.mrb[83].mxu1  ;;  %v2681_v11 = vmul.f32 %v5392_v3, %v5392_v3 }
 0x309   : > { %2119 = vst [vmem:[%s5261_s26 + $0x80] sm:$0xff] %v5395_v5  ;;  %v5407_v13 = vadd.f32 %v5254_v8, %v2043_v9  ;;  %v2679_v18 = vmul.f32 %v5395_v5, %v5395_v5 }
 0x30a   : > { %2122 = vst [vmem:[%s5261_s26 + $0x98] sm:$0xff] %v5400_v7  ;;  %2731 = vadd.xlane.f32.xlu0 %v2681_v11  ;;  %v2682_v14 = vmul.f32 %v5400_v7, %v5400_v7  ;;  %v2144_v19 = vpack.c.bf16 %v5400_v7, %v5392_v3 }
 0x30b   : > { %2120 = vst [vmem:[%s5261_s26 + $0x88] sm:$0xff] %v5407_v13  ;;  %v2143_v15 = vpack.c.bf16 %v5407_v13, %v5395_v5  ;;  %v2680_v20 = vmul.f32 %v5407_v13, %v5407_v13 }
 0x30c   : > { %2733 = vadd.xlane.f32.xlu1 %v2682_v14 }
 0x30d   : > { %4421 = vmatprep.mubr.bf16.mxu0 %v2143_v15 }
 0x30e   : > { %2727 = vadd.xlane.f32.xlu0 %v2679_v18  ;;  %4422 = vmatmul.mubr.bf16.gmra.mrb[112].mxu0 %v2144_v19 }
 0x310   : > { %2729 = vadd.xlane.f32.xlu1 %v2680_v20 }
 0x315   : > { %v4379_v24 = vpop.f32.mrb[84].mxu1 }
 0x316   : > { %v5433_v26 = vadd.f32 %v4379_v24, %v5254_v8  ;;  %v2056_v28 = vpop.f32.mrb[85].mxu1 }
 0x317   : > { %v5436_v29 = vadd.f32 %v5254_v8, %v2056_v28  ;;  %v4380_v31 = vpop.f32.mrb[86].mxu1 }
 0x318   : > { %2125 = vst [vmem:[%s5261_s26 + $0xb0] sm:$0xff] %v5433_v26  ;;  %v5444_v33 = vadd.f32 %v4380_v31, %v5254_v8  ;;  %v2059_v34 = vpop.f32.mrb[87].mxu1  ;;  %v2685_v35 = vmul.f32 %v5433_v26, %v5433_v26 }
 0x319   : > { %2123 = vst [vmem:[%s5261_s26 + $0xa0] sm:$0xff] %v5436_v29  ;;  %v5451_v36 = vadd.f32 %v5254_v8, %v2059_v34  ;;  %v2683_v44 = vmul.f32 %v5436_v29, %v5436_v29 }
 0x31a   : > { %2126 = vst [vmem:[%s5261_s26 + $0xb8] sm:$0xff] %v5444_v33  ;;  %2739 = vadd.xlane.f32.xlu0 %v2685_v35  ;;  %v2686_v38 = vmul.f32 %v5444_v33, %v5444_v33  ;;  %v2146_v46 = vpack.c.bf16 %v5444_v33, %v5433_v26 }
 0x31b   : > { %2124 = vst [vmem:[%s5261_s26 + $0xa8] sm:$0xff] %v5451_v36  ;;  %v2145_v40 = vpack.c.bf16 %v5451_v36, %v5436_v29  ;;  %v2684_v47 = vmul.f32 %v5451_v36, %v5451_v36 }
 0x31c   : > { %2741 = vadd.xlane.f32.xlu1 %v2686_v38 }
 0x31d   : > { %4425 = vmatprep.mubr.bf16.mxu0 %v2145_v40 }
 0x31e   : > { %2735 = vadd.xlane.f32.xlu0 %v2683_v44  ;;  %4426 = vmatmul.mubr.bf16.gmra.mrb[116].mxu0 %v2146_v46 }
 0x320   : > { %2737 = vadd.xlane.f32.xlu1 %v2684_v47 }
 0x325   : > { %v4383_v50 = vpop.f32.mrb[88].mxu1 }
 0x326   : > { %v5477_v51 = vadd.f32 %v4383_v50, %v5254_v8  ;;  %v2072_v54 = vpop.f32.mrb[89].mxu1 }
 0x327   : > { %v5480_v56 = vadd.f32 %v5254_v8, %v2072_v54  ;;  %v4384_v58 = vpop.f32.mrb[90].mxu1 }
 0x328   : > { %2129 = vst [vmem:[%s5261_s26 + $0xd0] sm:$0xff] %v5477_v51  ;;  %v5488_v61 = vadd.f32 %v4384_v58, %v5254_v8  ;;  %v2075_v62 = vpop.f32.mrb[91].mxu1  ;;  %v2689_v63 = vmul.f32 %v5477_v51, %v5477_v51 }
 0x329   : > { %2127 = vst [vmem:[%s5261_s26 + $0xc0] sm:$0xff] %v5480_v56  ;;  %v5495_v0 = vadd.f32 %v5254_v8, %v2075_v62  ;;  %v2687_v4 = vmul.f32 %v5480_v56, %v5480_v56 }
 0x32a   : > { %2130 = vst [vmem:[%s5261_s26 + $0xd8] sm:$0xff] %v5488_v61  ;;  %2747 = vadd.xlane.f32.xlu0 %v2689_v63  ;;  %v2690_v1 = vmul.f32 %v5488_v61, %v5488_v61  ;;  %v2148_v6 = vpack.c.bf16 %v5488_v61, %v5477_v51 }
 0x32b   : > { %2128 = vst [vmem:[%s5261_s26 + $0xc8] sm:$0xff] %v5495_v0  ;;  %v2147_v2 = vpack.c.bf16 %v5495_v0, %v5480_v56  ;;  %v2688_v9 = vmul.f32 %v5495_v0, %v5495_v0 }
 0x32c   : > { %2749 = vadd.xlane.f32.xlu1 %v2690_v1 }
 0x32d   : > { %4429 = vmatprep.mubr.bf16.mxu0 %v2147_v2 }
 0x32e   : > { %2743 = vadd.xlane.f32.xlu0 %v2687_v4  ;;  %4430 = vmatmul.mubr.bf16.gmra.mrb[120].mxu0 %v2148_v6 }
 0x330   : > { %2745 = vadd.xlane.f32.xlu1 %v2688_v9 }
 0x335   : > { %v4387_v11 = vpop.f32.mrb[92].mxu1 }
 0x336   : > { %v5512_v14 = vadd.f32 %v4387_v11, %v5254_v8  ;;  %v2088_v15 = vpop.f32.mrb[93].mxu1 }
 0x337   : > { %v5515_v17 = vadd.f32 %v5254_v8, %v2088_v15  ;;  %v4388_v18 = vpop.f32.mrb[94].mxu1 }
 0x338   : > { %2133 = vst [vmem:[%s5261_s26 + $0xf0] sm:$0xff] %v5512_v14  ;;  %v5520_v19 = vadd.f32 %v4388_v18, %v5254_v8  ;;  %v2091_v20 = vpop.f32.mrb[95].mxu1  ;;  %v2693_v21 = vmul.f32 %v5512_v14, %v5512_v14 }
 0x339   : > { %2131 = vst [vmem:[%s5261_s26 + $0xe0] sm:$0xff] %v5515_v17  ;;  %v5527_v22 = vadd.f32 %v5254_v8, %v2091_v20  ;;  %v2691_v31 = vmul.f32 %v5515_v17, %v5515_v17 }
 0x33a   : > { %2134 = vst [vmem:[%s5261_s26 + $0xf8] sm:$0xff] %v5520_v19  ;;  %2755 = vadd.xlane.f32.xlu0 %v2693_v21  ;;  %v2694_v24 = vmul.f32 %v5520_v19, %v5520_v19  ;;  %v2150_v32 = vpack.c.bf16 %v5520_v19, %v5512_v14 }
 0x33b   : > { %2132 = vst [vmem:[%s5261_s26 + $0xe8] sm:$0xff] %v5527_v22  ;;  %v2149_v28 = vpack.c.bf16 %v5527_v22, %v5515_v17  ;;  %v2692_v8 = vmul.f32 %v5527_v22, %v5527_v22 }
 0x33c   : > { %2757 = vadd.xlane.f32.xlu1 %v2694_v24 }
 0x33d   : > { %4433 = vmatprep.mubr.bf16.mxu0 %v2149_v28 }
 0x33e   : > { %2751 = vadd.xlane.f32.xlu0 %v2691_v31  ;;  %4434 = vmatmul.mubr.bf16.gmra.mrb[124].mxu0 %v2150_v32 }
 0x340   : > { %2753 = vadd.xlane.f32.xlu1 %v2692_v8 }
 0x357   : > { %v2700_v34 = vpop.xlane.xlu1 %2699 }
 0x358   : > { %v2761_v35 = vmax.f32 %v2700_v34, 1e-24  ;;  %v2696_v38 = vpop.xlane.xlu0 %2695 }
 0x359   : > { %v2759_v40 = vmax.f32 %v2696_v38, 1e-24 }
 0x35a   : > { %4653 = vrsqrt.f32 %v2761_v35 }
 0x35b   : > { %v2702_v43 = vpop.xlane.xlu1 %2701  ;;  %4655 = vrsqrt.f32 %v2759_v40 }
 0x35c   : > { %v2762_v44 = vmax.f32 %v2702_v43, 1e-24  ;;  %v2698_v46 = vpop.xlane.xlu0 %2697 }
 0x35d   : > { %v2760_v47 = vmax.f32 %v2698_v46, 1e-24 }
 0x35e   : > { %4657 = vrsqrt.f32 %v2762_v44 }
 0x35f   : > { %4659 = vrsqrt.f32 %v2760_v47 }
 0x364   : > { %v4654_v48 = vpop.eup %4653 }
 0x365   : > { %v4656_v49 = vpop.eup %4655  ;;  %v2985_v62 = vmul.f32 %v4654_v48, %v5264_v10 }
 0x366   : > { %v2983_v2 = vmul.f32 %v4656_v49, %v5267_v12 }
 0x367   : > { %v2708_v50 = vpop.xlane.xlu0 %2707 }
 0x368   : > { %v4658_v54 = vpop.eup %4657  ;;  %v2765_v58 = vmax.f32 %v2708_v50, 1e-24 }
 0x369   : > { %v4660_v59 = vpop.eup %4659  ;;  %v2986_v63 = vmul.f32 %v4658_v54, %v5272_v42  ;;  %v2710_v1 = vpop.xlane.xlu1 %2709 }
 0x36a   : > { %v2984_v4 = vmul.f32 %v4660_v59, %v5279_v16  ;;  %4661 = vrsqrt.f32 %v2765_v58  ;;  %v2766_v6 = vmax.f32 %v2710_v1, 1e-24 }
 0x36b   : > { %v3791_v9 = vpack.c.bf16 %v2986_v63, %v2985_v62  ;;  %v2704_v11 = vpop.xlane.xlu0 %2703 }
 0x36c   : > { %v3786_v10 = vpack.c.bf16 %v2984_v4, %v2983_v2  ;;  %4663 = vrsqrt.f32 %v2766_v6  ;;  %v2763_v42 = vmax.f32 %v2704_v11, 1e-24 }
 0x36d   : > { %3943 = vst [vmem:[%s5552_s22 + $0x8] sm:$0xff] %v3791_v9   ;;  %v2706_v15 = vpop.xlane.xlu1 %2705 }
 0x36e   : > { %3787 = vst [vmem:[%s5552_s22] sm:$0xff] %v3786_v10   ;;  %4665 = vrsqrt.f32 %v2763_v42  ;;  %v2764_v12 = vmax.f32 %v2706_v15, 1e-24 }
 0x370   : > { %4667 = vrsqrt.f32 %v2764_v12 }
 0x374   : > { %v4662_v18 = vpop.eup %4661 }
 0x375   : > { %v2989_v21 = vmul.f32 %v4662_v18, %v5296_v23 }
 0x376   : > { %v4664_v20 = vpop.eup %4663 }
 0x377   : > { %v2990_v16 = vmul.f32 %v4664_v20, %v5304_v27  ;;  %v2716_v24 = vpop.xlane.xlu0 %2715 }
 0x378   : > { %v4666_v28 = vpop.eup %4665  ;;  %v2769_v31 = vmax.f32 %v2716_v24, 1e-24 }
 0x379   : > { %v3801_v32 = vpack.c.bf16 %v2990_v16, %v2989_v21  ;;  %v2718_v8 = vpop.xlane.xlu1 %2717  ;;  %v2987_v38 = vmul.f32 %v4666_v28, %v5299_v25 }
 0x37a   : > { %v4668_v34 = vpop.eup %4667  ;;  %4669 = vrsqrt.f32 %v2769_v31  ;;  %v2770_v35 = vmax.f32 %v2718_v8, 1e-24 }
 0x37b   : > { %3945 = vst [vmem:[%s5552_s22 + $0x18] sm:$0xff] %v3801_v32   ;;  %v2988_v40 = vmul.f32 %v4668_v34, %v5311_v30  ;;  %v2712_v43 = vpop.xlane.xlu0 %2711 }
 0x37c   : > { %4671 = vrsqrt.f32 %v2770_v35  ;;  %v2767_v44 = vmax.f32 %v2712_v43, 1e-24 }
 0x37d   : > { %v3796_v23 = vpack.c.bf16 %v2988_v40, %v2987_v38  ;;  %v2714_v46 = vpop.xlane.xlu1 %2713 }
 0x37e   : > { %4673 = vrsqrt.f32 %v2767_v44  ;;  %v2768_v27 = vmax.f32 %v2714_v46, 1e-24 }
 0x37f   : > { %3944 = vst [vmem:[%s5552_s22 + $0x10] sm:$0xff] %v3796_v23  }
 0x380   : > { %4675 = vrsqrt.f32 %v2768_v27 }
 0x384   : > { %v4670_v47 = vpop.eup %4669 }
 0x385   : > { %v2993_v49 = vmul.f32 %v4670_v47, %v5328_v37 }
 0x386   : > { %v4672_v48 = vpop.eup %4671 }
 0x387   : > { %v2994_v50 = vmul.f32 %v4672_v48, %v5336_v41  ;;  %v2724_v54 = vpop.xlane.xlu0 %2723 }
 0x388   : > { %v4674_v25 = vpop.eup %4673  ;;  %v2773_v58 = vmax.f32 %v2724_v54, 1e-24 }
 0x389   : > { %v3811_v30 = vpack.c.bf16 %v2994_v50, %v2993_v49  ;;  %v2726_v59 = vpop.xlane.xlu1 %2725  ;;  %v2991_v1 = vmul.f32 %v4674_v25, %v5331_v39 }
 0x38a   : > { %v4676_v62 = vpop.eup %4675  ;;  %4677 = vrsqrt.f32 %v2773_v58  ;;  %v2774_v63 = vmax.f32 %v2726_v59, 1e-24 }
 0x38b   : > { %3947 = vst [vmem:[%s5552_s22 + $0x28] sm:$0xff] %v3811_v30   ;;  %v2992_v2 = vmul.f32 %v4676_v62, %v5343_v45  ;;  %v2720_v4 = vpop.xlane.xlu0 %2719 }
 0x38c   : > { %4679 = vrsqrt.f32 %v2774_v63  ;;  %v2771_v6 = vmax.f32 %v2720_v4, 1e-24 }
 0x38d   : > { %v3806_v37 = vpack.c.bf16 %v2992_v2, %v2991_v1  ;;  %v2722_v9 = vpop.xlane.xlu1 %2721 }
 0x38e   : > { %4681 = vrsqrt.f32 %v2771_v6  ;;  %v2772_v41 = vmax.f32 %v2722_v9, 1e-24 }
 0x38f   : > { %3946 = vst [vmem:[%s5552_s22 + $0x20] sm:$0xff] %v3806_v37  }
 0x390   : > { %4683 = vrsqrt.f32 %v2772_v41 }
 0x394   : > { %v4678_v11 = vpop.eup %4677 }
 0x395   : > { %v2997_v42 = vmul.f32 %v4678_v11, %v5360_v52 }
 0x396   : > { %v4680_v10 = vpop.eup %4679 }
 0x397   : > { %v2998_v15 = vmul.f32 %v4680_v10, %v5368_v57  ;;  %v2732_v12 = vpop.xlane.xlu0 %2731  ;;  %v5588_v10 = vld [vmem:[%s5864_s5] ss:$0 sm:$0xff] }
 0x398   : > { %v4682_v39 = vpop.eup %4681  ;;  %v2777_v18 = vmax.f32 %v2732_v12, 1e-24 }
 0x399   : > { %v3821_v45 = vpack.c.bf16 %v2998_v15, %v2997_v42  ;;  %v2734_v20 = vpop.xlane.xlu1 %2733  ;;  %v2995_v24 = vmul.f32 %v4682_v39, %v5363_v55 }
 0x39a   : > { %v4684_v21 = vpop.eup %4683  ;;  %4685 = vrsqrt.f32 %v2777_v18  ;;  %v2778_v16 = vmax.f32 %v2734_v20, 1e-24 }
 0x39b   : > { %3949 = vst [vmem:[%s5552_s22 + $0x38] sm:$0xff] %v3821_v45   ;;  %v2996_v28 = vmul.f32 %v4684_v21, %v5375_v60  ;;  %v2728_v31 = vpop.xlane.xlu0 %2727 }
 0x39c   : > { %4687 = vrsqrt.f32 %v2778_v16  ;;  %v2775_v32 = vmax.f32 %v2728_v31, 1e-24 }
 0x39d   : > { %v3816_v52 = vpack.c.bf16 %v2996_v28, %v2995_v24  ;;  %v2730_v8 = vpop.xlane.xlu1 %2729 }
 0x39e   : > { %4689 = vrsqrt.f32 %v2775_v32  ;;  %v2776_v57 = vmax.f32 %v2730_v8, 1e-24 }
 0x39f   : > { %3948 = vst [vmem:[%s5552_s22 + $0x30] sm:$0xff] %v3816_v52  }
 0x3a0   : > { %4691 = vrsqrt.f32 %v2776_v57 }
 0x3a1   : > { %v4407_v34 = vpop.f32.mrb[96].mxu0 }
 0x3a2   : > { %v2265_v35 = vadd.f32 %v4407_v34, %v5199_v53  ;;  %v2256_v38 = vpop.f32.mrb[97].mxu0 }
 0x3a3   : > { %v2257_v40 = vadd.f32 %v5199_v53, %v2256_v38  ;;  %v4408_v43 = vpop.f32.mrb[98].mxu0 }
 0x3a4   : > { %v4686_v44 = vpop.eup %4685  ;;  %v2268_v55 = vadd.f32 %v4408_v43, %v5199_v53  ;;  %v2259_v60 = vpop.f32.mrb[99].mxu0  ;;  %v2385_v27 = vmax.f32 %v2265_v35, 0.0 }
 0x3a5   : > { %v2260_v23 = vadd.f32 %v5199_v53, %v2259_v60  ;;  %v3001_v48 = vmul.f32 %v4686_v44, %v5392_v3  ;;  %v2383_v50 = vmax.f32 %v2257_v40, 0.0 }
 0x3a6   : > { %v4688_v46 = vpop.eup %4687  ;;  %v2386_v47 = vmax.f32 %v2268_v55, 0.0 }
 0x3a7   : > { %v3002_v49 = vmul.f32 %v4688_v46, %v5400_v7  ;;  %v2384_v54 = vmax.f32 %v2260_v23, 0.0  ;;  %v2740_v25 = vpop.xlane.xlu0 %2739 }
 0x3a8   : > { %v4690_v58 = vpop.eup %4689  ;;  %v2416_v30 = vpack.c.bf16 %v2386_v47, %v2385_v27  ;;  %v2781_v59 = vmax.f32 %v2740_v25, 1e-24 }
 0x3a9   : > { %v3831_v62 = vpack.c.bf16 %v3002_v49, %v3001_v48  ;;  %v2415_v63 = vpack.c.bf16 %v2384_v54, %v2383_v50  ;;  %v2742_v1 = vpop.xlane.xlu1 %2741  ;;  %v2999_v4 = vmul.f32 %v4690_v58, %v5395_v5 }
 0x3aa   : > { %v4692_v2 = vpop.eup %4691  ;;  %4693 = vrsqrt.f32 %v2781_v59  ;;  %v2782_v53 = vmax.f32 %v2742_v1, 1e-24 }
 0x3ab   : > { %3951 = vst [vmem:[%s5552_s22 + $0x48] sm:$0xff] %v3831_v62   ;;  %v3000_v3 = vmul.f32 %v4692_v2, %v5407_v13  ;;  %v2736_v6 = vpop.xlane.xlu0 %2735  ;;  %4453 = vmatprep.mubr.bf16.mxu1 %v2415_v63 }
 0x3ac   : > { %4695 = vrsqrt.f32 %v2782_v53  ;;  %v2779_v7 = vmax.f32 %v2736_v6, 1e-24  ;;  %4454 = vmatmul.mubr.bf16.vlgmr.msra.gmra.mrb[96].mxu1 %v2416_v30 }
 0x3ad   : > { %v3826_v37 = vpack.c.bf16 %v3000_v3, %v2999_v4  ;;  %v2738_v9 = vpop.xlane.xlu1 %2737 }
 0x3ae   : > { %4697 = vrsqrt.f32 %v2779_v7  ;;  %v2780_v41 = vmax.f32 %v2738_v9, 1e-24 }
 0x3af   : > { %3950 = vst [vmem:[%s5552_s22 + $0x40] sm:$0xff] %v3826_v37  }
 0x3b0   : > { %4699 = vrsqrt.f32 %v2780_v41 }
 0x3b1   : > { %v4411_v11 = vpop.f32.mrb[100].mxu0 }
 0x3b2   : > { %v2281_v5 = vadd.f32 %v5588_v10, %v4411_v11  ;;  %v2272_v13 = vpop.f32.mrb[101].mxu0 }
 0x3b3   : > { %v2273_v42 = vadd.f32 %v5588_v10, %v2272_v13  ;;  %v4412_v15 = vpop.f32.mrb[102].mxu0 }
 0x3b4   : > { %v4694_v12 = vpop.eup %4693  ;;  %v2284_v39 = vadd.f32 %v5588_v10, %v4412_v15  ;;  %v2275_v18 = vpop.f32.mrb[103].mxu0  ;;  %v2389_v21 = vmax.f32 %v2281_v5, 0.0 }
 0x3b5   : > { %v2276_v45 = vadd.f32 %v5588_v10, %v2275_v18  ;;  %v3005_v24 = vmul.f32 %v4694_v12, %v5433_v26  ;;  %v2387_v31 = vmax.f32 %v2273_v42, 0.0 }
 0x3b6   : > { %v4696_v20 = vpop.eup %4695  ;;  %v2390_v16 = vmax.f32 %v2284_v39, 0.0 }
 0x3b7   : > { %v3006_v28 = vmul.f32 %v4696_v20, %v5444_v33  ;;  %v2388_v32 = vmax.f32 %v2276_v45, 0.0  ;;  %v2748_v52 = vpop.xlane.xlu0 %2747 }
 0x3b8   : > { %v4698_v8 = vpop.eup %4697  ;;  %v2418_v57 = vpack.c.bf16 %v2390_v16, %v2389_v21  ;;  %v2785_v34 = vmax.f32 %v2748_v52, 1e-24 }
 0x3b9   : > { %v3841_v35 = vpack.c.bf16 %v3006_v28, %v3005_v24  ;;  %v2417_v38 = vpack.c.bf16 %v2388_v32, %v2387_v31  ;;  %v2750_v40 = vpop.xlane.xlu1 %2749  ;;  %v3003_v55 = vmul.f32 %v4698_v8, %v5436_v29 }
 0x3ba   : > { %v4700_v43 = vpop.eup %4699  ;;  %4701 = vrsqrt.f32 %v2785_v34  ;;  %v2786_v44 = vmax.f32 %v2750_v40, 1e-24 }
 0x3bb   : > { %3953 = vst [vmem:[%s5552_s22 + $0x58] sm:$0xff] %v3841_v35   ;;  %v3004_v26 = vmul.f32 %v4700_v43, %v5451_v36  ;;  %v2744_v60 = vpop.xlane.xlu0 %2743  ;;  %4457 = vmatprep.mubr.bf16.mxu1 %v2417_v38 }
 0x3bc   : > { %4703 = vrsqrt.f32 %v2786_v44  ;;  %v2783_v33 = vmax.f32 %v2744_v60, 1e-24  ;;  %4458 = vmatmul.mubr.bf16.gmra.mrb[100].mxu1 %v2418_v57 }
 0x3bd   : > { %v3836_v23 = vpack.c.bf16 %v3004_v26, %v3003_v55  ;;  %v2746_v46 = vpop.xlane.xlu1 %2745 }
 0x3be   : > { %4705 = vrsqrt.f32 %v2783_v33  ;;  %v2784_v27 = vmax.f32 %v2746_v46, 1e-24 }
 0x3bf   : > { %3952 = vst [vmem:[%s5552_s22 + $0x50] sm:$0xff] %v3836_v23  }
 0x3c0   : > { %4707 = vrsqrt.f32 %v2784_v27 }
 0x3c1   : > { %v4415_v47 = vpop.f32.mrb[104].mxu0 }
 0x3c2   : > { %v2297_v48 = vadd.f32 %v5588_v10, %v4415_v47  ;;  %v2288_v49 = vpop.f32.mrb[105].mxu0 }
 0x3c3   : > { %v2289_v50 = vadd.f32 %v5588_v10, %v2288_v49  ;;  %v4416_v29 = vpop.f32.mrb[106].mxu0 }
 0x3c4   : > { %v4702_v54 = vpop.eup %4701  ;;  %v2300_v36 = vadd.f32 %v5588_v10, %v4416_v29  ;;  %v2291_v25 = vpop.f32.mrb[107].mxu0  ;;  %v2393_v59 = vmax.f32 %v2297_v48, 0.0 }
 0x3c5   : > { %v2292_v58 = vadd.f32 %v5588_v10, %v2291_v25  ;;  %v3009_v63 = vmul.f32 %v4702_v54, %v5477_v51  ;;  %v2391_v2 = vmax.f32 %v2289_v50, 0.0 }
 0x3c6   : > { %v4704_v30 = vpop.eup %4703  ;;  %v2394_v62 = vmax.f32 %v2300_v36, 0.0 }
 0x3c7   : > { %v3010_v1 = vmul.f32 %v4704_v30, %v5488_v61  ;;  %v2392_v53 = vmax.f32 %v2292_v58, 0.0  ;;  %v2756_v4 = vpop.xlane.xlu0 %2755 }
 0x3c8   : > { %v4706_v3 = vpop.eup %4705  ;;  %v2420_v6 = vpack.c.bf16 %v2394_v62, %v2393_v59  ;;  %v2789_v7 = vmax.f32 %v2756_v4, 1e-24 }
 0x3c9   : > { %v3851_v37 = vpack.c.bf16 %v3010_v1, %v3009_v63  ;;  %v2419_v9 = vpack.c.bf16 %v2392_v53, %v2391_v2  ;;  %v2758_v41 = vpop.xlane.xlu1 %2757  ;;  %v3007_v13 = vmul.f32 %v4706_v3, %v5480_v56 }
 0x3ca   : > { %v4708_v11 = vpop.eup %4707  ;;  %4709 = vrsqrt.f32 %v2789_v7  ;;  %v2790_v5 = vmax.f32 %v2758_v41, 1e-24 }
 0x3cb   : > { %3955 = vst [vmem:[%s5552_s22 + $0x68] sm:$0xff] %v3851_v37   ;;  %v3008_v51 = vmul.f32 %v4708_v11, %v5495_v0  ;;  %v2752_v42 = vpop.xlane.xlu0 %2751  ;;  %4461 = vmatprep.mubr.bf16.mxu1 %v2419_v9 }
 0x3cc   : > { %4711 = vrsqrt.f32 %v2790_v5  ;;  %v2787_v61 = vmax.f32 %v2752_v42, 1e-24  ;;  %4462 = vmatmul.mubr.bf16.gmra.mrb[104].mxu1 %v2420_v6 }
 0x3cd   : > { %v3846_v15 = vpack.c.bf16 %v3008_v51, %v3007_v13  ;;  %v2754_v12 = vpop.xlane.xlu1 %2753 }
 0x3ce   : > { %4713 = vrsqrt.f32 %v2787_v61  ;;  %v2788_v39 = vmax.f32 %v2754_v12, 1e-24 }
 0x3cf   : > { %3954 = vst [vmem:[%s5552_s22 + $0x60] sm:$0xff] %v3846_v15  }
 0x3d0   : > { %4715 = vrsqrt.f32 %v2788_v39 }
 0x3d1   : > { %v4419_v18 = vpop.f32.mrb[108].mxu0 }
 0x3d2   : > { %v2313_v45 = vadd.f32 %v5588_v10, %v4419_v18  ;;  %v2304_v20 = vpop.f32.mrb[109].mxu0 }
 0x3d3   : > { %v2305_v21 = vadd.f32 %v5588_v10, %v2304_v20  ;;  %v4420_v56 = vpop.f32.mrb[110].mxu0 }
 0x3d4   : > { %v4710_v16 = vpop.eup %4709  ;;  %v2316_v0 = vadd.f32 %v5588_v10, %v4420_v56  ;;  %v2307_v24 = vpop.f32.mrb[111].mxu0  ;;  %v2397_v32 = vmax.f32 %v2313_v45, 0.0 }
 0x3d5   : > { %v2308_v28 = vadd.f32 %v5588_v10, %v2307_v24  ;;  %v3013_v8 = vmul.f32 %v4710_v16, %v5512_v14  ;;  %v2395_v34 = vmax.f32 %v2305_v21, 0.0 }
 0x3d6   : > { %v4712_v31 = vpop.eup %4711  ;;  %v2398_v52 = vmax.f32 %v2316_v0, 0.0 }
 0x3d7   : > { %v3014_v57 = vmul.f32 %v4712_v31, %v5520_v19  ;;  %v2396_v35 = vmax.f32 %v2308_v28, 0.0 }
 0x3d8   : > { %v4714_v38 = vpop.eup %4713  ;;  %v2422_v40 = vpack.c.bf16 %v2398_v52, %v2397_v32 }
 0x3d9   : > { %v3861_v43 = vpack.c.bf16 %v3014_v57, %v3013_v8  ;;  %v2421_v44 = vpack.c.bf16 %v2396_v35, %v2395_v34  ;;  %v3011_v26 = vmul.f32 %v4714_v38, %v5515_v17 }
 0x3da   : > { %v4716_v55 = vpop.eup %4715 }
 0x3db   : > { %3957 = vst [vmem:[%s5552_s22 + $0x78] sm:$0xff] %v3861_v43   ;;  %v3012_v60 = vmul.f32 %v4716_v55, %v5527_v22  ;;  %4465 = vmatprep.mubr.bf16.mxu1 %v2421_v44 }
 0x3dc   : > { %4466 = vmatmul.mubr.bf16.gmra.mrb[108].mxu1 %v2422_v40  ;;  %v5639_v40 = vld [vmem:[%s5866_s7] ss:$0 sm:$0xff] }
 0x3dd   : > { %v3856_v33 = vpack.c.bf16 %v3012_v60, %v3011_v26 }
 0x3df   : > { %3956 = vst [vmem:[%s5552_s22 + $0x70] sm:$0xff] %v3856_v33  }
 0x3e1   : > { %v4423_v23 = vpop.f32.mrb[112].mxu0 }
 0x3e2   : > { %v2329_v14 = vadd.f32 %v5588_v10, %v4423_v23  ;;  %v2320_v19 = vpop.f32.mrb[113].mxu0 }
 0x3e3   : > { %v2321_v46 = vadd.f32 %v5588_v10, %v2320_v19  ;;  %v4424_v27 = vpop.f32.mrb[114].mxu0 }
 0x3e4   : > { %v2332_v47 = vadd.f32 %v5588_v10, %v4424_v27  ;;  %v2323_v48 = vpop.f32.mrb[115].mxu0  ;;  %v2401_v50 = vmax.f32 %v2329_v14, 0.0 }
 0x3e5   : > { %v2324_v49 = vadd.f32 %v5588_v10, %v2323_v48  ;;  %v2399_v29 = vmax.f32 %v2321_v46, 0.0 }
 0x3e6   : > { %v2402_v17 = vmax.f32 %v2332_v47, 0.0 }
 0x3e7   : > { %v2400_v22 = vmax.f32 %v2324_v49, 0.0 }
 0x3e8   : > { %v2424_v54 = vpack.c.bf16 %v2402_v17, %v2401_v50 }
 0x3e9   : > { %v2423_v36 = vpack.c.bf16 %v2400_v22, %v2399_v29 }
 0x3eb   : > { %4469 = vmatprep.mubr.bf16.mxu1 %v2423_v36 }
 0x3ec   : > { %4470 = vmatmul.mubr.bf16.gmra.mrb[112].mxu1 %v2424_v54 }
 0x3f1   : > { %v4427_v25 = vpop.f32.mrb[116].mxu0 }
 0x3f2   : > { %v2345_v58 = vadd.f32 %v5588_v10, %v4427_v25  ;;  %v2336_v30 = vpop.f32.mrb[117].mxu0 }
 0x3f3   : > { %v2337_v59 = vadd.f32 %v5588_v10, %v2336_v30  ;;  %v4428_v62 = vpop.f32.mrb[118].mxu0 }
 0x3f4   : > { %v2348_v63 = vadd.f32 %v5588_v10, %v4428_v62  ;;  %v2339_v1 = vpop.f32.mrb[119].mxu0  ;;  %v2405_v53 = vmax.f32 %v2345_v58, 0.0 }
 0x3f5   : > { %v2340_v2 = vadd.f32 %v5588_v10, %v2339_v1  ;;  %v2403_v3 = vmax.f32 %v2337_v59, 0.0 }
 0x3f6   : > { %v2406_v4 = vmax.f32 %v2348_v63, 0.0 }
 0x3f7   : > { %v2404_v6 = vmax.f32 %v2340_v2, 0.0 }
 0x3f8   : > { %v2426_v7 = vpack.c.bf16 %v2406_v4, %v2405_v53 }
 0x3f9   : > { %v2425_v37 = vpack.c.bf16 %v2404_v6, %v2403_v3 }
 0x3fb   : > { %4473 = vmatprep.mubr.bf16.mxu1 %v2425_v37 }
 0x3fc   : > { %4474 = vmatmul.mubr.bf16.gmra.mrb[116].mxu1 %v2426_v7 }
 0x401   : > { %v4431_v9 = vpop.f32.mrb[120].mxu0 }
 0x402   : > { %v2361_v41 = vadd.f32 %v5588_v10, %v4431_v9  ;;  %v2352_v11 = vpop.f32.mrb[121].mxu0 }
 0x403   : > { %v2353_v5 = vadd.f32 %v5588_v10, %v2352_v11  ;;  %v4432_v13 = vpop.f32.mrb[122].mxu0 }
 0x404   : > { %v2364_v51 = vadd.f32 %v5588_v10, %v4432_v13  ;;  %v2355_v42 = vpop.f32.mrb[123].mxu0  ;;  %v2409_v15 = vmax.f32 %v2361_v41, 0.0 }
 0x405   : > { %v2356_v61 = vadd.f32 %v5588_v10, %v2355_v42  ;;  %v2407_v39 = vmax.f32 %v2353_v5, 0.0 }
 0x406   : > { %v2410_v12 = vmax.f32 %v2364_v51, 0.0 }
 0x407   : > { %v2408_v18 = vmax.f32 %v2356_v61, 0.0 }
 0x408   : > { %v2428_v45 = vpack.c.bf16 %v2410_v12, %v2409_v15 }
 0x409   : > { %v2427_v20 = vpack.c.bf16 %v2408_v18, %v2407_v39 }
 0x40b   : > { %4477 = vmatprep.mubr.bf16.mxu1 %v2427_v20 }
 0x40c   : > { %4478 = vmatmul.mubr.bf16.gmra.mrb[120].mxu1 %v2428_v45 }
 0x411   : > { %v4435_v21 = vpop.f32.mrb[124].mxu0 }
 0x412   : > { %v2377_v56 = vadd.f32 %v5588_v10, %v4435_v21  ;;  %v2368_v16 = vpop.f32.mrb[125].mxu0 }
 0x413   : > { %v2369_v0 = vadd.f32 %v5588_v10, %v2368_v16  ;;  %v4436_v24 = vpop.f32.mrb[126].mxu0 }
 0x414   : > { %v2380_v28 = vadd.f32 %v5588_v10, %v4436_v24  ;;  %v2371_v31 = vpop.f32.mrb[127].mxu0  ;;  %v2413_v52 = vmax.f32 %v2377_v56, 0.0 }
 0x415   : > { %v2372_v32 = vadd.f32 %v5588_v10, %v2371_v31  ;;  %v2411_v57 = vmax.f32 %v2369_v0, 0.0 }
 0x416   : > { %v2414_v8 = vmax.f32 %v2380_v28, 0.0 }
 0x417   : > { %v2412_v34 = vmax.f32 %v2372_v32, 0.0 }
 0x418   : > { %v2430_v35 = vpack.c.bf16 %v2414_v8, %v2413_v52 }
 0x419   : > { %v2429_v38 = vpack.c.bf16 %v2412_v34, %v2411_v57 }
 0x41b   : > { %4481 = vmatprep.mubr.bf16.mxu1 %v2429_v38 }
 0x41c   : > { %4482 = vmatmul.mubr.bf16.gmra.mrb[124].mxu1 %v2430_v35 }
 0x47f   : > { %v4455_v43 = vpop.f32.mrb[96].mxu1 }
 0x480   : > { %v5642_v44 = vadd.f32 %v4455_v43, %v5639_v40  ;;  %v2536_v55 = vpop.f32.mrb[97].mxu1 }
 0x481   : > { %v4456_v26 = vpop.f32.mrb[98].mxu1  ;;  %v5645_v10 = vadd.f32 %v5639_v40, %v2536_v55 }
 0x482   : > { %v5648_v60 = vadd.f32 %v4456_v26, %v5639_v40  ;;  %v2539_v33 = vpop.f32.mrb[99].mxu1  ;;  %v2825_v23 = vmul.f32 %v5642_v44, %v5642_v44 }
 0x483   : > { %v5653_v14 = vadd.f32 %v5639_v40, %v2539_v33  ;;  %v2823_v46 = vmul.f32 %v5645_v10, %v5645_v10 }
 0x484   : > { %2859 = vadd.xlane.f32.xlu0 %v2825_v23  ;;  %v2826_v19 = vmul.f32 %v5648_v60, %v5648_v60 }
 0x485   : > { %v2824_v27 = vmul.f32 %v5653_v14, %v5653_v14 }
 0x486   : > { %2861 = vadd.xlane.f32.xlu1 %v2826_v19 }
 0x488   : > { %2855 = vadd.xlane.f32.xlu0 %v2823_v46 }
 0x48a   : > { %2857 = vadd.xlane.f32.xlu1 %v2824_v27 }
 0x48f   : > { %v4459_v47 = vpop.f32.mrb[100].mxu1 }
 0x490   : > { %v5662_v48 = vadd.f32 %v4459_v47, %v5639_v40  ;;  %v2552_v49 = vpop.f32.mrb[101].mxu1 }
 0x491   : > { %v4460_v50 = vpop.f32.mrb[102].mxu1  ;;  %v5665_v17 = vadd.f32 %v5639_v40, %v2552_v49 }
 0x492   : > { %v5668_v29 = vadd.f32 %v4460_v50, %v5639_v40  ;;  %v2555_v22 = vpop.f32.mrb[103].mxu1  ;;  %v2829_v54 = vmul.f32 %v5662_v48, %v5662_v48 }
 0x493   : > { %v5673_v36 = vadd.f32 %v5639_v40, %v2555_v22  ;;  %v2827_v58 = vmul.f32 %v5665_v17, %v5665_v17 }
 0x494   : > { %2867 = vadd.xlane.f32.xlu0 %v2829_v54  ;;  %v2830_v25 = vmul.f32 %v5668_v29, %v5668_v29 }
 0x495   : > { %v2828_v30 = vmul.f32 %v5673_v36, %v5673_v36 }
 0x496   : > { %2869 = vadd.xlane.f32.xlu1 %v2830_v25 }
 0x498   : > { %2863 = vadd.xlane.f32.xlu0 %v2827_v58 }
 0x49a   : > { %2865 = vadd.xlane.f32.xlu1 %v2828_v30 }
 0x49f   : > { %v4463_v59 = vpop.f32.mrb[104].mxu1 }
 0x4a0   : > { %v5682_v62 = vadd.f32 %v4463_v59, %v5639_v40  ;;  %v2568_v63 = vpop.f32.mrb[105].mxu1 }
 0x4a1   : > { %v4464_v1 = vpop.f32.mrb[106].mxu1  ;;  %v5685_v2 = vadd.f32 %v5639_v40, %v2568_v63 }
 0x4a2   : > { %v5688_v53 = vadd.f32 %v4464_v1, %v5639_v40  ;;  %v2571_v4 = vpop.f32.mrb[107].mxu1  ;;  %v2833_v3 = vmul.f32 %v5682_v62, %v5682_v62 }
 0x4a3   : > { %v5693_v6 = vadd.f32 %v5639_v40, %v2571_v4  ;;  %v2831_v37 = vmul.f32 %v5685_v2, %v5685_v2 }
 0x4a4   : > { %2875 = vadd.xlane.f32.xlu0 %v2833_v3  ;;  %v2834_v7 = vmul.f32 %v5688_v53, %v5688_v53 }
 0x4a5   : > { %v2832_v9 = vmul.f32 %v5693_v6, %v5693_v6 }
 0x4a6   : > { %2877 = vadd.xlane.f32.xlu1 %v2834_v7 }
 0x4a8   : > { %2871 = vadd.xlane.f32.xlu0 %v2831_v37 }
 0x4aa   : > { %2873 = vadd.xlane.f32.xlu1 %v2832_v9 }
 0x4af   : > { %v4467_v41 = vpop.f32.mrb[108].mxu1 }
 0x4b0   : > { %v5702_v11 = vadd.f32 %v4467_v41, %v5639_v40  ;;  %v2584_v5 = vpop.f32.mrb[109].mxu1 }
 0x4b1   : > { %v4468_v13 = vpop.f32.mrb[110].mxu1  ;;  %v5705_v51 = vadd.f32 %v5639_v40, %v2584_v5 }
 0x4b2   : > { %v5708_v42 = vadd.f32 %v4468_v13, %v5639_v40  ;;  %v2587_v61 = vpop.f32.mrb[111].mxu1  ;;  %v2837_v15 = vmul.f32 %v5702_v11, %v5702_v11 }
 0x4b3   : > { %v5713_v12 = vadd.f32 %v5639_v40, %v2587_v61  ;;  %v2835_v18 = vmul.f32 %v5705_v51, %v5705_v51 }
 0x4b4   : > { %2883 = vadd.xlane.f32.xlu0 %v2837_v15  ;;  %v2838_v39 = vmul.f32 %v5708_v42, %v5708_v42 }
 0x4b5   : > { %v2836_v45 = vmul.f32 %v5713_v12, %v5713_v12 }
 0x4b6   : > { %2885 = vadd.xlane.f32.xlu1 %v2838_v39 }
 0x4b8   : > { %2879 = vadd.xlane.f32.xlu0 %v2835_v18 }
 0x4ba   : > { %2881 = vadd.xlane.f32.xlu1 %v2836_v45 }
 0x4bf   : > { %v4471_v20 = vpop.f32.mrb[112].mxu1 }
 0x4c0   : > { %v5722_v21 = vadd.f32 %v4471_v20, %v5639_v40  ;;  %v2600_v56 = vpop.f32.mrb[113].mxu1 }
 0x4c1   : > { %v4472_v16 = vpop.f32.mrb[114].mxu1  ;;  %v5725_v0 = vadd.f32 %v5639_v40, %v2600_v56 }
 0x4c2   : > { %v5728_v24 = vadd.f32 %v4472_v16, %v5639_v40  ;;  %v2603_v28 = vpop.f32.mrb[115].mxu1  ;;  %v2841_v31 = vmul.f32 %v5722_v21, %v5722_v21 }
 0x4c3   : > { %v5733_v32 = vadd.f32 %v5639_v40, %v2603_v28  ;;  %v2839_v8 = vmul.f32 %v5725_v0, %v5725_v0 }
 0x4c4   : > { %2891 = vadd.xlane.f32.xlu0 %v2841_v31  ;;  %v2842_v52 = vmul.f32 %v5728_v24, %v5728_v24 }
 0x4c5   : > { %v2840_v57 = vmul.f32 %v5733_v32, %v5733_v32 }
 0x4c6   : > { %2893 = vadd.xlane.f32.xlu1 %v2842_v52 }
 0x4c8   : > { %2887 = vadd.xlane.f32.xlu0 %v2839_v8 }
 0x4ca   : > { %2889 = vadd.xlane.f32.xlu1 %v2840_v57 }
 0x4cf   : > { %v4475_v34 = vpop.f32.mrb[116].mxu1 }
 0x4d0   : > { %v5742_v35 = vadd.f32 %v4475_v34, %v5639_v40  ;;  %v2616_v38 = vpop.f32.mrb[117].mxu1 }
 0x4d1   : > { %v4476_v43 = vpop.f32.mrb[118].mxu1  ;;  %v5745_v55 = vadd.f32 %v5639_v40, %v2616_v38 }
 0x4d2   : > { %v5748_v26 = vadd.f32 %v4476_v43, %v5639_v40  ;;  %v2619_v33 = vpop.f32.mrb[119].mxu1  ;;  %v2845_v23 = vmul.f32 %v5742_v35, %v5742_v35 }
 0x4d3   : > { %v5753_v19 = vadd.f32 %v5639_v40, %v2619_v33  ;;  %v2843_v27 = vmul.f32 %v5745_v55, %v5745_v55 }
 0x4d4   : > { %2899 = vadd.xlane.f32.xlu0 %v2845_v23  ;;  %v2846_v46 = vmul.f32 %v5748_v26, %v5748_v26 }
 0x4d5   : > { %v2844_v47 = vmul.f32 %v5753_v19, %v5753_v19 }
 0x4d6   : > { %2901 = vadd.xlane.f32.xlu1 %v2846_v46 }
 0x4d8   : > { %2895 = vadd.xlane.f32.xlu0 %v2843_v27 }
 0x4da   : > { %2897 = vadd.xlane.f32.xlu1 %v2844_v47 }
 0x4df   : > { %v4479_v49 = vpop.f32.mrb[120].mxu1 }
 0x4e0   : > { %v5762_v50 = vadd.f32 %v4479_v49, %v5639_v40  ;;  %v2632_v22 = vpop.f32.mrb[121].mxu1 }
 0x4e1   : > { %v4480_v54 = vpop.f32.mrb[122].mxu1  ;;  %v5765_v25 = vadd.f32 %v5639_v40, %v2632_v22 }
 0x4e2   : > { %v5768_v58 = vadd.f32 %v4480_v54, %v5639_v40  ;;  %v2635_v30 = vpop.f32.mrb[123].mxu1  ;;  %v2849_v59 = vmul.f32 %v5762_v50, %v5762_v50 }
 0x4e3   : > { %v5773_v63 = vadd.f32 %v5639_v40, %v2635_v30  ;;  %v2847_v4 = vmul.f32 %v5765_v25, %v5765_v25 }
 0x4e4   : > { %2907 = vadd.xlane.f32.xlu0 %v2849_v59  ;;  %v2850_v1 = vmul.f32 %v5768_v58, %v5768_v58 }
 0x4e5   : > { %v2848_v3 = vmul.f32 %v5773_v63, %v5773_v63 }
 0x4e6   : > { %2909 = vadd.xlane.f32.xlu1 %v2850_v1 }
 0x4e8   : > { %2903 = vadd.xlane.f32.xlu0 %v2847_v4 }
 0x4ea   : > { %2905 = vadd.xlane.f32.xlu1 %v2848_v3 }
 0x4ef   : > { %v4483_v7 = vpop.f32.mrb[124].mxu1 }
 0x4f0   : > { %v2648_v37 = vpop.f32.mrb[125].mxu1  ;;  %v5785_v13 = vadd.f32 %v4483_v7, %v5639_v40 }
 0x4f1   : > { %v5782_v9 = vadd.f32 %v5639_v40, %v2648_v37  ;;  %v4484_v41 = vpop.f32.mrb[126].mxu1 }
 0x4f2   : > { %v2651_v5 = vpop.f32.mrb[127].mxu1  ;;  %v5793_v39 = vadd.f32 %v4484_v41, %v5639_v40  ;;  %v2853_v45 = vmul.f32 %v5785_v13, %v5785_v13 }
 0x4f3   : > { %v5788_v61 = vadd.f32 %v5639_v40, %v2651_v5  ;;  %v2851_v15 = vmul.f32 %v5782_v9, %v5782_v9 }
 0x4f4   : > { %v2854_v20 = vmul.f32 %v5793_v39, %v5793_v39 }
 0x4f5   : > { %2911 = vadd.xlane.f32.xlu0 %v2851_v15  ;;  %v2852_v18 = vmul.f32 %v5788_v61, %v5788_v61 }
 0x4f7   : > { %2913 = vadd.xlane.f32.xlu1 %v2852_v18 }
 0x4f9   : > { %2915 = vadd.xlane.f32.xlu0 %v2853_v45 }
 0x4fb   : > { %2917 = vadd.xlane.f32.xlu1 %v2854_v20 }
 0x511   : > { %v2860_v56 = vpop.xlane.xlu0 %2859 }
 0x512   : > { %v2921_v16 = vmax.f32 %v2860_v56, 1e-24 }
 0x513   : > { %v2862_v28 = vpop.xlane.xlu1 %2861 }
 0x514   : > { %4717 = vrsqrt.f32 %v2921_v16  ;;  %v2922_v40 = vmax.f32 %v2862_v28, 1e-24 }
 0x515   : > { %v2856_v31 = vpop.xlane.xlu0 %2855 }
 0x516   : > { %4719 = vrsqrt.f32 %v2922_v40  ;;  %v2919_v52 = vmax.f32 %v2856_v31, 1e-24 }
 0x517   : > { %v2858_v8 = vpop.xlane.xlu1 %2857 }
 0x518   : > { %4721 = vrsqrt.f32 %v2919_v52  ;;  %v2920_v57 = vmax.f32 %v2858_v8, 1e-24 }
 0x51a   : > { %4723 = vrsqrt.f32 %v2920_v57 }
 0x51e   : > { %v4718_v34 = vpop.eup %4717 }
 0x51f   : > { %v3177_v43 = vmul.f32 %v4718_v34, %v5642_v44 }
 0x520   : > { %v4720_v38 = vpop.eup %4719 }
 0x521   : > { %v3178_v33 = vmul.f32 %v4720_v38, %v5648_v60  ;;  %v2868_v23 = vpop.xlane.xlu0 %2867 }
 0x522   : > { %v4722_v46 = vpop.eup %4721  ;;  %v2925_v27 = vmax.f32 %v2868_v23, 1e-24 }
 0x523   : > { %v3871_v47 = vpack.c.bf16 %v3178_v33, %v3177_v43  ;;  %v2870_v49 = vpop.xlane.xlu1 %2869  ;;  %v3175_v44 = vmul.f32 %v4722_v46, %v5645_v10 }
 0x524   : > { %v4724_v22 = vpop.eup %4723  ;;  %4725 = vrsqrt.f32 %v2925_v27  ;;  %v2926_v54 = vmax.f32 %v2870_v49, 1e-24 }
 0x525   : > { %3958 = vst [vmem:[%s5808_s16 + $0x8] sm:$0xff] %v3871_v47   ;;  %v3176_v60 = vmul.f32 %v4724_v22, %v5653_v14  ;;  %v2864_v30 = vpop.xlane.xlu0 %2863 }
 0x526   : > { %4727 = vrsqrt.f32 %v2926_v54  ;;  %v2923_v59 = vmax.f32 %v2864_v30, 1e-24 }
 0x527   : > { %v3866_v1 = vpack.c.bf16 %v3176_v60, %v3175_v44  ;;  %v2866_v4 = vpop.xlane.xlu1 %2865 }
 0x528   : > { %4729 = vrsqrt.f32 %v2923_v59  ;;  %v2924_v3 = vmax.f32 %v2866_v4, 1e-24 }
 0x529   : > { %3867 = vst [vmem:[%s5808_s16] sm:$0xff] %v3866_v1  }
 0x52a   : > { %4731 = vrsqrt.f32 %v2924_v3 }
 0x52e   : > { %v4726_v7 = vpop.eup %4725 }
 0x52f   : > { %v3181_v41 = vmul.f32 %v4726_v7, %v5662_v48 }
 0x530   : > { %v4728_v37 = vpop.eup %4727 }
 0x531   : > { %v3182_v5 = vmul.f32 %v4728_v37, %v5668_v29  ;;  %v2876_v15 = vpop.xlane.xlu0 %2875 }
 0x532   : > { %v4730_v10 = vpop.eup %4729  ;;  %v2929_v18 = vmax.f32 %v2876_v15, 1e-24 }
 0x533   : > { %v3881_v14 = vpack.c.bf16 %v3182_v5, %v3181_v41  ;;  %v2878_v45 = vpop.xlane.xlu1 %2877  ;;  %v3179_v16 = vmul.f32 %v4730_v10, %v5665_v17 }
 0x534   : > { %v4732_v20 = vpop.eup %4731  ;;  %4733 = vrsqrt.f32 %v2929_v18  ;;  %v2930_v56 = vmax.f32 %v2878_v45, 1e-24 }
 0x535   : > { %3960 = vst [vmem:[%s5808_s16 + $0x18] sm:$0xff] %v3881_v14   ;;  %v3180_v28 = vmul.f32 %v4732_v20, %v5673_v36  ;;  %v2872_v40 = vpop.xlane.xlu0 %2871 }
 0x536   : > { %4735 = vrsqrt.f32 %v2930_v56  ;;  %v2927_v31 = vmax.f32 %v2872_v40, 1e-24 }
 0x537   : > { %v3876_v48 = vpack.c.bf16 %v3180_v28, %v3179_v16  ;;  %v2874_v52 = vpop.xlane.xlu1 %2873 }
 0x538   : > { %4737 = vrsqrt.f32 %v2927_v31  ;;  %v2928_v29 = vmax.f32 %v2874_v52, 1e-24 }
 0x539   : > { %3959 = vst [vmem:[%s5808_s16 + $0x10] sm:$0xff] %v3876_v48  }
 0x53a   : > { %4739 = vrsqrt.f32 %v2928_v29 }
 0x53e   : > { %v4734_v8 = vpop.eup %4733 }
 0x53f   : > { %v3185_v34 = vmul.f32 %v4734_v8, %v5682_v62 }
 0x540   : > { %v4736_v57 = vpop.eup %4735 }
 0x541   : > { %v3186_v38 = vmul.f32 %v4736_v57, %v5688_v53  ;;  %v2884_v43 = vpop.xlane.xlu0 %2883 }
 0x542   : > { %v4738_v17 = vpop.eup %4737  ;;  %v2933_v33 = vmax.f32 %v2884_v43, 1e-24 }
 0x543   : > { %v3891_v36 = vpack.c.bf16 %v3186_v38, %v3185_v34  ;;  %v2886_v23 = vpop.xlane.xlu1 %2885  ;;  %v3183_v47 = vmul.f32 %v4738_v17, %v5685_v2 }
 0x544   : > { %v4740_v46 = vpop.eup %4739  ;;  %4741 = vrsqrt.f32 %v2933_v33  ;;  %v2934_v27 = vmax.f32 %v2886_v23, 1e-24 }
 0x545   : > { %3962 = vst [vmem:[%s5808_s16 + $0x28] sm:$0xff] %v3891_v36   ;;  %v3184_v49 = vmul.f32 %v4740_v46, %v5693_v6  ;;  %v2880_v22 = vpop.xlane.xlu0 %2879 }
 0x546   : > { %4743 = vrsqrt.f32 %v2934_v27  ;;  %v2931_v54 = vmax.f32 %v2880_v22, 1e-24 }
 0x547   : > { %v3886_v62 = vpack.c.bf16 %v3184_v49, %v3183_v47  ;;  %v2882_v44 = vpop.xlane.xlu1 %2881 }
 0x548   : > { %4745 = vrsqrt.f32 %v2931_v54  ;;  %v2932_v53 = vmax.f32 %v2882_v44, 1e-24 }
 0x549   : > { %3961 = vst [vmem:[%s5808_s16 + $0x20] sm:$0xff] %v3886_v62  }
 0x54a   : > { %4747 = vrsqrt.f32 %v2932_v53 }
 0x54e   : > { %v4742_v60 = vpop.eup %4741 }
 0x54f   : > { %v3189_v59 = vmul.f32 %v4742_v60, %v5702_v11 }
 0x550   : > { %v4744_v30 = vpop.eup %4743 }
 0x551   : > { %v3190_v1 = vmul.f32 %v4744_v30, %v5708_v42  ;;  %v2892_v4 = vpop.xlane.xlu0 %2891 }
 0x552   : > { %v4746_v2 = vpop.eup %4745  ;;  %v2937_v3 = vmax.f32 %v2892_v4, 1e-24 }
 0x553   : > { %v3901_v6 = vpack.c.bf16 %v3190_v1, %v3189_v59  ;;  %v2894_v7 = vpop.xlane.xlu1 %2893  ;;  %v3187_v5 = vmul.f32 %v4746_v2, %v5705_v51 }
 0x554   : > { %v4748_v37 = vpop.eup %4747  ;;  %4749 = vrsqrt.f32 %v2937_v3  ;;  %v2938_v41 = vmax.f32 %v2894_v7, 1e-24 }
 0x555   : > { %3964 = vst [vmem:[%s5808_s16 + $0x38] sm:$0xff] %v3901_v6   ;;  %v3188_v15 = vmul.f32 %v4748_v37, %v5713_v12  ;;  %v2888_v10 = vpop.xlane.xlu0 %2887 }
 0x556   : > { %4751 = vrsqrt.f32 %v2938_v41  ;;  %v2935_v18 = vmax.f32 %v2888_v10, 1e-24 }
 0x557   : > { %v3896_v11 = vpack.c.bf16 %v3188_v15, %v3187_v5  ;;  %v2890_v14 = vpop.xlane.xlu1 %2889 }
 0x558   : > { %4753 = vrsqrt.f32 %v2935_v18  ;;  %v2936_v42 = vmax.f32 %v2890_v14, 1e-24 }
 0x559   : > { %3963 = vst [vmem:[%s5808_s16 + $0x30] sm:$0xff] %v3896_v11  }
 0x55a   : > { %4755 = vrsqrt.f32 %v2936_v42 }
 0x55e   : > { %v4750_v45 = vpop.eup %4749 }
 0x55f   : > { %v3193_v56 = vmul.f32 %v4750_v45, %v5722_v21 }
 0x560   : > { %v4752_v20 = vpop.eup %4751 }
 0x561   : > { %v3194_v16 = vmul.f32 %v4752_v20, %v5728_v24  ;;  %v2900_v28 = vpop.xlane.xlu0 %2899 }
 0x562   : > { %v4754_v51 = vpop.eup %4753  ;;  %v2941_v40 = vmax.f32 %v2900_v28, 1e-24 }
 0x563   : > { %v3911_v12 = vpack.c.bf16 %v3194_v16, %v3193_v56  ;;  %v2902_v31 = vpop.xlane.xlu1 %2901  ;;  %v3191_v29 = vmul.f32 %v4754_v51, %v5725_v0 }
 0x564   : > { %v4756_v48 = vpop.eup %4755  ;;  %4757 = vrsqrt.f32 %v2941_v40  ;;  %v2942_v52 = vmax.f32 %v2902_v31, 1e-24 }
 0x565   : > { %3966 = vst [vmem:[%s5808_s16 + $0x48] sm:$0xff] %v3911_v12   ;;  %v3192_v8 = vmul.f32 %v4756_v48, %v5733_v32  ;;  %v2896_v57 = vpop.xlane.xlu0 %2895 }
 0x566   : > { %4759 = vrsqrt.f32 %v2942_v52  ;;  %v2939_v34 = vmax.f32 %v2896_v57, 1e-24 }
 0x567   : > { %v3906_v21 = vpack.c.bf16 %v3192_v8, %v3191_v29  ;;  %v2898_v38 = vpop.xlane.xlu1 %2897 }
 0x568   : > { %4761 = vrsqrt.f32 %v2939_v34  ;;  %v2940_v24 = vmax.f32 %v2898_v38, 1e-24 }
 0x569   : > { %3965 = vst [vmem:[%s5808_s16 + $0x40] sm:$0xff] %v3906_v21  }
 0x56a   : > { %4763 = vrsqrt.f32 %v2940_v24 }
 0x56e   : > { %v4758_v43 = vpop.eup %4757 }
 0x56f   : > { %v3197_v33 = vmul.f32 %v4758_v43, %v5742_v35 }
 0x570   : > { %v4760_v17 = vpop.eup %4759 }
 0x571   : > { %v3198_v36 = vmul.f32 %v4760_v17, %v5748_v26  ;;  %v2908_v23 = vpop.xlane.xlu0 %2907 }
 0x572   : > { %v4762_v0 = vpop.eup %4761  ;;  %v2945_v46 = vmax.f32 %v2908_v23, 1e-24 }
 0x573   : > { %v3921_v32 = vpack.c.bf16 %v3198_v36, %v3197_v33  ;;  %v2910_v27 = vpop.xlane.xlu1 %2909  ;;  %v3195_v22 = vmul.f32 %v4762_v0, %v5745_v55 }
 0x574   : > { %v4764_v47 = vpop.eup %4763  ;;  %4765 = vrsqrt.f32 %v2945_v46  ;;  %v2946_v49 = vmax.f32 %v2910_v27, 1e-24 }
 0x575   : > { %3968 = vst [vmem:[%s5808_s16 + $0x58] sm:$0xff] %v3921_v32   ;;  %v3196_v54 = vmul.f32 %v4764_v47, %v5753_v19  ;;  %v2904_v62 = vpop.xlane.xlu0 %2903 }
 0x576   : > { %4767 = vrsqrt.f32 %v2946_v49  ;;  %v2943_v44 = vmax.f32 %v2904_v62, 1e-24 }
 0x577   : > { %v3916_v35 = vpack.c.bf16 %v3196_v54, %v3195_v22  ;;  %v2906_v26 = vpop.xlane.xlu1 %2905 }
 0x578   : > { %4769 = vrsqrt.f32 %v2943_v44  ;;  %v2944_v53 = vmax.f32 %v2906_v26, 1e-24 }
 0x579   : > { %3967 = vst [vmem:[%s5808_s16 + $0x50] sm:$0xff] %v3916_v35  }
 0x57a   : > { %4771 = vrsqrt.f32 %v2944_v53 }
 0x57e   : > { %v4766_v60 = vpop.eup %4765 }
 0x57f   : > { %v3201_v59 = vmul.f32 %v4766_v60, %v5762_v50 }
 0x580   : > { %v4768_v30 = vpop.eup %4767 }
 0x581   : > { %v3202_v1 = vmul.f32 %v4768_v30, %v5768_v58 }
 0x582   : > { %v4770_v4 = vpop.eup %4769  ;;  %v2912_v55 = vpop.xlane.xlu0 %2911 }
 0x583   : > { %v3931_v19 = vpack.c.bf16 %v3202_v1, %v3201_v59  ;;  %v2947_v2 = vmax.f32 %v2912_v55, 1e-24  ;;  %v3199_v7 = vmul.f32 %v4770_v4, %v5765_v25 }
 0x584   : > { %v4772_v3 = vpop.eup %4771  ;;  %v2914_v6 = vpop.xlane.xlu1 %2913 }
 0x585   : > { %3970 = vst [vmem:[%s5808_s16 + $0x68] sm:$0xff] %v3931_v19   ;;  %v3200_v37 = vmul.f32 %v4772_v3, %v5773_v63  ;;  %4773 = vrsqrt.f32 %v2947_v2  ;;  %v2948_v41 = vmax.f32 %v2914_v6, 1e-24 }
 0x586   : > { %v2916_v5 = vpop.xlane.xlu0 %2915 }
 0x587   : > { %v3926_v15 = vpack.c.bf16 %v3200_v37, %v3199_v7  ;;  %4775 = vrsqrt.f32 %v2948_v41  ;;  %v2949_v50 = vmax.f32 %v2916_v5, 1e-24 }
 0x588   : > { %v2918_v58 = vpop.xlane.xlu1 %2917 }
 0x589   : > { %3969 = vst [vmem:[%s5808_s16 + $0x60] sm:$0xff] %v3926_v15   ;;  %4777 = vrsqrt.f32 %v2949_v50  ;;  %v2950_v10 = vmax.f32 %v2918_v58, 1e-24 }
 0x58b   : > { %4779 = vrsqrt.f32 %v2950_v10 }
 0x58f   : > { %v4774_v18 = vpop.eup %4773 }
 0x590   : > { %v3203_v14 = vmul.f32 %v4774_v18, %v5782_v9 }
 0x591   : > { %v4776_v11 = vpop.eup %4775 }
 0x592   : > { %v3204_v25 = vmul.f32 %v4776_v11, %v5788_v61 }
 0x593   : > { %v4778_v63 = vpop.eup %4777 }
 0x594   : > { %v3936_v42 = vpack.c.bf16 %v3204_v25, %v3203_v14  ;;  %v3205_v20 = vmul.f32 %v4778_v63, %v5785_v13 }
 0x595   : > { %v4780_v45 = vpop.eup %4779 }
 0x596   : > { %3971 = vst [vmem:[%s5808_s16 + $0x70] sm:$0xff] %v3936_v42   ;;  %v3206_v56 = vmul.f32 %v4780_v45, %v5793_v39 }
 0x598   : > { %v3941_v16 = vpack.c.bf16 %v3206_v56, %v3205_v20 }
 0x59a   : > { %3972 = vst [vmem:[%s5808_s16 + $0x78] sm:$0xff] %v3941_v16  }
 0x59b PF: > { %s23_s19 = sadd.s32 1, %s4788_s19  }
 0x59c   : > { %p20_p4 = scmp.ge.s32.totalorder %s23_s19, 4  }
 0x59e   :  { %22 = sbr.rel (!%p20_p4) target bundleno = 2 (0x2), region = 113 }

</bundles_post_ra>
